<compile_context>
chip_gen: v7x
topology: tpu7x:2x2x1
jax: 0.10.0
libtpu: 0.0.40
codegen_flags: <defaults>
</compile_context>

<pallas_src>
import numpy as np
import jax
import jax.numpy as jnp
from jax import lax
from jax.experimental import pallas as pl
from jax.experimental.pallas import tpu as pltpu


# ---------------------------------------------------------------------------
# Fused VAE forward kernel (one grid step == one image)
# ---------------------------------------------------------------------------
def _vae_kernel(cols1_ref, w1_ref, b1_ref, w2_ref, b2_ref,
                wml_ref, bml_ref, eps_ref, wd_ref, bd_ref,
                wt1_ref, bt1_ref, wt2_ref, bt2_ref,
                mu_ref, lv_ref, out_ref,
                pad_e, h2_s, xenc, xd_s, pad_d, pad_t):
    f32 = jnp.float32
    bf16 = jnp.bfloat16

    # ------------------------------ encoder -------------------------------
    # conv1 (3->32, k=4, s=2, p=1): one matmul against a block-diagonal weight
    # that emits the 16x16 output already in space-to-depth order:
    # rows = 8x8 blocks (u,v), lanes = (oy, ox, c) = 128  (fully lane-dense).
    a1 = cols1_ref[0]                                            # (64, 192) bf16
    h1 = jnp.dot(a1, w1_ref[...], preferred_element_type=f32)
    h1 = jnp.maximum(h1 + b1_ref[...], 0.0)                      # (64, 128) f32

    # zero-padded s2d buffer (pad = 1 in block coords) -- in-kernel "im2col"
    pad_e[...] = jnp.zeros(pad_e.shape, f32)
    for u in range(8):
        pad_e[1 + u, 1:9, :] = h1[u * 8:(u + 1) * 8, :]

    # conv2 (32->64, k=4, s=2, p=1) == 9 shifted stride-1 taps on the s2d grid
    acc2 = jnp.zeros((64, 64), f32)
    for t in range(9):
        dy, dx = t // 3, t % 3
        slab = pad_e[dy:dy + 8, dx:dx + 8, :]                    # (8, 8, 128)
        slab = slab.reshape(64, 128).astype(bf16)
        acc2 = acc2 + jnp.dot(slab, w2_ref[t], preferred_element_type=f32)
    h2 = jnp.maximum(acc2 + b2_ref[...], 0.0)                    # (64, 64) f32
    h2_s[...] = h2

    # flatten (u, v, c) -> one 4096-lane row (only layout fold in the net)
    for r in range(64):
        xenc[0:1, r * 64:(r + 1) * 64] = h2_s[r:r + 1, :]

    # ------------------------------- latent -------------------------------
    xe = xenc[...].astype(bf16)                                  # (1, 4096)
    mulv = jnp.dot(xe, wml_ref[...], preferred_element_type=f32) + bml_ref[...]
    mu = mulv[:, :128]
    logvar = mulv[:, 128:]
    mu_ref[0, :, :] = mu
    lv_ref[0, :, :] = logvar

    z = mu + eps_ref[0] * jnp.exp(0.5 * logvar)                  # (1, 128)

    xd = jnp.dot(z.astype(bf16), wd_ref[...],
                 preferred_element_type=f32) + bd_ref[...]       # (1, 4096)
    xd_s[...] = xd                                               # lanes (u,v,c)

    # unflatten into zero-padded (10,10,64) spatial buffer for convt1
    pad_d[...] = jnp.zeros(pad_d.shape, f32)
    for u in range(8):
        for v in range(8):
            k = u * 8 + v
            pad_d[1 + u, (1 + v):(2 + v), :] = xd_s[0:1, k * 64:(k + 1) * 64]

    # ------------------------------ decoder -------------------------------
    # convt1 (64->32, k=4, s=2, p=1): depth-to-space form = 9 stride-1 taps,
    # output lanes = (oy, ox, co) = 128 (pixel-shuffle deferred into convt2).
    acc3 = jnp.zeros((64, 128), f32)
    for t in range(9):
        dy, dx = t // 3, t % 3
        slab = pad_d[dy:dy + 8, dx:dx + 8, :].reshape(64, 64).astype(bf16)
        acc3 = acc3 + jnp.dot(slab, wt1_ref[t], preferred_element_type=f32)
    h3 = jnp.maximum(acc3 + bt1_ref[...], 0.0)                   # (64, 128)

    pad_t[...] = jnp.zeros(pad_t.shape, f32)
    for u in range(8):
        pad_t[1 + u, 1:9, :] = h3[u * 8:(u + 1) * 8, :]

    # convt2 (32->3, k=4, s=2, p=1): consumes convt1's phase channels directly
    # and emits, per 8x8 block, the 4x4x3 final pixel patch (48 lanes).
    acc4 = jnp.zeros((64, 48), f32)
    for t in range(9):
        dy, dx = t // 3, t % 3
        slab = pad_t[dy:dy + 8, dx:dx + 8, :].reshape(64, 128).astype(bf16)
        acc4 = acc4 + jnp.dot(slab, wt2_ref[t], preferred_element_type=f32)
    out_ref[0, :, :] = jax.nn.sigmoid(acc4 + bt2_ref[...])       # (64, 48)


# ---------------------------------------------------------------------------
# XLA prologue / epilogue glue (tiny: 49 KB and 24 KB respectively)
# ---------------------------------------------------------------------------
def conv1_im2col(x_nchw):
    """(B,3,32,32) NCHW -> (B, 64 blocks, 192) bf16; features (oy,ox,kh,kw,ci)."""
    B = x_nchw.shape[0]
    x = jnp.transpose(x_nchw, (0, 2, 3, 1))                      # NHWC
    xp = jnp.pad(x, ((0, 0), (1, 1), (1, 1), (0, 0)))            # (B,34,34,3)
    u = jnp.arange(8)
    s = jnp.arange(2)
    k = jnp.arange(4)
    idx = 4 * u[:, None, None] + 2 * s[None, :, None] + k[None, None, :]  # (8,2,4)
    g = xp[:, idx]                                               # (B,8,2,4,34,3)
    g = g[:, :, :, :, idx]                                       # (B,8,2,4,8,2,4,3)
    g = jnp.transpose(g, (0, 1, 4, 2, 5, 3, 6, 7))               # (b,u,v,oy,ox,kh,kw,ci)
    return g.reshape(B, 64, 192).astype(jnp.bfloat16)


def _assemble_output(out_blk):
    """(B, 64 blocks, 48=(ry,rx,c)) -> (B, 3, 32, 32) NCHW."""
    B = out_blk.shape[0]
    o = out_blk.reshape(B, 8, 8, 4, 4, 3)                        # (b,u,v,ry,rx,c)
    o = jnp.transpose(o, (0, 5, 1, 3, 2, 4))                     # (b,c,u,ry,v,rx)
    return o.reshape(B, 3, 32, 32)


# ---------------------------------------------------------------------------
# Forward wrapper (single pallas_call)
# ---------------------------------------------------------------------------
def vae_forward(pp, x, eps):
    """x: (B,3,32,32) f32, eps: (B,128) f32 -> (x_decoded NCHW, mu, logvar)."""
    B = x.shape[0]
    cols1 = conv1_im2col(x)
    eps3 = eps.reshape(B, 1, 128).astype(jnp.float32)

    mu3, lv3, out_blk = pl.pallas_call(
        _vae_kernel,
        out_shape=(jax.ShapeDtypeStruct((B, 1, 128), jnp.float32),
                   jax.ShapeDtypeStruct((B, 1, 128), jnp.float32),
                   jax.ShapeDtypeStruct((B, 64, 48), jnp.float32)),
        grid=(B,),
        in_specs=[
            pl.BlockSpec((1, 64, 192), lambda i: (i, 0, 0)),     # cols1
            pl.BlockSpec((192, 128), lambda i: (0, 0)),          # w1 (block-diag)
            pl.BlockSpec((1, 128), lambda i: (0, 0)),            # b1
            pl.BlockSpec((9, 128, 64), lambda i: (0, 0, 0)),     # w2 taps
            pl.BlockSpec((1, 64), lambda i: (0, 0)),             # b2
            pl.BlockSpec((4096, 256), lambda i: (0, 0)),         # fc_mu|logvar
            pl.BlockSpec((1, 256), lambda i: (0, 0)),            # b_mu|logvar
            pl.BlockSpec((1, 1, 128), lambda i: (i, 0, 0)),      # eps
            pl.BlockSpec((128, 4096), lambda i: (0, 0)),         # fc_decode
            pl.BlockSpec((1, 4096), lambda i: (0, 0)),           # b_decode
            pl.BlockSpec((9, 64, 128), lambda i: (0, 0, 0)),     # convt1 taps
            pl.BlockSpec((1, 128), lambda i: (0, 0)),            # convt1 bias
            pl.BlockSpec((9, 128, 48), lambda i: (0, 0, 0)),     # convt2 taps
            pl.BlockSpec((1, 48), lambda i: (0, 0)),             # convt2 bias
        ],
        out_specs=(
            pl.BlockSpec((1, 1, 128), lambda i: (i, 0, 0)),      # mu
            pl.BlockSpec((1, 1, 128), lambda i: (i, 0, 0)),      # logvar
            pl.BlockSpec((1, 64, 48), lambda i: (i, 0, 0)),      # decoded blocks
        ),
        scratch_shapes=[
            pltpu.VMEM((10, 10, 128), jnp.float32),              # padded s2d (enc)
            pltpu.VMEM((64, 64), jnp.float32),                   # conv2 output
            pltpu.VMEM((1, 4096), jnp.float32),                  # x_enc row
            pltpu.VMEM((1, 4096), jnp.float32),                  # fc_decode row
            pltpu.VMEM((10, 10, 64), jnp.float32),               # padded dec input
            pltpu.VMEM((10, 10, 128), jnp.float32),              # padded convt1 out
        ],
        compiler_params=pltpu.CompilerParams(
            dimension_semantics=("parallel",),
            vmem_limit_bytes=32 * 1024 * 1024),
    )(cols1, pp["w1"], pp["b1"], pp["w2"], pp["b2"],
      pp["wml"], pp["bml"], eps3, pp["wd"], pp["bd"],
      pp["wt1"], pp["bt1"], pp["wt2"], pp["bt2"])

    x_dec = _assemble_output(out_blk)
    return x_dec, mu3.reshape(B, 128), lv3.reshape(B, 128)


# ---------------------------------------------------------------------------
# Parameters: synthetic PyTorch-layout init + one-time kernel-layout packing
# ---------------------------------------------------------------------------
def init_params(key):
    ks = jax.random.split(key, 14)
    s = 0.05
    n = lambda k, shape: jax.random.normal(k, shape, jnp.float32) * s
    return {
        "conv1_w": n(ks[0], (32, 3, 4, 4)),   "conv1_b": n(ks[1], (32,)),
        "conv2_w": n(ks[2], (64, 32, 4, 4)),  "conv2_b": n(ks[3], (64,)),
        "fc_mu_w": n(ks[4], (4096, 128)),     "fc_mu_b": n(ks[5], (128,)),
        "fc_lv_w": n(ks[6], (4096, 128)),     "fc_lv_b": n(ks[7], (128,)),
        "fc_dec_w": n(ks[8], (128, 4096)),    "fc_dec_b": n(ks[9], (4096,)),
        "convt1_w": n(ks[10], (64, 32, 4, 4)), "convt1_b": n(ks[11], (32,)),
        "convt2_w": n(ks[12], (32, 3, 4, 4)),  "convt2_b": n(ks[13], (3,)),
    }


def prepare_params(p):
    """One-time weight packing into the kernel's block/space-to-depth layouts."""
    f32 = np.float32

    # conv1: block-diagonal (192,128); rows (oy,ox,kh,kw,ci), cols (oy,ox,co)
    c1w = np.asarray(p["conv1_w"], f32)
    w1_2d = c1w.transpose(2, 3, 1, 0).reshape(48, 32)
    w1bd = np.zeros((4, 48, 4, 32), f32)
    for g in range(4):
        w1bd[g, :, g, :] = w1_2d
    w1bd = w1bd.reshape(192, 128)
    b1 = np.tile(np.asarray(p["conv1_b"], f32), 4)

    # conv2 (s2d form): 9 taps of (128,64); kh = 2*dy + oy - 1
    c2w = np.asarray(p["conv2_w"], f32)
    w2 = np.zeros((3, 3, 2, 2, 32, 64), f32)
    for dy in range(3):
        for oy in range(2):
            kh = 2 * dy + oy - 1
            if not 0 <= kh < 4:
                continue
            for dx in range(3):
                for ox in range(2):
                    kw = 2 * dx + ox - 1
                    if not 0 <= kw < 4:
                        continue
                    w2[dy, dx, oy, ox] = c2w[:, :, kh, kw].T
    w2 = w2.reshape(9, 128, 64)
    b2 = np.asarray(p["conv2_b"], f32)

    # fc heads / fc_decode: permute NCHW flatten order (c,h,w) -> (u,v,c)
    perm = np.arange(4096).reshape(64, 8, 8).transpose(1, 2, 0).reshape(-1)
    wml = np.concatenate([np.asarray(p["fc_mu_w"], f32)[perm],
                          np.asarray(p["fc_lv_w"], f32)[perm]], axis=1)
    bml = np.concatenate([np.asarray(p["fc_mu_b"], f32),
                          np.asarray(p["fc_lv_b"], f32)])
    wd = np.asarray(p["fc_dec_w"], f32)[:, perm]
    bd = np.asarray(p["fc_dec_b"], f32)[perm]

    # convt1 (d2s form): 9 taps of (64,128=(oy,ox,co)); kh = 3 - 2*dy + oy
    t1w = np.asarray(p["convt1_w"], f32)
    wt1 = np.zeros((3, 3, 64, 2, 2, 32), f32)
    for dy in range(3):
        for oy in range(2):
            kh = 3 - 2 * dy + oy
            if not 0 <= kh < 4:
                continue
            for dx in range(3):
                for ox in range(2):
                    kw = 3 - 2 * dx + ox
                    if not 0 <= kw < 4:
                        continue
                    wt1[dy, dx, :, oy, ox, :] = t1w[:, :, kh, kw]
    wt1 = wt1.reshape(9, 64, 128)
    bt1 = np.tile(np.asarray(p["convt1_b"], f32), 4)

    # convt2 (d2s form, both pixel-shuffles folded in): 9 taps of
    # (128=(oy',ox',ci), 48=(ry,rx,co)); kh = ry + 5 - 4*dy - 2*oy'
    t2w = np.asarray(p["convt2_w"], f32)
    wt2 = np.zeros((3, 3, 2, 2, 32, 4, 4, 3), f32)
    for dy in range(3):
        for oyp in range(2):
            for ry in range(4):
                kh = ry + 5 - 4 * dy - 2 * oyp
                if not 0 <= kh < 4:
                    continue
                for dx in range(3):
                    for oxp in range(2):
                        for rx in range(4):
                            kw = rx + 5 - 4 * dx - 2 * oxp
                            if not 0 <= kw < 4:
                                continue
                            wt2[dy, dx, oyp, oxp, :, ry, rx, :] = t2w[:, :, kh, kw]
    wt2 = wt2.reshape(9, 128, 48)
    bt2 = np.tile(np.asarray(p["convt2_b"], f32), 16)

    bf = lambda a: jnp.asarray(a, jnp.bfloat16)
    fl = lambda a: jnp.asarray(a, jnp.float32)
    return {
        "w1": bf(w1bd), "b1": fl(b1.reshape(1, 128)),
        "w2": bf(w2), "b2": fl(b2.reshape(1, 64)),
        "wml": bf(wml), "bml": fl(bml.reshape(1, 256)),
        "wd": bf(wd), "bd": fl(bd.reshape(1, 4096)),
        "wt1": bf(wt1), "bt1": fl(bt1.reshape(1, 128)),
        "wt2": bf(wt2), "bt2": fl(bt2.reshape(1, 48)),
    }


# ---------------------------------------------------------------------------
# Plain-XLA float32 reference of the original PyTorch module
# ---------------------------------------------------------------------------
def ref_forward(p, x, eps):
    dn = ("NCHW", "OIHW", "NCHW")
    relu = jax.nn.relu

    def conv(x, w, b, stride):
        y = lax.conv_general_dilated(x, w, (stride, stride), ((1, 1), (1, 1)),
                                     dimension_numbers=dn)
        return y + b.reshape(1, -1, 1, 1)

    def convt(x, w, b):  # ConvTranspose2d(k=4, s=2, p=1); w: (Cin,Cout,4,4)
        w2 = jnp.flip(w, (2, 3)).transpose(1, 0, 2, 3)
        y = lax.conv_general_dilated(x, w2, (1, 1), ((2, 2), (2, 2)),
                                     lhs_dilation=(2, 2), dimension_numbers=dn)
        return y + b.reshape(1, -1, 1, 1)

    B = x.shape[0]
    h = relu(conv(x, p["conv1_w"], p["conv1_b"], 2))
    h = relu(conv(h, p["conv2_w"], p["conv2_b"], 2))
    xe = h.reshape(B, -1)
    mu = xe @ p["fc_mu_w"] + p["fc_mu_b"]
    lv = xe @ p["fc_lv_w"] + p["fc_lv_b"]
    z = mu + eps * jnp.exp(0.5 * lv)
    xd = (z @ p["fc_dec_w"] + p["fc_dec_b"]).reshape(B, 64, 8, 8)
    h = relu(convt(xd, p["convt1_w"], p["convt1_b"]))
    out = jax.nn.sigmoid(convt(h, p["convt2_w"], p["convt2_b"]))
    return out, mu, lv


# ---------------------------------------------------------------------------
if __name__ == "__main__":
    key = jax.random.PRNGKey(0)
    k_param, k_x, k_eps = jax.random.split(key, 3)

    params = init_params(k_param)
    pp = prepare_params(params)          # one-time kernel-layout weight packing

    x = jax.random.normal(k_x, (2, 3, 32, 32), jnp.float32)
    eps = jax.random.normal(k_eps, (2, 128), jnp.float32)

    fwd = jax.jit(vae_forward)
    x_dec, mu, logvar = fwd(pp, x, eps)
    jax.block_until_ready((x_dec, mu, logvar))

    assert x_dec.shape == (2, 3, 32, 32)
    assert mu.shape == (2, 128) and logvar.shape == (2, 128)
    assert bool(jnp.all(jnp.isfinite(x_dec)))
    assert bool(jnp.all((x_dec >= 0.0) & (x_dec <= 1.0)))

    # Cross-check against a plain-XLA reference (loose tolerance: bf16 MXU).
    r_dec, r_mu, r_lv = jax.jit(ref_forward)(params, x, eps)
    err_dec = float(jnp.max(jnp.abs(x_dec - r_dec)))
    err_mu = float(jnp.max(jnp.abs(mu - r_mu)))
    err_lv = float(jnp.max(jnp.abs(logvar - r_lv)))
    assert err_dec < 0.06 and err_mu < 0.2 and err_lv < 0.2, (err_dec, err_mu, err_lv)

    print("KERNEL_OK")
</pallas_src>

<mosaic_0001>
module attributes {stable_mosaic.version = 11 : i64} {
  func.func @_vae_kernel(%arg0: i32, %arg1: memref<1x64x192xbf16, #tpu.memory_space<vmem>>, %arg2: memref<192x128xbf16, #tpu.memory_space<vmem>>, %arg3: memref<1x128xf32, #tpu.memory_space<vmem>>, %arg4: memref<9x128x64xbf16, #tpu.memory_space<vmem>>, %arg5: memref<1x64xf32, #tpu.memory_space<vmem>>, %arg6: memref<4096x256xbf16, #tpu.memory_space<vmem>>, %arg7: memref<1x256xf32, #tpu.memory_space<vmem>>, %arg8: memref<1x1x128xf32, #tpu.memory_space<vmem>>, %arg9: memref<128x4096xbf16, #tpu.memory_space<vmem>>, %arg10: memref<1x4096xf32, #tpu.memory_space<vmem>>, %arg11: memref<9x64x128xbf16, #tpu.memory_space<vmem>>, %arg12: memref<1x128xf32, #tpu.memory_space<vmem>>, %arg13: memref<9x128x48xbf16, #tpu.memory_space<vmem>>, %arg14: memref<1x48xf32, #tpu.memory_space<vmem>>, %arg15: memref<1x1x128xf32, #tpu.memory_space<vmem>>, %arg16: memref<1x1x128xf32, #tpu.memory_space<vmem>>, %arg17: memref<1x64x48xf32, #tpu.memory_space<vmem>>, %arg18: memref<10x10x128xf32, #tpu.memory_space<vmem>>, %arg19: memref<64x64xf32, #tpu.memory_space<vmem>>, %arg20: memref<1x4096xf32, #tpu.memory_space<vmem>>, %arg21: memref<1x4096xf32, #tpu.memory_space<vmem>>, %arg22: memref<10x10x64xf32, #tpu.memory_space<vmem>>, %arg23: memref<10x10x128xf32, #tpu.memory_space<vmem>>) attributes {dimension_semantics = [#tpu.dimension_semantics<parallel>], iteration_bounds = array<i64: 2>, scalar_prefetch = 0 : i64, scratch_operands = 6 : i64, tpu.core_type = #tpu.core_type<tc>, window_params = [{transform_indices = @transform_0, window_bounds = array<i64: 1, 64, 192>}, {pipeline_mode = #tpu.pipeline_mode<synchronous>, transform_indices = @transform_1, window_bounds = array<i64: 192, 128>}, {pipeline_mode = #tpu.pipeline_mode<synchronous>, transform_indices = @transform_2, window_bounds = array<i64: 1, 128>}, {pipeline_mode = #tpu.pipeline_mode<synchronous>, transform_indices = @transform_3, window_bounds = array<i64: 9, 128, 64>}, {pipeline_mode = #tpu.pipeline_mode<synchronous>, transform_indices = @transform_4, window_bounds = array<i64: 1, 64>}, {pipeline_mode = #tpu.pipeline_mode<synchronous>, transform_indices = @transform_5, window_bounds = array<i64: 4096, 256>}, {pipeline_mode = #tpu.pipeline_mode<synchronous>, transform_indices = @transform_6, window_bounds = array<i64: 1, 256>}, {transform_indices = @transform_7, window_bounds = array<i64: 1, 1, 128>}, {pipeline_mode = #tpu.pipeline_mode<synchronous>, transform_indices = @transform_8, window_bounds = array<i64: 128, 4096>}, {pipeline_mode = #tpu.pipeline_mode<synchronous>, transform_indices = @transform_9, window_bounds = array<i64: 1, 4096>}, {pipeline_mode = #tpu.pipeline_mode<synchronous>, transform_indices = @transform_10, window_bounds = array<i64: 9, 64, 128>}, {pipeline_mode = #tpu.pipeline_mode<synchronous>, transform_indices = @transform_11, window_bounds = array<i64: 1, 128>}, {pipeline_mode = #tpu.pipeline_mode<synchronous>, transform_indices = @transform_12, window_bounds = array<i64: 9, 128, 48>}, {pipeline_mode = #tpu.pipeline_mode<synchronous>, transform_indices = @transform_13, window_bounds = array<i64: 1, 48>}, {transform_indices = @transform_14, window_bounds = array<i64: 1, 1, 128>}, {transform_indices = @transform_15, window_bounds = array<i64: 1, 1, 128>}, {transform_indices = @transform_16, window_bounds = array<i64: 1, 64, 48>}]} {
    %c0 = arith.constant 0 : index
    %c0_0 = arith.constant 0 : index
    %c0_1 = arith.constant 0 : index
    %0 = vector.load %arg1[%c0, %c0_0, %c0_1] : memref<1x64x192xbf16, #tpu.memory_space<vmem>>, vector<1x64x192xbf16>
    %1 = vector.shape_cast %0 : vector<1x64x192xbf16> to vector<64x192xbf16>
    %c0_2 = arith.constant 0 : index
    %c0_3 = arith.constant 0 : index
    %2 = vector.load %arg2[%c0_2, %c0_3] : memref<192x128xbf16, #tpu.memory_space<vmem>>, vector<192x128xbf16>
    %cst = arith.constant dense<0.000000e+00> : vector<64x128xf32>
    %3 = tpu.matmul %1, %2, %cst {dimension_numbers = #tpu.dot_dimension_numbers<[1], [0], [0], [1], [0, 0, 1, 1], [], []>} : vector<64x192xbf16>, vector<192x128xbf16>, vector<64x128xf32> -> vector<64x128xf32>
    %c0_4 = arith.constant 0 : index
    %c0_5 = arith.constant 0 : index
    %4 = vector.load %arg3[%c0_4, %c0_5] : memref<1x128xf32, #tpu.memory_space<vmem>>, vector<1x128xf32>
    %5 = vector.broadcast %4 : vector<1x128xf32> to vector<64x128xf32>
    %6 = arith.addf %3, %5 : vector<64x128xf32>
    %cst_6 = arith.constant 0.000000e+00 : f32
    %7 = vector.broadcast %cst_6 : f32 to vector<64x128xf32>
    %8 = arith.maximumf %6, %7 : vector<64x128xf32>
    %cst_7 = arith.constant 0.000000e+00 : f32
    %9 = vector.broadcast %cst_7 : f32 to vector<10x10x128xf32>
    %c0_8 = arith.constant 0 : index
    %c0_9 = arith.constant 0 : index
    %c0_10 = arith.constant 0 : index
    %10 = vector.load %arg18[%c0_8, %c0_9, %c0_10] : memref<10x10x128xf32, #tpu.memory_space<vmem>>, vector<10x10x128xf32>
    tpu.vector_store %arg18[%c0_8, %c0_9, %c0_10], %9 {strides = array<i32>} : memref<10x10x128xf32, #tpu.memory_space<vmem>>, vector<10x10x128xf32>,
    %11 = vector.extract_strided_slice %8 {offsets = [0, 0], sizes = [8, 128], strides = [1, 1]} : vector<64x128xf32> to vector<8x128xf32>
    %c1 = arith.constant 1 : index
    %c1_11 = arith.constant 1 : index
    %c0_12 = arith.constant 0 : index
    %12 = vector.load %arg18[%c1, %c1_11, %c0_12] : memref<10x10x128xf32, #tpu.memory_space<vmem>>, vector<1x8x128xf32>
    %13 = vector.shape_cast %12 : vector<1x8x128xf32> to vector<8x128xf32>
    %14 = vector.shape_cast %11 : vector<8x128xf32> to vector<1x8x128xf32>
    tpu.vector_store %arg18[%c1, %c1_11, %c0_12], %14 {strides = array<i32>} : memref<10x10x128xf32, #tpu.memory_space<vmem>>, vector<1x8x128xf32>,
    %15 = vector.extract_strided_slice %8 {offsets = [8, 0], sizes = [8, 128], strides = [1, 1]} : vector<64x128xf32> to vector<8x128xf32>
    %c2 = arith.constant 2 : index
    %c1_13 = arith.constant 1 : index
    %c0_14 = arith.constant 0 : index
    %16 = vector.load %arg18[%c2, %c1_13, %c0_14] : memref<10x10x128xf32, #tpu.memory_space<vmem>>, vector<1x8x128xf32>
    %17 = vector.shape_cast %16 : vector<1x8x128xf32> to vector<8x128xf32>
    %18 = vector.shape_cast %15 : vector<8x128xf32> to vector<1x8x128xf32>
    tpu.vector_store %arg18[%c2, %c1_13, %c0_14], %18 {strides = array<i32>} : memref<10x10x128xf32, #tpu.memory_space<vmem>>, vector<1x8x128xf32>,
    %19 = vector.extract_strided_slice %8 {offsets = [16, 0], sizes = [8, 128], strides = [1, 1]} : vector<64x128xf32> to vector<8x128xf32>
    %c3 = arith.constant 3 : index
    %c1_15 = arith.constant 1 : index
    %c0_16 = arith.constant 0 : index
    %20 = vector.load %arg18[%c3, %c1_15, %c0_16] : memref<10x10x128xf32, #tpu.memory_space<vmem>>, vector<1x8x128xf32>
    %21 = vector.shape_cast %20 : vector<1x8x128xf32> to vector<8x128xf32>
    %22 = vector.shape_cast %19 : vector<8x128xf32> to vector<1x8x128xf32>
    tpu.vector_store %arg18[%c3, %c1_15, %c0_16], %22 {strides = array<i32>} : memref<10x10x128xf32, #tpu.memory_space<vmem>>, vector<1x8x128xf32>,
    %23 = vector.extract_strided_slice %8 {offsets = [24, 0], sizes = [8, 128], strides = [1, 1]} : vector<64x128xf32> to vector<8x128xf32>
    %c4 = arith.constant 4 : index
    %c1_17 = arith.constant 1 : index
    %c0_18 = arith.constant 0 : index
    %24 = vector.load %arg18[%c4, %c1_17, %c0_18] : memref<10x10x128xf32, #tpu.memory_space<vmem>>, vector<1x8x128xf32>
    %25 = vector.shape_cast %24 : vector<1x8x128xf32> to vector<8x128xf32>
    %26 = vector.shape_cast %23 : vector<8x128xf32> to vector<1x8x128xf32>
    tpu.vector_store %arg18[%c4, %c1_17, %c0_18], %26 {strides = array<i32>} : memref<10x10x128xf32, #tpu.memory_space<vmem>>, vector<1x8x128xf32>,
    %27 = vector.extract_strided_slice %8 {offsets = [32, 0], sizes = [8, 128], strides = [1, 1]} : vector<64x128xf32> to vector<8x128xf32>
    %c5 = arith.constant 5 : index
    %c1_19 = arith.constant 1 : index
    %c0_20 = arith.constant 0 : index
    %28 = vector.load %arg18[%c5, %c1_19, %c0_20] : memref<10x10x128xf32, #tpu.memory_space<vmem>>, vector<1x8x128xf32>
    %29 = vector.shape_cast %28 : vector<1x8x128xf32> to vector<8x128xf32>
    %30 = vector.shape_cast %27 : vector<8x128xf32> to vector<1x8x128xf32>
    tpu.vector_store %arg18[%c5, %c1_19, %c0_20], %30 {strides = array<i32>} : memref<10x10x128xf32, #tpu.memory_space<vmem>>, vector<1x8x128xf32>,
    %31 = vector.extract_strided_slice %8 {offsets = [40, 0], sizes = [8, 128], strides = [1, 1]} : vector<64x128xf32> to vector<8x128xf32>
    %c6 = arith.constant 6 : index
    %c1_21 = arith.constant 1 : index
    %c0_22 = arith.constant 0 : index
    %32 = vector.load %arg18[%c6, %c1_21, %c0_22] : memref<10x10x128xf32, #tpu.memory_space<vmem>>, vector<1x8x128xf32>
    %33 = vector.shape_cast %32 : vector<1x8x128xf32> to vector<8x128xf32>
    %34 = vector.shape_cast %31 : vector<8x128xf32> to vector<1x8x128xf32>
    tpu.vector_store %arg18[%c6, %c1_21, %c0_22], %34 {strides = array<i32>} : memref<10x10x128xf32, #tpu.memory_space<vmem>>, vector<1x8x128xf32>,
    %35 = vector.extract_strided_slice %8 {offsets = [48, 0], sizes = [8, 128], strides = [1, 1]} : vector<64x128xf32> to vector<8x128xf32>
    %c7 = arith.constant 7 : index
    %c1_23 = arith.constant 1 : index
    %c0_24 = arith.constant 0 : index
    %36 = vector.load %arg18[%c7, %c1_23, %c0_24] : memref<10x10x128xf32, #tpu.memory_space<vmem>>, vector<1x8x128xf32>
    %37 = vector.shape_cast %36 : vector<1x8x128xf32> to vector<8x128xf32>
    %38 = vector.shape_cast %35 : vector<8x128xf32> to vector<1x8x128xf32>
    tpu.vector_store %arg18[%c7, %c1_23, %c0_24], %38 {strides = array<i32>} : memref<10x10x128xf32, #tpu.memory_space<vmem>>, vector<1x8x128xf32>,
    %39 = vector.extract_strided_slice %8 {offsets = [56, 0], sizes = [8, 128], strides = [1, 1]} : vector<64x128xf32> to vector<8x128xf32>
    %c8 = arith.constant 8 : index
    %c1_25 = arith.constant 1 : index
    %c0_26 = arith.constant 0 : index
    %40 = vector.load %arg18[%c8, %c1_25, %c0_26] : memref<10x10x128xf32, #tpu.memory_space<vmem>>, vector<1x8x128xf32>
    %41 = vector.shape_cast %40 : vector<1x8x128xf32> to vector<8x128xf32>
    %42 = vector.shape_cast %39 : vector<8x128xf32> to vector<1x8x128xf32>
    tpu.vector_store %arg18[%c8, %c1_25, %c0_26], %42 {strides = array<i32>} : memref<10x10x128xf32, #tpu.memory_space<vmem>>, vector<1x8x128xf32>,
    %cst_27 = arith.constant 0.000000e+00 : f32
    %43 = vector.broadcast %cst_27 : f32 to vector<64x64xf32>
    %c0_28 = arith.constant 0 : index
    %c0_29 = arith.constant 0 : index
    %c0_30 = arith.constant 0 : index
    %44 = vector.load %arg18[%c0_28, %c0_29, %c0_30] : memref<10x10x128xf32, #tpu.memory_space<vmem>>, vector<8x8x128xf32>
    %45 = vector.shape_cast %44 : vector<8x8x128xf32> to vector<64x128xf32>
    %46 = arith.truncf %45 : vector<64x128xf32> to vector<64x128xbf16>
    %c0_31 = arith.constant 0 : index
    %c0_32 = arith.constant 0 : index
    %c0_33 = arith.constant 0 : index
    %47 = vector.load %arg4[%c0_31, %c0_32, %c0_33] : memref<9x128x64xbf16, #tpu.memory_space<vmem>>, vector<1x128x64xbf16>
    %48 = vector.shape_cast %47 : vector<1x128x64xbf16> to vector<128x64xbf16>
    %cst_34 = arith.constant dense<0.000000e+00> : vector<64x64xf32>
    %49 = tpu.matmul %46, %48, %cst_34 {dimension_numbers = #tpu.dot_dimension_numbers<[1], [0], [0], [1], [0, 0, 1, 1], [], []>} : vector<64x128xbf16>, vector<128x64xbf16>, vector<64x64xf32> -> vector<64x64xf32>
    %50 = arith.addf %43, %49 : vector<64x64xf32>
    %c0_35 = arith.constant 0 : index
    %c1_36 = arith.constant 1 : index
    %c0_37 = arith.constant 0 : index
    %51 = vector.load %arg18[%c0_35, %c1_36, %c0_37] : memref<10x10x128xf32, #tpu.memory_space<vmem>>, vector<8x8x128xf32>
    %52 = vector.shape_cast %51 : vector<8x8x128xf32> to vector<64x128xf32>
    %53 = arith.truncf %52 : vector<64x128xf32> to vector<64x128xbf16>
    %c1_38 = arith.constant 1 : index
    %c0_39 = arith.constant 0 : index
    %c0_40 = arith.constant 0 : index
    %54 = vector.load %arg4[%c1_38, %c0_39, %c0_40] : memref<9x128x64xbf16, #tpu.memory_space<vmem>>, vector<1x128x64xbf16>
    %55 = vector.shape_cast %54 : vector<1x128x64xbf16> to vector<128x64xbf16>
    %cst_41 = arith.constant dense<0.000000e+00> : vector<64x64xf32>
    %56 = tpu.matmul %53, %55, %cst_41 {dimension_numbers = #tpu.dot_dimension_numbers<[1], [0], [0], [1], [0, 0, 1, 1], [], []>} : vector<64x128xbf16>, vector<128x64xbf16>, vector<64x64xf32> -> vector<64x64xf32>
    %57 = arith.addf %50, %56 : vector<64x64xf32>
    %c0_42 = arith.constant 0 : index
    %c2_43 = arith.constant 2 : index
    %c0_44 = arith.constant 0 : index
    %58 = vector.load %arg18[%c0_42, %c2_43, %c0_44] : memref<10x10x128xf32, #tpu.memory_space<vmem>>, vector<8x8x128xf32>
    %59 = vector.shape_cast %58 : vector<8x8x128xf32> to vector<64x128xf32>
    %60 = arith.truncf %59 : vector<64x128xf32> to vector<64x128xbf16>
    %c2_45 = arith.constant 2 : index
    %c0_46 = arith.constant 0 : index
    %c0_47 = arith.constant 0 : index
    %61 = vector.load %arg4[%c2_45, %c0_46, %c0_47] : memref<9x128x64xbf16, #tpu.memory_space<vmem>>, vector<1x128x64xbf16>
    %62 = vector.shape_cast %61 : vector<1x128x64xbf16> to vector<128x64xbf16>
    %cst_48 = arith.constant dense<0.000000e+00> : vector<64x64xf32>
    %63 = tpu.matmul %60, %62, %cst_48 {dimension_numbers = #tpu.dot_dimension_numbers<[1], [0], [0], [1], [0, 0, 1, 1], [], []>} : vector<64x128xbf16>, vector<128x64xbf16>, vector<64x64xf32> -> vector<64x64xf32>
    %64 = arith.addf %57, %63 : vector<64x64xf32>
    %c1_49 = arith.constant 1 : index
    %c0_50 = arith.constant 0 : index
    %c0_51 = arith.constant 0 : index
    %65 = vector.load %arg18[%c1_49, %c0_50, %c0_51] : memref<10x10x128xf32, #tpu.memory_space<vmem>>, vector<8x8x128xf32>
    %66 = vector.shape_cast %65 : vector<8x8x128xf32> to vector<64x128xf32>
    %67 = arith.truncf %66 : vector<64x128xf32> to vector<64x128xbf16>
    %c3_52 = arith.constant 3 : index
    %c0_53 = arith.constant 0 : index
    %c0_54 = arith.constant 0 : index
    %68 = vector.load %arg4[%c3_52, %c0_53, %c0_54] : memref<9x128x64xbf16, #tpu.memory_space<vmem>>, vector<1x128x64xbf16>
    %69 = vector.shape_cast %68 : vector<1x128x64xbf16> to vector<128x64xbf16>
    %cst_55 = arith.constant dense<0.000000e+00> : vector<64x64xf32>
    %70 = tpu.matmul %67, %69, %cst_55 {dimension_numbers = #tpu.dot_dimension_numbers<[1], [0], [0], [1], [0, 0, 1, 1], [], []>} : vector<64x128xbf16>, vector<128x64xbf16>, vector<64x64xf32> -> vector<64x64xf32>
    %71 = arith.addf %64, %70 : vector<64x64xf32>
    %c1_56 = arith.constant 1 : index
    %c1_57 = arith.constant 1 : index
    %c0_58 = arith.constant 0 : index
    %72 = vector.load %arg18[%c1_56, %c1_57, %c0_58] : memref<10x10x128xf32, #tpu.memory_space<vmem>>, vector<8x8x128xf32>
    %73 = vector.shape_cast %72 : vector<8x8x128xf32> to vector<64x128xf32>
    %74 = arith.truncf %73 : vector<64x128xf32> to vector<64x128xbf16>
    %c4_59 = arith.constant 4 : index
    %c0_60 = arith.constant 0 : index
    %c0_61 = arith.constant 0 : index
    %75 = vector.load %arg4[%c4_59, %c0_60, %c0_61] : memref<9x128x64xbf16, #tpu.memory_space<vmem>>, vector<1x128x64xbf16>
    %76 = vector.shape_cast %75 : vector<1x128x64xbf16> to vector<128x64xbf16>
    %cst_62 = arith.constant dense<0.000000e+00> : vector<64x64xf32>
    %77 = tpu.matmul %74, %76, %cst_62 {dimension_numbers = #tpu.dot_dimension_numbers<[1], [0], [0], [1], [0, 0, 1, 1], [], []>} : vector<64x128xbf16>, vector<128x64xbf16>, vector<64x64xf32> -> vector<64x64xf32>
    %78 = arith.addf %71, %77 : vector<64x64xf32>
    %c1_63 = arith.constant 1 : index
    %c2_64 = arith.constant 2 : index
    %c0_65 = arith.constant 0 : index
    %79 = vector.load %arg18[%c1_63, %c2_64, %c0_65] : memref<10x10x128xf32, #tpu.memory_space<vmem>>, vector<8x8x128xf32>
    %80 = vector.shape_cast %79 : vector<8x8x128xf32> to vector<64x128xf32>
    %81 = arith.truncf %80 : vector<64x128xf32> to vector<64x128xbf16>
    %c5_66 = arith.constant 5 : index
    %c0_67 = arith.constant 0 : index
    %c0_68 = arith.constant 0 : index
    %82 = vector.load %arg4[%c5_66, %c0_67, %c0_68] : memref<9x128x64xbf16, #tpu.memory_space<vmem>>, vector<1x128x64xbf16>
    %83 = vector.shape_cast %82 : vector<1x128x64xbf16> to vector<128x64xbf16>
    %cst_69 = arith.constant dense<0.000000e+00> : vector<64x64xf32>
    %84 = tpu.matmul %81, %83, %cst_69 {dimension_numbers = #tpu.dot_dimension_numbers<[1], [0], [0], [1], [0, 0, 1, 1], [], []>} : vector<64x128xbf16>, vector<128x64xbf16>, vector<64x64xf32> -> vector<64x64xf32>
    %85 = arith.addf %78, %84 : vector<64x64xf32>
    %c2_70 = arith.constant 2 : index
    %c0_71 = arith.constant 0 : index
    %c0_72 = arith.constant 0 : index
    %86 = vector.load %arg18[%c2_70, %c0_71, %c0_72] : memref<10x10x128xf32, #tpu.memory_space<vmem>>, vector<8x8x128xf32>
    %87 = vector.shape_cast %86 : vector<8x8x128xf32> to vector<64x128xf32>
    %88 = arith.truncf %87 : vector<64x128xf32> to vector<64x128xbf16>
    %c6_73 = arith.constant 6 : index
    %c0_74 = arith.constant 0 : index
    %c0_75 = arith.constant 0 : index
    %89 = vector.load %arg4[%c6_73, %c0_74, %c0_75] : memref<9x128x64xbf16, #tpu.memory_space<vmem>>, vector<1x128x64xbf16>
    %90 = vector.shape_cast %89 : vector<1x128x64xbf16> to vector<128x64xbf16>
    %cst_76 = arith.constant dense<0.000000e+00> : vector<64x64xf32>
    %91 = tpu.matmul %88, %90, %cst_76 {dimension_numbers = #tpu.dot_dimension_numbers<[1], [0], [0], [1], [0, 0, 1, 1], [], []>} : vector<64x128xbf16>, vector<128x64xbf16>, vector<64x64xf32> -> vector<64x64xf32>
    %92 = arith.addf %85, %91 : vector<64x64xf32>
    %c2_77 = arith.constant 2 : index
    %c1_78 = arith.constant 1 : index
    %c0_79 = arith.constant 0 : index
    %93 = vector.load %arg18[%c2_77, %c1_78, %c0_79] : memref<10x10x128xf32, #tpu.memory_space<vmem>>, vector<8x8x128xf32>
    %94 = vector.shape_cast %93 : vector<8x8x128xf32> to vector<64x128xf32>
    %95 = arith.truncf %94 : vector<64x128xf32> to vector<64x128xbf16>
    %c7_80 = arith.constant 7 : index
    %c0_81 = arith.constant 0 : index
    %c0_82 = arith.constant 0 : index
    %96 = vector.load %arg4[%c7_80, %c0_81, %c0_82] : memref<9x128x64xbf16, #tpu.memory_space<vmem>>, vector<1x128x64xbf16>
    %97 = vector.shape_cast %96 : vector<1x128x64xbf16> to vector<128x64xbf16>
    %cst_83 = arith.constant dense<0.000000e+00> : vector<64x64xf32>
    %98 = tpu.matmul %95, %97, %cst_83 {dimension_numbers = #tpu.dot_dimension_numbers<[1], [0], [0], [1], [0, 0, 1, 1], [], []>} : vector<64x128xbf16>, vector<128x64xbf16>, vector<64x64xf32> -> vector<64x64xf32>
    %99 = arith.addf %92, %98 : vector<64x64xf32>
    %c2_84 = arith.constant 2 : index
    %c2_85 = arith.constant 2 : index
    %c0_86 = arith.constant 0 : index
    %100 = vector.load %arg18[%c2_84, %c2_85, %c0_86] : memref<10x10x128xf32, #tpu.memory_space<vmem>>, vector<8x8x128xf32>
    %101 = vector.shape_cast %100 : vector<8x8x128xf32> to vector<64x128xf32>
    %102 = arith.truncf %101 : vector<64x128xf32> to vector<64x128xbf16>
    %c8_87 = arith.constant 8 : index
    %c0_88 = arith.constant 0 : index
    %c0_89 = arith.constant 0 : index
    %103 = vector.load %arg4[%c8_87, %c0_88, %c0_89] : memref<9x128x64xbf16, #tpu.memory_space<vmem>>, vector<1x128x64xbf16>
    %104 = vector.shape_cast %103 : vector<1x128x64xbf16> to vector<128x64xbf16>
    %cst_90 = arith.constant dense<0.000000e+00> : vector<64x64xf32>
    %105 = tpu.matmul %102, %104, %cst_90 {dimension_numbers = #tpu.dot_dimension_numbers<[1], [0], [0], [1], [0, 0, 1, 1], [], []>} : vector<64x128xbf16>, vector<128x64xbf16>, vector<64x64xf32> -> vector<64x64xf32>
    %106 = arith.addf %99, %105 : vector<64x64xf32>
    %c0_91 = arith.constant 0 : index
    %c0_92 = arith.constant 0 : index
    %107 = vector.load %arg5[%c0_91, %c0_92] : memref<1x64xf32, #tpu.memory_space<vmem>>, vector<1x64xf32>
    %108 = vector.broadcast %107 : vector<1x64xf32> to vector<64x64xf32>
    %109 = arith.addf %106, %108 : vector<64x64xf32>
    %cst_93 = arith.constant 0.000000e+00 : f32
    %110 = vector.broadcast %cst_93 : f32 to vector<64x64xf32>
    %111 = arith.maximumf %109, %110 : vector<64x64xf32>
    %c0_94 = arith.constant 0 : index
    %c0_95 = arith.constant 0 : index
    %112 = vector.load %arg19[%c0_94, %c0_95] : memref<64x64xf32, #tpu.memory_space<vmem>>, vector<64x64xf32>
    tpu.vector_store %arg19[%c0_94, %c0_95], %111 {strides = array<i32>} : memref<64x64xf32, #tpu.memory_space<vmem>>, vector<64x64xf32>,
    %c0_96 = arith.constant 0 : index
    %c0_97 = arith.constant 0 : index
    %113 = vector.load %arg19[%c0_96, %c0_97] : memref<64x64xf32, #tpu.memory_space<vmem>>, vector<1x64xf32>
    %c0_98 = arith.constant 0 : index
    %c0_99 = arith.constant 0 : index
    %114 = vector.load %arg20[%c0_98, %c0_99] : memref<1x4096xf32, #tpu.memory_space<vmem>>, vector<1x64xf32>
    tpu.vector_store %arg20[%c0_98, %c0_99], %113 {strides = array<i32>} : memref<1x4096xf32, #tpu.memory_space<vmem>>, vector<1x64xf32>,
    %c1_100 = arith.constant 1 : index
    %c0_101 = arith.constant 0 : index
    %115 = vector.load %arg19[%c1_100, %c0_101] : memref<64x64xf32, #tpu.memory_space<vmem>>, vector<1x64xf32>
    %c0_102 = arith.constant 0 : index
    %c64 = arith.constant 64 : index
    %116 = vector.load %arg20[%c0_102, %c64] : memref<1x4096xf32, #tpu.memory_space<vmem>>, vector<1x64xf32>
    tpu.vector_store %arg20[%c0_102, %c64], %115 {strides = array<i32>} : memref<1x4096xf32, #tpu.memory_space<vmem>>, vector<1x64xf32>,
    %c2_103 = arith.constant 2 : index
    %c0_104 = arith.constant 0 : index
    %117 = vector.load %arg19[%c2_103, %c0_104] : memref<64x64xf32, #tpu.memory_space<vmem>>, vector<1x64xf32>
    %c0_105 = arith.constant 0 : index
    %c128 = arith.constant 128 : index
    %118 = vector.load %arg20[%c0_105, %c128] : memref<1x4096xf32, #tpu.memory_space<vmem>>, vector<1x64xf32>
    tpu.vector_store %arg20[%c0_105, %c128], %117 {strides = array<i32>} : memref<1x4096xf32, #tpu.memory_space<vmem>>, vector<1x64xf32>,
    %c3_106 = arith.constant 3 : index
    %c0_107 = arith.constant 0 : index
    %119 = vector.load %arg19[%c3_106, %c0_107] : memref<64x64xf32, #tpu.memory_space<vmem>>, vector<1x64xf32>
    %c0_108 = arith.constant 0 : index
    %c192 = arith.constant 192 : index
    %120 = vector.load %arg20[%c0_108, %c192] : memref<1x4096xf32, #tpu.memory_space<vmem>>, vector<1x64xf32>
    tpu.vector_store %arg20[%c0_108, %c192], %119 {strides = array<i32>} : memref<1x4096xf32, #tpu.memory_space<vmem>>, vector<1x64xf32>,
    %c4_109 = arith.constant 4 : index
    %c0_110 = arith.constant 0 : index
    %121 = vector.load %arg19[%c4_109, %c0_110] : memref<64x64xf32, #tpu.memory_space<vmem>>, vector<1x64xf32>
    %c0_111 = arith.constant 0 : index
    %c256 = arith.constant 256 : index
    %122 = vector.load %arg20[%c0_111, %c256] : memref<1x4096xf32, #tpu.memory_space<vmem>>, vector<1x64xf32>
    tpu.vector_store %arg20[%c0_111, %c256], %121 {strides = array<i32>} : memref<1x4096xf32, #tpu.memory_space<vmem>>, vector<1x64xf32>,
    %c5_112 = arith.constant 5 : index
    %c0_113 = arith.constant 0 : index
    %123 = vector.load %arg19[%c5_112, %c0_113] : memref<64x64xf32, #tpu.memory_space<vmem>>, vector<1x64xf32>
    %c0_114 = arith.constant 0 : index
    %c320 = arith.constant 320 : index
    %124 = vector.load %arg20[%c0_114, %c320] : memref<1x4096xf32, #tpu.memory_space<vmem>>, vector<1x64xf32>
    tpu.vector_store %arg20[%c0_114, %c320], %123 {strides = array<i32>} : memref<1x4096xf32, #tpu.memory_space<vmem>>, vector<1x64xf32>,
    %c6_115 = arith.constant 6 : index
    %c0_116 = arith.constant 0 : index
    %125 = vector.load %arg19[%c6_115, %c0_116] : memref<64x64xf32, #tpu.memory_space<vmem>>, vector<1x64xf32>
    %c0_117 = arith.constant 0 : index
    %c384 = arith.constant 384 : index
    %126 = vector.load %arg20[%c0_117, %c384] : memref<1x4096xf32, #tpu.memory_space<vmem>>, vector<1x64xf32>
    tpu.vector_store %arg20[%c0_117, %c384], %125 {strides = array<i32>} : memref<1x4096xf32, #tpu.memory_space<vmem>>, vector<1x64xf32>,
    %c7_118 = arith.constant 7 : index
    %c0_119 = arith.constant 0 : index
    %127 = vector.load %arg19[%c7_118, %c0_119] : memref<64x64xf32, #tpu.memory_space<vmem>>, vector<1x64xf32>
    %c0_120 = arith.constant 0 : index
    %c448 = arith.constant 448 : index
    %128 = vector.load %arg20[%c0_120, %c448] : memref<1x4096xf32, #tpu.memory_space<vmem>>, vector<1x64xf32>
    tpu.vector_store %arg20[%c0_120, %c448], %127 {strides = array<i32>} : memref<1x4096xf32, #tpu.memory_space<vmem>>, vector<1x64xf32>,
    %c8_121 = arith.constant 8 : index
    %c0_122 = arith.constant 0 : index
    %129 = vector.load %arg19[%c8_121, %c0_122] : memref<64x64xf32, #tpu.memory_space<vmem>>, vector<1x64xf32>
    %c0_123 = arith.constant 0 : index
    %c512 = arith.constant 512 : index
    %130 = vector.load %arg20[%c0_123, %c512] : memref<1x4096xf32, #tpu.memory_space<vmem>>, vector<1x64xf32>
    tpu.vector_store %arg20[%c0_123, %c512], %129 {strides = array<i32>} : memref<1x4096xf32, #tpu.memory_space<vmem>>, vector<1x64xf32>,
    %c9 = arith.constant 9 : index
    %c0_124 = arith.constant 0 : index
    %131 = vector.load %arg19[%c9, %c0_124] : memref<64x64xf32, #tpu.memory_space<vmem>>, vector<1x64xf32>
    %c0_125 = arith.constant 0 : index
    %c576 = arith.constant 576 : index
    %132 = vector.load %arg20[%c0_125, %c576] : memref<1x4096xf32, #tpu.memory_space<vmem>>, vector<1x64xf32>
    tpu.vector_store %arg20[%c0_125, %c576], %131 {strides = array<i32>} : memref<1x4096xf32, #tpu.memory_space<vmem>>, vector<1x64xf32>,
    %c10 = arith.constant 10 : index
    %c0_126 = arith.constant 0 : index
    %133 = vector.load %arg19[%c10, %c0_126] : memref<64x64xf32, #tpu.memory_space<vmem>>, vector<1x64xf32>
    %c0_127 = arith.constant 0 : index
    %c640 = arith.constant 640 : index
    %134 = vector.load %arg20[%c0_127, %c640] : memref<1x4096xf32, #tpu.memory_space<vmem>>, vector<1x64xf32>
    tpu.vector_store %arg20[%c0_127, %c640], %133 {strides = array<i32>} : memref<1x4096xf32, #tpu.memory_space<vmem>>, vector<1x64xf32>,
    %c11 = arith.constant 11 : index
    %c0_128 = arith.constant 0 : index
    %135 = vector.load %arg19[%c11, %c0_128] : memref<64x64xf32, #tpu.memory_space<vmem>>, vector<1x64xf32>
    %c0_129 = arith.constant 0 : index
    %c704 = arith.constant 704 : index
    %136 = vector.load %arg20[%c0_129, %c704] : memref<1x4096xf32, #tpu.memory_space<vmem>>, vector<1x64xf32>
    tpu.vector_store %arg20[%c0_129, %c704], %135 {strides = array<i32>} : memref<1x4096xf32, #tpu.memory_space<vmem>>, vector<1x64xf32>,
    %c12 = arith.constant 12 : index
    %c0_130 = arith.constant 0 : index
    %137 = vector.load %arg19[%c12, %c0_130] : memref<64x64xf32, #tpu.memory_space<vmem>>, vector<1x64xf32>
    %c0_131 = arith.constant 0 : index
    %c768 = arith.constant 768 : index
    %138 = vector.load %arg20[%c0_131, %c768] : memref<1x4096xf32, #tpu.memory_space<vmem>>, vector<1x64xf32>
    tpu.vector_store %arg20[%c0_131, %c768], %137 {strides = array<i32>} : memref<1x4096xf32, #tpu.memory_space<vmem>>, vector<1x64xf32>,
    %c13 = arith.constant 13 : index
    %c0_132 = arith.constant 0 : index
    %139 = vector.load %arg19[%c13, %c0_132] : memref<64x64xf32, #tpu.memory_space<vmem>>, vector<1x64xf32>
    %c0_133 = arith.constant 0 : index
    %c832 = arith.constant 832 : index
    %140 = vector.load %arg20[%c0_133, %c832] : memref<1x4096xf32, #tpu.memory_space<vmem>>, vector<1x64xf32>
    tpu.vector_store %arg20[%c0_133, %c832], %139 {strides = array<i32>} : memref<1x4096xf32, #tpu.memory_space<vmem>>, vector<1x64xf32>,
    %c14 = arith.constant 14 : index
    %c0_134 = arith.constant 0 : index
    %141 = vector.load %arg19[%c14, %c0_134] : memref<64x64xf32, #tpu.memory_space<vmem>>, vector<1x64xf32>
    %c0_135 = arith.constant 0 : index
    %c896 = arith.constant 896 : index
    %142 = vector.load %arg20[%c0_135, %c896] : memref<1x4096xf32, #tpu.memory_space<vmem>>, vector<1x64xf32>
    tpu.vector_store %arg20[%c0_135, %c896], %141 {strides = array<i32>} : memref<1x4096xf32, #tpu.memory_space<vmem>>, vector<1x64xf32>,
    %c15 = arith.constant 15 : index
    %c0_136 = arith.constant 0 : index
    %143 = vector.load %arg19[%c15, %c0_136] : memref<64x64xf32, #tpu.memory_space<vmem>>, vector<1x64xf32>
    %c0_137 = arith.constant 0 : index
    %c960 = arith.constant 960 : index
    %144 = vector.load %arg20[%c0_137, %c960] : memref<1x4096xf32, #tpu.memory_space<vmem>>, vector<1x64xf32>
    tpu.vector_store %arg20[%c0_137, %c960], %143 {strides = array<i32>} : memref<1x4096xf32, #tpu.memory_space<vmem>>, vector<1x64xf32>,
    %c16 = arith.constant 16 : index
    %c0_138 = arith.constant 0 : index
    %145 = vector.load %arg19[%c16, %c0_138] : memref<64x64xf32, #tpu.memory_space<vmem>>, vector<1x64xf32>
    %c0_139 = arith.constant 0 : index
    %c1024 = arith.constant 1024 : index
    %146 = vector.load %arg20[%c0_139, %c1024] : memref<1x4096xf32, #tpu.memory_space<vmem>>, vector<1x64xf32>
    tpu.vector_store %arg20[%c0_139, %c1024], %145 {strides = array<i32>} : memref<1x4096xf32, #tpu.memory_space<vmem>>, vector<1x64xf32>,
    %c17 = arith.constant 17 : index
    %c0_140 = arith.constant 0 : index
    %147 = vector.load %arg19[%c17, %c0_140] : memref<64x64xf32, #tpu.memory_space<vmem>>, vector<1x64xf32>
    %c0_141 = arith.constant 0 : index
    %c1088 = arith.constant 1088 : index
    %148 = vector.load %arg20[%c0_141, %c1088] : memref<1x4096xf32, #tpu.memory_space<vmem>>, vector<1x64xf32>
    tpu.vector_store %arg20[%c0_141, %c1088], %147 {strides = array<i32>} : memref<1x4096xf32, #tpu.memory_space<vmem>>, vector<1x64xf32>,
    %c18 = arith.constant 18 : index
    %c0_142 = arith.constant 0 : index
    %149 = vector.load %arg19[%c18, %c0_142] : memref<64x64xf32, #tpu.memory_space<vmem>>, vector<1x64xf32>
    %c0_143 = arith.constant 0 : index
    %c1152 = arith.constant 1152 : index
    %150 = vector.load %arg20[%c0_143, %c1152] : memref<1x4096xf32, #tpu.memory_space<vmem>>, vector<1x64xf32>
    tpu.vector_store %arg20[%c0_143, %c1152], %149 {strides = array<i32>} : memref<1x4096xf32, #tpu.memory_space<vmem>>, vector<1x64xf32>,
    %c19 = arith.constant 19 : index
    %c0_144 = arith.constant 0 : index
    %151 = vector.load %arg19[%c19, %c0_144] : memref<64x64xf32, #tpu.memory_space<vmem>>, vector<1x64xf32>
    %c0_145 = arith.constant 0 : index
    %c1216 = arith.constant 1216 : index
    %152 = vector.load %arg20[%c0_145, %c1216] : memref<1x4096xf32, #tpu.memory_space<vmem>>, vector<1x64xf32>
    tpu.vector_store %arg20[%c0_145, %c1216], %151 {strides = array<i32>} : memref<1x4096xf32, #tpu.memory_space<vmem>>, vector<1x64xf32>,
    %c20 = arith.constant 20 : index
    %c0_146 = arith.constant 0 : index
    %153 = vector.load %arg19[%c20, %c0_146] : memref<64x64xf32, #tpu.memory_space<vmem>>, vector<1x64xf32>
    %c0_147 = arith.constant 0 : index
    %c1280 = arith.constant 1280 : index
    %154 = vector.load %arg20[%c0_147, %c1280] : memref<1x4096xf32, #tpu.memory_space<vmem>>, vector<1x64xf32>
    tpu.vector_store %arg20[%c0_147, %c1280], %153 {strides = array<i32>} : memref<1x4096xf32, #tpu.memory_space<vmem>>, vector<1x64xf32>,
    %c21 = arith.constant 21 : index
    %c0_148 = arith.constant 0 : index
    %155 = vector.load %arg19[%c21, %c0_148] : memref<64x64xf32, #tpu.memory_space<vmem>>, vector<1x64xf32>
    %c0_149 = arith.constant 0 : index
    %c1344 = arith.constant 1344 : index
    %156 = vector.load %arg20[%c0_149, %c1344] : memref<1x4096xf32, #tpu.memory_space<vmem>>, vector<1x64xf32>
    tpu.vector_store %arg20[%c0_149, %c1344], %155 {strides = array<i32>} : memref<1x4096xf32, #tpu.memory_space<vmem>>, vector<1x64xf32>,
    %c22 = arith.constant 22 : index
    %c0_150 = arith.constant 0 : index
    %157 = vector.load %arg19[%c22, %c0_150] : memref<64x64xf32, #tpu.memory_space<vmem>>, vector<1x64xf32>
    %c0_151 = arith.constant 0 : index
    %c1408 = arith.constant 1408 : index
    %158 = vector.load %arg20[%c0_151, %c1408] : memref<1x4096xf32, #tpu.memory_space<vmem>>, vector<1x64xf32>
    tpu.vector_store %arg20[%c0_151, %c1408], %157 {strides = array<i32>} : memref<1x4096xf32, #tpu.memory_space<vmem>>, vector<1x64xf32>,
    %c23 = arith.constant 23 : index
    %c0_152 = arith.constant 0 : index
    %159 = vector.load %arg19[%c23, %c0_152] : memref<64x64xf32, #tpu.memory_space<vmem>>, vector<1x64xf32>
    %c0_153 = arith.constant 0 : index
    %c1472 = arith.constant 1472 : index
    %160 = vector.load %arg20[%c0_153, %c1472] : memref<1x4096xf32, #tpu.memory_space<vmem>>, vector<1x64xf32>
    tpu.vector_store %arg20[%c0_153, %c1472], %159 {strides = array<i32>} : memref<1x4096xf32, #tpu.memory_space<vmem>>, vector<1x64xf32>,
    %c24 = arith.constant 24 : index
    %c0_154 = arith.constant 0 : index
    %161 = vector.load %arg19[%c24, %c0_154] : memref<64x64xf32, #tpu.memory_space<vmem>>, vector<1x64xf32>
    %c0_155 = arith.constant 0 : index
    %c1536 = arith.constant 1536 : index
    %162 = vector.load %arg20[%c0_155, %c1536] : memref<1x4096xf32, #tpu.memory_space<vmem>>, vector<1x64xf32>
    tpu.vector_store %arg20[%c0_155, %c1536], %161 {strides = array<i32>} : memref<1x4096xf32, #tpu.memory_space<vmem>>, vector<1x64xf32>,
    %c25 = arith.constant 25 : index
    %c0_156 = arith.constant 0 : index
    %163 = vector.load %arg19[%c25, %c0_156] : memref<64x64xf32, #tpu.memory_space<vmem>>, vector<1x64xf32>
    %c0_157 = arith.constant 0 : index
    %c1600 = arith.constant 1600 : index
    %164 = vector.load %arg20[%c0_157, %c1600] : memref<1x4096xf32, #tpu.memory_space<vmem>>, vector<1x64xf32>
    tpu.vector_store %arg20[%c0_157, %c1600], %163 {strides = array<i32>} : memref<1x4096xf32, #tpu.memory_space<vmem>>, vector<1x64xf32>,
    %c26 = arith.constant 26 : index
    %c0_158 = arith.constant 0 : index
    %165 = vector.load %arg19[%c26, %c0_158] : memref<64x64xf32, #tpu.memory_space<vmem>>, vector<1x64xf32>
    %c0_159 = arith.constant 0 : index
    %c1664 = arith.constant 1664 : index
    %166 = vector.load %arg20[%c0_159, %c1664] : memref<1x4096xf32, #tpu.memory_space<vmem>>, vector<1x64xf32>
    tpu.vector_store %arg20[%c0_159, %c1664], %165 {strides = array<i32>} : memref<1x4096xf32, #tpu.memory_space<vmem>>, vector<1x64xf32>,
    %c27 = arith.constant 27 : index
    %c0_160 = arith.constant 0 : index
    %167 = vector.load %arg19[%c27, %c0_160] : memref<64x64xf32, #tpu.memory_space<vmem>>, vector<1x64xf32>
    %c0_161 = arith.constant 0 : index
    %c1728 = arith.constant 1728 : index
    %168 = vector.load %arg20[%c0_161, %c1728] : memref<1x4096xf32, #tpu.memory_space<vmem>>, vector<1x64xf32>
    tpu.vector_store %arg20[%c0_161, %c1728], %167 {strides = array<i32>} : memref<1x4096xf32, #tpu.memory_space<vmem>>, vector<1x64xf32>,
    %c28 = arith.constant 28 : index
    %c0_162 = arith.constant 0 : index
    %169 = vector.load %arg19[%c28, %c0_162] : memref<64x64xf32, #tpu.memory_space<vmem>>, vector<1x64xf32>
    %c0_163 = arith.constant 0 : index
    %c1792 = arith.constant 1792 : index
    %170 = vector.load %arg20[%c0_163, %c1792] : memref<1x4096xf32, #tpu.memory_space<vmem>>, vector<1x64xf32>
    tpu.vector_store %arg20[%c0_163, %c1792], %169 {strides = array<i32>} : memref<1x4096xf32, #tpu.memory_space<vmem>>, vector<1x64xf32>,
    %c29 = arith.constant 29 : index
    %c0_164 = arith.constant 0 : index
    %171 = vector.load %arg19[%c29, %c0_164] : memref<64x64xf32, #tpu.memory_space<vmem>>, vector<1x64xf32>
    %c0_165 = arith.constant 0 : index
    %c1856 = arith.constant 1856 : index
    %172 = vector.load %arg20[%c0_165, %c1856] : memref<1x4096xf32, #tpu.memory_space<vmem>>, vector<1x64xf32>
    tpu.vector_store %arg20[%c0_165, %c1856], %171 {strides = array<i32>} : memref<1x4096xf32, #tpu.memory_space<vmem>>, vector<1x64xf32>,
    %c30 = arith.constant 30 : index
    %c0_166 = arith.constant 0 : index
    %173 = vector.load %arg19[%c30, %c0_166] : memref<64x64xf32, #tpu.memory_space<vmem>>, vector<1x64xf32>
    %c0_167 = arith.constant 0 : index
    %c1920 = arith.constant 1920 : index
    %174 = vector.load %arg20[%c0_167, %c1920] : memref<1x4096xf32, #tpu.memory_space<vmem>>, vector<1x64xf32>
    tpu.vector_store %arg20[%c0_167, %c1920], %173 {strides = array<i32>} : memref<1x4096xf32, #tpu.memory_space<vmem>>, vector<1x64xf32>,
    %c31 = arith.constant 31 : index
    %c0_168 = arith.constant 0 : index
    %175 = vector.load %arg19[%c31, %c0_168] : memref<64x64xf32, #tpu.memory_space<vmem>>, vector<1x64xf32>
    %c0_169 = arith.constant 0 : index
    %c1984 = arith.constant 1984 : index
    %176 = vector.load %arg20[%c0_169, %c1984] : memref<1x4096xf32, #tpu.memory_space<vmem>>, vector<1x64xf32>
    tpu.vector_store %arg20[%c0_169, %c1984], %175 {strides = array<i32>} : memref<1x4096xf32, #tpu.memory_space<vmem>>, vector<1x64xf32>,
    %c32 = arith.constant 32 : index
    %c0_170 = arith.constant 0 : index
    %177 = vector.load %arg19[%c32, %c0_170] : memref<64x64xf32, #tpu.memory_space<vmem>>, vector<1x64xf32>
    %c0_171 = arith.constant 0 : index
    %c2048 = arith.constant 2048 : index
    %178 = vector.load %arg20[%c0_171, %c2048] : memref<1x4096xf32, #tpu.memory_space<vmem>>, vector<1x64xf32>
    tpu.vector_store %arg20[%c0_171, %c2048], %177 {strides = array<i32>} : memref<1x4096xf32, #tpu.memory_space<vmem>>, vector<1x64xf32>,
    %c33 = arith.constant 33 : index
    %c0_172 = arith.constant 0 : index
    %179 = vector.load %arg19[%c33, %c0_172] : memref<64x64xf32, #tpu.memory_space<vmem>>, vector<1x64xf32>
    %c0_173 = arith.constant 0 : index
    %c2112 = arith.constant 2112 : index
    %180 = vector.load %arg20[%c0_173, %c2112] : memref<1x4096xf32, #tpu.memory_space<vmem>>, vector<1x64xf32>
    tpu.vector_store %arg20[%c0_173, %c2112], %179 {strides = array<i32>} : memref<1x4096xf32, #tpu.memory_space<vmem>>, vector<1x64xf32>,
    %c34 = arith.constant 34 : index
    %c0_174 = arith.constant 0 : index
    %181 = vector.load %arg19[%c34, %c0_174] : memref<64x64xf32, #tpu.memory_space<vmem>>, vector<1x64xf32>
    %c0_175 = arith.constant 0 : index
    %c2176 = arith.constant 2176 : index
    %182 = vector.load %arg20[%c0_175, %c2176] : memref<1x4096xf32, #tpu.memory_space<vmem>>, vector<1x64xf32>
    tpu.vector_store %arg20[%c0_175, %c2176], %181 {strides = array<i32>} : memref<1x4096xf32, #tpu.memory_space<vmem>>, vector<1x64xf32>,
    %c35 = arith.constant 35 : index
    %c0_176 = arith.constant 0 : index
    %183 = vector.load %arg19[%c35, %c0_176] : memref<64x64xf32, #tpu.memory_space<vmem>>, vector<1x64xf32>
    %c0_177 = arith.constant 0 : index
    %c2240 = arith.constant 2240 : index
    %184 = vector.load %arg20[%c0_177, %c2240] : memref<1x4096xf32, #tpu.memory_space<vmem>>, vector<1x64xf32>
    tpu.vector_store %arg20[%c0_177, %c2240], %183 {strides = array<i32>} : memref<1x4096xf32, #tpu.memory_space<vmem>>, vector<1x64xf32>,
    %c36 = arith.constant 36 : index
    %c0_178 = arith.constant 0 : index
    %185 = vector.load %arg19[%c36, %c0_178] : memref<64x64xf32, #tpu.memory_space<vmem>>, vector<1x64xf32>
    %c0_179 = arith.constant 0 : index
    %c2304 = arith.constant 2304 : index
    %186 = vector.load %arg20[%c0_179, %c2304] : memref<1x4096xf32, #tpu.memory_space<vmem>>, vector<1x64xf32>
    tpu.vector_store %arg20[%c0_179, %c2304], %185 {strides = array<i32>} : memref<1x4096xf32, #tpu.memory_space<vmem>>, vector<1x64xf32>,
    %c37 = arith.constant 37 : index
    %c0_180 = arith.constant 0 : index
    %187 = vector.load %arg19[%c37, %c0_180] : memref<64x64xf32, #tpu.memory_space<vmem>>, vector<1x64xf32>
    %c0_181 = arith.constant 0 : index
    %c2368 = arith.constant 2368 : index
    %188 = vector.load %arg20[%c0_181, %c2368] : memref<1x4096xf32, #tpu.memory_space<vmem>>, vector<1x64xf32>
    tpu.vector_store %arg20[%c0_181, %c2368], %187 {strides = array<i32>} : memref<1x4096xf32, #tpu.memory_space<vmem>>, vector<1x64xf32>,
    %c38 = arith.constant 38 : index
    %c0_182 = arith.constant 0 : index
    %189 = vector.load %arg19[%c38, %c0_182] : memref<64x64xf32, #tpu.memory_space<vmem>>, vector<1x64xf32>
    %c0_183 = arith.constant 0 : index
    %c2432 = arith.constant 2432 : index
    %190 = vector.load %arg20[%c0_183, %c2432] : memref<1x4096xf32, #tpu.memory_space<vmem>>, vector<1x64xf32>
    tpu.vector_store %arg20[%c0_183, %c2432], %189 {strides = array<i32>} : memref<1x4096xf32, #tpu.memory_space<vmem>>, vector<1x64xf32>,
    %c39 = arith.constant 39 : index
    %c0_184 = arith.constant 0 : index
    %191 = vector.load %arg19[%c39, %c0_184] : memref<64x64xf32, #tpu.memory_space<vmem>>, vector<1x64xf32>
    %c0_185 = arith.constant 0 : index
    %c2496 = arith.constant 2496 : index
    %192 = vector.load %arg20[%c0_185, %c2496] : memref<1x4096xf32, #tpu.memory_space<vmem>>, vector<1x64xf32>
    tpu.vector_store %arg20[%c0_185, %c2496], %191 {strides = array<i32>} : memref<1x4096xf32, #tpu.memory_space<vmem>>, vector<1x64xf32>,
    %c40 = arith.constant 40 : index
    %c0_186 = arith.constant 0 : index
    %193 = vector.load %arg19[%c40, %c0_186] : memref<64x64xf32, #tpu.memory_space<vmem>>, vector<1x64xf32>
    %c0_187 = arith.constant 0 : index
    %c2560 = arith.constant 2560 : index
    %194 = vector.load %arg20[%c0_187, %c2560] : memref<1x4096xf32, #tpu.memory_space<vmem>>, vector<1x64xf32>
    tpu.vector_store %arg20[%c0_187, %c2560], %193 {strides = array<i32>} : memref<1x4096xf32, #tpu.memory_space<vmem>>, vector<1x64xf32>,
    %c41 = arith.constant 41 : index
    %c0_188 = arith.constant 0 : index
    %195 = vector.load %arg19[%c41, %c0_188] : memref<64x64xf32, #tpu.memory_space<vmem>>, vector<1x64xf32>
    %c0_189 = arith.constant 0 : index
    %c2624 = arith.constant 2624 : index
    %196 = vector.load %arg20[%c0_189, %c2624] : memref<1x4096xf32, #tpu.memory_space<vmem>>, vector<1x64xf32>
    tpu.vector_store %arg20[%c0_189, %c2624], %195 {strides = array<i32>} : memref<1x4096xf32, #tpu.memory_space<vmem>>, vector<1x64xf32>,
    %c42 = arith.constant 42 : index
    %c0_190 = arith.constant 0 : index
    %197 = vector.load %arg19[%c42, %c0_190] : memref<64x64xf32, #tpu.memory_space<vmem>>, vector<1x64xf32>
    %c0_191 = arith.constant 0 : index
    %c2688 = arith.constant 2688 : index
    %198 = vector.load %arg20[%c0_191, %c2688] : memref<1x4096xf32, #tpu.memory_space<vmem>>, vector<1x64xf32>
    tpu.vector_store %arg20[%c0_191, %c2688], %197 {strides = array<i32>} : memref<1x4096xf32, #tpu.memory_space<vmem>>, vector<1x64xf32>,
    %c43 = arith.constant 43 : index
    %c0_192 = arith.constant 0 : index
    %199 = vector.load %arg19[%c43, %c0_192] : memref<64x64xf32, #tpu.memory_space<vmem>>, vector<1x64xf32>
    %c0_193 = arith.constant 0 : index
    %c2752 = arith.constant 2752 : index
    %200 = vector.load %arg20[%c0_193, %c2752] : memref<1x4096xf32, #tpu.memory_space<vmem>>, vector<1x64xf32>
    tpu.vector_store %arg20[%c0_193, %c2752], %199 {strides = array<i32>} : memref<1x4096xf32, #tpu.memory_space<vmem>>, vector<1x64xf32>,
    %c44 = arith.constant 44 : index
    %c0_194 = arith.constant 0 : index
    %201 = vector.load %arg19[%c44, %c0_194] : memref<64x64xf32, #tpu.memory_space<vmem>>, vector<1x64xf32>
    %c0_195 = arith.constant 0 : index
    %c2816 = arith.constant 2816 : index
    %202 = vector.load %arg20[%c0_195, %c2816] : memref<1x4096xf32, #tpu.memory_space<vmem>>, vector<1x64xf32>
    tpu.vector_store %arg20[%c0_195, %c2816], %201 {strides = array<i32>} : memref<1x4096xf32, #tpu.memory_space<vmem>>, vector<1x64xf32>,
    %c45 = arith.constant 45 : index
    %c0_196 = arith.constant 0 : index
    %203 = vector.load %arg19[%c45, %c0_196] : memref<64x64xf32, #tpu.memory_space<vmem>>, vector<1x64xf32>
    %c0_197 = arith.constant 0 : index
    %c2880 = arith.constant 2880 : index
    %204 = vector.load %arg20[%c0_197, %c2880] : memref<1x4096xf32, #tpu.memory_space<vmem>>, vector<1x64xf32>
    tpu.vector_store %arg20[%c0_197, %c2880], %203 {strides = array<i32>} : memref<1x4096xf32, #tpu.memory_space<vmem>>, vector<1x64xf32>,
    %c46 = arith.constant 46 : index
    %c0_198 = arith.constant 0 : index
    %205 = vector.load %arg19[%c46, %c0_198] : memref<64x64xf32, #tpu.memory_space<vmem>>, vector<1x64xf32>
    %c0_199 = arith.constant 0 : index
    %c2944 = arith.constant 2944 : index
    %206 = vector.load %arg20[%c0_199, %c2944] : memref<1x4096xf32, #tpu.memory_space<vmem>>, vector<1x64xf32>
    tpu.vector_store %arg20[%c0_199, %c2944], %205 {strides = array<i32>} : memref<1x4096xf32, #tpu.memory_space<vmem>>, vector<1x64xf32>,
    %c47 = arith.constant 47 : index
    %c0_200 = arith.constant 0 : index
    %207 = vector.load %arg19[%c47, %c0_200] : memref<64x64xf32, #tpu.memory_space<vmem>>, vector<1x64xf32>
    %c0_201 = arith.constant 0 : index
    %c3008 = arith.constant 3008 : index
    %208 = vector.load %arg20[%c0_201, %c3008] : memref<1x4096xf32, #tpu.memory_space<vmem>>, vector<1x64xf32>
    tpu.vector_store %arg20[%c0_201, %c3008], %207 {strides = array<i32>} : memref<1x4096xf32, #tpu.memory_space<vmem>>, vector<1x64xf32>,
    %c48 = arith.constant 48 : index
    %c0_202 = arith.constant 0 : index
    %209 = vector.load %arg19[%c48, %c0_202] : memref<64x64xf32, #tpu.memory_space<vmem>>, vector<1x64xf32>
    %c0_203 = arith.constant 0 : index
    %c3072 = arith.constant 3072 : index
    %210 = vector.load %arg20[%c0_203, %c3072] : memref<1x4096xf32, #tpu.memory_space<vmem>>, vector<1x64xf32>
    tpu.vector_store %arg20[%c0_203, %c3072], %209 {strides = array<i32>} : memref<1x4096xf32, #tpu.memory_space<vmem>>, vector<1x64xf32>,
    %c49 = arith.constant 49 : index
    %c0_204 = arith.constant 0 : index
    %211 = vector.load %arg19[%c49, %c0_204] : memref<64x64xf32, #tpu.memory_space<vmem>>, vector<1x64xf32>
    %c0_205 = arith.constant 0 : index
    %c3136 = arith.constant 3136 : index
    %212 = vector.load %arg20[%c0_205, %c3136] : memref<1x4096xf32, #tpu.memory_space<vmem>>, vector<1x64xf32>
    tpu.vector_store %arg20[%c0_205, %c3136], %211 {strides = array<i32>} : memref<1x4096xf32, #tpu.memory_space<vmem>>, vector<1x64xf32>,
    %c50 = arith.constant 50 : index
    %c0_206 = arith.constant 0 : index
    %213 = vector.load %arg19[%c50, %c0_206] : memref<64x64xf32, #tpu.memory_space<vmem>>, vector<1x64xf32>
    %c0_207 = arith.constant 0 : index
    %c3200 = arith.constant 3200 : index
    %214 = vector.load %arg20[%c0_207, %c3200] : memref<1x4096xf32, #tpu.memory_space<vmem>>, vector<1x64xf32>
    tpu.vector_store %arg20[%c0_207, %c3200], %213 {strides = array<i32>} : memref<1x4096xf32, #tpu.memory_space<vmem>>, vector<1x64xf32>,
    %c51 = arith.constant 51 : index
    %c0_208 = arith.constant 0 : index
    %215 = vector.load %arg19[%c51, %c0_208] : memref<64x64xf32, #tpu.memory_space<vmem>>, vector<1x64xf32>
    %c0_209 = arith.constant 0 : index
    %c3264 = arith.constant 3264 : index
    %216 = vector.load %arg20[%c0_209, %c3264] : memref<1x4096xf32, #tpu.memory_space<vmem>>, vector<1x64xf32>
    tpu.vector_store %arg20[%c0_209, %c3264], %215 {strides = array<i32>} : memref<1x4096xf32, #tpu.memory_space<vmem>>, vector<1x64xf32>,
    %c52 = arith.constant 52 : index
    %c0_210 = arith.constant 0 : index
    %217 = vector.load %arg19[%c52, %c0_210] : memref<64x64xf32, #tpu.memory_space<vmem>>, vector<1x64xf32>
    %c0_211 = arith.constant 0 : index
    %c3328 = arith.constant 3328 : index
    %218 = vector.load %arg20[%c0_211, %c3328] : memref<1x4096xf32, #tpu.memory_space<vmem>>, vector<1x64xf32>
    tpu.vector_store %arg20[%c0_211, %c3328], %217 {strides = array<i32>} : memref<1x4096xf32, #tpu.memory_space<vmem>>, vector<1x64xf32>,
    %c53 = arith.constant 53 : index
    %c0_212 = arith.constant 0 : index
    %219 = vector.load %arg19[%c53, %c0_212] : memref<64x64xf32, #tpu.memory_space<vmem>>, vector<1x64xf32>
    %c0_213 = arith.constant 0 : index
    %c3392 = arith.constant 3392 : index
    %220 = vector.load %arg20[%c0_213, %c3392] : memref<1x4096xf32, #tpu.memory_space<vmem>>, vector<1x64xf32>
    tpu.vector_store %arg20[%c0_213, %c3392], %219 {strides = array<i32>} : memref<1x4096xf32, #tpu.memory_space<vmem>>, vector<1x64xf32>,
    %c54 = arith.constant 54 : index
    %c0_214 = arith.constant 0 : index
    %221 = vector.load %arg19[%c54, %c0_214] : memref<64x64xf32, #tpu.memory_space<vmem>>, vector<1x64xf32>
    %c0_215 = arith.constant 0 : index
    %c3456 = arith.constant 3456 : index
    %222 = vector.load %arg20[%c0_215, %c3456] : memref<1x4096xf32, #tpu.memory_space<vmem>>, vector<1x64xf32>
    tpu.vector_store %arg20[%c0_215, %c3456], %221 {strides = array<i32>} : memref<1x4096xf32, #tpu.memory_space<vmem>>, vector<1x64xf32>,
    %c55 = arith.constant 55 : index
    %c0_216 = arith.constant 0 : index
    %223 = vector.load %arg19[%c55, %c0_216] : memref<64x64xf32, #tpu.memory_space<vmem>>, vector<1x64xf32>
    %c0_217 = arith.constant 0 : index
    %c3520 = arith.constant 3520 : index
    %224 = vector.load %arg20[%c0_217, %c3520] : memref<1x4096xf32, #tpu.memory_space<vmem>>, vector<1x64xf32>
    tpu.vector_store %arg20[%c0_217, %c3520], %223 {strides = array<i32>} : memref<1x4096xf32, #tpu.memory_space<vmem>>, vector<1x64xf32>,
    %c56 = arith.constant 56 : index
    %c0_218 = arith.constant 0 : index
    %225 = vector.load %arg19[%c56, %c0_218] : memref<64x64xf32, #tpu.memory_space<vmem>>, vector<1x64xf32>
    %c0_219 = arith.constant 0 : index
    %c3584 = arith.constant 3584 : index
    %226 = vector.load %arg20[%c0_219, %c3584] : memref<1x4096xf32, #tpu.memory_space<vmem>>, vector<1x64xf32>
    tpu.vector_store %arg20[%c0_219, %c3584], %225 {strides = array<i32>} : memref<1x4096xf32, #tpu.memory_space<vmem>>, vector<1x64xf32>,
    %c57 = arith.constant 57 : index
    %c0_220 = arith.constant 0 : index
    %227 = vector.load %arg19[%c57, %c0_220] : memref<64x64xf32, #tpu.memory_space<vmem>>, vector<1x64xf32>
    %c0_221 = arith.constant 0 : index
    %c3648 = arith.constant 3648 : index
    %228 = vector.load %arg20[%c0_221, %c3648] : memref<1x4096xf32, #tpu.memory_space<vmem>>, vector<1x64xf32>
    tpu.vector_store %arg20[%c0_221, %c3648], %227 {strides = array<i32>} : memref<1x4096xf32, #tpu.memory_space<vmem>>, vector<1x64xf32>,
    %c58 = arith.constant 58 : index
    %c0_222 = arith.constant 0 : index
    %229 = vector.load %arg19[%c58, %c0_222] : memref<64x64xf32, #tpu.memory_space<vmem>>, vector<1x64xf32>
    %c0_223 = arith.constant 0 : index
    %c3712 = arith.constant 3712 : index
    %230 = vector.load %arg20[%c0_223, %c3712] : memref<1x4096xf32, #tpu.memory_space<vmem>>, vector<1x64xf32>
    tpu.vector_store %arg20[%c0_223, %c3712], %229 {strides = array<i32>} : memref<1x4096xf32, #tpu.memory_space<vmem>>, vector<1x64xf32>,
    %c59 = arith.constant 59 : index
    %c0_224 = arith.constant 0 : index
    %231 = vector.load %arg19[%c59, %c0_224] : memref<64x64xf32, #tpu.memory_space<vmem>>, vector<1x64xf32>
    %c0_225 = arith.constant 0 : index
    %c3776 = arith.constant 3776 : index
    %232 = vector.load %arg20[%c0_225, %c3776] : memref<1x4096xf32, #tpu.memory_space<vmem>>, vector<1x64xf32>
    tpu.vector_store %arg20[%c0_225, %c3776], %231 {strides = array<i32>} : memref<1x4096xf32, #tpu.memory_space<vmem>>, vector<1x64xf32>,
    %c60 = arith.constant 60 : index
    %c0_226 = arith.constant 0 : index
    %233 = vector.load %arg19[%c60, %c0_226] : memref<64x64xf32, #tpu.memory_space<vmem>>, vector<1x64xf32>
    %c0_227 = arith.constant 0 : index
    %c3840 = arith.constant 3840 : index
    %234 = vector.load %arg20[%c0_227, %c3840] : memref<1x4096xf32, #tpu.memory_space<vmem>>, vector<1x64xf32>
    tpu.vector_store %arg20[%c0_227, %c3840], %233 {strides = array<i32>} : memref<1x4096xf32, #tpu.memory_space<vmem>>, vector<1x64xf32>,
    %c61 = arith.constant 61 : index
    %c0_228 = arith.constant 0 : index
    %235 = vector.load %arg19[%c61, %c0_228] : memref<64x64xf32, #tpu.memory_space<vmem>>, vector<1x64xf32>
    %c0_229 = arith.constant 0 : index
    %c3904 = arith.constant 3904 : index
    %236 = vector.load %arg20[%c0_229, %c3904] : memref<1x4096xf32, #tpu.memory_space<vmem>>, vector<1x64xf32>
    tpu.vector_store %arg20[%c0_229, %c3904], %235 {strides = array<i32>} : memref<1x4096xf32, #tpu.memory_space<vmem>>, vector<1x64xf32>,
    %c62 = arith.constant 62 : index
    %c0_230 = arith.constant 0 : index
    %237 = vector.load %arg19[%c62, %c0_230] : memref<64x64xf32, #tpu.memory_space<vmem>>, vector<1x64xf32>
    %c0_231 = arith.constant 0 : index
    %c3968 = arith.constant 3968 : index
    %238 = vector.load %arg20[%c0_231, %c3968] : memref<1x4096xf32, #tpu.memory_space<vmem>>, vector<1x64xf32>
    tpu.vector_store %arg20[%c0_231, %c3968], %237 {strides = array<i32>} : memref<1x4096xf32, #tpu.memory_space<vmem>>, vector<1x64xf32>,
    %c63 = arith.constant 63 : index
    %c0_232 = arith.constant 0 : index
    %239 = vector.load %arg19[%c63, %c0_232] : memref<64x64xf32, #tpu.memory_space<vmem>>, vector<1x64xf32>
    %c0_233 = arith.constant 0 : index
    %c4032 = arith.constant 4032 : index
    %240 = vector.load %arg20[%c0_233, %c4032] : memref<1x4096xf32, #tpu.memory_space<vmem>>, vector<1x64xf32>
    tpu.vector_store %arg20[%c0_233, %c4032], %239 {strides = array<i32>} : memref<1x4096xf32, #tpu.memory_space<vmem>>, vector<1x64xf32>,
    %c0_234 = arith.constant 0 : index
    %c0_235 = arith.constant 0 : index
    %241 = vector.load %arg20[%c0_234, %c0_235] : memref<1x4096xf32, #tpu.memory_space<vmem>>, vector<1x4096xf32>
    %242 = arith.truncf %241 : vector<1x4096xf32> to vector<1x4096xbf16>
    %c0_236 = arith.constant 0 : index
    %c0_237 = arith.constant 0 : index
    %243 = vector.load %arg6[%c0_236, %c0_237] : memref<4096x256xbf16, #tpu.memory_space<vmem>>, vector<4096x256xbf16>
    %cst_238 = arith.constant dense<0.000000e+00> : vector<1x256xf32>
    %244 = tpu.matmul %242, %243, %cst_238 {dimension_numbers = #tpu.dot_dimension_numbers<[1], [0], [0], [1], [0, 0, 1, 1], [], []>} : vector<1x4096xbf16>, vector<4096x256xbf16>, vector<1x256xf32> -> vector<1x256xf32>
    %c0_239 = arith.constant 0 : index
    %c0_240 = arith.constant 0 : index
    %245 = vector.load %arg7[%c0_239, %c0_240] : memref<1x256xf32, #tpu.memory_space<vmem>>, vector<1x256xf32>
    %246 = arith.addf %244, %245 : vector<1x256xf32>
    %247 = vector.extract_strided_slice %246 {offsets = [0, 0], sizes = [1, 128], strides = [1, 1]} : vector<1x256xf32> to vector<1x128xf32>
    %248 = vector.extract_strided_slice %246 {offsets = [0, 128], sizes = [1, 128], strides = [1, 1]} : vector<1x256xf32> to vector<1x128xf32>
    %c0_241 = arith.constant 0 : index
    %c0_242 = arith.constant 0 : index
    %c0_243 = arith.constant 0 : index
    %249 = vector.load %arg15[%c0_241, %c0_242, %c0_243] : memref<1x1x128xf32, #tpu.memory_space<vmem>>, vector<1x1x128xf32>
    %250 = vector.shape_cast %249 : vector<1x1x128xf32> to vector<1x128xf32>
    %251 = vector.shape_cast %247 : vector<1x128xf32> to vector<1x1x128xf32>
    tpu.vector_store %arg15[%c0_241, %c0_242, %c0_243], %251 {strides = array<i32>} : memref<1x1x128xf32, #tpu.memory_space<vmem>>, vector<1x1x128xf32>,
    %c0_244 = arith.constant 0 : index
    %c0_245 = arith.constant 0 : index
    %c0_246 = arith.constant 0 : index
    %252 = vector.load %arg16[%c0_244, %c0_245, %c0_246] : memref<1x1x128xf32, #tpu.memory_space<vmem>>, vector<1x1x128xf32>
    %253 = vector.shape_cast %252 : vector<1x1x128xf32> to vector<1x128xf32>
    %254 = vector.shape_cast %248 : vector<1x128xf32> to vector<1x1x128xf32>
    tpu.vector_store %arg16[%c0_244, %c0_245, %c0_246], %254 {strides = array<i32>} : memref<1x1x128xf32, #tpu.memory_space<vmem>>, vector<1x1x128xf32>,
    %c0_247 = arith.constant 0 : index
    %c0_248 = arith.constant 0 : index
    %c0_249 = arith.constant 0 : index
    %255 = vector.load %arg8[%c0_247, %c0_248, %c0_249] : memref<1x1x128xf32, #tpu.memory_space<vmem>>, vector<1x1x128xf32>
    %256 = vector.shape_cast %255 : vector<1x1x128xf32> to vector<1x128xf32>
    %cst_250 = arith.constant 5.000000e-01 : f32
    %257 = vector.broadcast %cst_250 : f32 to vector<1x128xf32>
    %258 = arith.mulf %257, %248 : vector<1x128xf32>
    %259 = math.exp %258 : vector<1x128xf32>
    %260 = arith.mulf %256, %259 : vector<1x128xf32>
    %261 = arith.addf %247, %260 : vector<1x128xf32>
    %262 = arith.truncf %261 : vector<1x128xf32> to vector<1x128xbf16>
    %c0_251 = arith.constant 0 : index
    %c0_252 = arith.constant 0 : index
    %263 = vector.load %arg9[%c0_251, %c0_252] : memref<128x4096xbf16, #tpu.memory_space<vmem>>, vector<128x4096xbf16>
    %cst_253 = arith.constant dense<0.000000e+00> : vector<1x4096xf32>
    %264 = tpu.matmul %262, %263, %cst_253 {dimension_numbers = #tpu.dot_dimension_numbers<[1], [0], [0], [1], [0, 0, 1, 1], [], []>} : vector<1x128xbf16>, vector<128x4096xbf16>, vector<1x4096xf32> -> vector<1x4096xf32>
    %c0_254 = arith.constant 0 : index
    %c0_255 = arith.constant 0 : index
    %265 = vector.load %arg10[%c0_254, %c0_255] : memref<1x4096xf32, #tpu.memory_space<vmem>>, vector<1x4096xf32>
    %266 = arith.addf %264, %265 : vector<1x4096xf32>
    %c0_256 = arith.constant 0 : index
    %c0_257 = arith.constant 0 : index
    %267 = vector.load %arg21[%c0_256, %c0_257] : memref<1x4096xf32, #tpu.memory_space<vmem>>, vector<1x4096xf32>
    tpu.vector_store %arg21[%c0_256, %c0_257], %266 {strides = array<i32>} : memref<1x4096xf32, #tpu.memory_space<vmem>>, vector<1x4096xf32>,
    %cst_258 = arith.constant 0.000000e+00 : f32
    %268 = vector.broadcast %cst_258 : f32 to vector<10x10x64xf32>
    %c0_259 = arith.constant 0 : index
    %c0_260 = arith.constant 0 : index
    %c0_261 = arith.constant 0 : index
    %269 = vector.load %arg22[%c0_259, %c0_260, %c0_261] : memref<10x10x64xf32, #tpu.memory_space<vmem>>, vector<10x10x64xf32>
    tpu.vector_store %arg22[%c0_259, %c0_260, %c0_261], %268 {strides = array<i32>} : memref<10x10x64xf32, #tpu.memory_space<vmem>>, vector<10x10x64xf32>,
    %c0_262 = arith.constant 0 : index
    %c0_263 = arith.constant 0 : index
    %270 = vector.load %arg21[%c0_262, %c0_263] : memref<1x4096xf32, #tpu.memory_space<vmem>>, vector<1x64xf32>
    %c1_264 = arith.constant 1 : index
    %c1_265 = arith.constant 1 : index
    %c0_266 = arith.constant 0 : index
    %271 = vector.load %arg22[%c1_264, %c1_265, %c0_266] : memref<10x10x64xf32, #tpu.memory_space<vmem>>, vector<1x1x64xf32>
    %272 = vector.shape_cast %271 : vector<1x1x64xf32> to vector<1x64xf32>
    %273 = vector.shape_cast %270 : vector<1x64xf32> to vector<1x1x64xf32>
    tpu.vector_store %arg22[%c1_264, %c1_265, %c0_266], %273 {strides = array<i32>} : memref<10x10x64xf32, #tpu.memory_space<vmem>>, vector<1x1x64xf32>,
    %c0_267 = arith.constant 0 : index
    %c64_268 = arith.constant 64 : index
    %274 = vector.load %arg21[%c0_267, %c64_268] : memref<1x4096xf32, #tpu.memory_space<vmem>>, vector<1x64xf32>
    %c1_269 = arith.constant 1 : index
    %c2_270 = arith.constant 2 : index
    %c0_271 = arith.constant 0 : index
    %275 = vector.load %arg22[%c1_269, %c2_270, %c0_271] : memref<10x10x64xf32, #tpu.memory_space<vmem>>, vector<1x1x64xf32>
    %276 = vector.shape_cast %275 : vector<1x1x64xf32> to vector<1x64xf32>
    %277 = vector.shape_cast %274 : vector<1x64xf32> to vector<1x1x64xf32>
    tpu.vector_store %arg22[%c1_269, %c2_270, %c0_271], %277 {strides = array<i32>} : memref<10x10x64xf32, #tpu.memory_space<vmem>>, vector<1x1x64xf32>,
    %c0_272 = arith.constant 0 : index
    %c128_273 = arith.constant 128 : index
    %278 = vector.load %arg21[%c0_272, %c128_273] : memref<1x4096xf32, #tpu.memory_space<vmem>>, vector<1x64xf32>
    %c1_274 = arith.constant 1 : index
    %c3_275 = arith.constant 3 : index
    %c0_276 = arith.constant 0 : index
    %279 = vector.load %arg22[%c1_274, %c3_275, %c0_276] : memref<10x10x64xf32, #tpu.memory_space<vmem>>, vector<1x1x64xf32>
    %280 = vector.shape_cast %279 : vector<1x1x64xf32> to vector<1x64xf32>
    %281 = vector.shape_cast %278 : vector<1x64xf32> to vector<1x1x64xf32>
    tpu.vector_store %arg22[%c1_274, %c3_275, %c0_276], %281 {strides = array<i32>} : memref<10x10x64xf32, #tpu.memory_space<vmem>>, vector<1x1x64xf32>,
    %c0_277 = arith.constant 0 : index
    %c192_278 = arith.constant 192 : index
    %282 = vector.load %arg21[%c0_277, %c192_278] : memref<1x4096xf32, #tpu.memory_space<vmem>>, vector<1x64xf32>
    %c1_279 = arith.constant 1 : index
    %c4_280 = arith.constant 4 : index
    %c0_281 = arith.constant 0 : index
    %283 = vector.load %arg22[%c1_279, %c4_280, %c0_281] : memref<10x10x64xf32, #tpu.memory_space<vmem>>, vector<1x1x64xf32>
    %284 = vector.shape_cast %283 : vector<1x1x64xf32> to vector<1x64xf32>
    %285 = vector.shape_cast %282 : vector<1x64xf32> to vector<1x1x64xf32>
    tpu.vector_store %arg22[%c1_279, %c4_280, %c0_281], %285 {strides = array<i32>} : memref<10x10x64xf32, #tpu.memory_space<vmem>>, vector<1x1x64xf32>,
    %c0_282 = arith.constant 0 : index
    %c256_283 = arith.constant 256 : index
    %286 = vector.load %arg21[%c0_282, %c256_283] : memref<1x4096xf32, #tpu.memory_space<vmem>>, vector<1x64xf32>
    %c1_284 = arith.constant 1 : index
    %c5_285 = arith.constant 5 : index
    %c0_286 = arith.constant 0 : index
    %287 = vector.load %arg22[%c1_284, %c5_285, %c0_286] : memref<10x10x64xf32, #tpu.memory_space<vmem>>, vector<1x1x64xf32>
    %288 = vector.shape_cast %287 : vector<1x1x64xf32> to vector<1x64xf32>
    %289 = vector.shape_cast %286 : vector<1x64xf32> to vector<1x1x64xf32>
    tpu.vector_store %arg22[%c1_284, %c5_285, %c0_286], %289 {strides = array<i32>} : memref<10x10x64xf32, #tpu.memory_space<vmem>>, vector<1x1x64xf32>,
    %c0_287 = arith.constant 0 : index
    %c320_288 = arith.constant 320 : index
    %290 = vector.load %arg21[%c0_287, %c320_288] : memref<1x4096xf32, #tpu.memory_space<vmem>>, vector<1x64xf32>
    %c1_289 = arith.constant 1 : index
    %c6_290 = arith.constant 6 : index
    %c0_291 = arith.constant 0 : index
    %291 = vector.load %arg22[%c1_289, %c6_290, %c0_291] : memref<10x10x64xf32, #tpu.memory_space<vmem>>, vector<1x1x64xf32>
    %292 = vector.shape_cast %291 : vector<1x1x64xf32> to vector<1x64xf32>
    %293 = vector.shape_cast %290 : vector<1x64xf32> to vector<1x1x64xf32>
    tpu.vector_store %arg22[%c1_289, %c6_290, %c0_291], %293 {strides = array<i32>} : memref<10x10x64xf32, #tpu.memory_space<vmem>>, vector<1x1x64xf32>,
    %c0_292 = arith.constant 0 : index
    %c384_293 = arith.constant 384 : index
    %294 = vector.load %arg21[%c0_292, %c384_293] : memref<1x4096xf32, #tpu.memory_space<vmem>>, vector<1x64xf32>
    %c1_294 = arith.constant 1 : index
    %c7_295 = arith.constant 7 : index
    %c0_296 = arith.constant 0 : index
    %295 = vector.load %arg22[%c1_294, %c7_295, %c0_296] : memref<10x10x64xf32, #tpu.memory_space<vmem>>, vector<1x1x64xf32>
    %296 = vector.shape_cast %295 : vector<1x1x64xf32> to vector<1x64xf32>
    %297 = vector.shape_cast %294 : vector<1x64xf32> to vector<1x1x64xf32>
    tpu.vector_store %arg22[%c1_294, %c7_295, %c0_296], %297 {strides = array<i32>} : memref<10x10x64xf32, #tpu.memory_space<vmem>>, vector<1x1x64xf32>,
    %c0_297 = arith.constant 0 : index
    %c448_298 = arith.constant 448 : index
    %298 = vector.load %arg21[%c0_297, %c448_298] : memref<1x4096xf32, #tpu.memory_space<vmem>>, vector<1x64xf32>
    %c1_299 = arith.constant 1 : index
    %c8_300 = arith.constant 8 : index
    %c0_301 = arith.constant 0 : index
    %299 = vector.load %arg22[%c1_299, %c8_300, %c0_301] : memref<10x10x64xf32, #tpu.memory_space<vmem>>, vector<1x1x64xf32>
    %300 = vector.shape_cast %299 : vector<1x1x64xf32> to vector<1x64xf32>
    %301 = vector.shape_cast %298 : vector<1x64xf32> to vector<1x1x64xf32>
    tpu.vector_store %arg22[%c1_299, %c8_300, %c0_301], %301 {strides = array<i32>} : memref<10x10x64xf32, #tpu.memory_space<vmem>>, vector<1x1x64xf32>,
    %c0_302 = arith.constant 0 : index
    %c512_303 = arith.constant 512 : index
    %302 = vector.load %arg21[%c0_302, %c512_303] : memref<1x4096xf32, #tpu.memory_space<vmem>>, vector<1x64xf32>
    %c2_304 = arith.constant 2 : index
    %c1_305 = arith.constant 1 : index
    %c0_306 = arith.constant 0 : index
    %303 = vector.load %arg22[%c2_304, %c1_305, %c0_306] : memref<10x10x64xf32, #tpu.memory_space<vmem>>, vector<1x1x64xf32>
    %304 = vector.shape_cast %303 : vector<1x1x64xf32> to vector<1x64xf32>
    %305 = vector.shape_cast %302 : vector<1x64xf32> to vector<1x1x64xf32>
    tpu.vector_store %arg22[%c2_304, %c1_305, %c0_306], %305 {strides = array<i32>} : memref<10x10x64xf32, #tpu.memory_space<vmem>>, vector<1x1x64xf32>,
    %c0_307 = arith.constant 0 : index
    %c576_308 = arith.constant 576 : index
    %306 = vector.load %arg21[%c0_307, %c576_308] : memref<1x4096xf32, #tpu.memory_space<vmem>>, vector<1x64xf32>
    %c2_309 = arith.constant 2 : index
    %c2_310 = arith.constant 2 : index
    %c0_311 = arith.constant 0 : index
    %307 = vector.load %arg22[%c2_309, %c2_310, %c0_311] : memref<10x10x64xf32, #tpu.memory_space<vmem>>, vector<1x1x64xf32>
    %308 = vector.shape_cast %307 : vector<1x1x64xf32> to vector<1x64xf32>
    %309 = vector.shape_cast %306 : vector<1x64xf32> to vector<1x1x64xf32>
    tpu.vector_store %arg22[%c2_309, %c2_310, %c0_311], %309 {strides = array<i32>} : memref<10x10x64xf32, #tpu.memory_space<vmem>>, vector<1x1x64xf32>,
    %c0_312 = arith.constant 0 : index
    %c640_313 = arith.constant 640 : index
    %310 = vector.load %arg21[%c0_312, %c640_313] : memref<1x4096xf32, #tpu.memory_space<vmem>>, vector<1x64xf32>
    %c2_314 = arith.constant 2 : index
    %c3_315 = arith.constant 3 : index
    %c0_316 = arith.constant 0 : index
    %311 = vector.load %arg22[%c2_314, %c3_315, %c0_316] : memref<10x10x64xf32, #tpu.memory_space<vmem>>, vector<1x1x64xf32>
    %312 = vector.shape_cast %311 : vector<1x1x64xf32> to vector<1x64xf32>
    %313 = vector.shape_cast %310 : vector<1x64xf32> to vector<1x1x64xf32>
    tpu.vector_store %arg22[%c2_314, %c3_315, %c0_316], %313 {strides = array<i32>} : memref<10x10x64xf32, #tpu.memory_space<vmem>>, vector<1x1x64xf32>,
    %c0_317 = arith.constant 0 : index
    %c704_318 = arith.constant 704 : index
    %314 = vector.load %arg21[%c0_317, %c704_318] : memref<1x4096xf32, #tpu.memory_space<vmem>>, vector<1x64xf32>
    %c2_319 = arith.constant 2 : index
    %c4_320 = arith.constant 4 : index
    %c0_321 = arith.constant 0 : index
    %315 = vector.load %arg22[%c2_319, %c4_320, %c0_321] : memref<10x10x64xf32, #tpu.memory_space<vmem>>, vector<1x1x64xf32>
    %316 = vector.shape_cast %315 : vector<1x1x64xf32> to vector<1x64xf32>
    %317 = vector.shape_cast %314 : vector<1x64xf32> to vector<1x1x64xf32>
    tpu.vector_store %arg22[%c2_319, %c4_320, %c0_321], %317 {strides = array<i32>} : memref<10x10x64xf32, #tpu.memory_space<vmem>>, vector<1x1x64xf32>,
    %c0_322 = arith.constant 0 : index
    %c768_323 = arith.constant 768 : index
    %318 = vector.load %arg21[%c0_322, %c768_323] : memref<1x4096xf32, #tpu.memory_space<vmem>>, vector<1x64xf32>
    %c2_324 = arith.constant 2 : index
    %c5_325 = arith.constant 5 : index
    %c0_326 = arith.constant 0 : index
    %319 = vector.load %arg22[%c2_324, %c5_325, %c0_326] : memref<10x10x64xf32, #tpu.memory_space<vmem>>, vector<1x1x64xf32>
    %320 = vector.shape_cast %319 : vector<1x1x64xf32> to vector<1x64xf32>
    %321 = vector.shape_cast %318 : vector<1x64xf32> to vector<1x1x64xf32>
    tpu.vector_store %arg22[%c2_324, %c5_325, %c0_326], %321 {strides = array<i32>} : memref<10x10x64xf32, #tpu.memory_space<vmem>>, vector<1x1x64xf32>,
    %c0_327 = arith.constant 0 : index
    %c832_328 = arith.constant 832 : index
    %322 = vector.load %arg21[%c0_327, %c832_328] : memref<1x4096xf32, #tpu.memory_space<vmem>>, vector<1x64xf32>
    %c2_329 = arith.constant 2 : index
    %c6_330 = arith.constant 6 : index
    %c0_331 = arith.constant 0 : index
    %323 = vector.load %arg22[%c2_329, %c6_330, %c0_331] : memref<10x10x64xf32, #tpu.memory_space<vmem>>, vector<1x1x64xf32>
    %324 = vector.shape_cast %323 : vector<1x1x64xf32> to vector<1x64xf32>
    %325 = vector.shape_cast %322 : vector<1x64xf32> to vector<1x1x64xf32>
    tpu.vector_store %arg22[%c2_329, %c6_330, %c0_331], %325 {strides = array<i32>} : memref<10x10x64xf32, #tpu.memory_space<vmem>>, vector<1x1x64xf32>,
    %c0_332 = arith.constant 0 : index
    %c896_333 = arith.constant 896 : index
    %326 = vector.load %arg21[%c0_332, %c896_333] : memref<1x4096xf32, #tpu.memory_space<vmem>>, vector<1x64xf32>
    %c2_334 = arith.constant 2 : index
    %c7_335 = arith.constant 7 : index
    %c0_336 = arith.constant 0 : index
    %327 = vector.load %arg22[%c2_334, %c7_335, %c0_336] : memref<10x10x64xf32, #tpu.memory_space<vmem>>, vector<1x1x64xf32>
    %328 = vector.shape_cast %327 : vector<1x1x64xf32> to vector<1x64xf32>
    %329 = vector.shape_cast %326 : vector<1x64xf32> to vector<1x1x64xf32>
    tpu.vector_store %arg22[%c2_334, %c7_335, %c0_336], %329 {strides = array<i32>} : memref<10x10x64xf32, #tpu.memory_space<vmem>>, vector<1x1x64xf32>,
    %c0_337 = arith.constant 0 : index
    %c960_338 = arith.constant 960 : index
    %330 = vector.load %arg21[%c0_337, %c960_338] : memref<1x4096xf32, #tpu.memory_space<vmem>>, vector<1x64xf32>
    %c2_339 = arith.constant 2 : index
    %c8_340 = arith.constant 8 : index
    %c0_341 = arith.constant 0 : index
    %331 = vector.load %arg22[%c2_339, %c8_340, %c0_341] : memref<10x10x64xf32, #tpu.memory_space<vmem>>, vector<1x1x64xf32>
    %332 = vector.shape_cast %331 : vector<1x1x64xf32> to vector<1x64xf32>
    %333 = vector.shape_cast %330 : vector<1x64xf32> to vector<1x1x64xf32>
    tpu.vector_store %arg22[%c2_339, %c8_340, %c0_341], %333 {strides = array<i32>} : memref<10x10x64xf32, #tpu.memory_space<vmem>>, vector<1x1x64xf32>,
    %c0_342 = arith.constant 0 : index
    %c1024_343 = arith.constant 1024 : index
    %334 = vector.load %arg21[%c0_342, %c1024_343] : memref<1x4096xf32, #tpu.memory_space<vmem>>, vector<1x64xf32>
    %c3_344 = arith.constant 3 : index
    %c1_345 = arith.constant 1 : index
    %c0_346 = arith.constant 0 : index
    %335 = vector.load %arg22[%c3_344, %c1_345, %c0_346] : memref<10x10x64xf32, #tpu.memory_space<vmem>>, vector<1x1x64xf32>
    %336 = vector.shape_cast %335 : vector<1x1x64xf32> to vector<1x64xf32>
    %337 = vector.shape_cast %334 : vector<1x64xf32> to vector<1x1x64xf32>
    tpu.vector_store %arg22[%c3_344, %c1_345, %c0_346], %337 {strides = array<i32>} : memref<10x10x64xf32, #tpu.memory_space<vmem>>, vector<1x1x64xf32>,
    %c0_347 = arith.constant 0 : index
    %c1088_348 = arith.constant 1088 : index
    %338 = vector.load %arg21[%c0_347, %c1088_348] : memref<1x4096xf32, #tpu.memory_space<vmem>>, vector<1x64xf32>
    %c3_349 = arith.constant 3 : index
    %c2_350 = arith.constant 2 : index
    %c0_351 = arith.constant 0 : index
    %339 = vector.load %arg22[%c3_349, %c2_350, %c0_351] : memref<10x10x64xf32, #tpu.memory_space<vmem>>, vector<1x1x64xf32>
    %340 = vector.shape_cast %339 : vector<1x1x64xf32> to vector<1x64xf32>
    %341 = vector.shape_cast %338 : vector<1x64xf32> to vector<1x1x64xf32>
    tpu.vector_store %arg22[%c3_349, %c2_350, %c0_351], %341 {strides = array<i32>} : memref<10x10x64xf32, #tpu.memory_space<vmem>>, vector<1x1x64xf32>,
    %c0_352 = arith.constant 0 : index
    %c1152_353 = arith.constant 1152 : index
    %342 = vector.load %arg21[%c0_352, %c1152_353] : memref<1x4096xf32, #tpu.memory_space<vmem>>, vector<1x64xf32>
    %c3_354 = arith.constant 3 : index
    %c3_355 = arith.constant 3 : index
    %c0_356 = arith.constant 0 : index
    %343 = vector.load %arg22[%c3_354, %c3_355, %c0_356] : memref<10x10x64xf32, #tpu.memory_space<vmem>>, vector<1x1x64xf32>
    %344 = vector.shape_cast %343 : vector<1x1x64xf32> to vector<1x64xf32>
    %345 = vector.shape_cast %342 : vector<1x64xf32> to vector<1x1x64xf32>
    tpu.vector_store %arg22[%c3_354, %c3_355, %c0_356], %345 {strides = array<i32>} : memref<10x10x64xf32, #tpu.memory_space<vmem>>, vector<1x1x64xf32>,
    %c0_357 = arith.constant 0 : index
    %c1216_358 = arith.constant 1216 : index
    %346 = vector.load %arg21[%c0_357, %c1216_358] : memref<1x4096xf32, #tpu.memory_space<vmem>>, vector<1x64xf32>
    %c3_359 = arith.constant 3 : index
    %c4_360 = arith.constant 4 : index
    %c0_361 = arith.constant 0 : index
    %347 = vector.load %arg22[%c3_359, %c4_360, %c0_361] : memref<10x10x64xf32, #tpu.memory_space<vmem>>, vector<1x1x64xf32>
    %348 = vector.shape_cast %347 : vector<1x1x64xf32> to vector<1x64xf32>
    %349 = vector.shape_cast %346 : vector<1x64xf32> to vector<1x1x64xf32>
    tpu.vector_store %arg22[%c3_359, %c4_360, %c0_361], %349 {strides = array<i32>} : memref<10x10x64xf32, #tpu.memory_space<vmem>>, vector<1x1x64xf32>,
    %c0_362 = arith.constant 0 : index
    %c1280_363 = arith.constant 1280 : index
    %350 = vector.load %arg21[%c0_362, %c1280_363] : memref<1x4096xf32, #tpu.memory_space<vmem>>, vector<1x64xf32>
    %c3_364 = arith.constant 3 : index
    %c5_365 = arith.constant 5 : index
    %c0_366 = arith.constant 0 : index
    %351 = vector.load %arg22[%c3_364, %c5_365, %c0_366] : memref<10x10x64xf32, #tpu.memory_space<vmem>>, vector<1x1x64xf32>
    %352 = vector.shape_cast %351 : vector<1x1x64xf32> to vector<1x64xf32>
    %353 = vector.shape_cast %350 : vector<1x64xf32> to vector<1x1x64xf32>
    tpu.vector_store %arg22[%c3_364, %c5_365, %c0_366], %353 {strides = array<i32>} : memref<10x10x64xf32, #tpu.memory_space<vmem>>, vector<1x1x64xf32>,
    %c0_367 = arith.constant 0 : index
    %c1344_368 = arith.constant 1344 : index
    %354 = vector.load %arg21[%c0_367, %c1344_368] : memref<1x4096xf32, #tpu.memory_space<vmem>>, vector<1x64xf32>
    %c3_369 = arith.constant 3 : index
    %c6_370 = arith.constant 6 : index
    %c0_371 = arith.constant 0 : index
    %355 = vector.load %arg22[%c3_369, %c6_370, %c0_371] : memref<10x10x64xf32, #tpu.memory_space<vmem>>, vector<1x1x64xf32>
    %356 = vector.shape_cast %355 : vector<1x1x64xf32> to vector<1x64xf32>
    %357 = vector.shape_cast %354 : vector<1x64xf32> to vector<1x1x64xf32>
    tpu.vector_store %arg22[%c3_369, %c6_370, %c0_371], %357 {strides = array<i32>} : memref<10x10x64xf32, #tpu.memory_space<vmem>>, vector<1x1x64xf32>,
    %c0_372 = arith.constant 0 : index
    %c1408_373 = arith.constant 1408 : index
    %358 = vector.load %arg21[%c0_372, %c1408_373] : memref<1x4096xf32, #tpu.memory_space<vmem>>, vector<1x64xf32>
    %c3_374 = arith.constant 3 : index
    %c7_375 = arith.constant 7 : index
    %c0_376 = arith.constant 0 : index
    %359 = vector.load %arg22[%c3_374, %c7_375, %c0_376] : memref<10x10x64xf32, #tpu.memory_space<vmem>>, vector<1x1x64xf32>
    %360 = vector.shape_cast %359 : vector<1x1x64xf32> to vector<1x64xf32>
    %361 = vector.shape_cast %358 : vector<1x64xf32> to vector<1x1x64xf32>
    tpu.vector_store %arg22[%c3_374, %c7_375, %c0_376], %361 {strides = array<i32>} : memref<10x10x64xf32, #tpu.memory_space<vmem>>, vector<1x1x64xf32>,
    %c0_377 = arith.constant 0 : index
    %c1472_378 = arith.constant 1472 : index
    %362 = vector.load %arg21[%c0_377, %c1472_378] : memref<1x4096xf32, #tpu.memory_space<vmem>>, vector<1x64xf32>
    %c3_379 = arith.constant 3 : index
    %c8_380 = arith.constant 8 : index
    %c0_381 = arith.constant 0 : index
    %363 = vector.load %arg22[%c3_379, %c8_380, %c0_381] : memref<10x10x64xf32, #tpu.memory_space<vmem>>, vector<1x1x64xf32>
    %364 = vector.shape_cast %363 : vector<1x1x64xf32> to vector<1x64xf32>
    %365 = vector.shape_cast %362 : vector<1x64xf32> to vector<1x1x64xf32>
    tpu.vector_store %arg22[%c3_379, %c8_380, %c0_381], %365 {strides = array<i32>} : memref<10x10x64xf32, #tpu.memory_space<vmem>>, vector<1x1x64xf32>,
    %c0_382 = arith.constant 0 : index
    %c1536_383 = arith.constant 1536 : index
    %366 = vector.load %arg21[%c0_382, %c1536_383] : memref<1x4096xf32, #tpu.memory_space<vmem>>, vector<1x64xf32>
    %c4_384 = arith.constant 4 : index
    %c1_385 = arith.constant 1 : index
    %c0_386 = arith.constant 0 : index
    %367 = vector.load %arg22[%c4_384, %c1_385, %c0_386] : memref<10x10x64xf32, #tpu.memory_space<vmem>>, vector<1x1x64xf32>
    %368 = vector.shape_cast %367 : vector<1x1x64xf32> to vector<1x64xf32>
    %369 = vector.shape_cast %366 : vector<1x64xf32> to vector<1x1x64xf32>
    tpu.vector_store %arg22[%c4_384, %c1_385, %c0_386], %369 {strides = array<i32>} : memref<10x10x64xf32, #tpu.memory_space<vmem>>, vector<1x1x64xf32>,
    %c0_387 = arith.constant 0 : index
    %c1600_388 = arith.constant 1600 : index
    %370 = vector.load %arg21[%c0_387, %c1600_388] : memref<1x4096xf32, #tpu.memory_space<vmem>>, vector<1x64xf32>
    %c4_389 = arith.constant 4 : index
    %c2_390 = arith.constant 2 : index
    %c0_391 = arith.constant 0 : index
    %371 = vector.load %arg22[%c4_389, %c2_390, %c0_391] : memref<10x10x64xf32, #tpu.memory_space<vmem>>, vector<1x1x64xf32>
    %372 = vector.shape_cast %371 : vector<1x1x64xf32> to vector<1x64xf32>
    %373 = vector.shape_cast %370 : vector<1x64xf32> to vector<1x1x64xf32>
    tpu.vector_store %arg22[%c4_389, %c2_390, %c0_391], %373 {strides = array<i32>} : memref<10x10x64xf32, #tpu.memory_space<vmem>>, vector<1x1x64xf32>,
    %c0_392 = arith.constant 0 : index
    %c1664_393 = arith.constant 1664 : index
    %374 = vector.load %arg21[%c0_392, %c1664_393] : memref<1x4096xf32, #tpu.memory_space<vmem>>, vector<1x64xf32>
    %c4_394 = arith.constant 4 : index
    %c3_395 = arith.constant 3 : index
    %c0_396 = arith.constant 0 : index
    %375 = vector.load %arg22[%c4_394, %c3_395, %c0_396] : memref<10x10x64xf32, #tpu.memory_space<vmem>>, vector<1x1x64xf32>
    %376 = vector.shape_cast %375 : vector<1x1x64xf32> to vector<1x64xf32>
    %377 = vector.shape_cast %374 : vector<1x64xf32> to vector<1x1x64xf32>
    tpu.vector_store %arg22[%c4_394, %c3_395, %c0_396], %377 {strides = array<i32>} : memref<10x10x64xf32, #tpu.memory_space<vmem>>, vector<1x1x64xf32>,
    %c0_397 = arith.constant 0 : index
    %c1728_398 = arith.constant 1728 : index
    %378 = vector.load %arg21[%c0_397, %c1728_398] : memref<1x4096xf32, #tpu.memory_space<vmem>>, vector<1x64xf32>
    %c4_399 = arith.constant 4 : index
    %c4_400 = arith.constant 4 : index
    %c0_401 = arith.constant 0 : index
    %379 = vector.load %arg22[%c4_399, %c4_400, %c0_401] : memref<10x10x64xf32, #tpu.memory_space<vmem>>, vector<1x1x64xf32>
    %380 = vector.shape_cast %379 : vector<1x1x64xf32> to vector<1x64xf32>
    %381 = vector.shape_cast %378 : vector<1x64xf32> to vector<1x1x64xf32>
    tpu.vector_store %arg22[%c4_399, %c4_400, %c0_401], %381 {strides = array<i32>} : memref<10x10x64xf32, #tpu.memory_space<vmem>>, vector<1x1x64xf32>,
    %c0_402 = arith.constant 0 : index
    %c1792_403 = arith.constant 1792 : index
    %382 = vector.load %arg21[%c0_402, %c1792_403] : memref<1x4096xf32, #tpu.memory_space<vmem>>, vector<1x64xf32>
    %c4_404 = arith.constant 4 : index
    %c5_405 = arith.constant 5 : index
    %c0_406 = arith.constant 0 : index
    %383 = vector.load %arg22[%c4_404, %c5_405, %c0_406] : memref<10x10x64xf32, #tpu.memory_space<vmem>>, vector<1x1x64xf32>
    %384 = vector.shape_cast %383 : vector<1x1x64xf32> to vector<1x64xf32>
    %385 = vector.shape_cast %382 : vector<1x64xf32> to vector<1x1x64xf32>
    tpu.vector_store %arg22[%c4_404, %c5_405, %c0_406], %385 {strides = array<i32>} : memref<10x10x64xf32, #tpu.memory_space<vmem>>, vector<1x1x64xf32>,
    %c0_407 = arith.constant 0 : index
    %c1856_408 = arith.constant 1856 : index
    %386 = vector.load %arg21[%c0_407, %c1856_408] : memref<1x4096xf32, #tpu.memory_space<vmem>>, vector<1x64xf32>
    %c4_409 = arith.constant 4 : index
    %c6_410 = arith.constant 6 : index
    %c0_411 = arith.constant 0 : index
    %387 = vector.load %arg22[%c4_409, %c6_410, %c0_411] : memref<10x10x64xf32, #tpu.memory_space<vmem>>, vector<1x1x64xf32>
    %388 = vector.shape_cast %387 : vector<1x1x64xf32> to vector<1x64xf32>
    %389 = vector.shape_cast %386 : vector<1x64xf32> to vector<1x1x64xf32>
    tpu.vector_store %arg22[%c4_409, %c6_410, %c0_411], %389 {strides = array<i32>} : memref<10x10x64xf32, #tpu.memory_space<vmem>>, vector<1x1x64xf32>,
    %c0_412 = arith.constant 0 : index
    %c1920_413 = arith.constant 1920 : index
    %390 = vector.load %arg21[%c0_412, %c1920_413] : memref<1x4096xf32, #tpu.memory_space<vmem>>, vector<1x64xf32>
    %c4_414 = arith.constant 4 : index
    %c7_415 = arith.constant 7 : index
    %c0_416 = arith.constant 0 : index
    %391 = vector.load %arg22[%c4_414, %c7_415, %c0_416] : memref<10x10x64xf32, #tpu.memory_space<vmem>>, vector<1x1x64xf32>
    %392 = vector.shape_cast %391 : vector<1x1x64xf32> to vector<1x64xf32>
    %393 = vector.shape_cast %390 : vector<1x64xf32> to vector<1x1x64xf32>
    tpu.vector_store %arg22[%c4_414, %c7_415, %c0_416], %393 {strides = array<i32>} : memref<10x10x64xf32, #tpu.memory_space<vmem>>, vector<1x1x64xf32>,
    %c0_417 = arith.constant 0 : index
    %c1984_418 = arith.constant 1984 : index
    %394 = vector.load %arg21[%c0_417, %c1984_418] : memref<1x4096xf32, #tpu.memory_space<vmem>>, vector<1x64xf32>
    %c4_419 = arith.constant 4 : index
    %c8_420 = arith.constant 8 : index
    %c0_421 = arith.constant 0 : index
    %395 = vector.load %arg22[%c4_419, %c8_420, %c0_421] : memref<10x10x64xf32, #tpu.memory_space<vmem>>, vector<1x1x64xf32>
    %396 = vector.shape_cast %395 : vector<1x1x64xf32> to vector<1x64xf32>
    %397 = vector.shape_cast %394 : vector<1x64xf32> to vector<1x1x64xf32>
    tpu.vector_store %arg22[%c4_419, %c8_420, %c0_421], %397 {strides = array<i32>} : memref<10x10x64xf32, #tpu.memory_space<vmem>>, vector<1x1x64xf32>,
    %c0_422 = arith.constant 0 : index
    %c2048_423 = arith.constant 2048 : index
    %398 = vector.load %arg21[%c0_422, %c2048_423] : memref<1x4096xf32, #tpu.memory_space<vmem>>, vector<1x64xf32>
    %c5_424 = arith.constant 5 : index
    %c1_425 = arith.constant 1 : index
    %c0_426 = arith.constant 0 : index
    %399 = vector.load %arg22[%c5_424, %c1_425, %c0_426] : memref<10x10x64xf32, #tpu.memory_space<vmem>>, vector<1x1x64xf32>
    %400 = vector.shape_cast %399 : vector<1x1x64xf32> to vector<1x64xf32>
    %401 = vector.shape_cast %398 : vector<1x64xf32> to vector<1x1x64xf32>
    tpu.vector_store %arg22[%c5_424, %c1_425, %c0_426], %401 {strides = array<i32>} : memref<10x10x64xf32, #tpu.memory_space<vmem>>, vector<1x1x64xf32>,
    %c0_427 = arith.constant 0 : index
    %c2112_428 = arith.constant 2112 : index
    %402 = vector.load %arg21[%c0_427, %c2112_428] : memref<1x4096xf32, #tpu.memory_space<vmem>>, vector<1x64xf32>
    %c5_429 = arith.constant 5 : index
    %c2_430 = arith.constant 2 : index
    %c0_431 = arith.constant 0 : index
    %403 = vector.load %arg22[%c5_429, %c2_430, %c0_431] : memref<10x10x64xf32, #tpu.memory_space<vmem>>, vector<1x1x64xf32>
    %404 = vector.shape_cast %403 : vector<1x1x64xf32> to vector<1x64xf32>
    %405 = vector.shape_cast %402 : vector<1x64xf32> to vector<1x1x64xf32>
    tpu.vector_store %arg22[%c5_429, %c2_430, %c0_431], %405 {strides = array<i32>} : memref<10x10x64xf32, #tpu.memory_space<vmem>>, vector<1x1x64xf32>,
    %c0_432 = arith.constant 0 : index
    %c2176_433 = arith.constant 2176 : index
    %406 = vector.load %arg21[%c0_432, %c2176_433] : memref<1x4096xf32, #tpu.memory_space<vmem>>, vector<1x64xf32>
    %c5_434 = arith.constant 5 : index
    %c3_435 = arith.constant 3 : index
    %c0_436 = arith.constant 0 : index
    %407 = vector.load %arg22[%c5_434, %c3_435, %c0_436] : memref<10x10x64xf32, #tpu.memory_space<vmem>>, vector<1x1x64xf32>
    %408 = vector.shape_cast %407 : vector<1x1x64xf32> to vector<1x64xf32>
    %409 = vector.shape_cast %406 : vector<1x64xf32> to vector<1x1x64xf32>
    tpu.vector_store %arg22[%c5_434, %c3_435, %c0_436], %409 {strides = array<i32>} : memref<10x10x64xf32, #tpu.memory_space<vmem>>, vector<1x1x64xf32>,
    %c0_437 = arith.constant 0 : index
    %c2240_438 = arith.constant 2240 : index
    %410 = vector.load %arg21[%c0_437, %c2240_438] : memref<1x4096xf32, #tpu.memory_space<vmem>>, vector<1x64xf32>
    %c5_439 = arith.constant 5 : index
    %c4_440 = arith.constant 4 : index
    %c0_441 = arith.constant 0 : index
    %411 = vector.load %arg22[%c5_439, %c4_440, %c0_441] : memref<10x10x64xf32, #tpu.memory_space<vmem>>, vector<1x1x64xf32>
    %412 = vector.shape_cast %411 : vector<1x1x64xf32> to vector<1x64xf32>
    %413 = vector.shape_cast %410 : vector<1x64xf32> to vector<1x1x64xf32>
    tpu.vector_store %arg22[%c5_439, %c4_440, %c0_441], %413 {strides = array<i32>} : memref<10x10x64xf32, #tpu.memory_space<vmem>>, vector<1x1x64xf32>,
    %c0_442 = arith.constant 0 : index
    %c2304_443 = arith.constant 2304 : index
    %414 = vector.load %arg21[%c0_442, %c2304_443] : memref<1x4096xf32, #tpu.memory_space<vmem>>, vector<1x64xf32>
    %c5_444 = arith.constant 5 : index
    %c5_445 = arith.constant 5 : index
    %c0_446 = arith.constant 0 : index
    %415 = vector.load %arg22[%c5_444, %c5_445, %c0_446] : memref<10x10x64xf32, #tpu.memory_space<vmem>>, vector<1x1x64xf32>
    %416 = vector.shape_cast %415 : vector<1x1x64xf32> to vector<1x64xf32>
    %417 = vector.shape_cast %414 : vector<1x64xf32> to vector<1x1x64xf32>
    tpu.vector_store %arg22[%c5_444, %c5_445, %c0_446], %417 {strides = array<i32>} : memref<10x10x64xf32, #tpu.memory_space<vmem>>, vector<1x1x64xf32>,
    %c0_447 = arith.constant 0 : index
    %c2368_448 = arith.constant 2368 : index
    %418 = vector.load %arg21[%c0_447, %c2368_448] : memref<1x4096xf32, #tpu.memory_space<vmem>>, vector<1x64xf32>
    %c5_449 = arith.constant 5 : index
    %c6_450 = arith.constant 6 : index
    %c0_451 = arith.constant 0 : index
    %419 = vector.load %arg22[%c5_449, %c6_450, %c0_451] : memref<10x10x64xf32, #tpu.memory_space<vmem>>, vector<1x1x64xf32>
    %420 = vector.shape_cast %419 : vector<1x1x64xf32> to vector<1x64xf32>
    %421 = vector.shape_cast %418 : vector<1x64xf32> to vector<1x1x64xf32>
    tpu.vector_store %arg22[%c5_449, %c6_450, %c0_451], %421 {strides = array<i32>} : memref<10x10x64xf32, #tpu.memory_space<vmem>>, vector<1x1x64xf32>,
    %c0_452 = arith.constant 0 : index
    %c2432_453 = arith.constant 2432 : index
    %422 = vector.load %arg21[%c0_452, %c2432_453] : memref<1x4096xf32, #tpu.memory_space<vmem>>, vector<1x64xf32>
    %c5_454 = arith.constant 5 : index
    %c7_455 = arith.constant 7 : index
    %c0_456 = arith.constant 0 : index
    %423 = vector.load %arg22[%c5_454, %c7_455, %c0_456] : memref<10x10x64xf32, #tpu.memory_space<vmem>>, vector<1x1x64xf32>
    %424 = vector.shape_cast %423 : vector<1x1x64xf32> to vector<1x64xf32>
    %425 = vector.shape_cast %422 : vector<1x64xf32> to vector<1x1x64xf32>
    tpu.vector_store %arg22[%c5_454, %c7_455, %c0_456], %425 {strides = array<i32>} : memref<10x10x64xf32, #tpu.memory_space<vmem>>, vector<1x1x64xf32>,
    %c0_457 = arith.constant 0 : index
    %c2496_458 = arith.constant 2496 : index
    %426 = vector.load %arg21[%c0_457, %c2496_458] : memref<1x4096xf32, #tpu.memory_space<vmem>>, vector<1x64xf32>
    %c5_459 = arith.constant 5 : index
    %c8_460 = arith.constant 8 : index
    %c0_461 = arith.constant 0 : index
    %427 = vector.load %arg22[%c5_459, %c8_460, %c0_461] : memref<10x10x64xf32, #tpu.memory_space<vmem>>, vector<1x1x64xf32>
    %428 = vector.shape_cast %427 : vector<1x1x64xf32> to vector<1x64xf32>
    %429 = vector.shape_cast %426 : vector<1x64xf32> to vector<1x1x64xf32>
    tpu.vector_store %arg22[%c5_459, %c8_460, %c0_461], %429 {strides = array<i32>} : memref<10x10x64xf32, #tpu.memory_space<vmem>>, vector<1x1x64xf32>,
    %c0_462 = arith.constant 0 : index
    %c2560_463 = arith.constant 2560 : index
    %430 = vector.load %arg21[%c0_462, %c2560_463] : memref<1x4096xf32, #tpu.memory_space<vmem>>, vector<1x64xf32>
    %c6_464 = arith.constant 6 : index
    %c1_465 = arith.constant 1 : index
    %c0_466 = arith.constant 0 : index
    %431 = vector.load %arg22[%c6_464, %c1_465, %c0_466] : memref<10x10x64xf32, #tpu.memory_space<vmem>>, vector<1x1x64xf32>
    %432 = vector.shape_cast %431 : vector<1x1x64xf32> to vector<1x64xf32>
    %433 = vector.shape_cast %430 : vector<1x64xf32> to vector<1x1x64xf32>
    tpu.vector_store %arg22[%c6_464, %c1_465, %c0_466], %433 {strides = array<i32>} : memref<10x10x64xf32, #tpu.memory_space<vmem>>, vector<1x1x64xf32>,
    %c0_467 = arith.constant 0 : index
    %c2624_468 = arith.constant 2624 : index
    %434 = vector.load %arg21[%c0_467, %c2624_468] : memref<1x4096xf32, #tpu.memory_space<vmem>>, vector<1x64xf32>
    %c6_469 = arith.constant 6 : index
    %c2_470 = arith.constant 2 : index
    %c0_471 = arith.constant 0 : index
    %435 = vector.load %arg22[%c6_469, %c2_470, %c0_471] : memref<10x10x64xf32, #tpu.memory_space<vmem>>, vector<1x1x64xf32>
    %436 = vector.shape_cast %435 : vector<1x1x64xf32> to vector<1x64xf32>
    %437 = vector.shape_cast %434 : vector<1x64xf32> to vector<1x1x64xf32>
    tpu.vector_store %arg22[%c6_469, %c2_470, %c0_471], %437 {strides = array<i32>} : memref<10x10x64xf32, #tpu.memory_space<vmem>>, vector<1x1x64xf32>,
    %c0_472 = arith.constant 0 : index
    %c2688_473 = arith.constant 2688 : index
    %438 = vector.load %arg21[%c0_472, %c2688_473] : memref<1x4096xf32, #tpu.memory_space<vmem>>, vector<1x64xf32>
    %c6_474 = arith.constant 6 : index
    %c3_475 = arith.constant 3 : index
    %c0_476 = arith.constant 0 : index
    %439 = vector.load %arg22[%c6_474, %c3_475, %c0_476] : memref<10x10x64xf32, #tpu.memory_space<vmem>>, vector<1x1x64xf32>
    %440 = vector.shape_cast %439 : vector<1x1x64xf32> to vector<1x64xf32>
    %441 = vector.shape_cast %438 : vector<1x64xf32> to vector<1x1x64xf32>
    tpu.vector_store %arg22[%c6_474, %c3_475, %c0_476], %441 {strides = array<i32>} : memref<10x10x64xf32, #tpu.memory_space<vmem>>, vector<1x1x64xf32>,
    %c0_477 = arith.constant 0 : index
    %c2752_478 = arith.constant 2752 : index
    %442 = vector.load %arg21[%c0_477, %c2752_478] : memref<1x4096xf32, #tpu.memory_space<vmem>>, vector<1x64xf32>
    %c6_479 = arith.constant 6 : index
    %c4_480 = arith.constant 4 : index
    %c0_481 = arith.constant 0 : index
    %443 = vector.load %arg22[%c6_479, %c4_480, %c0_481] : memref<10x10x64xf32, #tpu.memory_space<vmem>>, vector<1x1x64xf32>
    %444 = vector.shape_cast %443 : vector<1x1x64xf32> to vector<1x64xf32>
    %445 = vector.shape_cast %442 : vector<1x64xf32> to vector<1x1x64xf32>
    tpu.vector_store %arg22[%c6_479, %c4_480, %c0_481], %445 {strides = array<i32>} : memref<10x10x64xf32, #tpu.memory_space<vmem>>, vector<1x1x64xf32>,
    %c0_482 = arith.constant 0 : index
    %c2816_483 = arith.constant 2816 : index
    %446 = vector.load %arg21[%c0_482, %c2816_483] : memref<1x4096xf32, #tpu.memory_space<vmem>>, vector<1x64xf32>
    %c6_484 = arith.constant 6 : index
    %c5_485 = arith.constant 5 : index
    %c0_486 = arith.constant 0 : index
    %447 = vector.load %arg22[%c6_484, %c5_485, %c0_486] : memref<10x10x64xf32, #tpu.memory_space<vmem>>, vector<1x1x64xf32>
    %448 = vector.shape_cast %447 : vector<1x1x64xf32> to vector<1x64xf32>
    %449 = vector.shape_cast %446 : vector<1x64xf32> to vector<1x1x64xf32>
    tpu.vector_store %arg22[%c6_484, %c5_485, %c0_486], %449 {strides = array<i32>} : memref<10x10x64xf32, #tpu.memory_space<vmem>>, vector<1x1x64xf32>,
    %c0_487 = arith.constant 0 : index
    %c2880_488 = arith.constant 2880 : index
    %450 = vector.load %arg21[%c0_487, %c2880_488] : memref<1x4096xf32, #tpu.memory_space<vmem>>, vector<1x64xf32>
    %c6_489 = arith.constant 6 : index
    %c6_490 = arith.constant 6 : index
    %c0_491 = arith.constant 0 : index
    %451 = vector.load %arg22[%c6_489, %c6_490, %c0_491] : memref<10x10x64xf32, #tpu.memory_space<vmem>>, vector<1x1x64xf32>
    %452 = vector.shape_cast %451 : vector<1x1x64xf32> to vector<1x64xf32>
    %453 = vector.shape_cast %450 : vector<1x64xf32> to vector<1x1x64xf32>
    tpu.vector_store %arg22[%c6_489, %c6_490, %c0_491], %453 {strides = array<i32>} : memref<10x10x64xf32, #tpu.memory_space<vmem>>, vector<1x1x64xf32>,
    %c0_492 = arith.constant 0 : index
    %c2944_493 = arith.constant 2944 : index
    %454 = vector.load %arg21[%c0_492, %c2944_493] : memref<1x4096xf32, #tpu.memory_space<vmem>>, vector<1x64xf32>
    %c6_494 = arith.constant 6 : index
    %c7_495 = arith.constant 7 : index
    %c0_496 = arith.constant 0 : index
    %455 = vector.load %arg22[%c6_494, %c7_495, %c0_496] : memref<10x10x64xf32, #tpu.memory_space<vmem>>, vector<1x1x64xf32>
    %456 = vector.shape_cast %455 : vector<1x1x64xf32> to vector<1x64xf32>
    %457 = vector.shape_cast %454 : vector<1x64xf32> to vector<1x1x64xf32>
    tpu.vector_store %arg22[%c6_494, %c7_495, %c0_496], %457 {strides = array<i32>} : memref<10x10x64xf32, #tpu.memory_space<vmem>>, vector<1x1x64xf32>,
    %c0_497 = arith.constant 0 : index
    %c3008_498 = arith.constant 3008 : index
    %458 = vector.load %arg21[%c0_497, %c3008_498] : memref<1x4096xf32, #tpu.memory_space<vmem>>, vector<1x64xf32>
    %c6_499 = arith.constant 6 : index
    %c8_500 = arith.constant 8 : index
    %c0_501 = arith.constant 0 : index
    %459 = vector.load %arg22[%c6_499, %c8_500, %c0_501] : memref<10x10x64xf32, #tpu.memory_space<vmem>>, vector<1x1x64xf32>
    %460 = vector.shape_cast %459 : vector<1x1x64xf32> to vector<1x64xf32>
    %461 = vector.shape_cast %458 : vector<1x64xf32> to vector<1x1x64xf32>
    tpu.vector_store %arg22[%c6_499, %c8_500, %c0_501], %461 {strides = array<i32>} : memref<10x10x64xf32, #tpu.memory_space<vmem>>, vector<1x1x64xf32>,
    %c0_502 = arith.constant 0 : index
    %c3072_503 = arith.constant 3072 : index
    %462 = vector.load %arg21[%c0_502, %c3072_503] : memref<1x4096xf32, #tpu.memory_space<vmem>>, vector<1x64xf32>
    %c7_504 = arith.constant 7 : index
    %c1_505 = arith.constant 1 : index
    %c0_506 = arith.constant 0 : index
    %463 = vector.load %arg22[%c7_504, %c1_505, %c0_506] : memref<10x10x64xf32, #tpu.memory_space<vmem>>, vector<1x1x64xf32>
    %464 = vector.shape_cast %463 : vector<1x1x64xf32> to vector<1x64xf32>
    %465 = vector.shape_cast %462 : vector<1x64xf32> to vector<1x1x64xf32>
    tpu.vector_store %arg22[%c7_504, %c1_505, %c0_506], %465 {strides = array<i32>} : memref<10x10x64xf32, #tpu.memory_space<vmem>>, vector<1x1x64xf32>,
    %c0_507 = arith.constant 0 : index
    %c3136_508 = arith.constant 3136 : index
    %466 = vector.load %arg21[%c0_507, %c3136_508] : memref<1x4096xf32, #tpu.memory_space<vmem>>, vector<1x64xf32>
    %c7_509 = arith.constant 7 : index
    %c2_510 = arith.constant 2 : index
    %c0_511 = arith.constant 0 : index
    %467 = vector.load %arg22[%c7_509, %c2_510, %c0_511] : memref<10x10x64xf32, #tpu.memory_space<vmem>>, vector<1x1x64xf32>
    %468 = vector.shape_cast %467 : vector<1x1x64xf32> to vector<1x64xf32>
    %469 = vector.shape_cast %466 : vector<1x64xf32> to vector<1x1x64xf32>
    tpu.vector_store %arg22[%c7_509, %c2_510, %c0_511], %469 {strides = array<i32>} : memref<10x10x64xf32, #tpu.memory_space<vmem>>, vector<1x1x64xf32>,
    %c0_512 = arith.constant 0 : index
    %c3200_513 = arith.constant 3200 : index
    %470 = vector.load %arg21[%c0_512, %c3200_513] : memref<1x4096xf32, #tpu.memory_space<vmem>>, vector<1x64xf32>
    %c7_514 = arith.constant 7 : index
    %c3_515 = arith.constant 3 : index
    %c0_516 = arith.constant 0 : index
    %471 = vector.load %arg22[%c7_514, %c3_515, %c0_516] : memref<10x10x64xf32, #tpu.memory_space<vmem>>, vector<1x1x64xf32>
    %472 = vector.shape_cast %471 : vector<1x1x64xf32> to vector<1x64xf32>
    %473 = vector.shape_cast %470 : vector<1x64xf32> to vector<1x1x64xf32>
    tpu.vector_store %arg22[%c7_514, %c3_515, %c0_516], %473 {strides = array<i32>} : memref<10x10x64xf32, #tpu.memory_space<vmem>>, vector<1x1x64xf32>,
    %c0_517 = arith.constant 0 : index
    %c3264_518 = arith.constant 3264 : index
    %474 = vector.load %arg21[%c0_517, %c3264_518] : memref<1x4096xf32, #tpu.memory_space<vmem>>, vector<1x64xf32>
    %c7_519 = arith.constant 7 : index
    %c4_520 = arith.constant 4 : index
    %c0_521 = arith.constant 0 : index
    %475 = vector.load %arg22[%c7_519, %c4_520, %c0_521] : memref<10x10x64xf32, #tpu.memory_space<vmem>>, vector<1x1x64xf32>
    %476 = vector.shape_cast %475 : vector<1x1x64xf32> to vector<1x64xf32>
    %477 = vector.shape_cast %474 : vector<1x64xf32> to vector<1x1x64xf32>
    tpu.vector_store %arg22[%c7_519, %c4_520, %c0_521], %477 {strides = array<i32>} : memref<10x10x64xf32, #tpu.memory_space<vmem>>, vector<1x1x64xf32>,
    %c0_522 = arith.constant 0 : index
    %c3328_523 = arith.constant 3328 : index
    %478 = vector.load %arg21[%c0_522, %c3328_523] : memref<1x4096xf32, #tpu.memory_space<vmem>>, vector<1x64xf32>
    %c7_524 = arith.constant 7 : index
    %c5_525 = arith.constant 5 : index
    %c0_526 = arith.constant 0 : index
    %479 = vector.load %arg22[%c7_524, %c5_525, %c0_526] : memref<10x10x64xf32, #tpu.memory_space<vmem>>, vector<1x1x64xf32>
    %480 = vector.shape_cast %479 : vector<1x1x64xf32> to vector<1x64xf32>
    %481 = vector.shape_cast %478 : vector<1x64xf32> to vector<1x1x64xf32>
    tpu.vector_store %arg22[%c7_524, %c5_525, %c0_526], %481 {strides = array<i32>} : memref<10x10x64xf32, #tpu.memory_space<vmem>>, vector<1x1x64xf32>,
    %c0_527 = arith.constant 0 : index
    %c3392_528 = arith.constant 3392 : index
    %482 = vector.load %arg21[%c0_527, %c3392_528] : memref<1x4096xf32, #tpu.memory_space<vmem>>, vector<1x64xf32>
    %c7_529 = arith.constant 7 : index
    %c6_530 = arith.constant 6 : index
    %c0_531 = arith.constant 0 : index
    %483 = vector.load %arg22[%c7_529, %c6_530, %c0_531] : memref<10x10x64xf32, #tpu.memory_space<vmem>>, vector<1x1x64xf32>
    %484 = vector.shape_cast %483 : vector<1x1x64xf32> to vector<1x64xf32>
    %485 = vector.shape_cast %482 : vector<1x64xf32> to vector<1x1x64xf32>
    tpu.vector_store %arg22[%c7_529, %c6_530, %c0_531], %485 {strides = array<i32>} : memref<10x10x64xf32, #tpu.memory_space<vmem>>, vector<1x1x64xf32>,
    %c0_532 = arith.constant 0 : index
    %c3456_533 = arith.constant 3456 : index
    %486 = vector.load %arg21[%c0_532, %c3456_533] : memref<1x4096xf32, #tpu.memory_space<vmem>>, vector<1x64xf32>
    %c7_534 = arith.constant 7 : index
    %c7_535 = arith.constant 7 : index
    %c0_536 = arith.constant 0 : index
    %487 = vector.load %arg22[%c7_534, %c7_535, %c0_536] : memref<10x10x64xf32, #tpu.memory_space<vmem>>, vector<1x1x64xf32>
    %488 = vector.shape_cast %487 : vector<1x1x64xf32> to vector<1x64xf32>
    %489 = vector.shape_cast %486 : vector<1x64xf32> to vector<1x1x64xf32>
    tpu.vector_store %arg22[%c7_534, %c7_535, %c0_536], %489 {strides = array<i32>} : memref<10x10x64xf32, #tpu.memory_space<vmem>>, vector<1x1x64xf32>,
    %c0_537 = arith.constant 0 : index
    %c3520_538 = arith.constant 3520 : index
    %490 = vector.load %arg21[%c0_537, %c3520_538] : memref<1x4096xf32, #tpu.memory_space<vmem>>, vector<1x64xf32>
    %c7_539 = arith.constant 7 : index
    %c8_540 = arith.constant 8 : index
    %c0_541 = arith.constant 0 : index
    %491 = vector.load %arg22[%c7_539, %c8_540, %c0_541] : memref<10x10x64xf32, #tpu.memory_space<vmem>>, vector<1x1x64xf32>
    %492 = vector.shape_cast %491 : vector<1x1x64xf32> to vector<1x64xf32>
    %493 = vector.shape_cast %490 : vector<1x64xf32> to vector<1x1x64xf32>
    tpu.vector_store %arg22[%c7_539, %c8_540, %c0_541], %493 {strides = array<i32>} : memref<10x10x64xf32, #tpu.memory_space<vmem>>, vector<1x1x64xf32>,
    %c0_542 = arith.constant 0 : index
    %c3584_543 = arith.constant 3584 : index
    %494 = vector.load %arg21[%c0_542, %c3584_543] : memref<1x4096xf32, #tpu.memory_space<vmem>>, vector<1x64xf32>
    %c8_544 = arith.constant 8 : index
    %c1_545 = arith.constant 1 : index
    %c0_546 = arith.constant 0 : index
    %495 = vector.load %arg22[%c8_544, %c1_545, %c0_546] : memref<10x10x64xf32, #tpu.memory_space<vmem>>, vector<1x1x64xf32>
    %496 = vector.shape_cast %495 : vector<1x1x64xf32> to vector<1x64xf32>
    %497 = vector.shape_cast %494 : vector<1x64xf32> to vector<1x1x64xf32>
    tpu.vector_store %arg22[%c8_544, %c1_545, %c0_546], %497 {strides = array<i32>} : memref<10x10x64xf32, #tpu.memory_space<vmem>>, vector<1x1x64xf32>,
    %c0_547 = arith.constant 0 : index
    %c3648_548 = arith.constant 3648 : index
    %498 = vector.load %arg21[%c0_547, %c3648_548] : memref<1x4096xf32, #tpu.memory_space<vmem>>, vector<1x64xf32>
    %c8_549 = arith.constant 8 : index
    %c2_550 = arith.constant 2 : index
    %c0_551 = arith.constant 0 : index
    %499 = vector.load %arg22[%c8_549, %c2_550, %c0_551] : memref<10x10x64xf32, #tpu.memory_space<vmem>>, vector<1x1x64xf32>
    %500 = vector.shape_cast %499 : vector<1x1x64xf32> to vector<1x64xf32>
    %501 = vector.shape_cast %498 : vector<1x64xf32> to vector<1x1x64xf32>
    tpu.vector_store %arg22[%c8_549, %c2_550, %c0_551], %501 {strides = array<i32>} : memref<10x10x64xf32, #tpu.memory_space<vmem>>, vector<1x1x64xf32>,
    %c0_552 = arith.constant 0 : index
    %c3712_553 = arith.constant 3712 : index
    %502 = vector.load %arg21[%c0_552, %c3712_553] : memref<1x4096xf32, #tpu.memory_space<vmem>>, vector<1x64xf32>
    %c8_554 = arith.constant 8 : index
    %c3_555 = arith.constant 3 : index
    %c0_556 = arith.constant 0 : index
    %503 = vector.load %arg22[%c8_554, %c3_555, %c0_556] : memref<10x10x64xf32, #tpu.memory_space<vmem>>, vector<1x1x64xf32>
    %504 = vector.shape_cast %503 : vector<1x1x64xf32> to vector<1x64xf32>
    %505 = vector.shape_cast %502 : vector<1x64xf32> to vector<1x1x64xf32>
    tpu.vector_store %arg22[%c8_554, %c3_555, %c0_556], %505 {strides = array<i32>} : memref<10x10x64xf32, #tpu.memory_space<vmem>>, vector<1x1x64xf32>,
    %c0_557 = arith.constant 0 : index
    %c3776_558 = arith.constant 3776 : index
    %506 = vector.load %arg21[%c0_557, %c3776_558] : memref<1x4096xf32, #tpu.memory_space<vmem>>, vector<1x64xf32>
    %c8_559 = arith.constant 8 : index
    %c4_560 = arith.constant 4 : index
    %c0_561 = arith.constant 0 : index
    %507 = vector.load %arg22[%c8_559, %c4_560, %c0_561] : memref<10x10x64xf32, #tpu.memory_space<vmem>>, vector<1x1x64xf32>
    %508 = vector.shape_cast %507 : vector<1x1x64xf32> to vector<1x64xf32>
    %509 = vector.shape_cast %506 : vector<1x64xf32> to vector<1x1x64xf32>
    tpu.vector_store %arg22[%c8_559, %c4_560, %c0_561], %509 {strides = array<i32>} : memref<10x10x64xf32, #tpu.memory_space<vmem>>, vector<1x1x64xf32>,
    %c0_562 = arith.constant 0 : index
    %c3840_563 = arith.constant 3840 : index
    %510 = vector.load %arg21[%c0_562, %c3840_563] : memref<1x4096xf32, #tpu.memory_space<vmem>>, vector<1x64xf32>
    %c8_564 = arith.constant 8 : index
    %c5_565 = arith.constant 5 : index
    %c0_566 = arith.constant 0 : index
    %511 = vector.load %arg22[%c8_564, %c5_565, %c0_566] : memref<10x10x64xf32, #tpu.memory_space<vmem>>, vector<1x1x64xf32>
    %512 = vector.shape_cast %511 : vector<1x1x64xf32> to vector<1x64xf32>
    %513 = vector.shape_cast %510 : vector<1x64xf32> to vector<1x1x64xf32>
    tpu.vector_store %arg22[%c8_564, %c5_565, %c0_566], %513 {strides = array<i32>} : memref<10x10x64xf32, #tpu.memory_space<vmem>>, vector<1x1x64xf32>,
    %c0_567 = arith.constant 0 : index
    %c3904_568 = arith.constant 3904 : index
    %514 = vector.load %arg21[%c0_567, %c3904_568] : memref<1x4096xf32, #tpu.memory_space<vmem>>, vector<1x64xf32>
    %c8_569 = arith.constant 8 : index
    %c6_570 = arith.constant 6 : index
    %c0_571 = arith.constant 0 : index
    %515 = vector.load %arg22[%c8_569, %c6_570, %c0_571] : memref<10x10x64xf32, #tpu.memory_space<vmem>>, vector<1x1x64xf32>
    %516 = vector.shape_cast %515 : vector<1x1x64xf32> to vector<1x64xf32>
    %517 = vector.shape_cast %514 : vector<1x64xf32> to vector<1x1x64xf32>
    tpu.vector_store %arg22[%c8_569, %c6_570, %c0_571], %517 {strides = array<i32>} : memref<10x10x64xf32, #tpu.memory_space<vmem>>, vector<1x1x64xf32>,
    %c0_572 = arith.constant 0 : index
    %c3968_573 = arith.constant 3968 : index
    %518 = vector.load %arg21[%c0_572, %c3968_573] : memref<1x4096xf32, #tpu.memory_space<vmem>>, vector<1x64xf32>
    %c8_574 = arith.constant 8 : index
    %c7_575 = arith.constant 7 : index
    %c0_576 = arith.constant 0 : index
    %519 = vector.load %arg22[%c8_574, %c7_575, %c0_576] : memref<10x10x64xf32, #tpu.memory_space<vmem>>, vector<1x1x64xf32>
    %520 = vector.shape_cast %519 : vector<1x1x64xf32> to vector<1x64xf32>
    %521 = vector.shape_cast %518 : vector<1x64xf32> to vector<1x1x64xf32>
    tpu.vector_store %arg22[%c8_574, %c7_575, %c0_576], %521 {strides = array<i32>} : memref<10x10x64xf32, #tpu.memory_space<vmem>>, vector<1x1x64xf32>,
    %c0_577 = arith.constant 0 : index
    %c4032_578 = arith.constant 4032 : index
    %522 = vector.load %arg21[%c0_577, %c4032_578] : memref<1x4096xf32, #tpu.memory_space<vmem>>, vector<1x64xf32>
    %c8_579 = arith.constant 8 : index
    %c8_580 = arith.constant 8 : index
    %c0_581 = arith.constant 0 : index
    %523 = vector.load %arg22[%c8_579, %c8_580, %c0_581] : memref<10x10x64xf32, #tpu.memory_space<vmem>>, vector<1x1x64xf32>
    %524 = vector.shape_cast %523 : vector<1x1x64xf32> to vector<1x64xf32>
    %525 = vector.shape_cast %522 : vector<1x64xf32> to vector<1x1x64xf32>
    tpu.vector_store %arg22[%c8_579, %c8_580, %c0_581], %525 {strides = array<i32>} : memref<10x10x64xf32, #tpu.memory_space<vmem>>, vector<1x1x64xf32>,
    %cst_582 = arith.constant 0.000000e+00 : f32
    %526 = vector.broadcast %cst_582 : f32 to vector<64x128xf32>
    %c0_583 = arith.constant 0 : index
    %c0_584 = arith.constant 0 : index
    %c0_585 = arith.constant 0 : index
    %527 = vector.load %arg22[%c0_583, %c0_584, %c0_585] : memref<10x10x64xf32, #tpu.memory_space<vmem>>, vector<8x8x64xf32>
    %528 = vector.shape_cast %527 : vector<8x8x64xf32> to vector<64x64xf32>
    %529 = arith.truncf %528 : vector<64x64xf32> to vector<64x64xbf16>
    %c0_586 = arith.constant 0 : index
    %c0_587 = arith.constant 0 : index
    %c0_588 = arith.constant 0 : index
    %530 = vector.load %arg11[%c0_586, %c0_587, %c0_588] : memref<9x64x128xbf16, #tpu.memory_space<vmem>>, vector<1x64x128xbf16>
    %531 = vector.shape_cast %530 : vector<1x64x128xbf16> to vector<64x128xbf16>
    %cst_589 = arith.constant dense<0.000000e+00> : vector<64x128xf32>
    %532 = tpu.matmul %529, %531, %cst_589 {dimension_numbers = #tpu.dot_dimension_numbers<[1], [0], [0], [1], [0, 0, 1, 1], [], []>} : vector<64x64xbf16>, vector<64x128xbf16>, vector<64x128xf32> -> vector<64x128xf32>
    %533 = arith.addf %526, %532 : vector<64x128xf32>
    %c0_590 = arith.constant 0 : index
    %c1_591 = arith.constant 1 : index
    %c0_592 = arith.constant 0 : index
    %534 = vector.load %arg22[%c0_590, %c1_591, %c0_592] : memref<10x10x64xf32, #tpu.memory_space<vmem>>, vector<8x8x64xf32>
    %535 = vector.shape_cast %534 : vector<8x8x64xf32> to vector<64x64xf32>
    %536 = arith.truncf %535 : vector<64x64xf32> to vector<64x64xbf16>
    %c1_593 = arith.constant 1 : index
    %c0_594 = arith.constant 0 : index
    %c0_595 = arith.constant 0 : index
    %537 = vector.load %arg11[%c1_593, %c0_594, %c0_595] : memref<9x64x128xbf16, #tpu.memory_space<vmem>>, vector<1x64x128xbf16>
    %538 = vector.shape_cast %537 : vector<1x64x128xbf16> to vector<64x128xbf16>
    %cst_596 = arith.constant dense<0.000000e+00> : vector<64x128xf32>
    %539 = tpu.matmul %536, %538, %cst_596 {dimension_numbers = #tpu.dot_dimension_numbers<[1], [0], [0], [1], [0, 0, 1, 1], [], []>} : vector<64x64xbf16>, vector<64x128xbf16>, vector<64x128xf32> -> vector<64x128xf32>
    %540 = arith.addf %533, %539 : vector<64x128xf32>
    %c0_597 = arith.constant 0 : index
    %c2_598 = arith.constant 2 : index
    %c0_599 = arith.constant 0 : index
    %541 = vector.load %arg22[%c0_597, %c2_598, %c0_599] : memref<10x10x64xf32, #tpu.memory_space<vmem>>, vector<8x8x64xf32>
    %542 = vector.shape_cast %541 : vector<8x8x64xf32> to vector<64x64xf32>
    %543 = arith.truncf %542 : vector<64x64xf32> to vector<64x64xbf16>
    %c2_600 = arith.constant 2 : index
    %c0_601 = arith.constant 0 : index
    %c0_602 = arith.constant 0 : index
    %544 = vector.load %arg11[%c2_600, %c0_601, %c0_602] : memref<9x64x128xbf16, #tpu.memory_space<vmem>>, vector<1x64x128xbf16>
    %545 = vector.shape_cast %544 : vector<1x64x128xbf16> to vector<64x128xbf16>
    %cst_603 = arith.constant dense<0.000000e+00> : vector<64x128xf32>
    %546 = tpu.matmul %543, %545, %cst_603 {dimension_numbers = #tpu.dot_dimension_numbers<[1], [0], [0], [1], [0, 0, 1, 1], [], []>} : vector<64x64xbf16>, vector<64x128xbf16>, vector<64x128xf32> -> vector<64x128xf32>
    %547 = arith.addf %540, %546 : vector<64x128xf32>
    %c1_604 = arith.constant 1 : index
    %c0_605 = arith.constant 0 : index
    %c0_606 = arith.constant 0 : index
    %548 = vector.load %arg22[%c1_604, %c0_605, %c0_606] : memref<10x10x64xf32, #tpu.memory_space<vmem>>, vector<8x8x64xf32>
    %549 = vector.shape_cast %548 : vector<8x8x64xf32> to vector<64x64xf32>
    %550 = arith.truncf %549 : vector<64x64xf32> to vector<64x64xbf16>
    %c3_607 = arith.constant 3 : index
    %c0_608 = arith.constant 0 : index
    %c0_609 = arith.constant 0 : index
    %551 = vector.load %arg11[%c3_607, %c0_608, %c0_609] : memref<9x64x128xbf16, #tpu.memory_space<vmem>>, vector<1x64x128xbf16>
    %552 = vector.shape_cast %551 : vector<1x64x128xbf16> to vector<64x128xbf16>
    %cst_610 = arith.constant dense<0.000000e+00> : vector<64x128xf32>
    %553 = tpu.matmul %550, %552, %cst_610 {dimension_numbers = #tpu.dot_dimension_numbers<[1], [0], [0], [1], [0, 0, 1, 1], [], []>} : vector<64x64xbf16>, vector<64x128xbf16>, vector<64x128xf32> -> vector<64x128xf32>
    %554 = arith.addf %547, %553 : vector<64x128xf32>
    %c1_611 = arith.constant 1 : index
    %c1_612 = arith.constant 1 : index
    %c0_613 = arith.constant 0 : index
    %555 = vector.load %arg22[%c1_611, %c1_612, %c0_613] : memref<10x10x64xf32, #tpu.memory_space<vmem>>, vector<8x8x64xf32>
    %556 = vector.shape_cast %555 : vector<8x8x64xf32> to vector<64x64xf32>
    %557 = arith.truncf %556 : vector<64x64xf32> to vector<64x64xbf16>
    %c4_614 = arith.constant 4 : index
    %c0_615 = arith.constant 0 : index
    %c0_616 = arith.constant 0 : index
    %558 = vector.load %arg11[%c4_614, %c0_615, %c0_616] : memref<9x64x128xbf16, #tpu.memory_space<vmem>>, vector<1x64x128xbf16>
    %559 = vector.shape_cast %558 : vector<1x64x128xbf16> to vector<64x128xbf16>
    %cst_617 = arith.constant dense<0.000000e+00> : vector<64x128xf32>
    %560 = tpu.matmul %557, %559, %cst_617 {dimension_numbers = #tpu.dot_dimension_numbers<[1], [0], [0], [1], [0, 0, 1, 1], [], []>} : vector<64x64xbf16>, vector<64x128xbf16>, vector<64x128xf32> -> vector<64x128xf32>
    %561 = arith.addf %554, %560 : vector<64x128xf32>
    %c1_618 = arith.constant 1 : index
    %c2_619 = arith.constant 2 : index
    %c0_620 = arith.constant 0 : index
    %562 = vector.load %arg22[%c1_618, %c2_619, %c0_620] : memref<10x10x64xf32, #tpu.memory_space<vmem>>, vector<8x8x64xf32>
    %563 = vector.shape_cast %562 : vector<8x8x64xf32> to vector<64x64xf32>
    %564 = arith.truncf %563 : vector<64x64xf32> to vector<64x64xbf16>
    %c5_621 = arith.constant 5 : index
    %c0_622 = arith.constant 0 : index
    %c0_623 = arith.constant 0 : index
    %565 = vector.load %arg11[%c5_621, %c0_622, %c0_623] : memref<9x64x128xbf16, #tpu.memory_space<vmem>>, vector<1x64x128xbf16>
    %566 = vector.shape_cast %565 : vector<1x64x128xbf16> to vector<64x128xbf16>
    %cst_624 = arith.constant dense<0.000000e+00> : vector<64x128xf32>
    %567 = tpu.matmul %564, %566, %cst_624 {dimension_numbers = #tpu.dot_dimension_numbers<[1], [0], [0], [1], [0, 0, 1, 1], [], []>} : vector<64x64xbf16>, vector<64x128xbf16>, vector<64x128xf32> -> vector<64x128xf32>
    %568 = arith.addf %561, %567 : vector<64x128xf32>
    %c2_625 = arith.constant 2 : index
    %c0_626 = arith.constant 0 : index
    %c0_627 = arith.constant 0 : index
    %569 = vector.load %arg22[%c2_625, %c0_626, %c0_627] : memref<10x10x64xf32, #tpu.memory_space<vmem>>, vector<8x8x64xf32>
    %570 = vector.shape_cast %569 : vector<8x8x64xf32> to vector<64x64xf32>
    %571 = arith.truncf %570 : vector<64x64xf32> to vector<64x64xbf16>
    %c6_628 = arith.constant 6 : index
    %c0_629 = arith.constant 0 : index
    %c0_630 = arith.constant 0 : index
    %572 = vector.load %arg11[%c6_628, %c0_629, %c0_630] : memref<9x64x128xbf16, #tpu.memory_space<vmem>>, vector<1x64x128xbf16>
    %573 = vector.shape_cast %572 : vector<1x64x128xbf16> to vector<64x128xbf16>
    %cst_631 = arith.constant dense<0.000000e+00> : vector<64x128xf32>
    %574 = tpu.matmul %571, %573, %cst_631 {dimension_numbers = #tpu.dot_dimension_numbers<[1], [0], [0], [1], [0, 0, 1, 1], [], []>} : vector<64x64xbf16>, vector<64x128xbf16>, vector<64x128xf32> -> vector<64x128xf32>
    %575 = arith.addf %568, %574 : vector<64x128xf32>
    %c2_632 = arith.constant 2 : index
    %c1_633 = arith.constant 1 : index
    %c0_634 = arith.constant 0 : index
    %576 = vector.load %arg22[%c2_632, %c1_633, %c0_634] : memref<10x10x64xf32, #tpu.memory_space<vmem>>, vector<8x8x64xf32>
    %577 = vector.shape_cast %576 : vector<8x8x64xf32> to vector<64x64xf32>
    %578 = arith.truncf %577 : vector<64x64xf32> to vector<64x64xbf16>
    %c7_635 = arith.constant 7 : index
    %c0_636 = arith.constant 0 : index
    %c0_637 = arith.constant 0 : index
    %579 = vector.load %arg11[%c7_635, %c0_636, %c0_637] : memref<9x64x128xbf16, #tpu.memory_space<vmem>>, vector<1x64x128xbf16>
    %580 = vector.shape_cast %579 : vector<1x64x128xbf16> to vector<64x128xbf16>
    %cst_638 = arith.constant dense<0.000000e+00> : vector<64x128xf32>
    %581 = tpu.matmul %578, %580, %cst_638 {dimension_numbers = #tpu.dot_dimension_numbers<[1], [0], [0], [1], [0, 0, 1, 1], [], []>} : vector<64x64xbf16>, vector<64x128xbf16>, vector<64x128xf32> -> vector<64x128xf32>
    %582 = arith.addf %575, %581 : vector<64x128xf32>
    %c2_639 = arith.constant 2 : index
    %c2_640 = arith.constant 2 : index
    %c0_641 = arith.constant 0 : index
    %583 = vector.load %arg22[%c2_639, %c2_640, %c0_641] : memref<10x10x64xf32, #tpu.memory_space<vmem>>, vector<8x8x64xf32>
    %584 = vector.shape_cast %583 : vector<8x8x64xf32> to vector<64x64xf32>
    %585 = arith.truncf %584 : vector<64x64xf32> to vector<64x64xbf16>
    %c8_642 = arith.constant 8 : index
    %c0_643 = arith.constant 0 : index
    %c0_644 = arith.constant 0 : index
    %586 = vector.load %arg11[%c8_642, %c0_643, %c0_644] : memref<9x64x128xbf16, #tpu.memory_space<vmem>>, vector<1x64x128xbf16>
    %587 = vector.shape_cast %586 : vector<1x64x128xbf16> to vector<64x128xbf16>
    %cst_645 = arith.constant dense<0.000000e+00> : vector<64x128xf32>
    %588 = tpu.matmul %585, %587, %cst_645 {dimension_numbers = #tpu.dot_dimension_numbers<[1], [0], [0], [1], [0, 0, 1, 1], [], []>} : vector<64x64xbf16>, vector<64x128xbf16>, vector<64x128xf32> -> vector<64x128xf32>
    %589 = arith.addf %582, %588 : vector<64x128xf32>
    %c0_646 = arith.constant 0 : index
    %c0_647 = arith.constant 0 : index
    %590 = vector.load %arg12[%c0_646, %c0_647] : memref<1x128xf32, #tpu.memory_space<vmem>>, vector<1x128xf32>
    %591 = vector.broadcast %590 : vector<1x128xf32> to vector<64x128xf32>
    %592 = arith.addf %589, %591 : vector<64x128xf32>
    %cst_648 = arith.constant 0.000000e+00 : f32
    %593 = vector.broadcast %cst_648 : f32 to vector<64x128xf32>
    %594 = arith.maximumf %592, %593 : vector<64x128xf32>
    %cst_649 = arith.constant 0.000000e+00 : f32
    %595 = vector.broadcast %cst_649 : f32 to vector<10x10x128xf32>
    %c0_650 = arith.constant 0 : index
    %c0_651 = arith.constant 0 : index
    %c0_652 = arith.constant 0 : index
    %596 = vector.load %arg23[%c0_650, %c0_651, %c0_652] : memref<10x10x128xf32, #tpu.memory_space<vmem>>, vector<10x10x128xf32>
    tpu.vector_store %arg23[%c0_650, %c0_651, %c0_652], %595 {strides = array<i32>} : memref<10x10x128xf32, #tpu.memory_space<vmem>>, vector<10x10x128xf32>,
    %597 = vector.extract_strided_slice %594 {offsets = [0, 0], sizes = [8, 128], strides = [1, 1]} : vector<64x128xf32> to vector<8x128xf32>
    %c1_653 = arith.constant 1 : index
    %c1_654 = arith.constant 1 : index
    %c0_655 = arith.constant 0 : index
    %598 = vector.load %arg23[%c1_653, %c1_654, %c0_655] : memref<10x10x128xf32, #tpu.memory_space<vmem>>, vector<1x8x128xf32>
    %599 = vector.shape_cast %598 : vector<1x8x128xf32> to vector<8x128xf32>
    %600 = vector.shape_cast %597 : vector<8x128xf32> to vector<1x8x128xf32>
    tpu.vector_store %arg23[%c1_653, %c1_654, %c0_655], %600 {strides = array<i32>} : memref<10x10x128xf32, #tpu.memory_space<vmem>>, vector<1x8x128xf32>,
    %601 = vector.extract_strided_slice %594 {offsets = [8, 0], sizes = [8, 128], strides = [1, 1]} : vector<64x128xf32> to vector<8x128xf32>
    %c2_656 = arith.constant 2 : index
    %c1_657 = arith.constant 1 : index
    %c0_658 = arith.constant 0 : index
    %602 = vector.load %arg23[%c2_656, %c1_657, %c0_658] : memref<10x10x128xf32, #tpu.memory_space<vmem>>, vector<1x8x128xf32>
    %603 = vector.shape_cast %602 : vector<1x8x128xf32> to vector<8x128xf32>
    %604 = vector.shape_cast %601 : vector<8x128xf32> to vector<1x8x128xf32>
    tpu.vector_store %arg23[%c2_656, %c1_657, %c0_658], %604 {strides = array<i32>} : memref<10x10x128xf32, #tpu.memory_space<vmem>>, vector<1x8x128xf32>,
    %605 = vector.extract_strided_slice %594 {offsets = [16, 0], sizes = [8, 128], strides = [1, 1]} : vector<64x128xf32> to vector<8x128xf32>
    %c3_659 = arith.constant 3 : index
    %c1_660 = arith.constant 1 : index
    %c0_661 = arith.constant 0 : index
    %606 = vector.load %arg23[%c3_659, %c1_660, %c0_661] : memref<10x10x128xf32, #tpu.memory_space<vmem>>, vector<1x8x128xf32>
    %607 = vector.shape_cast %606 : vector<1x8x128xf32> to vector<8x128xf32>
    %608 = vector.shape_cast %605 : vector<8x128xf32> to vector<1x8x128xf32>
    tpu.vector_store %arg23[%c3_659, %c1_660, %c0_661], %608 {strides = array<i32>} : memref<10x10x128xf32, #tpu.memory_space<vmem>>, vector<1x8x128xf32>,
    %609 = vector.extract_strided_slice %594 {offsets = [24, 0], sizes = [8, 128], strides = [1, 1]} : vector<64x128xf32> to vector<8x128xf32>
    %c4_662 = arith.constant 4 : index
    %c1_663 = arith.constant 1 : index
    %c0_664 = arith.constant 0 : index
    %610 = vector.load %arg23[%c4_662, %c1_663, %c0_664] : memref<10x10x128xf32, #tpu.memory_space<vmem>>, vector<1x8x128xf32>
    %611 = vector.shape_cast %610 : vector<1x8x128xf32> to vector<8x128xf32>
    %612 = vector.shape_cast %609 : vector<8x128xf32> to vector<1x8x128xf32>
    tpu.vector_store %arg23[%c4_662, %c1_663, %c0_664], %612 {strides = array<i32>} : memref<10x10x128xf32, #tpu.memory_space<vmem>>, vector<1x8x128xf32>,
    %613 = vector.extract_strided_slice %594 {offsets = [32, 0], sizes = [8, 128], strides = [1, 1]} : vector<64x128xf32> to vector<8x128xf32>
    %c5_665 = arith.constant 5 : index
    %c1_666 = arith.constant 1 : index
    %c0_667 = arith.constant 0 : index
    %614 = vector.load %arg23[%c5_665, %c1_666, %c0_667] : memref<10x10x128xf32, #tpu.memory_space<vmem>>, vector<1x8x128xf32>
    %615 = vector.shape_cast %614 : vector<1x8x128xf32> to vector<8x128xf32>
    %616 = vector.shape_cast %613 : vector<8x128xf32> to vector<1x8x128xf32>
    tpu.vector_store %arg23[%c5_665, %c1_666, %c0_667], %616 {strides = array<i32>} : memref<10x10x128xf32, #tpu.memory_space<vmem>>, vector<1x8x128xf32>,
    %617 = vector.extract_strided_slice %594 {offsets = [40, 0], sizes = [8, 128], strides = [1, 1]} : vector<64x128xf32> to vector<8x128xf32>
    %c6_668 = arith.constant 6 : index
    %c1_669 = arith.constant 1 : index
    %c0_670 = arith.constant 0 : index
    %618 = vector.load %arg23[%c6_668, %c1_669, %c0_670] : memref<10x10x128xf32, #tpu.memory_space<vmem>>, vector<1x8x128xf32>
    %619 = vector.shape_cast %618 : vector<1x8x128xf32> to vector<8x128xf32>
    %620 = vector.shape_cast %617 : vector<8x128xf32> to vector<1x8x128xf32>
    tpu.vector_store %arg23[%c6_668, %c1_669, %c0_670], %620 {strides = array<i32>} : memref<10x10x128xf32, #tpu.memory_space<vmem>>, vector<1x8x128xf32>,
    %621 = vector.extract_strided_slice %594 {offsets = [48, 0], sizes = [8, 128], strides = [1, 1]} : vector<64x128xf32> to vector<8x128xf32>
    %c7_671 = arith.constant 7 : index
    %c1_672 = arith.constant 1 : index
    %c0_673 = arith.constant 0 : index
    %622 = vector.load %arg23[%c7_671, %c1_672, %c0_673] : memref<10x10x128xf32, #tpu.memory_space<vmem>>, vector<1x8x128xf32>
    %623 = vector.shape_cast %622 : vector<1x8x128xf32> to vector<8x128xf32>
    %624 = vector.shape_cast %621 : vector<8x128xf32> to vector<1x8x128xf32>
    tpu.vector_store %arg23[%c7_671, %c1_672, %c0_673], %624 {strides = array<i32>} : memref<10x10x128xf32, #tpu.memory_space<vmem>>, vector<1x8x128xf32>,
    %625 = vector.extract_strided_slice %594 {offsets = [56, 0], sizes = [8, 128], strides = [1, 1]} : vector<64x128xf32> to vector<8x128xf32>
    %c8_674 = arith.constant 8 : index
    %c1_675 = arith.constant 1 : index
    %c0_676 = arith.constant 0 : index
    %626 = vector.load %arg23[%c8_674, %c1_675, %c0_676] : memref<10x10x128xf32, #tpu.memory_space<vmem>>, vector<1x8x128xf32>
    %627 = vector.shape_cast %626 : vector<1x8x128xf32> to vector<8x128xf32>
    %628 = vector.shape_cast %625 : vector<8x128xf32> to vector<1x8x128xf32>
    tpu.vector_store %arg23[%c8_674, %c1_675, %c0_676], %628 {strides = array<i32>} : memref<10x10x128xf32, #tpu.memory_space<vmem>>, vector<1x8x128xf32>,
    %cst_677 = arith.constant 0.000000e+00 : f32
    %629 = vector.broadcast %cst_677 : f32 to vector<64x48xf32>
    %c0_678 = arith.constant 0 : index
    %c0_679 = arith.constant 0 : index
    %c0_680 = arith.constant 0 : index
    %630 = vector.load %arg23[%c0_678, %c0_679, %c0_680] : memref<10x10x128xf32, #tpu.memory_space<vmem>>, vector<8x8x128xf32>
    %631 = vector.shape_cast %630 : vector<8x8x128xf32> to vector<64x128xf32>
    %632 = arith.truncf %631 : vector<64x128xf32> to vector<64x128xbf16>
    %c0_681 = arith.constant 0 : index
    %c0_682 = arith.constant 0 : index
    %c0_683 = arith.constant 0 : index
    %633 = vector.load %arg13[%c0_681, %c0_682, %c0_683] : memref<9x128x48xbf16, #tpu.memory_space<vmem>>, vector<1x128x48xbf16>
    %634 = vector.shape_cast %633 : vector<1x128x48xbf16> to vector<128x48xbf16>
    %cst_684 = arith.constant dense<0.000000e+00> : vector<64x48xf32>
    %635 = tpu.matmul %632, %634, %cst_684 {dimension_numbers = #tpu.dot_dimension_numbers<[1], [0], [0], [1], [0, 0, 1, 1], [], []>} : vector<64x128xbf16>, vector<128x48xbf16>, vector<64x48xf32> -> vector<64x48xf32>
    %636 = arith.addf %629, %635 : vector<64x48xf32>
    %c0_685 = arith.constant 0 : index
    %c1_686 = arith.constant 1 : index
    %c0_687 = arith.constant 0 : index
    %637 = vector.load %arg23[%c0_685, %c1_686, %c0_687] : memref<10x10x128xf32, #tpu.memory_space<vmem>>, vector<8x8x128xf32>
    %638 = vector.shape_cast %637 : vector<8x8x128xf32> to vector<64x128xf32>
    %639 = arith.truncf %638 : vector<64x128xf32> to vector<64x128xbf16>
    %c1_688 = arith.constant 1 : index
    %c0_689 = arith.constant 0 : index
    %c0_690 = arith.constant 0 : index
    %640 = vector.load %arg13[%c1_688, %c0_689, %c0_690] : memref<9x128x48xbf16, #tpu.memory_space<vmem>>, vector<1x128x48xbf16>
    %641 = vector.shape_cast %640 : vector<1x128x48xbf16> to vector<128x48xbf16>
    %cst_691 = arith.constant dense<0.000000e+00> : vector<64x48xf32>
    %642 = tpu.matmul %639, %641, %cst_691 {dimension_numbers = #tpu.dot_dimension_numbers<[1], [0], [0], [1], [0, 0, 1, 1], [], []>} : vector<64x128xbf16>, vector<128x48xbf16>, vector<64x48xf32> -> vector<64x48xf32>
    %643 = arith.addf %636, %642 : vector<64x48xf32>
    %c0_692 = arith.constant 0 : index
    %c2_693 = arith.constant 2 : index
    %c0_694 = arith.constant 0 : index
    %644 = vector.load %arg23[%c0_692, %c2_693, %c0_694] : memref<10x10x128xf32, #tpu.memory_space<vmem>>, vector<8x8x128xf32>
    %645 = vector.shape_cast %644 : vector<8x8x128xf32> to vector<64x128xf32>
    %646 = arith.truncf %645 : vector<64x128xf32> to vector<64x128xbf16>
    %c2_695 = arith.constant 2 : index
    %c0_696 = arith.constant 0 : index
    %c0_697 = arith.constant 0 : index
    %647 = vector.load %arg13[%c2_695, %c0_696, %c0_697] : memref<9x128x48xbf16, #tpu.memory_space<vmem>>, vector<1x128x48xbf16>
    %648 = vector.shape_cast %647 : vector<1x128x48xbf16> to vector<128x48xbf16>
    %cst_698 = arith.constant dense<0.000000e+00> : vector<64x48xf32>
    %649 = tpu.matmul %646, %648, %cst_698 {dimension_numbers = #tpu.dot_dimension_numbers<[1], [0], [0], [1], [0, 0, 1, 1], [], []>} : vector<64x128xbf16>, vector<128x48xbf16>, vector<64x48xf32> -> vector<64x48xf32>
    %650 = arith.addf %643, %649 : vector<64x48xf32>
    %c1_699 = arith.constant 1 : index
    %c0_700 = arith.constant 0 : index
    %c0_701 = arith.constant 0 : index
    %651 = vector.load %arg23[%c1_699, %c0_700, %c0_701] : memref<10x10x128xf32, #tpu.memory_space<vmem>>, vector<8x8x128xf32>
    %652 = vector.shape_cast %651 : vector<8x8x128xf32> to vector<64x128xf32>
    %653 = arith.truncf %652 : vector<64x128xf32> to vector<64x128xbf16>
    %c3_702 = arith.constant 3 : index
    %c0_703 = arith.constant 0 : index
    %c0_704 = arith.constant 0 : index
    %654 = vector.load %arg13[%c3_702, %c0_703, %c0_704] : memref<9x128x48xbf16, #tpu.memory_space<vmem>>, vector<1x128x48xbf16>
    %655 = vector.shape_cast %654 : vector<1x128x48xbf16> to vector<128x48xbf16>
    %cst_705 = arith.constant dense<0.000000e+00> : vector<64x48xf32>
    %656 = tpu.matmul %653, %655, %cst_705 {dimension_numbers = #tpu.dot_dimension_numbers<[1], [0], [0], [1], [0, 0, 1, 1], [], []>} : vector<64x128xbf16>, vector<128x48xbf16>, vector<64x48xf32> -> vector<64x48xf32>
    %657 = arith.addf %650, %656 : vector<64x48xf32>
    %c1_706 = arith.constant 1 : index
    %c1_707 = arith.constant 1 : index
    %c0_708 = arith.constant 0 : index
    %658 = vector.load %arg23[%c1_706, %c1_707, %c0_708] : memref<10x10x128xf32, #tpu.memory_space<vmem>>, vector<8x8x128xf32>
    %659 = vector.shape_cast %658 : vector<8x8x128xf32> to vector<64x128xf32>
    %660 = arith.truncf %659 : vector<64x128xf32> to vector<64x128xbf16>
    %c4_709 = arith.constant 4 : index
    %c0_710 = arith.constant 0 : index
    %c0_711 = arith.constant 0 : index
    %661 = vector.load %arg13[%c4_709, %c0_710, %c0_711] : memref<9x128x48xbf16, #tpu.memory_space<vmem>>, vector<1x128x48xbf16>
    %662 = vector.shape_cast %661 : vector<1x128x48xbf16> to vector<128x48xbf16>
    %cst_712 = arith.constant dense<0.000000e+00> : vector<64x48xf32>
    %663 = tpu.matmul %660, %662, %cst_712 {dimension_numbers = #tpu.dot_dimension_numbers<[1], [0], [0], [1], [0, 0, 1, 1], [], []>} : vector<64x128xbf16>, vector<128x48xbf16>, vector<64x48xf32> -> vector<64x48xf32>
    %664 = arith.addf %657, %663 : vector<64x48xf32>
    %c1_713 = arith.constant 1 : index
    %c2_714 = arith.constant 2 : index
    %c0_715 = arith.constant 0 : index
    %665 = vector.load %arg23[%c1_713, %c2_714, %c0_715] : memref<10x10x128xf32, #tpu.memory_space<vmem>>, vector<8x8x128xf32>
    %666 = vector.shape_cast %665 : vector<8x8x128xf32> to vector<64x128xf32>
    %667 = arith.truncf %666 : vector<64x128xf32> to vector<64x128xbf16>
    %c5_716 = arith.constant 5 : index
    %c0_717 = arith.constant 0 : index
    %c0_718 = arith.constant 0 : index
    %668 = vector.load %arg13[%c5_716, %c0_717, %c0_718] : memref<9x128x48xbf16, #tpu.memory_space<vmem>>, vector<1x128x48xbf16>
    %669 = vector.shape_cast %668 : vector<1x128x48xbf16> to vector<128x48xbf16>
    %cst_719 = arith.constant dense<0.000000e+00> : vector<64x48xf32>
    %670 = tpu.matmul %667, %669, %cst_719 {dimension_numbers = #tpu.dot_dimension_numbers<[1], [0], [0], [1], [0, 0, 1, 1], [], []>} : vector<64x128xbf16>, vector<128x48xbf16>, vector<64x48xf32> -> vector<64x48xf32>
    %671 = arith.addf %664, %670 : vector<64x48xf32>
    %c2_720 = arith.constant 2 : index
    %c0_721 = arith.constant 0 : index
    %c0_722 = arith.constant 0 : index
    %672 = vector.load %arg23[%c2_720, %c0_721, %c0_722] : memref<10x10x128xf32, #tpu.memory_space<vmem>>, vector<8x8x128xf32>
    %673 = vector.shape_cast %672 : vector<8x8x128xf32> to vector<64x128xf32>
    %674 = arith.truncf %673 : vector<64x128xf32> to vector<64x128xbf16>
    %c6_723 = arith.constant 6 : index
    %c0_724 = arith.constant 0 : index
    %c0_725 = arith.constant 0 : index
    %675 = vector.load %arg13[%c6_723, %c0_724, %c0_725] : memref<9x128x48xbf16, #tpu.memory_space<vmem>>, vector<1x128x48xbf16>
    %676 = vector.shape_cast %675 : vector<1x128x48xbf16> to vector<128x48xbf16>
    %cst_726 = arith.constant dense<0.000000e+00> : vector<64x48xf32>
    %677 = tpu.matmul %674, %676, %cst_726 {dimension_numbers = #tpu.dot_dimension_numbers<[1], [0], [0], [1], [0, 0, 1, 1], [], []>} : vector<64x128xbf16>, vector<128x48xbf16>, vector<64x48xf32> -> vector<64x48xf32>
    %678 = arith.addf %671, %677 : vector<64x48xf32>
    %c2_727 = arith.constant 2 : index
    %c1_728 = arith.constant 1 : index
    %c0_729 = arith.constant 0 : index
    %679 = vector.load %arg23[%c2_727, %c1_728, %c0_729] : memref<10x10x128xf32, #tpu.memory_space<vmem>>, vector<8x8x128xf32>
    %680 = vector.shape_cast %679 : vector<8x8x128xf32> to vector<64x128xf32>
    %681 = arith.truncf %680 : vector<64x128xf32> to vector<64x128xbf16>
    %c7_730 = arith.constant 7 : index
    %c0_731 = arith.constant 0 : index
    %c0_732 = arith.constant 0 : index
    %682 = vector.load %arg13[%c7_730, %c0_731, %c0_732] : memref<9x128x48xbf16, #tpu.memory_space<vmem>>, vector<1x128x48xbf16>
    %683 = vector.shape_cast %682 : vector<1x128x48xbf16> to vector<128x48xbf16>
    %cst_733 = arith.constant dense<0.000000e+00> : vector<64x48xf32>
    %684 = tpu.matmul %681, %683, %cst_733 {dimension_numbers = #tpu.dot_dimension_numbers<[1], [0], [0], [1], [0, 0, 1, 1], [], []>} : vector<64x128xbf16>, vector<128x48xbf16>, vector<64x48xf32> -> vector<64x48xf32>
    %685 = arith.addf %678, %684 : vector<64x48xf32>
    %c2_734 = arith.constant 2 : index
    %c2_735 = arith.constant 2 : index
    %c0_736 = arith.constant 0 : index
    %686 = vector.load %arg23[%c2_734, %c2_735, %c0_736] : memref<10x10x128xf32, #tpu.memory_space<vmem>>, vector<8x8x128xf32>
    %687 = vector.shape_cast %686 : vector<8x8x128xf32> to vector<64x128xf32>
    %688 = arith.truncf %687 : vector<64x128xf32> to vector<64x128xbf16>
    %c8_737 = arith.constant 8 : index
    %c0_738 = arith.constant 0 : index
    %c0_739 = arith.constant 0 : index
    %689 = vector.load %arg13[%c8_737, %c0_738, %c0_739] : memref<9x128x48xbf16, #tpu.memory_space<vmem>>, vector<1x128x48xbf16>
    %690 = vector.shape_cast %689 : vector<1x128x48xbf16> to vector<128x48xbf16>
    %cst_740 = arith.constant dense<0.000000e+00> : vector<64x48xf32>
    %691 = tpu.matmul %688, %690, %cst_740 {dimension_numbers = #tpu.dot_dimension_numbers<[1], [0], [0], [1], [0, 0, 1, 1], [], []>} : vector<64x128xbf16>, vector<128x48xbf16>, vector<64x48xf32> -> vector<64x48xf32>
    %692 = arith.addf %685, %691 : vector<64x48xf32>
    %c0_741 = arith.constant 0 : index
    %c0_742 = arith.constant 0 : index
    %693 = vector.load %arg14[%c0_741, %c0_742] : memref<1x48xf32, #tpu.memory_space<vmem>>, vector<1x48xf32>
    %694 = vector.broadcast %693 : vector<1x48xf32> to vector<64x48xf32>
    %695 = arith.addf %692, %694 : vector<64x48xf32>
    %696 = arith.negf %695 : vector<64x48xf32>
    %697 = math.exp %696 : vector<64x48xf32>
    %cst_743 = arith.constant 1.000000e+00 : f32
    %698 = vector.broadcast %cst_743 : f32 to vector<64x48xf32>
    %699 = arith.addf %698, %697 : vector<64x48xf32>
    %700 = arith.divf %698, %699 : vector<64x48xf32>
    %c0_744 = arith.constant 0 : index
    %c0_745 = arith.constant 0 : index
    %c0_746 = arith.constant 0 : index
    %701 = vector.load %arg17[%c0_744, %c0_745, %c0_746] : memref<1x64x48xf32, #tpu.memory_space<vmem>>, vector<1x64x48xf32>
    %702 = vector.shape_cast %701 : vector<1x64x48xf32> to vector<64x48xf32>
    %703 = vector.shape_cast %700 : vector<64x48xf32> to vector<1x64x48xf32>
    tpu.vector_store %arg17[%c0_744, %c0_745, %c0_746], %703 {strides = array<i32>} : memref<1x64x48xf32, #tpu.memory_space<vmem>>, vector<1x64x48xf32>,
    return
  }
  func.func @transform_0(%arg0: i32) -> (i32, i32, i32) {
    %c0_i32 = arith.constant 0 : i32
    %c0_i32_0 = arith.constant 0 : i32
    %c0_i32_1 = arith.constant 0 : i32
    return %arg0, %c0_i32, %c0_i32_0 : i32, i32, i32
  }
  func.func @transform_1(%arg0: i32) -> (i32, i32) {
    %c0_i32 = arith.constant 0 : i32
    %c0_i32_0 = arith.constant 0 : i32
    %c0_i32_1 = arith.constant 0 : i32
    return %c0_i32, %c0_i32_0 : i32, i32
  }
  func.func @transform_2(%arg0: i32) -> (i32, i32) {
    %c0_i32 = arith.constant 0 : i32
    %c0_i32_0 = arith.constant 0 : i32
    %c0_i32_1 = arith.constant 0 : i32
    return %c0_i32, %c0_i32_0 : i32, i32
  }
  func.func @transform_3(%arg0: i32) -> (i32, i32, i32) {
    %c0_i32 = arith.constant 0 : i32
    %c0_i32_0 = arith.constant 0 : i32
    %c0_i32_1 = arith.constant 0 : i32
    %c0_i32_2 = arith.constant 0 : i32
    return %c0_i32, %c0_i32_0, %c0_i32_1 : i32, i32, i32
  }
  func.func @transform_4(%arg0: i32) -> (i32, i32) {
    %c0_i32 = arith.constant 0 : i32
    %c0_i32_0 = arith.constant 0 : i32
    %c0_i32_1 = arith.constant 0 : i32
    return %c0_i32, %c0_i32_0 : i32, i32
  }
  func.func @transform_5(%arg0: i32) -> (i32, i32) {
    %c0_i32 = arith.constant 0 : i32
    %c0_i32_0 = arith.constant 0 : i32
    %c0_i32_1 = arith.constant 0 : i32
    return %c0_i32, %c0_i32_0 : i32, i32
  }
  func.func @transform_6(%arg0: i32) -> (i32, i32) {
    %c0_i32 = arith.constant 0 : i32
    %c0_i32_0 = arith.constant 0 : i32
    %c0_i32_1 = arith.constant 0 : i32
    return %c0_i32, %c0_i32_0 : i32, i32
  }
  func.func @transform_7(%arg0: i32) -> (i32, i32, i32) {
    %c0_i32 = arith.constant 0 : i32
    %c0_i32_0 = arith.constant 0 : i32
    %c0_i32_1 = arith.constant 0 : i32
    return %arg0, %c0_i32, %c0_i32_0 : i32, i32, i32
  }
  func.func @transform_8(%arg0: i32) -> (i32, i32) {
    %c0_i32 = arith.constant 0 : i32
    %c0_i32_0 = arith.constant 0 : i32
    %c0_i32_1 = arith.constant 0 : i32
    return %c0_i32, %c0_i32_0 : i32, i32
  }
  func.func @transform_9(%arg0: i32) -> (i32, i32) {
    %c0_i32 = arith.constant 0 : i32
    %c0_i32_0 = arith.constant 0 : i32
    %c0_i32_1 = arith.constant 0 : i32
    return %c0_i32, %c0_i32_0 : i32, i32
  }
  func.func @transform_10(%arg0: i32) -> (i32, i32, i32) {
    %c0_i32 = arith.constant 0 : i32
    %c0_i32_0 = arith.constant 0 : i32
    %c0_i32_1 = arith.constant 0 : i32
    %c0_i32_2 = arith.constant 0 : i32
    return %c0_i32, %c0_i32_0, %c0_i32_1 : i32, i32, i32
  }
  func.func @transform_11(%arg0: i32) -> (i32, i32) {
    %c0_i32 = arith.constant 0 : i32
    %c0_i32_0 = arith.constant 0 : i32
    %c0_i32_1 = arith.constant 0 : i32
    return %c0_i32, %c0_i32_0 : i32, i32
  }
  func.func @transform_12(%arg0: i32) -> (i32, i32, i32) {
    %c0_i32 = arith.constant 0 : i32
    %c0_i32_0 = arith.constant 0 : i32
    %c0_i32_1 = arith.constant 0 : i32
    %c0_i32_2 = arith.constant 0 : i32
    return %c0_i32, %c0_i32_0, %c0_i32_1 : i32, i32, i32
  }
  func.func @transform_13(%arg0: i32) -> (i32, i32) {
    %c0_i32 = arith.constant 0 : i32
    %c0_i32_0 = arith.constant 0 : i32
    %c0_i32_1 = arith.constant 0 : i32
    return %c0_i32, %c0_i32_0 : i32, i32
  }
  func.func @transform_14(%arg0: i32) -> (i32, i32, i32) {
    %c0_i32 = arith.constant 0 : i32
    %c0_i32_0 = arith.constant 0 : i32
    %c0_i32_1 = arith.constant 0 : i32
    return %arg0, %c0_i32, %c0_i32_0 : i32, i32, i32
  }
  func.func @transform_15(%arg0: i32) -> (i32, i32, i32) {
    %c0_i32 = arith.constant 0 : i32
    %c0_i32_0 = arith.constant 0 : i32
    %c0_i32_1 = arith.constant 0 : i32
    return %arg0, %c0_i32, %c0_i32_0 : i32, i32, i32
  }
  func.func @transform_16(%arg0: i32) -> (i32, i32, i32) {
    %c0_i32 = arith.constant 0 : i32
    %c0_i32_0 = arith.constant 0 : i32
    %c0_i32_1 = arith.constant 0 : i32
    return %arg0, %c0_i32, %c0_i32_0 : i32, i32, i32
  }
}

</mosaic_0001>

<bundles_post_ra>
// kernel: vae_forward.1
= control target key start
LH: loop header
LB: loop body
LE: loop exit
PB: predicated region body
PF: predicated region fallthrough
CT: control target
= control target key end

     0   :  { %s20572_s0 = inlined_call_operand.vmem [shape: bf16[2,64,192], index: 0, kind: input, shape index: {}]   ;;  %s20573_s1 = inlined_call_operand.vmem [shape: bf16[192,128], index: 1, kind: input, shape index: {}]   ;;  %s20574_s2 = inlined_call_operand.vmem [shape: f32[1,128], index: 2, kind: input, shape index: {}]   ;;  %s20575_s3 = inlined_call_operand.vmem [shape: bf16[9,128,64], index: 3, kind: input, shape index: {}]   ;;  %s20576_s4 = inlined_call_operand.vmem [shape: f32[1,64], index: 4, kind: input, shape index: {}]   ;;  %s20577_s5 = inlined_call_operand.vmem [shape: bf16[4096,256], index: 5, kind: input, shape index: {}]   ;;  %s20578_s6 = inlined_call_operand.vmem [shape: f32[1,256], index: 6, kind: input, shape index: {}]   ;;  %s20579_s7 = inlined_call_operand.vmem [shape: f32[2,1,128], index: 7, kind: input, shape index: {}]   ;;  %s20580_s8 = inlined_call_operand.vmem [shape: bf16[128,4096], index: 8, kind: input, shape index: {}]   ;;  %s20581_s9 = inlined_call_operand.vmem [shape: f32[1,4096], index: 9, kind: input, shape index: {}]   ;;  %s20582_s10 = inlined_call_operand.vmem [shape: bf16[9,64,128], index: 10, kind: input, shape index: {}]   ;;  %s20583_s11 = inlined_call_operand.vmem [shape: f32[1,128], index: 11, kind: input, shape index: {}]   ;;  %s20584_s12 = inlined_call_operand.vmem [shape: bf16[9,128,48], index: 12, kind: input, shape index: {}]   ;;  %s20585_s13 = inlined_call_operand.vmem [shape: f32[1,48], index: 13, kind: input, shape index: {}]   ;;  %s20586_s14 = inlined_call_operand.hbm [shape: f32[2,1,128], index: 14, kind: output, shape index: {0}]   ;;  %s20587_s15 = inlined_call_operand.hbm [shape: f32[2,1,128], index: 15, kind: output, shape index: {1}]   ;;  %s20588_s16 = inlined_call_operand.vmem [shape: f32[2,64,48], index: 16, kind: output, shape index: {2}]  }
   0x1   :  { %20599 = sst [smem:[#allocation18_spill]] %s20572_s0 }
   0x2   :  { %20600 = sst [smem:[#allocation19_spill]] %s20573_s1 }
   0x3   :  { %20601 = sst [smem:[#allocation20_spill]] %s20574_s2 }
   0x4   :  { %20602 = sst [smem:[#allocation21_spill]] %s20575_s3 }
   0x5   :  { %20603 = sst [smem:[#allocation22_spill]] %s20576_s4 }
   0x6   :  { %20604 = sst [smem:[#allocation23_spill]] %s20577_s5 }
   0x7   :  { %20605 = sst [smem:[#allocation24_spill]] %s20578_s6 }
   0x8   :  { %22 = vsyncpa [#allocation9], 0 }
   0x9   :  { %24 = vsyncpa [#allocation9 + $0x1], 0 }
   0xa   :  { %25 = vsyncpa [#allocation11], 0 }
   0xb   :  { %27 = vsyncpa [#allocation11 + $0x1], 0  ;;  %s16411_s21 = smov 0   ;;  %s16413_s22 = smov 0  }
   0xc   :  { %s16415_s23 = smov 0   ;;  %s16417_s24 = smov 0  }
   0xd LB: > { %20606 = sst [smem:[#allocation14_spill]] %s16314_s23  ;;  %s16432_s25 = sadd.s32 4294967295, %s16318_s24   ;;  %s16318_s24 = sphi %s16417_s24, %s20629_s24   ;;  %s16314_s23 = sphi %s16415_s23, %s20631_s23   ;;  %s16310_s22 = sphi %s16413_s22, %s20633_s22   ;;  %s16306_s21 = sphi %s16411_s21, %s20632_s21  }
   0xe   : > { %s12631_s26 = sadd.s32 4294967294, %s16318_s24   ;;  %s16436_s27 = sadd.s32 1, %s16318_s24  }
   0xf   : > { %20607 = sst [smem:[#allocation15_spill]] %s16436_s27  ;;  %s344_s28 = sadd.s32 1, %s16314_s23 }
  0x10   : > { %s341_s29 = ssub.s32 %s16318_s24, %s16436_s27  ;;  %p354_p0 = scmp.ne.s32.totalorder %s16314_s23, %s16310_s22 }
  0x11   : > { %p342_p1 = scmp.eq.s32.totalorder %s341_s29, 0  ;;  %p355_p2 = scmp.eq.s32.totalorder %s16432_s25, 1 }
  0x12   : > { %p360_p3 = scmp.ne.s32.totalorder %s16310_s22, %s16306_s21  ;;  %p361_p4 = scmp.eq.s32.totalorder %s12631_s26, 1 }
  0x13   : > { %s16447_s30 = scalar_select %p342_p1, %s16314_s23, %s344_s28  }
  0x14   : > { %p16449_p5 = por %p355_p2, %p354_p0  ;;  %p16453_p6 = por %p361_p4, %p360_p3 }
  0x15   : > { %20608 = sst [smem:[#allocation16_spill]] %s16447_s30  ;;  %p12634_p7 = scmp.ge.s32.totalorder %s16318_s24, 1 }
  0x16   : > { %s20610_s17 = scalar_select %p16453_p6, 1, 0 }
  0x17   : > { %p481_p8 = scmp.lt.s32.totalorder %s16318_s24, 3 }
  0x18   : > { %20611 = sst [smem:[#allocation17_spill]] %s20610_s17 }
  0x19   : > { %p482_p9 = pnand %p12634_p7, %p481_p8 }
  0x1a   : > { %s20612_s1 = sld [smem:[#allocation19_spill]] (!%p482_p9)  ;;  %v16320_v1 = vmov (!%p482_p9), 0   ;;  %p542_p10 = scmp.lt.s32.totalorder (!%p482_p9), %s16432_s25, 1  ;;  %vm703_vm0 = vcmask (!%p482_p9), 523264   ;;  %v16321_v29 = vmov (!%p482_p9), 0.0   ;;  %vm9468_vm5 = vcmask (!%p482_p9), 516096  }
  0x1b   : > { %485 = sbr.rel (%p482_p9) target bundleno = 3750 (0xea6), region = 76  ;;  %716 = vmatprep.subr.bf16.mxu0 (!%p482_p9), %v16320_v1  ;;  %s20613_s27 = sld [smem:[#allocation18_spill]] (!%p482_p9)  ;;  %791 = vst [vmem:[#allocation2 + $0x10] sm:$0xff] (!%p482_p9), %v16321_v29  ;;  %792 = vst [vmem:[#allocation2 + $0x18] sm:$0x3] (!%p482_p9), %v16321_v29  ;;  %vm9446_vm6 = vcmask (!%p482_p9), 517120  }
  0x1c   : > { %s20614_s3 = sld [smem:[#allocation21_spill]] (!%p482_p9)  ;;  %789 = vst [vmem:[#allocation2] sm:$0xff] (!%p482_p9), %v16321_v29  ;;  %790 = vst [vmem:[#allocation2 + $0x8] sm:$0x3] (!%p482_p9), %v16321_v29  ;;  %s20615_s2 = sld [smem:[#allocation20_spill]] (!%p482_p9) }
  0x1d   : > { %793 = vst [vmem:[#allocation2 + $0x20] sm:$0xff] (!%p482_p9), %v16321_v29  ;;  %794 = vst [vmem:[#allocation2 + $0x28] sm:$0x3] (!%p482_p9), %v16321_v29  ;;  %s20616_s5 = sld [smem:[#allocation23_spill]] (!%p482_p9)  ;;  %s20617_s4 = sld [smem:[#allocation22_spill]] (!%p482_p9) }
  0x1e   : > { %795 = vst [vmem:[#allocation2 + $0x30] sm:$0xff] (!%p482_p9), %v16321_v29  ;;  %796 = vst [vmem:[#allocation2 + $0x38] sm:$0x3] (!%p482_p9), %v16321_v29  ;;  %s20594_s30 = smov (!%p482_p9), 64   ;;  %s20622_s6 = sld [smem:[#allocation24_spill]] (!%p482_p9) }
  0x1f   : > { %797 = vst [vmem:[#allocation2 + $0x40] sm:$0xff] (!%p482_p9), %v16321_v29  ;;  %798 = vst [vmem:[#allocation2 + $0x48] sm:$0x3] (!%p482_p9), %v16321_v29  ;;  %s18830_s20 = sand.u32 (!%p482_p9), 1, %s16310_s22   ;;  %s16324_s23 = smov (!%p482_p9), [#allocation8]  }
  0x20   : > { %v15215_v0 = vld [vmem:[%s20612_s1] sm:$0xff] (!%p482_p9)   ;;  %v15216_v2 = vld [vmem:[%s20612_s1 + $0x8] sm:$0xff] (!%p482_p9)   ;;  %v15217_v3 = vld [vmem:[%s20612_s1 + $0x10] sm:$0xff] (!%p482_p9)   ;;  %799 = vst [vmem:[#allocation2 + $0x50] sm:$0xff] (!%p482_p9), %v16321_v29 }
  0x21   : > { %717 = vmatpush1.bf16.msra.mxu0 (!%p482_p9), %v15215_v0  ;;  %v15218_v4 = vld [vmem:[%s20612_s1 + $0x18] sm:$0xff] (!%p482_p9)   ;;  %v15219_v6 = vld [vmem:[%s20612_s1 + $0x20] sm:$0xff] (!%p482_p9)   ;;  %v15220_v7 = vld [vmem:[%s20612_s1 + $0x28] sm:$0xff] (!%p482_p9)   ;;  %800 = vst [vmem:[#allocation2 + $0x58] sm:$0x3] (!%p482_p9), %v16321_v29 }
  0x22   : > { %718 = vmatprep.subr.bf16.mxu0 %v16320_v1  ;;  %s16469_s28 = scalar_select %p542_p10, %s16432_s25, 1  ;;  %v15240_v8 = vld [vmem:[%s20614_s3 + $0x80] sm:$0xff]   ;;  %v15242_v9 = vld [vmem:[%s20614_s3 + $0x88] sm:$0xff]   ;;  %v15221_v10 = vld [vmem:[%s20612_s1 + $0x30] sm:$0xff]   ;;  %801 = vst [vmem:[#allocation2 + $0x60] sm:$0xff] %v16321_v29 }
  0x23   : > { %14385 = vmatprep.subr.bf16.mxu1 %v15240_v8  ;;  %v15244_v11 = vld [vmem:[%s20614_s3 + $0x90] sm:$0xff]   ;;  %v15222_v12 = vld [vmem:[%s20612_s1 + $0x38] sm:$0xff]   ;;  %v15223_v13 = vld [vmem:[%s20612_s1 + $0x40] sm:$0xff]   ;;  %802 = vst [vmem:[#allocation2 + $0x68] sm:$0x3] %v16321_v29 }
  0x24   : > { %s20593_s19 = sshll.u32 %s16469_s28, 6  ;;  %14386 = vmatpush3.bf16.msra.mxu1 %v15240_v8  ;;  %v15224_v14 = vld [vmem:[%s20612_s1 + $0x48] sm:$0xff]   ;;  %v15225_v15 = vld [vmem:[%s20612_s1 + $0x50] sm:$0xff]   ;;  %v15226_v16 = vld [vmem:[%s20612_s1 + $0x58] sm:$0xff]   ;;  %803 = vst [vmem:[#allocation2 + $0x70] sm:$0xff] %v16321_v29  ;;  %s549_s29 = scalar_lea.vmem %s20579_s7, %s16469_s28 }
  0x25   : > { %719 = vmatpush1.bf16.msra.mxu0 %v15216_v2  ;;  %s16484_s17 = scalar_lea.vmem %s20613_s27, %s20593_s19  ;;  %14387 = vmatprep.subr.bf16.mxu1 %v15242_v9  ;;  %v15239_v17 = vld [vmem:[%s20614_s3 + $0x40] sm:$0xff]   ;;  %v15241_v20 = vld [vmem:[%s20614_s3 + $0x48] sm:$0xff]   ;;  %v15243_v21 = vld [vmem:[%s20614_s3 + $0x50] sm:$0xff]   ;;  %804 = vst [vmem:[#allocation2 + $0x78] sm:$0x3] %v16321_v29  ;;  %s20597_s19 = scalar_lea.vmem [#allocation8], %s18830_s20 }
  0x26   : > { %720 = vmatprep.subr.bf16.mxu0 %v16320_v1  ;;  %v15229_v5 = vld [vmem:[%s16484_s17 + $0x4] ss:$8 sps:$4 sm:$0xff]   ;;  %v15227_v18 = vld [vmem:[%s16484_s17] ss:$8 sps:$4 sm:$0xff]   ;;  %v15230_v19 = vld [vmem:[%s16484_s17 + $0x14] ss:$8 sps:$4 sm:$0xff]  }
  0x27   : > { %12660 = vmatprep.mubr.msk.bf16.mxu0 %vm703_vm0, %v15229_v5  ;;  %v15232_v22 = vld [vmem:[%s16484_s17 + $0x10] ss:$8 sps:$4 sm:$0xff]   ;;  %v15233_v23 = vld [vmem:[%s16484_s17 + $0x24] ss:$8 sps:$4 sm:$0xff]   ;;  %v15235_v24 = vld [vmem:[%s16484_s17 + $0x20] ss:$8 sps:$4 sm:$0xff]  }
  0x28   : > { %14388 = vmatpush3.bf16.msra.mxu1 %v15242_v9  ;;  %v15236_v25 = vld [vmem:[%s16484_s17 + $0x34] ss:$8 sps:$4 sm:$0xff]   ;;  %v15238_v26 = vld [vmem:[%s16484_s17 + $0x30] ss:$8 sps:$4 sm:$0xff]   ;;  %v15247_v28 = vld [vmem:[%s20614_s3 + $0x60] sm:$0xff]   ;;  %805 = vst [vmem:[#allocation2 + $0x80] sm:$0xff] %v16321_v29 }
  0x29   : > { %721 = vmatpush1.bf16.msra.mxu0 %v15217_v3  ;;  %14389 = vmatprep.subr.bf16.mxu1 %v15244_v11  ;;  %v15245_v27 = vld [vmem:[%s20614_s3 + $0x58] sm:$0xff]   ;;  %806 = vst [vmem:[#allocation2 + $0x88] sm:$0x3] %v16321_v29  ;;  %807 = vst [vmem:[#allocation2 + $0x90] sm:$0xff] %v16321_v29  ;;  %v15249_v31 = vld [vmem:[%s20614_s3 + $0x68] sm:$0xff]   ;;  %s20623_s27 = smov 64  }
  0x2a   : > { %722 = vmatprep.subr.bf16.mxu0 %v16320_v1  ;;  %808 = vst [vmem:[#allocation2 + $0x98] sm:$0x3] %v16321_v29  ;;  %9445 = vst.msk [vmem:[#allocation6] sm:$0xff] %vm703_vm0, %v16321_v29  ;;  %v15246_v30 = vld [vmem:[%s20614_s3 + $0x98] sm:$0xff]   ;;  %v15248_v32 = vld [vmem:[%s20614_s3 + $0xa0] sm:$0xff]  }
  0x2b   : > { %9448 = vst.msk [vmem:[#allocation6 + $0x10] sm:$0xff] %vm703_vm0, %v16321_v29  ;;  %9450 = vst.msk [vmem:[#allocation6 + $0x20] sm:$0xff] %vm703_vm0, %v16321_v29  ;;  %v15251_v33 = vld [vmem:[%s20614_s3 + $0x70] sm:$0xff]   ;;  %v15250_v34 = vld [vmem:[%s20614_s3 + $0xa8] sm:$0xff]  }
  0x2c   : > { %14390 = vmatpush3.bf16.msra.mxu1 %v15244_v11  ;;  %9452 = vst.msk [vmem:[#allocation6 + $0x30] sm:$0xff] %vm703_vm0, %v16321_v29  ;;  %9454 = vst.msk [vmem:[#allocation6 + $0x40] sm:$0xff] %vm703_vm0, %v16321_v29  ;;  %v15253_v35 = vld [vmem:[%s20614_s3 + $0x78] sm:$0xff]   ;;  %v15252_v36 = vld [vmem:[%s20614_s3 + $0xb0] sm:$0xff]  }
  0x2d   : > { %723 = vmatpush1.bf16.msra.mxu0 %v15218_v4  ;;  %9456 = vst.msk [vmem:[#allocation6 + $0x50] sm:$0xff] %vm703_vm0, %v16321_v29  ;;  %9458 = vst.msk [vmem:[#allocation6 + $0x60] sm:$0xff] %vm703_vm0, %v16321_v29  ;;  %14391 = vmatprep.subr.bf16.mxu1 %v15246_v30  ;;  %v15255_v37 = vld [vmem:[%s20614_s3] sm:$0xff]   ;;  %v15254_v38 = vld [vmem:[%s20614_s3 + $0xb8] sm:$0xff]  }
  0x2e   : > { %724 = vmatprep.subr.bf16.mxu0 %v16320_v1  ;;  %9460 = vst.msk [vmem:[#allocation6 + $0x70] sm:$0xff] %vm703_vm0, %v16321_v29  ;;  %9462 = vst.msk [vmem:[#allocation6 + $0x80] sm:$0xff] %vm703_vm0, %v16321_v29  ;;  %v15256_v39 = vld [vmem:[%s20614_s3 + $0xc0] sm:$0xff]   ;;  %v15257_v0 = vld [vmem:[%s20614_s3 + $0x8] sm:$0xff]  }
  0x2f   : > { %9464 = vst.msk [vmem:[#allocation6 + $0x90] sm:$0xff] %vm703_vm0, %v16321_v29  ;;  %11035 = vst [vmem:[#allocation7] sm:$0xff] %v16321_v29  ;;  %v16598_v40 = vld [vmem:[%s20615_s2] ss:$0 sm:$0xff]  ;;  %v853_v45 = vld [vmem:[#allocation2 + $0x1] sm:$0xff]  ;;  %s16228_s2 = sshll.u32 %s16324_s23, 4  ;;  %s16229_s2 = int_to_ptr.vmem [resolvable:$false] %s16228_s2 }
  0x30   : > { %11036 = vst [vmem:[#allocation7 + $0x8] sm:$0x3] %v16321_v29  ;;  %11037 = vst [vmem:[#allocation7 + $0x10] sm:$0xff] %v16321_v29  ;;  %14392 = vmatpush3.bf16.msra.mxu1 %v15246_v30  ;;  %v1108_v56 = vld [vmem:[#allocation2 + $0x2] sm:$0xff]  ;;  %v15259_v8 = vld [vmem:[%s20614_s3 + $0x10] sm:$0xff]  }
  0x31   : > { %725 = vmatpush1.bf16.msra.mxu0 %v15219_v6  ;;  %11038 = vst [vmem:[#allocation7 + $0x18] sm:$0x3] %v16321_v29  ;;  %11039 = vst [vmem:[#allocation7 + $0x20] sm:$0xff] %v16321_v29  ;;  %14393 = vmatprep.subr.bf16.mxu1 %v15248_v32 }
  0x32   : > { %726 = vmatprep.subr.bf16.mxu0 %v16320_v1  ;;  %11040 = vst [vmem:[#allocation7 + $0x28] sm:$0x3] %v16321_v29  ;;  %11041 = vst [vmem:[#allocation7 + $0x30] sm:$0xff] %v16321_v29 }
  0x33   : > { %11042 = vst [vmem:[#allocation7 + $0x38] sm:$0x3] %v16321_v29  ;;  %11043 = vst [vmem:[#allocation7 + $0x40] sm:$0xff] %v16321_v29 }
  0x34   : > { %11044 = vst [vmem:[#allocation7 + $0x48] sm:$0x3] %v16321_v29  ;;  %11045 = vst [vmem:[#allocation7 + $0x50] sm:$0xff] %v16321_v29  ;;  %14394 = vmatpush3.bf16.msra.mxu1 %v15248_v32 }
  0x35   : > { %727 = vmatpush1.bf16.msra.mxu0 %v15220_v7  ;;  %11046 = vst [vmem:[#allocation7 + $0x58] sm:$0x3] %v16321_v29  ;;  %11047 = vst [vmem:[#allocation7 + $0x60] sm:$0xff] %v16321_v29  ;;  %14395 = vmatprep.subr.bf16.mxu1 %v15250_v34 }
  0x36   : > { %728 = vmatprep.subr.bf16.mxu0 %v16320_v1  ;;  %11048 = vst [vmem:[#allocation7 + $0x68] sm:$0x3] %v16321_v29  ;;  %11049 = vst [vmem:[#allocation7 + $0x70] sm:$0xff] %v16321_v29 }
  0x37   : > { %11050 = vst [vmem:[#allocation7 + $0x78] sm:$0x3] %v16321_v29  ;;  %11051 = vst [vmem:[#allocation7 + $0x80] sm:$0xff] %v16321_v29 }
  0x38   : > { %11052 = vst [vmem:[#allocation7 + $0x88] sm:$0x3] %v16321_v29  ;;  %11053 = vst [vmem:[#allocation7 + $0x90] sm:$0xff] %v16321_v29  ;;  %14396 = vmatpush3.bf16.msra.mxu1 %v15250_v34 }
  0x39   : > { %729 = vmatpush1.bf16.msra.mxu0 %v15221_v10  ;;  %11054 = vst [vmem:[#allocation7 + $0x98] sm:$0x3] %v16321_v29  ;;  %14397 = vmatprep.subr.bf16.mxu1 %v15252_v36 }
  0x3a   : > { %730 = vmatprep.subr.bf16.mxu0 %v16320_v1 }
  0x3c   : > { %14398 = vmatpush3.bf16.msra.mxu1 %v15252_v36 }
  0x3d   : > { %731 = vmatpush1.bf16.msra.mxu0 %v15222_v12  ;;  %14399 = vmatprep.subr.bf16.mxu1 %v15254_v38 }
  0x3e   : > { %732 = vmatprep.subr.bf16.mxu0 %v16320_v1 }
  0x40   : > { %14400 = vmatpush3.bf16.msra.mxu1 %v15254_v38  ;;  %v15265_v38 = vld [vmem:[%s20614_s3 + $0x28] sm:$0xff]  }
  0x41   : > { %733 = vmatpush1.bf16.msra.mxu0 %v15223_v13  ;;  %14409 = vmatprep.subr.bf16.mxu1 %v15256_v39 }
  0x42   : > { %734 = vmatprep.subr.bf16.mxu0 %v16320_v1 }
  0x45   : > { %735 = vmatpush1.bf16.msra.mxu0 %v15224_v14  ;;  %v15258_v14 = vld [vmem:[%s20614_s3 + $0xc8] sm:$0xff]  }
  0x46   : > { %736 = vmatprep.subr.bf16.mxu0 %v16320_v1 }
  0x49   : > { %737 = vmatpush1.bf16.msra.mxu0 %v15225_v15 }
  0x4a   : > { %738 = vmatprep.subr.bf16.mxu0 %v16320_v1 }
  0x4d   : > { %739 = vmatpush1.bf16.msra.mxu0 %v15226_v16 }
  0x4e   : > { %14337 = vmatprep.subr.bf16.mxu0 %v15239_v17 }
  0x50   : > { %749 = vmatmul.mubr.bf16.vlgmr.msra.gmra.mrb[0].mxu0 %v15227_v18  ;;  %v15261_v18 = vld [vmem:[%s20614_s3 + $0x18] sm:$0xff]  }
  0x51   : > { %12661 = vmatprep.mubr.msk.bf16.mxu0 %vm703_vm0, %v15230_v19  ;;  %14338 = vmatpush3.bf16.msra.mxu0 %v15239_v17 }
  0x52   : > { %14339 = vmatprep.subr.bf16.mxu0 %v15241_v20 }
  0x55   : > { %14340 = vmatpush3.bf16.msra.mxu0 %v15241_v20 }
  0x56   : > { %14341 = vmatprep.subr.bf16.mxu0 %v15243_v21 }
  0x58   : > { %757 = vmatmul.mubr.bf16.gmra.mrb[4].mxu0 %v15232_v22 }
  0x59   : > { %12662 = vmatprep.mubr.msk.bf16.mxu0 %vm703_vm0, %v15233_v23  ;;  %14342 = vmatpush3.bf16.msra.mxu0 %v15243_v21  ;;  %v15260_v23 = vld [vmem:[%s20614_s3 + $0xd0] sm:$0xff]  }
  0x5a   : > { %14343 = vmatprep.subr.bf16.mxu0 %v15245_v27 }
  0x5d   : > { %14344 = vmatpush3.bf16.msra.mxu0 %v15245_v27 }
  0x5e   : > { %14345 = vmatprep.subr.bf16.mxu0 %v15247_v28 }
  0x60   : > { %765 = vmatmul.mubr.bf16.gmra.mrb[8].mxu0 %v15235_v24 }
  0x61   : > { %12663 = vmatprep.mubr.msk.bf16.mxu0 %vm703_vm0, %v15236_v25  ;;  %14346 = vmatpush3.bf16.msra.mxu0 %v15247_v28 }
  0x62   : > { %14347 = vmatprep.subr.bf16.mxu0 %v15249_v31 }
  0x65   : > { %14348 = vmatpush3.bf16.msra.mxu0 %v15249_v31 }
  0x66   : > { %14349 = vmatprep.subr.bf16.mxu0 %v15251_v33 }
  0x68   : > { %773 = vmatmul.mubr.bf16.gmra.mrb[12].mxu0 %v15238_v26  ;;  %v15263_v26 = vld [vmem:[%s20614_s3 + $0x20] sm:$0xff]  }
  0x69   : > { %14350 = vmatpush3.bf16.msra.mxu0 %v15251_v33 }
  0x6a   : > { %14351 = vmatprep.subr.bf16.mxu0 %v15253_v35 }
  0x6d   : > { %14352 = vmatpush3.bf16.msra.mxu0 %v15253_v35  ;;  %v15262_v35 = vld [vmem:[%s20614_s3 + $0xd8] sm:$0xff]  }
  0x6e   : > { %14361 = vmatprep.subr.bf16.mxu0 %v15255_v37 }
 0x123   : > { %v750_v41 = vpop.f32.mrb[0].mxu0 }
 0x124   : > { %v751_v42 = vadd.f32 %v16598_v40, %v750_v41  ;;  %v752_v43 = vpop.f32.mrb[1].mxu0 }
 0x125   : > { %v753_v44 = vpop.f32.mrb[2].mxu0 }
 0x126   : > { %v16601_v46 = vmax.f32 %v751_v42, 0.0  ;;  %v754_v47 = vadd.f32 %v16598_v40, %v753_v44  ;;  %v755_v48 = vpop.f32.mrb[3].mxu0  ;;  %v15267_v44 = vld [vmem:[%s20614_s3 + $0x30] sm:$0xff]  }
 0x127   : > { %v15266_v48 = vld [vmem:[%s20614_s3 + $0xe8] sm:$0xff]  }
 0x128   : > { %810 = vst [vmem:[#allocation2 + $0x11] sm:$0xff] %v16601_v46  ;;  %v16605_v49 = vmax.f32 %v754_v47, 0.0  ;;  %v861_v50 = vpack.c.bf16 %v16601_v46, %v853_v45 }
 0x12a   : > { %812 = vst [vmem:[#allocation2 + $0x21] sm:$0xff] %v16605_v49  ;;  %14353 = vmatprep.mubr.bf16.mxu0 %v861_v50  ;;  %v1416_v51 = vpack.c.bf16 %v16605_v49, %v16601_v46  ;;  %v15278_v46 = vld [vmem:[%s20614_s3 + $0x138] sm:$0xff]  }
 0x12b   : > { %v758_v52 = vpop.f32.mrb[4].mxu0 }
 0x12c   : > { %v759_v53 = vadd.f32 %v16598_v40, %v758_v52  ;;  %v760_v54 = vpop.f32.mrb[5].mxu0 }
 0x12d   : > { %v761_v55 = vpop.f32.mrb[6].mxu0  ;;  %v15268_v54 = vld [vmem:[%s20614_s3 + $0xf0] sm:$0xff]  }
 0x12e   : > { %v16612_v57 = vmax.f32 %v759_v53, 0.0  ;;  %v762_v58 = vadd.f32 %v16598_v40, %v761_v55  ;;  %v763_v59 = vpop.f32.mrb[7].mxu0  ;;  %v15269_v53 = vld [vmem:[%s20614_s3 + $0x38] sm:$0xff]  }
 0x12f   : > { %v16615_v60 = vld [vmem:[#allocation2 + $0x12] sm:$0xff] }
 0x130   : > { %814 = vst [vmem:[#allocation2 + $0x31] sm:$0xff] %v16612_v57  ;;  %v16618_v61 = vmax.f32 %v762_v58, 0.0  ;;  %v1116_v62 = vpack.c.bf16 %v16615_v60, %v1108_v56  ;;  %v16623_v63 = vpack.c.bf16 %v16612_v57, %v16605_v49  ;;  %v826_v32 = vld [vmem:[#allocation2 + $0x10] sm:$0xff]  ;;  %v15270_v56 = vld [vmem:[%s20614_s3 + $0xf8] sm:$0xff]   ;;  %v15279_v49 = vld [vmem:[%s20614_s3 + $0x140] sm:$0xff]  }
 0x131   : > { %v16628_v2 = vld [vmem:[#allocation2 + $0x22] sm:$0xff] }
 0x132   : > { %816 = vst [vmem:[#allocation2 + $0x41] sm:$0xff] %v16618_v61  ;;  %14401 = vmatprep.mubr.bf16.mxu1 %v1116_v62  ;;  %14354 = vmatmul.mubr.bf16.vlgmr.msra.gmra.mrb[16].mxu0 %v16623_v63  ;;  %v1417_v3 = vpack.c.bf16 %v16618_v61, %v16612_v57  ;;  %v1566_v4 = vpack.c.bf16 %v16628_v2, %v16615_v60  ;;  %v1259_v45 = vld [vmem:[#allocation2 + $0x20] sm:$0xff]  ;;  %v15286_v60 = vld [vmem:[%s20614_s3 + $0x178] sm:$0xff]  }
 0x133   : > { %v766_v5 = vpop.f32.mrb[8].mxu0  ;;  %14362 = vmatpush3.bf16.msra.mxu0 %v15255_v37  ;;  %v1266_v52 = vpack.c.bf16 %v1259_v45, %v826_v32  ;;  %v15283_v57 = vld [vmem:[%s20614_s3 + $0x160] sm:$0xff]  }
 0x134   : > { %v767_v6 = vadd.f32 %v16598_v40, %v766_v5  ;;  %v768_v7 = vpop.f32.mrb[9].mxu0  ;;  %14363 = vmatprep.subr.bf16.mxu0 %v15257_v0  ;;  %v15271_v5 = vld [vmem:[%s20614_s3 + $0x100] sm:$0xff]  }
 0x135   : > { %v769_v9 = vpop.f32.mrb[10].mxu0 }
 0x136   : > { %v16640_v10 = vmax.f32 %v767_v6, 0.0  ;;  %v770_v11 = vadd.f32 %v16598_v40, %v769_v9  ;;  %v771_v12 = vpop.f32.mrb[11].mxu0 }
 0x137   : > { %v16643_v13 = vld [vmem:[#allocation2 + $0x32] sm:$0xff]  ;;  %14364 = vmatpush3.bf16.msra.mxu0 %v15257_v0 }
 0x138   : > { %818 = vst [vmem:[#allocation2 + $0x51] sm:$0xff] %v16640_v10  ;;  %v16649_v15 = vmax.f32 %v770_v11, 0.0  ;;  %v16653_v16 = vpack.c.bf16 %v16643_v13, %v16628_v2  ;;  %14365 = vmatprep.subr.bf16.mxu0 %v15259_v8  ;;  %v16657_v17 = vpack.c.bf16 %v16640_v10, %v16618_v61  ;;  %v828_v55 = vld [vmem:[#allocation2 + $0x30] sm:$0xff]  ;;  %v15284_v61 = vld [vmem:[%s20614_s3 + $0x168] sm:$0xff]   ;;  %v15287_v2 = vld [vmem:[%s20614_s3 + $0x180] sm:$0xff]  }
 0x139   : > { %v16662_v19 = vld [vmem:[#allocation2 + $0x42] sm:$0xff]  ;;  %v16737_v62 = vpack.c.bf16 %v828_v55, %v1259_v45  ;;  %v1865_v45 = vld [vmem:[#allocation2 + $0x91] sm:$0xff] }
 0x13a   : > { %820 = vst [vmem:[#allocation2 + $0x61] sm:$0xff] %v16649_v15  ;;  %14402 = vmatmul.mubr.bf16.vlgmr.msra.gmra.mrb[0].mxu1 %v16653_v16  ;;  %14357 = vmatprep.mubr.bf16.mxu0 %v16657_v17  ;;  %v1418_v20 = vpack.c.bf16 %v16649_v15, %v16640_v10  ;;  %v1567_v21 = vpack.c.bf16 %v16662_v19, %v16643_v13  ;;  %v1261_v58 = vld [vmem:[#allocation2 + $0x40] sm:$0xff]  ;;  %v15289_v10 = vld [vmem:[%s20614_s3 + $0x190] sm:$0xff]   ;;  %v15290_v13 = vld [vmem:[%s20614_s3 + $0x198] sm:$0xff]  }
 0x13b   : > { %14410 = vmatpush3.bf16.msra.mxu1 %v15256_v39  ;;  %v774_v22 = vpop.f32.mrb[12].mxu0  ;;  %14366 = vmatpush3.bf16.msra.mxu0 %v15259_v8  ;;  %v15264_v39 = vld [vmem:[%s20614_s3 + $0xe0] sm:$0xff]   ;;  %v15272_v8 = vld [vmem:[%s20614_s3 + $0x108] sm:$0xff]   ;;  %v1267_v9 = vpack.c.bf16 %v1261_v58, %v828_v55 }
 0x13c   : > { %v775_v24 = vadd.f32 %v16598_v40, %v774_v22  ;;  %14411 = vmatprep.subr.bf16.mxu1 %v15258_v14  ;;  %v776_v25 = vpop.f32.mrb[13].mxu0  ;;  %14367 = vmatprep.subr.bf16.mxu0 %v15261_v18  ;;  %v15274_v22 = vld [vmem:[%s20614_s3 + $0x118] sm:$0xff]  }
 0x13d   : > { %v777_v27 = vpop.f32.mrb[14].mxu0  ;;  %v15276_v25 = vld [vmem:[%s20614_s3 + $0x128] sm:$0xff]  }
 0x13e   : > { %v16678_v28 = vmax.f32 %v775_v24, 0.0  ;;  %v778_v29 = vadd.f32 %v16598_v40, %v777_v27  ;;  %v779_v30 = vpop.f32.mrb[15].mxu0  ;;  %v16708_v40 = vld [vmem:[#allocation2] sm:$0xff]  ;;  %v15281_v27 = vld [vmem:[%s20614_s3 + $0x150] sm:$0xff]  }
 0x13f   : > { %14412 = vmatpush3.bf16.msra.mxu1 %v15258_v14  ;;  %v16681_v31 = vld [vmem:[#allocation2 + $0x52] sm:$0xff]  ;;  %14368 = vmatpush3.bf16.msra.mxu0 %v15261_v18  ;;  %v833_v41 = vpack.c.bf16 %v826_v32, %v16708_v40  ;;  %v15275_v24 = vld [vmem:[%s20614_s3 + $0x120] sm:$0xff]   ;;  %v15296_v32 = vld [vmem:[%s20614_s3 + $0x1c8] sm:$0xff]  }
 0x140   : > { %822 = vst [vmem:[#allocation2 + $0x71] sm:$0xff] %v16678_v28  ;;  %14413 = vmatprep.subr.bf16.mxu1 %v15260_v23  ;;  %v16684_v33 = vmax.f32 %v778_v29, 0.0  ;;  %v16688_v34 = vpack.c.bf16 %v16681_v31, %v16662_v19  ;;  %14369 = vmatprep.subr.bf16.mxu0 %v15263_v26  ;;  %v16695_v36 = vpack.c.bf16 %v16678_v28, %v16649_v15  ;;  %v830_v59 = vld [vmem:[#allocation2 + $0x50] sm:$0xff]  ;;  %v15282_v29 = vld [vmem:[%s20614_s3 + $0x158] sm:$0xff]   ;;  %v15291_v19 = vld [vmem:[%s20614_s3 + $0x1a0] sm:$0xff]  }
 0x141   : > { %v16697_v37 = vld [vmem:[#allocation2 + $0x62] sm:$0xff]  ;;  %v16739_v0 = vpack.c.bf16 %v830_v59, %v1261_v58  ;;  %v15273_v14 = vld [vmem:[%s20614_s3 + $0x110] sm:$0xff]   ;;  %v15294_v30 = vld [vmem:[%s20614_s3 + $0x1b8] sm:$0xff]  }
 0x142   : > { %824 = vst [vmem:[#allocation2 + $0x81] sm:$0xff] %v16684_v33  ;;  %14405 = vmatprep.mubr.bf16.mxu1 %v16688_v34  ;;  %14358 = vmatmul.mubr.bf16.gmra.mrb[20].mxu0 %v16695_v36  ;;  %v1419_v42 = vpack.c.bf16 %v16684_v33, %v16678_v28  ;;  %v1568_v43 = vpack.c.bf16 %v16697_v37, %v16681_v31  ;;  %v1263_v6 = vld [vmem:[#allocation2 + $0x60] sm:$0xff]  ;;  %v15293_v28 = vld [vmem:[%s20614_s3 + $0x1b0] sm:$0xff]  }
 0x143   : > { %14414 = vmatpush3.bf16.msra.mxu1 %v15260_v23  ;;  %14370 = vmatpush3.bf16.msra.mxu0 %v15263_v26  ;;  %v1268_v11 = vpack.c.bf16 %v1263_v6, %v830_v59  ;;  %v15277_v26 = vld [vmem:[%s20614_s3 + $0x130] sm:$0xff]   ;;  %v15295_v31 = vld [vmem:[%s20614_s3 + $0x1c0] sm:$0xff]  }
 0x144   : > { %14415 = vmatprep.subr.bf16.mxu1 %v15262_v35  ;;  %14377 = vmatprep.mubr.bf16.mxu0 %v833_v41  ;;  %v15301_v41 = vld [vmem:[%s20614_s3 + $0x1f0] sm:$0xff]  }
 0x145   : > { %14371 = vmatprep.subr.bf16.mxu0 %v15265_v38 }
 0x147   : > { %14416 = vmatpush3.bf16.msra.mxu1 %v15262_v35  ;;  %v16718_v47 = vld [vmem:[#allocation2 + $0x72] sm:$0xff]  ;;  %14372 = vmatpush3.bf16.msra.mxu0 %v15265_v38 }
 0x148   : > { %14417 = vmatprep.subr.bf16.mxu1 %v15264_v39  ;;  %v16725_v50 = vpack.c.bf16 %v16718_v47, %v16697_v37  ;;  %14373 = vmatprep.subr.bf16.mxu0 %v15267_v44  ;;  %v832_v7 = vld [vmem:[#allocation2 + $0x70] sm:$0xff]  ;;  %v15298_v38 = vld [vmem:[%s20614_s3 + $0x1d8] sm:$0xff]  }
 0x149   : > { %v16749_v12 = vpack.c.bf16 %v832_v7, %v1263_v6  ;;  %v16754_v18 = vld [vmem:[#allocation2 + $0x80] sm:$0xff]  ;;  %v15297_v35 = vld [vmem:[%s20614_s3 + $0x1d0] sm:$0xff]  }
 0x14a   : > { %14406 = vmatmul.mubr.bf16.gmra.mrb[4].mxu1 %v16725_v50  ;;  %v1269_v23 = vpack.c.bf16 %v16754_v18, %v832_v7  ;;  %v16827_v15 = vld [vmem:[#allocation2 + $0x82] sm:$0xff]  ;;  %v1719_v37 = vpack.c.bf16 %v16708_v40, %v16754_v18  ;;  %v15316_v6 = vld [vmem:[%s20616_s5 + $0x14] ss:$8 sps:$4 sm:$0xff]   ;;  %v15314_v7 = vld [vmem:[%s20616_s5 + $0x10] ss:$8 sps:$4 sm:$0xff]  }
 0x14b   : > { %14418 = vmatpush3.bf16.msra.mxu1 %v15264_v39  ;;  %14425 = vmatprep.mubr.bf16.mxu1 %v1266_v52  ;;  %v15299_v39 = vld [vmem:[%s20614_s3 + $0x1e0] sm:$0xff]   ;;  %v15300_v40 = vld [vmem:[%s20614_s3 + $0x1e8] sm:$0xff]   ;;  %v2015_v52 = vld [vmem:[#allocation2 + $0x92] sm:$0xff] }
 0x14c   : > { %14419 = vmatprep.subr.bf16.mxu1 %v15266_v48  ;;  %14374 = vmatpush3.bf16.msra.mxu0 %v15267_v44  ;;  %v15305_v44 = vld [vmem:[%s20614_s3 + $0x210] sm:$0xff]   ;;  %v15323_v18 = vld [vmem:[%s20616_s5 + $0x40] ss:$8 sps:$4 sm:$0xff]  }
 0x14d   : > { %14375 = vmatprep.subr.bf16.mxu0 %v15269_v53 }
 0x14f   : > { %14420 = vmatpush3.bf16.msra.mxu1 %v15266_v48  ;;  %v15306_v48 = vld [vmem:[%s20614_s3 + $0x218] sm:$0xff]  }
 0x150   : > { %14421 = vmatprep.subr.bf16.mxu1 %v15268_v54  ;;  %14376 = vmatpush3.bf16.msra.mxu0 %v15269_v53  ;;  %v2019_v53 = vpack.c.bf16 %v2015_v52, %v16827_v15 }
 0x153   : > { %14422 = vmatpush3.bf16.msra.mxu1 %v15268_v54  ;;  %14378 = vmatmul.mubr.bf16.vlgmr.msra.gmra.mrb[16].mxu0 %v16737_v62 }
 0x154   : > { %14423 = vmatprep.subr.bf16.mxu1 %v15270_v56  ;;  %14381 = vmatprep.mubr.bf16.mxu0 %v16739_v0 }
 0x157   : > { %14424 = vmatpush3.bf16.msra.mxu1 %v15270_v56 }
 0x158   : > { %14433 = vmatprep.subr.bf16.mxu1 %v15271_v5 }
 0x15a   : > { %14426 = vmatmul.mubr.bf16.vlgmr.msra.gmra.mrb[0].mxu1 %v1267_v9  ;;  %v15317_v9 = vld [vmem:[%s20616_s5 + $0x20] ss:$8 sps:$4 sm:$0xff]  }
 0x15b   : > { %14429 = vmatprep.mubr.bf16.mxu1 %v1268_v11  ;;  %14434 = vmatpush3.bf16.msra.mxu1 %v15271_v5  ;;  %v15322_v11 = vld [vmem:[%s20616_s5 + $0x34] ss:$8 sps:$4 sm:$0xff]  }
 0x15c   : > { %14435 = vmatprep.subr.bf16.mxu1 %v15272_v8  ;;  %14382 = vmatmul.mubr.bf16.gmra.mrb[20].mxu0 %v16749_v12 }
 0x15f   : > { %14436 = vmatpush3.bf16.msra.mxu1 %v15272_v8  ;;  %v15319_v8 = vld [vmem:[%s20616_s5 + $0x24] ss:$8 sps:$4 sm:$0xff]  }
 0x160   : > { %14437 = vmatprep.subr.bf16.mxu1 %v15273_v14 }
 0x162   : > { %14430 = vmatmul.mubr.bf16.gmra.mrb[4].mxu1 %v1269_v23  ;;  %v15326_v23 = vld [vmem:[%s20616_s5 + $0x50] ss:$8 sps:$4 sm:$0xff]  }
 0x163   : > { %14438 = vmatpush3.bf16.msra.mxu1 %v15273_v14  ;;  %14449 = vmatprep.mubr.bf16.mxu1 %v1416_v51  ;;  %v15280_v51 = vld [vmem:[%s20614_s3 + $0x148] sm:$0xff]  }
 0x164   : > { %14439 = vmatprep.subr.bf16.mxu1 %v15274_v22  ;;  %v15325_v14 = vld [vmem:[%s20616_s5 + $0x44] ss:$8 sps:$4 sm:$0xff]  }
 0x167   : > { %14440 = vmatpush3.bf16.msra.mxu1 %v15274_v22  ;;  %v15328_v22 = vld [vmem:[%s20616_s5 + $0x54] ss:$8 sps:$4 sm:$0xff]  }
 0x168   : > { %14441 = vmatprep.subr.bf16.mxu1 %v15275_v24 }
 0x16b   : > { %14442 = vmatpush3.bf16.msra.mxu1 %v15275_v24  ;;  %v15331_v24 = vld [vmem:[%s20616_s5 + $0x64] ss:$8 sps:$4 sm:$0xff]  }
 0x16c   : > { %14443 = vmatprep.subr.bf16.mxu1 %v15276_v25 }
 0x16f   : > { %14444 = vmatpush3.bf16.msra.mxu1 %v15276_v25  ;;  %v15329_v25 = vld [vmem:[%s20616_s5 + $0x60] ss:$8 sps:$4 sm:$0xff]  }
 0x170   : > { %14445 = vmatprep.subr.bf16.mxu1 %v15277_v26 }
 0x173   : > { %14446 = vmatpush3.bf16.msra.mxu1 %v15277_v26  ;;  %v15334_v26 = vld [vmem:[%s20616_s5 + $0x74] ss:$8 sps:$4 sm:$0xff]  }
 0x174   : > { %14447 = vmatprep.subr.bf16.mxu1 %v15278_v46 }
 0x177   : > { %14448 = vmatpush3.bf16.msra.mxu1 %v15278_v46  ;;  %v15332_v46 = vld [vmem:[%s20616_s5 + $0x70] ss:$8 sps:$4 sm:$0xff]  }
 0x178   : > { %14457 = vmatprep.subr.bf16.mxu1 %v15279_v49 }
 0x17a   : > { %14450 = vmatmul.mubr.bf16.vlgmr.msra.gmra.mrb[0].mxu1 %v1417_v3  ;;  %v15285_v3 = vld [vmem:[%s20614_s3 + $0x170] sm:$0xff]  }
 0x17b   : > { %14453 = vmatprep.mubr.bf16.mxu1 %v1418_v20  ;;  %14458 = vmatpush3.bf16.msra.mxu1 %v15279_v49  ;;  %v1569_v20 = vpack.c.bf16 %v16827_v15, %v16718_v47  ;;  %v1869_v47 = vpack.c.bf16 %v1865_v45, %v16684_v33  ;;  %v15308_v33 = vld [vmem:[%s20614_s3 + $0x228] sm:$0xff]  }
 0x17c   : > { %14459 = vmatprep.subr.bf16.mxu1 %v15280_v51  ;;  %v15337_v49 = vld [vmem:[%s20616_s5 + $0x84] ss:$8 sps:$4 sm:$0xff]  }
 0x17f   : > { %14460 = vmatpush3.bf16.msra.mxu1 %v15280_v51  ;;  %v15335_v51 = vld [vmem:[%s20616_s5 + $0x80] ss:$8 sps:$4 sm:$0xff]  }
 0x180   : > { %14461 = vmatprep.subr.bf16.mxu1 %v15281_v27 }
 0x182   : > { %14454 = vmatmul.mubr.bf16.gmra.mrb[4].mxu1 %v1419_v42  ;;  %v15303_v42 = vld [vmem:[%s20614_s3 + $0x200] sm:$0xff]  }
 0x183   : > { %14462 = vmatpush3.bf16.msra.mxu1 %v15281_v27  ;;  %14473 = vmatprep.mubr.bf16.mxu1 %v1566_v4  ;;  %v15288_v4 = vld [vmem:[%s20614_s3 + $0x188] sm:$0xff]   ;;  %v15340_v27 = vld [vmem:[%s20616_s5 + $0x94] ss:$8 sps:$4 sm:$0xff]  }
 0x184   : > { %14463 = vmatprep.subr.bf16.mxu1 %v15282_v29 }
 0x187   : > { %14464 = vmatpush3.bf16.msra.mxu1 %v15282_v29  ;;  %v15338_v29 = vld [vmem:[%s20616_s5 + $0x90] ss:$8 sps:$4 sm:$0xff]  }
 0x188   : > { %14465 = vmatprep.subr.bf16.mxu1 %v15283_v57 }
 0x18b   : > { %14466 = vmatpush3.bf16.msra.mxu1 %v15283_v57 }
 0x18c   : > { %14467 = vmatprep.subr.bf16.mxu1 %v15284_v61 }
 0x18f   : > { %14468 = vmatpush3.bf16.msra.mxu1 %v15284_v61  ;;  %v12864_v61 = vld [vmem:[%s20617_s4] ss:$0 sm:$0xff] }
 0x190   : > { %14469 = vmatprep.subr.bf16.mxu1 %v15285_v3 }
 0x193   : > { %14470 = vmatpush3.bf16.msra.mxu1 %v15285_v3 }
 0x194   : > { %14471 = vmatprep.subr.bf16.mxu1 %v15286_v60 }
 0x197   : > { %14472 = vmatpush3.bf16.msra.mxu1 %v15286_v60 }
 0x198   : > { %14481 = vmatprep.subr.bf16.mxu1 %v15287_v2 }
 0x19a   : > { %14474 = vmatmul.mubr.bf16.vlgmr.msra.gmra.mrb[0].mxu1 %v1567_v21  ;;  %v15292_v21 = vld [vmem:[%s20614_s3 + $0x1a8] sm:$0xff]  }
 0x19b   : > { %14477 = vmatprep.mubr.bf16.mxu1 %v1568_v43  ;;  %14482 = vmatpush3.bf16.msra.mxu1 %v15287_v2  ;;  %v15304_v43 = vld [vmem:[%s20614_s3 + $0x208] sm:$0xff]  }
 0x19c   : > { %14483 = vmatprep.subr.bf16.mxu1 %v15288_v4 }
 0x19f   : > { %14484 = vmatpush3.bf16.msra.mxu1 %v15288_v4 }
 0x1a0   : > { %14485 = vmatprep.subr.bf16.mxu1 %v15289_v10 }
 0x1a2   : > { %14478 = vmatmul.mubr.bf16.gmra.mrb[4].mxu1 %v1569_v20 }
 0x1a3   : > { %14486 = vmatpush3.bf16.msra.mxu1 %v15289_v10  ;;  %14497 = vmatprep.mubr.bf16.mxu1 %v16737_v62 }
 0x1a4   : > { %14487 = vmatprep.subr.bf16.mxu1 %v15290_v13 }
 0x1a7   : > { %14488 = vmatpush3.bf16.msra.mxu1 %v15290_v13 }
 0x1a8   : > { %14489 = vmatprep.subr.bf16.mxu1 %v15291_v19 }
 0x1ab   : > { %14490 = vmatpush3.bf16.msra.mxu1 %v15291_v19 }
 0x1ac   : > { %14491 = vmatprep.subr.bf16.mxu1 %v15292_v21 }
 0x1af   : > { %14492 = vmatpush3.bf16.msra.mxu1 %v15292_v21  ;;  %v2190_v21 = vlaneseq }
 0x1b0   : > { %14493 = vmatprep.subr.bf16.mxu1 %v15293_v28 }
 0x1b1   : > { %vm17007_vm1 = vcmp.lt.s32.totalorder %v2190_v21, 64  ;;  %vm2214_vm2 = vcmp.ge.s32.totalorder %v2190_v21, 64  ;;  %vm2215_vm3 = vcmp.lt.s32.totalorder %v2190_v21, 128 }
 0x1b2   : > { %vm17171_vm4 = vmand %vm2214_vm2, %vm2215_vm3 }
 0x1b3   : > { %14494 = vmatpush3.bf16.msra.mxu1 %v15293_v28  ;;  %v16322_v28 = vmov 1966171168  }
 0x1b4   : > { %14495 = vmatprep.subr.bf16.mxu1 %v15294_v30 }
 0x1b7   : > { %14496 = vmatpush3.bf16.msra.mxu1 %v15294_v30  ;;  %v2205_v30 = vunpack.c.l.s4 %v16322_v28 }
 0x1b8   : > { %14505 = vmatprep.subr.bf16.mxu1 %v15295_v31 }
 0x1ba   : > { %14498 = vmatmul.mubr.bf16.vlgmr.msra.gmra.mrb[0].mxu1 %v16739_v0 }
 0x1bb   : > { %14501 = vmatprep.mubr.bf16.mxu1 %v16749_v12  ;;  %14506 = vmatpush3.bf16.msra.mxu1 %v15295_v31  ;;  %v15320_v12 = vld [vmem:[%s20616_s5 + $0x30] ss:$8 sps:$4 sm:$0xff]  }
 0x1bc   : > { %14507 = vmatprep.subr.bf16.mxu1 %v15296_v32 }
 0x1bf   : > { %14508 = vmatpush3.bf16.msra.mxu1 %v15296_v32 }
 0x1c0   : > { %14509 = vmatprep.subr.bf16.mxu1 %v15297_v35 }
 0x1c2   : > { %14502 = vmatmul.mubr.bf16.gmra.mrb[4].mxu1 %v1719_v37 }
 0x1c3   : > { %14510 = vmatpush3.bf16.msra.mxu1 %v15297_v35  ;;  %14521 = vmatprep.mubr.bf16.mxu1 %v16623_v63  ;;  %v15302_v63 = vld [vmem:[%s20614_s3 + $0x1f8] sm:$0xff]  }
 0x1c4   : > { %14511 = vmatprep.subr.bf16.mxu1 %v15298_v38 }
 0x1c7   : > { %14512 = vmatpush3.bf16.msra.mxu1 %v15298_v38  ;;  %v15341_v38 = vld [vmem:[%s20616_s5 + $0xa0] ss:$8 sps:$4 sm:$0xff]  }
 0x1c8   : > { %14513 = vmatprep.subr.bf16.mxu1 %v15299_v39 }
 0x1cb   : > { %14514 = vmatpush3.bf16.msra.mxu1 %v15299_v39  ;;  %v15343_v39 = vld [vmem:[%s20616_s5 + $0xa4] ss:$8 sps:$4 sm:$0xff]  }
 0x1cc   : > { %14515 = vmatprep.subr.bf16.mxu1 %v15300_v40 }
 0x1cf   : > { %14516 = vmatpush3.bf16.msra.mxu1 %v15300_v40 }
 0x1d0   : > { %14517 = vmatprep.subr.bf16.mxu1 %v15301_v41 }
 0x1d3   : > { %14518 = vmatpush3.bf16.msra.mxu1 %v15301_v41 }
 0x1d4   : > { %14519 = vmatprep.subr.bf16.mxu1 %v15302_v63 }
 0x1d7   : > { %14520 = vmatpush3.bf16.msra.mxu1 %v15302_v63 }
 0x1d8   : > { %14529 = vmatprep.subr.bf16.mxu1 %v15303_v42 }
 0x1da   : > { %14522 = vmatmul.mubr.bf16.vlgmr.msra.gmra.mrb[0].mxu1 %v16657_v17  ;;  %v15307_v17 = vld [vmem:[%s20614_s3 + $0x220] sm:$0xff]  }
 0x1db   : > { %14525 = vmatprep.mubr.bf16.mxu1 %v16695_v36  ;;  %14530 = vmatpush3.bf16.msra.mxu1 %v15303_v42  ;;  %v15309_v36 = vld [vmem:[%s20614_s3 + $0x230] sm:$0xff]   ;;  %v2206_v42 = vunpack.c.0.s8 %v2205_v30 }
 0x1dc   : > { %14531 = vmatprep.subr.bf16.mxu1 %v15304_v43 }
 0x1df   : > { %14532 = vmatpush3.bf16.msra.mxu1 %v15304_v43  ;;  %v16988_v43 = vshrl.u32 %v2190_v21, 7 }
 0x1e0   : > { %14533 = vmatprep.subr.bf16.mxu1 %v15305_v44 }
 0x1e2   : > { %14526 = vmatmul.mubr.bf16.gmra.mrb[4].mxu1 %v1869_v47 }
 0x1e3   : > { %14534 = vmatpush3.bf16.msra.mxu1 %v15305_v44  ;;  %14545 = vmatprep.mubr.bf16.mxu1 %v16653_v16  ;;  %v15310_v16 = vld [vmem:[%s20614_s3 + $0x238] sm:$0xff]   ;;  %s16230_s3 = scalar_lea.vmem %s16229_s2, 32 }
 0x1e4   : > { %14535 = vmatprep.subr.bf16.mxu1 %v15306_v48 }
 0x1e7   : > { %14536 = vmatpush3.bf16.msra.mxu1 %v15306_v48 }
 0x1e8   : > { %14537 = vmatprep.subr.bf16.mxu1 %v15307_v17 }
 0x1eb   : > { %14538 = vmatpush3.bf16.msra.mxu1 %v15307_v17  ;;  %v15344_v17 = vld [vmem:[%s20616_s5 + $0xb0] ss:$8 sps:$4 sm:$0xff]  }
 0x1ec   : > { %14539 = vmatprep.subr.bf16.mxu1 %v15308_v33 }
 0x1ef   : > { %14540 = vmatpush3.bf16.msra.mxu1 %v15308_v33  ;;  %v15346_v33 = vld [vmem:[%s20616_s5 + $0xb4] ss:$8 sps:$4 sm:$0xff]  }
 0x1f0   : > { %14541 = vmatprep.subr.bf16.mxu1 %v15309_v36 }
 0x1f3   : > { %14542 = vmatpush3.bf16.msra.mxu1 %v15309_v36 }
 0x1f4   : > { %14543 = vmatprep.subr.bf16.mxu1 %v15310_v16 }
 0x1f7   : > { %14544 = vmatpush3.bf16.msra.mxu1 %v15310_v16 }
 0x1fa   : > { %14546 = vmatmul.mubr.bf16.vlgmr.msra.gmra.mrb[0].mxu1 %v16688_v34  ;;  %v15311_v34 = vld [vmem:[%s20616_s5] ss:$8 sps:$4 sm:$0xff]  }
 0x1fb   : > { %14549 = vmatprep.mubr.bf16.mxu1 %v16725_v50  ;;  %v15313_v50 = vld [vmem:[%s20616_s5 + $0x4] ss:$8 sps:$4 sm:$0xff]  }
 0x1fc   : > { %6184 = vmatprep.subr.bf16.mxu0 %v15313_v50 }
 0x1fd   : > { %6185 = vmatpush1.bf16.msra.mxu0 %v15311_v34 }
 0x1fe   : > { %6186 = vmatprep.subr.bf16.mxu0 %v15316_v6 }
 0x201   : > { %6187 = vmatpush1.bf16.msra.mxu0 %v15314_v7 }
 0x202   : > { %14550 = vmatmul.mubr.bf16.gmra.mrb[4].mxu1 %v2019_v53  ;;  %6188 = vmatprep.subr.bf16.mxu0 %v15319_v8 }
 0x203   : > { %8585 = vmatprep.mubr.bf16.mxu1 %v16320_v1 }
 0x205   : > { %6189 = vmatpush1.bf16.msra.mxu0 %v15317_v9 }
 0x206   : > { %6190 = vmatprep.subr.bf16.mxu0 %v15322_v11 }
 0x209   : > { %6191 = vmatpush1.bf16.msra.mxu0 %v15320_v12 }
 0x20a   : > { %6192 = vmatprep.subr.bf16.mxu0 %v15325_v14 }
 0x20d   : > { %6193 = vmatpush1.bf16.msra.mxu0 %v15323_v18 }
 0x20e   : > { %6194 = vmatprep.subr.bf16.mxu0 %v15328_v22 }
 0x211   : > { %6195 = vmatpush1.bf16.msra.mxu0 %v15326_v23 }
 0x212   : > { %6196 = vmatprep.subr.bf16.mxu0 %v15331_v24 }
 0x215   : > { %6197 = vmatpush1.bf16.msra.mxu0 %v15329_v25 }
 0x216   : > { %6198 = vmatprep.subr.bf16.mxu0 %v15334_v26 }
 0x219   : > { %6199 = vmatpush1.bf16.msra.mxu0 %v15332_v46 }
 0x21a   : > { %6200 = vmatprep.subr.bf16.mxu0 %v15337_v49 }
 0x21d   : > { %6201 = vmatpush1.bf16.msra.mxu0 %v15335_v51  ;;  %v15347_v51 = vld [vmem:[%s20616_s5 + $0xc0] ss:$8 sps:$4 sm:$0xff]  }
 0x21e   : > { %6202 = vmatprep.subr.bf16.mxu0 %v15340_v27 }
 0x221   : > { %6203 = vmatpush1.bf16.msra.mxu0 %v15338_v29  ;;  %v15349_v29 = vld [vmem:[%s20616_s5 + $0xc4] ss:$8 sps:$4 sm:$0xff]  }
 0x222   : > { %6204 = vmatprep.subr.bf16.mxu0 %v15343_v39 }
 0x225   : > { %6205 = vmatpush1.bf16.msra.mxu0 %v15341_v38 }
 0x226   : > { %v14379_v54 = vpop.f32.mrb[16].mxu0  ;;  %6206 = vmatprep.subr.bf16.mxu0 %v15346_v33 }
 0x227   : > { %v1077_v55 = vpop.f32.mrb[17].mxu0 }
 0x228   : > { %v14380_v56 = vpop.f32.mrb[18].mxu0 }
 0x229   : > { %v1080_v58 = vpop.f32.mrb[19].mxu0  ;;  %6207 = vmatpush1.bf16.msra.mxu0 %v15344_v17 }
 0x22a   : > { %6208 = vmatprep.subr.bf16.mxu0 %v15349_v29 }
 0x22d   : > { %6209 = vmatpush1.bf16.msra.mxu0 %v15347_v51 }
 0x22f   : > { %v16908_v59 = vpop.f32.mrb[20].mxu0 }
 0x230   : > { %v16910_v62 = vpop.f32.mrb[21].mxu0 }
 0x231   : > { %v16912_v0 = vpop.f32.mrb[22].mxu0 }
 0x232   : > { %v16914_v5 = vpop.f32.mrb[23].mxu0 }
 0x2cd   : > { %v14547_v57 = vpop.f32.mrb[0].mxu1 }
 0x2ce   : > { %v14913_v3 = vadd.f32 %v14547_v57, %v14379_v54  ;;  %v2119_v60 = vpop.f32.mrb[1].mxu1 }
 0x2cf   : > { %v14914_v2 = vadd.f32 %v2119_v60, %v1077_v55  ;;  %v14548_v4 = vpop.f32.mrb[2].mxu1  ;;  %v17003_v55 = vsub.s32 %v2206_v42, %v16988_v43 }
 0x2d0   : > { %v2167_v10 = vadd.f32 %v14913_v3, %v12864_v61  ;;  %v14915_v15 = vadd.f32 %v14548_v4, %v14380_v56  ;;  %v2122_v20 = vpop.f32.mrb[3].mxu1  ;;  %v15350_v4 = vld [vmem:[%s20616_s5 + $0xd0] ss:$8 sps:$4 sm:$0xff]  }
 0x2d1   : > { %v2165_v13 = vadd.f32 %v14914_v2, %v12864_v61  ;;  %v14916_v19 = vadd.f32 %v2122_v20, %v1080_v58 }
 0x2d2   : > { %v2175_v31 = vmax.f32 %v2167_v10, 0.0  ;;  %v2168_v32 = vadd.f32 %v14915_v15, %v12864_v61  ;;  %v15352_v15 = vld [vmem:[%s20616_s5 + $0xd4] ss:$8 sps:$4 sm:$0xff]  }
 0x2d3   : > { %v2173_v35 = vmax.f32 %v2165_v13, 0.0  ;;  %v2166_v37 = vadd.f32 %v14916_v19, %v12864_v61  ;;  %6210 = vmatprep.subr.bf16.mxu0 %v15352_v15 }
 0x2d4   : > { %2183 = vst.msk [vmem:[#allocation3 + $0x10] sm:$0xff] %vm703_vm0, %v2175_v31  ;;  %v2176_v40 = vmax.f32 %v2168_v32, 0.0  ;;  %6211 = vmatpush1.bf16.msra.mxu0 %v15350_v4  ;;  %v15353_v31 = vld [vmem:[%s20616_s5 + $0xe0] ss:$8 sps:$4 sm:$0xff]  }
 0x2d5   : > { %2181 = vst.msk [vmem:[#allocation3] sm:$0xff] %vm703_vm0, %v2173_v35  ;;  %v2174_v41 = vmax.f32 %v2166_v37, 0.0  ;;  %v14551_v63 = vpop.f32.mrb[4].mxu1  ;;  %v15355_v35 = vld [vmem:[%s20616_s5 + $0xe4] ss:$8 sps:$4 sm:$0xff]  }
 0x2d6   : > { %2184 = vst.msk [vmem:[#allocation3 + $0x18] sm:$0xff] %vm703_vm0, %v2176_v40  ;;  %v14917_v44 = vadd.f32 %v14551_v63, %v16908_v59  ;;  %v2135_v45 = vpop.f32.mrb[5].mxu1  ;;  %6212 = vmatprep.subr.bf16.mxu0 %v15355_v35  ;;  %v15356_v63 = vld [vmem:[%s20616_s5 + $0xf0] ss:$8 sps:$4 sm:$0xff]  }
 0x2d7   : > { %2182 = vst.msk [vmem:[#allocation3 + $0x8] sm:$0xff] %vm703_vm0, %v2174_v41  ;;  %v14918_v47 = vadd.f32 %v2135_v45, %v16910_v62  ;;  %v14552_v48 = vpop.f32.mrb[6].mxu1 }
 0x2d8   : > { %v2171_v36 = vadd.f32 %v14917_v44, %v12864_v61  ;;  %v14919_v16 = vadd.f32 %v14552_v48, %v16912_v0  ;;  %v2138_v52 = vpop.f32.mrb[7].mxu1  ;;  %6213 = vmatpush1.bf16.msra.mxu0 %v15353_v31  ;;  %v15358_v44 = vld [vmem:[%s20616_s5 + $0xf4] ss:$8 sps:$4 sm:$0xff]  }
 0x2d9   : > { %v2169_v53 = vadd.f32 %v14918_v47, %v12864_v61  ;;  %v14920_v54 = vadd.f32 %v2138_v52, %v16914_v5  ;;  %6214 = vmatprep.subr.bf16.mxu0 %v15358_v44 }
 0x2da   : > { %v2179_v56 = vmax.f32 %v2171_v36, 0.0  ;;  %v2172_v58 = vadd.f32 %v14919_v16, %v12864_v61 }
 0x2db   : > { %v2177_v59 = vmax.f32 %v2169_v53, 0.0  ;;  %v2170_v62 = vadd.f32 %v14920_v54, %v12864_v61  ;;  %v12874_v13 = vld.sshfl [vmem:[#allocation3 + $0x13] sm:$0x1 pattern:$0x75316420] }
 0x2dc   : > { %2187 = vst.msk [vmem:[#allocation3 + $0x30] sm:$0xff] %vm703_vm0, %v2179_v56  ;;  %v2180_v34 = vmax.f32 %v2172_v58, 0.0  ;;  %v12867_v50 = vld.sshfl [vmem:[#allocation3 + $0x5] sm:$0x1 pattern:$0x75316420]  ;;  %v2411_v32 = vrot.slane %v12874_v13, %v17003_v55  ;;  %6215 = vmatpush1.bf16.msra.mxu0 %v15356_v63 }
 0x2dd   : > { %2185 = vst.msk [vmem:[#allocation3 + $0x20] sm:$0xff] %vm703_vm0, %v2177_v59  ;;  %v2178_v5 = vmax.f32 %v2170_v62, 0.0  ;;  %v2257_v6 = vrot.slane %v12867_v50, %v17003_v55  ;;  %v12865_v7 = vld.sshfl [vmem:[#allocation3 + $0x1] sm:$0x1 pattern:$0x75316420] }
 0x2de   : > { %2188 = vst.msk [vmem:[#allocation3 + $0x38] sm:$0xff] %vm703_vm0, %v2180_v34  ;;  %v2210_v8 = vrot.slane %v12865_v7, %v17003_v55  ;;  %v12868_v9 = vld.sshfl [vmem:[#allocation3 + $0x7] sm:$0x1 pattern:$0x75316420] }
 0x2df   : > { %v2240_v11 = vld [vmem:[#allocation3 + $0x4] sm:$0x1]  ;;  %2186 = vst.msk [vmem:[#allocation3 + $0x28] sm:$0xff] %vm703_vm0, %v2178_v5  ;;  %2258 = vrot.lane.b32.xlu1 %v2257_v6, %s20594_s30  ;;  %v2189_v14 = vld [vmem:[#allocation3] sm:$0x1]  ;;  %v2279_v22 = vrot.slane %v12868_v9, %v17003_v55 }
 0x2e0   : > { %v12866_v12 = vld.sshfl [vmem:[#allocation3 + $0x3] sm:$0x1 pattern:$0x75316420]  ;;  %2241 = vst.msk [vmem:[#allocation4 + $0x2] sm:$0x1] %vm17007_vm1, %v2240_v11  ;;  %2211 = vrot.lane.b32.xlu0 %v2210_v8, %s20594_s30 }
 0x2e1   : > { %2194 = vst.msk [vmem:[#allocation4] sm:$0x1] %vm17007_vm1, %v2189_v14  ;;  %v2262_v18 = vld [vmem:[#allocation3 + $0x6] sm:$0x1]  ;;  %v2218_v23 = vld [vmem:[#allocation3 + $0x2] sm:$0x1]  ;;  %v2235_v24 = vrot.slane %v12866_v12, %v17003_v55 }
 0x2e2   : > { %2263 = vst.msk [vmem:[#allocation4 + $0x3] sm:$0x1] %vm17007_vm1, %v2262_v18  ;;  %v12870_v25 = vld.sshfl [vmem:[#allocation3 + $0xb] sm:$0x1 pattern:$0x75316420] }
 0x2e3   : > { %2219 = vst.msk [vmem:[#allocation4 + $0x1] sm:$0x1] %vm17007_vm1, %v2218_v23  ;;  %v2306_v26 = vld [vmem:[#allocation3 + $0xa] sm:$0x1]  ;;  %2280 = vrot.lane.b32.xlu1 %v2279_v22, %s20594_s30  ;;  %v2284_v49 = vld [vmem:[#allocation3 + $0x8] sm:$0x1]  ;;  %v2323_v27 = vrot.slane %v12870_v25, %v17003_v55 }
 0x2e4   : > { %v12869_v46 = vld.sshfl [vmem:[#allocation3 + $0x9] sm:$0x1 pattern:$0x75316420]  ;;  %2307 = vst.msk [vmem:[#allocation4 + $0x5] sm:$0x1] %vm17007_vm1, %v2306_v26  ;;  %2236 = vrot.lane.b32.xlu0 %v2235_v24, %s20594_s30 }
 0x2e5   : > { %2285 = vst.msk [vmem:[#allocation4 + $0x4] sm:$0x1] %vm17007_vm1, %v2284_v49  ;;  %v2301_v57 = vrot.slane %v12869_v46, %v17003_v55  ;;  %v12872_v61 = vld.sshfl [vmem:[#allocation3 + $0xf] sm:$0x1 pattern:$0x75316420] }
 0x2e6   : > { %v2350_v3 = vld [vmem:[#allocation3 + $0xe] sm:$0x1]  ;;  %v12871_v60 = vld.sshfl [vmem:[#allocation3 + $0xd] sm:$0x1 pattern:$0x75316420]  ;;  %v2367_v10 = vrot.slane %v12872_v61, %v17003_v55 }
 0x2e7   : > { %2324 = vrot.lane.b32.xlu1 %v2323_v27, %s20594_s30  ;;  %2351 = vst.msk [vmem:[#allocation4 + $0x7] sm:$0x1] %vm17007_vm1, %v2350_v3  ;;  %v2328_v2 = vld [vmem:[#allocation3 + $0xc] sm:$0x1]  ;;  %v2345_v20 = vrot.slane %v12871_v60, %v17003_v55  ;;  %v2394_v19 = vld [vmem:[#allocation3 + $0x12] sm:$0x1] }
 0x2e8   : > { %2302 = vrot.lane.b32.xlu0 %v2301_v57, %s20594_s30  ;;  %2329 = vst.msk [vmem:[#allocation4 + $0x6] sm:$0x1] %vm17007_vm1, %v2328_v2  ;;  %v12873_v28 = vld.sshfl [vmem:[#allocation3 + $0x11] sm:$0x1 pattern:$0x75316420] }
 0x2e9   : > { %2395 = vst.msk [vmem:[#allocation4 + $0x9] sm:$0x1] %vm17007_vm1, %v2394_v19  ;;  %v2372_v30 = vld [vmem:[#allocation3 + $0x10] sm:$0x1]  ;;  %v2389_v37 = vrot.slane %v12873_v28, %v17003_v55  ;;  %v2438_v39 = vld [vmem:[#allocation3 + $0x16] sm:$0x1] }
 0x2ea   : > { %2373 = vst.msk [vmem:[#allocation4 + $0x8] sm:$0x1] %vm17007_vm1, %v2372_v30  ;;  %v12876_v38 = vld.sshfl [vmem:[#allocation3 + $0x17] sm:$0x1 pattern:$0x75316420] }
 0x2eb   : > { %2368 = vrot.lane.b32.xlu1 %v2367_v10, %s20594_s30  ;;  %v12875_v40 = vld.sshfl [vmem:[#allocation3 + $0x15] sm:$0x1 pattern:$0x75316420]  ;;  %2439 = vst.msk [vmem:[#allocation4 + $0xb] sm:$0x1] %vm17007_vm1, %v2438_v39  ;;  %v2455_v42 = vrot.slane %v12876_v38, %v17003_v55 }
 0x2ec   : > { %2346 = vrot.lane.b32.xlu0 %v2345_v20, %s20594_s30  ;;  %v2416_v41 = vld [vmem:[#allocation3 + $0x14] sm:$0x1]  ;;  %v2433_v45 = vrot.slane %v12875_v40, %v17003_v55  ;;  %v12878_v47 = vld.sshfl [vmem:[#allocation3 + $0x1b] sm:$0x1 pattern:$0x75316420] }
 0x2ed   : > { %2417 = vst.msk [vmem:[#allocation4 + $0xa] sm:$0x1] %vm17007_vm1, %v2416_v41  ;;  %v2482_v48 = vld [vmem:[#allocation3 + $0x1a] sm:$0x1]  ;;  %v2460_v33 = vld [vmem:[#allocation3 + $0x18] sm:$0x1]  ;;  %v2499_v36 = vrot.slane %v12878_v47, %v17003_v55 }
 0x2ee   : > { %v12877_v17 = vld.sshfl [vmem:[#allocation3 + $0x19] sm:$0x1 pattern:$0x75316420]  ;;  %2483 = vst.msk [vmem:[#allocation4 + $0xd] sm:$0x1] %vm17007_vm1, %v2482_v48 }
 0x2ef   : > { %2412 = vrot.lane.b32.xlu1 %v2411_v32, %s20594_s30  ;;  %2461 = vst.msk [vmem:[#allocation4 + $0xc] sm:$0x1] %vm17007_vm1, %v2460_v33  ;;  %v2477_v16 = vrot.slane %v12877_v17, %v17003_v55  ;;  %v12880_v52 = vld.sshfl [vmem:[#allocation3 + $0x1f] sm:$0x1 pattern:$0x75316420] }
 0x2f0   : > { %2390 = vrot.lane.b32.xlu0 %v2389_v37, %s20594_s30  ;;  %v15361_v53 = vld [vmem:[%s20616_s5 + $0x104] ss:$8 sps:$4 sm:$0xff]   ;;  %v12879_v54 = vld.sshfl [vmem:[#allocation3 + $0x1d] sm:$0x1 pattern:$0x75316420]  ;;  %v2543_v58 = vrot.slane %v12880_v52, %v17003_v55 }
 0x2f1   : > { %6225 = vmatprep.subr.bf16.mxu0 %v15361_v53  ;;  %v2526_v56 = vld [vmem:[#allocation3 + $0x1e] sm:$0x1]  ;;  %v12882_v59 = vld.sshfl [vmem:[#allocation3 + $0x23] sm:$0x1 pattern:$0x75316420]  ;;  %v2521_v34 = vrot.slane %v12879_v54, %v17003_v55 }
 0x2f2   : > { %2527 = vst.msk [vmem:[#allocation4 + $0xf] sm:$0x1] %vm17007_vm1, %v2526_v56  ;;  %v2504_v62 = vld [vmem:[#allocation3 + $0x1c] sm:$0x1]  ;;  %v2570_v5 = vld [vmem:[#allocation3 + $0x22] sm:$0x1]  ;;  %v2587_v9 = vrot.slane %v12882_v59, %v17003_v55 }
 0x2f3   : > { %2456 = vrot.lane.b32.xlu1 %v2455_v42, %s20594_s30  ;;  %v12881_v50 = vld.sshfl [vmem:[#allocation3 + $0x21] sm:$0x1 pattern:$0x75316420]  ;;  %2505 = vst.msk [vmem:[#allocation4 + $0xe] sm:$0x1] %vm17007_vm1, %v2504_v62 }
 0x2f4   : > { %2434 = vrot.lane.b32.xlu0 %v2433_v45, %s20594_s30  ;;  %v2548_v6 = vld [vmem:[#allocation3 + $0x20] sm:$0x1]  ;;  %v12884_v7 = vld.sshfl [vmem:[#allocation3 + $0x27] sm:$0x1 pattern:$0x75316420]  ;;  %v2565_v14 = vrot.slane %v12881_v50, %v17003_v55 }
 0x2f5   : > { %2571 = vst.msk [vmem:[#allocation4 + $0x11] sm:$0x1] %vm17007_vm1, %v2570_v5  ;;  %2549 = vst.msk [vmem:[#allocation4 + $0x10] sm:$0x1] %vm17007_vm1, %v2548_v6  ;;  %v2614_v8 = vld [vmem:[#allocation3 + $0x26] sm:$0x1]  ;;  %v2631_v46 = vrot.slane %v12884_v7, %v17003_v55 }
 0x2f6   : > { %v12883_v11 = vld.sshfl [vmem:[#allocation3 + $0x25] sm:$0x1 pattern:$0x75316420]  ;;  %2615 = vst.msk [vmem:[#allocation4 + $0x13] sm:$0x1] %vm17007_vm1, %v2614_v8 }
 0x2f7   : > { %2500 = vrot.lane.b32.xlu1 %v2499_v36, %s20594_s30  ;;  %v2592_v12 = vld [vmem:[#allocation3 + $0x24] sm:$0x1]  ;;  %v2658_v18 = vld [vmem:[#allocation3 + $0x2a] sm:$0x1]  ;;  %v2636_v22 = vld [vmem:[#allocation3 + $0x28] sm:$0x1]  ;;  %v2609_v29 = vrot.slane %v12883_v11, %v17003_v55 }
 0x2f8   : > { %2478 = vrot.lane.b32.xlu0 %v2477_v16, %s20594_s30  ;;  %2593 = vst.msk [vmem:[#allocation4 + $0x12] sm:$0x1] %vm17007_vm1, %v2592_v12  ;;  %2659 = vst.msk [vmem:[#allocation4 + $0x15] sm:$0x1] %vm17007_vm1, %v2658_v18  ;;  %v2702_v23 = vld [vmem:[#allocation3 + $0x2e] sm:$0x1] }
 0x2f9   : > { %2637 = vst.msk [vmem:[#allocation4 + $0x14] sm:$0x1] %vm17007_vm1, %v2636_v22  ;;  %v2680_v24 = vld [vmem:[#allocation3 + $0x2c] sm:$0x1]  ;;  %2703 = vst.msk [vmem:[#allocation4 + $0x17] sm:$0x1] %vm17007_vm1, %v2702_v23 }
 0x2fa   : > { %v12886_v25 = vld.sshfl [vmem:[#allocation3 + $0x2b] sm:$0x1 pattern:$0x75316420]  ;;  %2681 = vst.msk [vmem:[#allocation4 + $0x16] sm:$0x1] %vm17007_vm1, %v2680_v24 }
 0x2fb   : > { %2544 = vrot.lane.b32.xlu1 %v2543_v58, %s20594_s30  ;;  %v2746_v26 = vld [vmem:[#allocation3 + $0x32] sm:$0x1]  ;;  %v2724_v49 = vld [vmem:[#allocation3 + $0x30] sm:$0x1]  ;;  %v2790_v51 = vld [vmem:[#allocation3 + $0x36] sm:$0x1]  ;;  %v2675_v4 = vrot.slane %v12886_v25, %v17003_v55 }
 0x2fc   : > { %2522 = vrot.lane.b32.xlu0 %v2521_v34, %s20594_s30  ;;  %2747 = vst.msk [vmem:[#allocation4 + $0x19] sm:$0x1] %vm17007_vm1, %v2746_v26  ;;  %v2768_v27 = vld [vmem:[#allocation3 + $0x34] sm:$0x1]  ;;  %2725 = vst.msk [vmem:[#allocation4 + $0x18] sm:$0x1] %vm17007_vm1, %v2724_v49 }
 0x2fd   : > { %2791 = vst.msk [vmem:[#allocation4 + $0x1b] sm:$0x1] %vm17007_vm1, %v2790_v51  ;;  %2769 = vst.msk [vmem:[#allocation4 + $0x1a] sm:$0x1] %vm17007_vm1, %v2768_v27  ;;  %v2834_v57 = vld [vmem:[#allocation3 + $0x3a] sm:$0x1] }
 0x2fe   : > { %v2812_v61 = vld [vmem:[#allocation3 + $0x38] sm:$0x1]  ;;  %v2878_v3 = vld [vmem:[#allocation3 + $0x3e] sm:$0x1]  ;;  %2835 = vst.msk [vmem:[#allocation4 + $0x1d] sm:$0x1] %vm17007_vm1, %v2834_v57 }
 0x2ff   : > { %2588 = vrot.lane.b32.xlu1 %v2587_v9, %s20594_s30  ;;  %v12885_v60 = vld.sshfl [vmem:[#allocation3 + $0x29] sm:$0x1 pattern:$0x75316420]  ;;  %2813 = vst.msk [vmem:[#allocation4 + $0x1c] sm:$0x1] %vm17007_vm1, %v2812_v61 }
 0x300   : > { %2566 = vrot.lane.b32.xlu0 %v2565_v14, %s20594_s30  ;;  %2879 = vst.msk [vmem:[#allocation4 + $0x1f] sm:$0x1] %vm17007_vm1, %v2878_v3  ;;  %v2856_v2 = vld [vmem:[#allocation3 + $0x3c] sm:$0x1]  ;;  %v2653_v10 = vrot.slane %v12885_v60, %v17003_v55  ;;  %v17196_v59 = vsub.s32 1, %v16988_v43  ;;  %v17199_v62 = vsub.s32 0, %v16988_v43 }
 0x301   : > { %2857 = vst.msk [vmem:[#allocation4 + $0x1e] sm:$0x1] %vm17007_vm1, %v2856_v2  ;;  %v12888_v15 = vld.sshfl [vmem:[#allocation3 + $0x2f] sm:$0x1 pattern:$0x75316420] }
 0x302   : > { %v12887_v20 = vld.sshfl [vmem:[#allocation3 + $0x2d] sm:$0x1 pattern:$0x75316420]  ;;  %v2719_v13 = vrot.slane %v12888_v15, %v17003_v55  ;;  %v17202_v34 = vsub.s32 3, %v16988_v43 }
 0x303   : > { %2632 = vrot.lane.b32.xlu1 %v2631_v46, %s20594_s30  ;;  %v2697_v19 = vrot.slane %v12887_v20, %v17003_v55  ;;  %v12890_v28 = vld.sshfl [vmem:[#allocation3 + $0x33] sm:$0x1 pattern:$0x75316420]  ;;  %v15359_v14 = vld [vmem:[%s20616_s5 + $0x100] ss:$8 sps:$4 sm:$0xff]  }
 0x304   : > { %2610 = vrot.lane.b32.xlu0 %v2609_v29, %s20594_s30  ;;  %v12889_v30 = vld.sshfl [vmem:[#allocation3 + $0x31] sm:$0x1 pattern:$0x75316420]  ;;  %v2763_v0 = vrot.slane %v12890_v28, %v17003_v55  ;;  %v15364_v23 = vld [vmem:[%s20616_s5 + $0x114] ss:$8 sps:$4 sm:$0xff]  }
 0x305   : > { %v2741_v31 = vrot.slane %v12889_v30, %v17003_v55  ;;  %v12892_v32 = vld.sshfl [vmem:[#allocation3 + $0x37] sm:$0x1 pattern:$0x75316420]  ;;  %v15362_v26 = vld [vmem:[%s20616_s5 + $0x110] ss:$8 sps:$4 sm:$0xff]  }
 0x306   : > { %v12891_v35 = vld.sshfl [vmem:[#allocation3 + $0x35] sm:$0x1 pattern:$0x75316420]  ;;  %v2807_v37 = vrot.slane %v12892_v32, %v17003_v55  ;;  %v15367_v49 = vld [vmem:[%s20616_s5 + $0x124] ss:$8 sps:$4 sm:$0xff]  }
 0x307   : > { %2676 = vrot.lane.b32.xlu1 %v2675_v4, %s20594_s30  ;;  %v2785_v38 = vrot.slane %v12891_v35, %v17003_v55  ;;  %v12894_v39 = vld.sshfl [vmem:[#allocation3 + $0x3b] sm:$0x1 pattern:$0x75316420]  ;;  %v15365_v27 = vld [vmem:[%s20616_s5 + $0x120] ss:$8 sps:$4 sm:$0xff]  }
 0x308   : > { %2654 = vrot.lane.b32.xlu0 %v2653_v10, %s20594_s30  ;;  %v12893_v40 = vld.sshfl [vmem:[#allocation3 + $0x39] sm:$0x1 pattern:$0x75316420]  ;;  %v2851_v41 = vrot.slane %v12894_v39, %v17003_v55  ;;  %v15370_v57 = vld [vmem:[%s20616_s5 + $0x134] ss:$8 sps:$4 sm:$0xff]  }
 0x309   : > { %v2829_v63 = vrot.slane %v12893_v40, %v17003_v55  ;;  %v12896_v42 = vld.sshfl [vmem:[#allocation3 + $0x3f] sm:$0x1 pattern:$0x75316420]  ;;  %v15368_v3 = vld [vmem:[%s20616_s5 + $0x130] ss:$8 sps:$4 sm:$0xff]  }
 0x30a   : > { %v12895_v44 = vld.sshfl [vmem:[#allocation3 + $0x3d] sm:$0x1 pattern:$0x75316420]  ;;  %v2895_v45 = vrot.slane %v12896_v42, %v17003_v55  ;;  %v15373_v2 = vld [vmem:[%s20616_s5 + $0x144] ss:$8 sps:$4 sm:$0xff]  }
 0x30b   : > { %2720 = vrot.lane.b32.xlu1 %v2719_v13, %s20594_s30  ;;  %v2873_v47 = vrot.slane %v12895_v44, %v17003_v55  ;;  %v15371_v10 = vld [vmem:[%s20616_s5 + $0x140] ss:$8 sps:$4 sm:$0xff]   ;;  %v15376_v20 = vld [vmem:[%s20616_s5 + $0x154] ss:$8 sps:$4 sm:$0xff]   ;;  %v15379_v30 = vld [vmem:[%s20616_s5 + $0x164] ss:$8 sps:$4 sm:$0xff]  }
 0x30c   : > { %2698 = vrot.lane.b32.xlu0 %v2697_v19, %s20594_s30  ;;  %v15374_v19 = vld [vmem:[%s20616_s5 + $0x150] ss:$8 sps:$4 sm:$0xff]   ;;  %v15382_v35 = vld [vmem:[%s20616_s5 + $0x174] ss:$8 sps:$4 sm:$0xff]   ;;  %v15385_v40 = vld [vmem:[%s20616_s5 + $0x184] ss:$8 sps:$4 sm:$0xff]  }
 0x30d   : > { %v15388_v44 = vld [vmem:[%s20616_s5 + $0x194] ss:$8 sps:$4 sm:$0xff]   ;;  %v15397_v48 = vld [vmem:[%s20616_s5 + $0x1c4] ss:$8 sps:$4 sm:$0xff]  }
 0x30f   : > { %2764 = vrot.lane.b32.xlu1 %v2763_v0, %s20594_s30 }
 0x310   : > { %2742 = vrot.lane.b32.xlu0 %v2741_v31, %s20594_s30  ;;  %v15377_v31 = vld [vmem:[%s20616_s5 + $0x160] ss:$8 sps:$4 sm:$0xff]  }
 0x313   : > { %2808 = vrot.lane.b32.xlu1 %v2807_v37, %s20594_s30 }
 0x314   : > { %2786 = vrot.lane.b32.xlu0 %v2785_v38, %s20594_s30  ;;  %v15380_v38 = vld [vmem:[%s20616_s5 + $0x170] ss:$8 sps:$4 sm:$0xff]  }
 0x317   : > { %2852 = vrot.lane.b32.xlu1 %v2851_v41, %s20594_s30 }
 0x318   : > { %2830 = vrot.lane.b32.xlu0 %v2829_v63, %s20594_s30  ;;  %v15383_v63 = vld [vmem:[%s20616_s5 + $0x180] ss:$8 sps:$4 sm:$0xff]  }
 0x31b   : > { %2896 = vrot.lane.b32.xlu1 %v2895_v45, %s20594_s30 }
 0x31c   : > { %2874 = vrot.lane.b32.xlu0 %v2873_v47, %s20594_s30  ;;  %v15386_v47 = vld [vmem:[%s20616_s5 + $0x190] ss:$8 sps:$4 sm:$0xff]   ;;  %s20596_s30 = scalar_lea.vmem [#allocation10], %s18830_s20 }
 0x351   : > { %v2259_v17 = vpop.permute.xlu1 %2258 }
 0x352   : > { %2261 = vst.msk [vmem:[#allocation4 + $0x2] sm:$0x1] %vm17171_vm4, %v2259_v17  ;;  %v2212_v33 = vpop.permute.xlu0 %2211 }
 0x353   : > { %2217 = vst.msk [vmem:[#allocation4] sm:$0x1] %vm17171_vm4, %v2212_v33  ;;  %v15391_v33 = vld [vmem:[%s20616_s5 + $0x1a4] ss:$8 sps:$4 sm:$0xff]  }
 0x355   : > { %v2281_v36 = vpop.permute.xlu1 %2280 }
 0x356   : > { %2283 = vst.msk [vmem:[#allocation4 + $0x3] sm:$0x1] %vm17171_vm4, %v2281_v36  ;;  %v2237_v16 = vpop.permute.xlu0 %2236  ;;  %v15389_v36 = vld [vmem:[%s20616_s5 + $0x1a0] ss:$8 sps:$4 sm:$0xff]  }
 0x357   : > { %2239 = vst.msk [vmem:[#allocation4 + $0x1] sm:$0x1] %vm17171_vm4, %v2237_v16  ;;  %v15394_v16 = vld [vmem:[%s20616_s5 + $0x1b4] ss:$8 sps:$4 sm:$0xff]  }
 0x359   : > { %v2325_v21 = vpop.permute.xlu1 %2324 }
 0x35a   : > { %2327 = vst.msk [vmem:[#allocation4 + $0x5] sm:$0x1] %vm17171_vm4, %v2325_v21  ;;  %v2303_v52 = vpop.permute.xlu0 %2302  ;;  %v15392_v21 = vld [vmem:[%s20616_s5 + $0x1b0] ss:$8 sps:$4 sm:$0xff]  }
 0x35b   : > { %2305 = vst.msk [vmem:[#allocation4 + $0x4] sm:$0x1] %vm17171_vm4, %v2303_v52  ;;  %v15395_v52 = vld [vmem:[%s20616_s5 + $0x1c0] ss:$8 sps:$4 sm:$0xff]  }
 0x35d   : > { %v2369_v53 = vpop.permute.xlu1 %2368 }
 0x35e   : > { %2371 = vst.msk [vmem:[#allocation4 + $0x7] sm:$0x1] %vm17171_vm4, %v2369_v53  ;;  %v2347_v54 = vpop.permute.xlu0 %2346  ;;  %v15400_v53 = vld [vmem:[%s20616_s5 + $0x1d4] ss:$8 sps:$4 sm:$0xff]  }
 0x35f   : > { %2349 = vst.msk [vmem:[#allocation4 + $0x6] sm:$0x1] %vm17171_vm4, %v2347_v54  ;;  %v15398_v54 = vld [vmem:[%s20616_s5 + $0x1d0] ss:$8 sps:$4 sm:$0xff]  }
 0x361   : > { %v2413_v56 = vpop.permute.xlu1 %2412 }
 0x362   : > { %2415 = vst.msk [vmem:[#allocation4 + $0x9] sm:$0x1] %vm17171_vm4, %v2413_v56  ;;  %v2391_v58 = vpop.permute.xlu0 %2390  ;;  %v15403_v56 = vld [vmem:[%s20616_s5 + $0x1e4] ss:$8 sps:$4 sm:$0xff]  }
 0x363   : > { %2393 = vst.msk [vmem:[#allocation4 + $0x8] sm:$0x1] %vm17171_vm4, %v2391_v58  ;;  %v15401_v58 = vld [vmem:[%s20616_s5 + $0x1e0] ss:$8 sps:$4 sm:$0xff]  }
 0x365   : > { %v2457_v50 = vpop.permute.xlu1 %2456 }
 0x366   : > { %2459 = vst.msk [vmem:[#allocation4 + $0xb] sm:$0x1] %vm17171_vm4, %v2457_v50  ;;  %v2435_v5 = vpop.permute.xlu0 %2434  ;;  %v17206_v6 = vld [vmem:[#allocation4] sm:$0xff]  ;;  %v15406_v50 = vld [vmem:[%s20616_s5 + $0x1f4] ss:$8 sps:$4 sm:$0xff]  }
 0x367   : > { %2437 = vst.msk [vmem:[#allocation4 + $0xa] sm:$0x1] %vm17171_vm4, %v2435_v5  ;;  %v2915_v7 = vrot.slane %v17206_v6, %v17196_v59  ;;  %v2911_v8 = vrot.slane %v17206_v6, %v17199_v62  ;;  %v2923_v9 = vrot.slane %v17206_v6, %v17202_v34  ;;  %v17347_v5 = vsub.s32 2, %v16988_v43 }
 0x369   : > { %v2501_v11 = vpop.permute.xlu1 %2500  ;;  %v3069_v12 = vpack.c.bf16 %v2915_v7, %v2915_v7  ;;  %v3068_v18 = vpack.c.bf16 %v2911_v8, %v2911_v8  ;;  %v3071_v24 = vpack.c.bf16 %v2923_v9, %v2923_v9  ;;  %v17350_v7 = vsub.s32 5, %v16988_v43  ;;  %v15404_v8 = vld [vmem:[%s20616_s5 + $0x1f0] ss:$8 sps:$4 sm:$0xff]  }
 0x36a   : > { %2503 = vst.msk [vmem:[#allocation4 + $0xd] sm:$0x1] %vm17171_vm4, %v2501_v11  ;;  %v2479_v22 = vpop.permute.xlu0 %2478  ;;  %v2919_v9 = vrot.slane %v17206_v6, %v17347_v5  ;;  %v15409_v11 = vld [vmem:[%s20616_s5 + $0x204] ss:$8 sps:$4 sm:$0xff]  }
 0x36b   : > { %2481 = vst.msk [vmem:[#allocation4 + $0xc] sm:$0x1] %vm17171_vm4, %v2479_v22  ;;  %6216 = vmatprep.mubr.bf16.mxu0 %v3069_v12  ;;  %v2931_v12 = vrot.slane %v17206_v6, %v17350_v7  ;;  %v15412_v22 = vld [vmem:[%s20616_s5 + $0x214] ss:$8 sps:$4 sm:$0xff]  }
 0x36c   : > { %6217 = vmatmul.mubr.bf16.vlgmr.msra.gmra.mrb[24].mxu0 %v3068_v18  ;;  %v3070_v18 = vpack.c.bf16 %v2919_v9, %v2919_v9  ;;  %v15473_v9 = vld [vmem:[%s20616_s5 + $0x360] ss:$8 sps:$4 sm:$0xff]  }
 0x36d   : > { %6226 = vmatpush1.bf16.msra.mxu0 %v15359_v14  ;;  %6257 = vmatprep.mubr.bf16.mxu0 %v3071_v24  ;;  %v2545_v25 = vpop.permute.xlu1 %2544  ;;  %v15407_v14 = vld [vmem:[%s20616_s5 + $0x200] ss:$8 sps:$4 sm:$0xff]   ;;  %v15410_v24 = vld [vmem:[%s20616_s5 + $0x210] ss:$8 sps:$4 sm:$0xff]  }
 0x36e   : > { %2547 = vst.msk [vmem:[#allocation4 + $0xf] sm:$0x1] %vm17171_vm4, %v2545_v25  ;;  %v2523_v46 = vpop.permute.xlu0 %2522  ;;  %6227 = vmatprep.subr.bf16.mxu0 %v15364_v23  ;;  %v3073_v23 = vpack.c.bf16 %v2931_v12, %v2931_v12  ;;  %v15415_v25 = vld [vmem:[%s20616_s5 + $0x224] ss:$8 sps:$4 sm:$0xff]   ;;  %v15476_v12 = vld [vmem:[%s20616_s5 + $0x370] ss:$8 sps:$4 sm:$0xff]  }
 0x36f   : > { %2525 = vst.msk [vmem:[#allocation4 + $0xe] sm:$0x1] %vm17171_vm4, %v2523_v46  ;;  %v15418_v46 = vld [vmem:[%s20616_s5 + $0x234] ss:$8 sps:$4 sm:$0xff]  }
 0x371   : > { %6228 = vmatpush1.bf16.msra.mxu0 %v15362_v26  ;;  %v2589_v51 = vpop.permute.xlu1 %2588  ;;  %v15413_v26 = vld [vmem:[%s20616_s5 + $0x220] ss:$8 sps:$4 sm:$0xff]  }
 0x372   : > { %2591 = vst.msk [vmem:[#allocation4 + $0x11] sm:$0x1] %vm17171_vm4, %v2589_v51  ;;  %v2567_v29 = vpop.permute.xlu0 %2566  ;;  %6229 = vmatprep.subr.bf16.mxu0 %v15367_v49  ;;  %v15416_v49 = vld [vmem:[%s20616_s5 + $0x230] ss:$8 sps:$4 sm:$0xff]   ;;  %v15421_v51 = vld [vmem:[%s20616_s5 + $0x244] ss:$8 sps:$4 sm:$0xff]  }
 0x373   : > { %2569 = vst.msk [vmem:[#allocation4 + $0x10] sm:$0x1] %vm17171_vm4, %v2567_v29  ;;  %v15424_v29 = vld [vmem:[%s20616_s5 + $0x254] ss:$8 sps:$4 sm:$0xff]  }
 0x375   : > { %6230 = vmatpush1.bf16.msra.mxu0 %v15365_v27  ;;  %v2633_v61 = vpop.permute.xlu1 %2632  ;;  %v15419_v27 = vld [vmem:[%s20616_s5 + $0x240] ss:$8 sps:$4 sm:$0xff]  }
 0x376   : > { %2635 = vst.msk [vmem:[#allocation4 + $0x13] sm:$0x1] %vm17171_vm4, %v2633_v61  ;;  %v2611_v60 = vpop.permute.xlu0 %2610  ;;  %6231 = vmatprep.subr.bf16.mxu0 %v15370_v57  ;;  %v15422_v57 = vld [vmem:[%s20616_s5 + $0x250] ss:$8 sps:$4 sm:$0xff]   ;;  %v15427_v61 = vld [vmem:[%s20616_s5 + $0x264] ss:$8 sps:$4 sm:$0xff]  }
 0x377   : > { %2613 = vst.msk [vmem:[#allocation4 + $0x12] sm:$0x1] %vm17171_vm4, %v2611_v60  ;;  %v15430_v60 = vld [vmem:[%s20616_s5 + $0x274] ss:$8 sps:$4 sm:$0xff]  }
 0x379   : > { %6232 = vmatpush1.bf16.msra.mxu0 %v15368_v3  ;;  %v2677_v4 = vpop.permute.xlu1 %2676  ;;  %v15425_v3 = vld [vmem:[%s20616_s5 + $0x260] ss:$8 sps:$4 sm:$0xff]  }
 0x37a   : > { %2679 = vst.msk [vmem:[#allocation4 + $0x15] sm:$0x1] %vm17171_vm4, %v2677_v4  ;;  %v2655_v15 = vpop.permute.xlu0 %2654  ;;  %6233 = vmatprep.subr.bf16.mxu0 %v15373_v2  ;;  %v15428_v2 = vld [vmem:[%s20616_s5 + $0x270] ss:$8 sps:$4 sm:$0xff]   ;;  %v15433_v4 = vld [vmem:[%s20616_s5 + $0x284] ss:$8 sps:$4 sm:$0xff]  }
 0x37b   : > { %2657 = vst.msk [vmem:[#allocation4 + $0x14] sm:$0x1] %vm17171_vm4, %v2655_v15  ;;  %v15436_v15 = vld [vmem:[%s20616_s5 + $0x294] ss:$8 sps:$4 sm:$0xff]  }
 0x37d   : > { %6234 = vmatpush1.bf16.msra.mxu0 %v15371_v10  ;;  %v2721_v13 = vpop.permute.xlu1 %2720  ;;  %v15431_v10 = vld [vmem:[%s20616_s5 + $0x280] ss:$8 sps:$4 sm:$0xff]  }
 0x37e   : > { %2723 = vst.msk [vmem:[#allocation4 + $0x17] sm:$0x1] %vm17171_vm4, %v2721_v13  ;;  %v2699_v28 = vpop.permute.xlu0 %2698  ;;  %6235 = vmatprep.subr.bf16.mxu0 %v15376_v20  ;;  %v15434_v20 = vld [vmem:[%s20616_s5 + $0x290] ss:$8 sps:$4 sm:$0xff]   ;;  %v15439_v13 = vld [vmem:[%s20616_s5 + $0x2a4] ss:$8 sps:$4 sm:$0xff]  }
 0x37f   : > { %2701 = vst.msk [vmem:[#allocation4 + $0x16] sm:$0x1] %vm17171_vm4, %v2699_v28  ;;  %v15442_v28 = vld [vmem:[%s20616_s5 + $0x2b4] ss:$8 sps:$4 sm:$0xff]  }
 0x381   : > { %6236 = vmatpush1.bf16.msra.mxu0 %v15374_v19  ;;  %v2765_v0 = vpop.permute.xlu1 %2764  ;;  %v15437_v19 = vld [vmem:[%s20616_s5 + $0x2a0] ss:$8 sps:$4 sm:$0xff]  }
 0x382   : > { %2767 = vst.msk [vmem:[#allocation4 + $0x19] sm:$0x1] %vm17171_vm4, %v2765_v0  ;;  %v2743_v32 = vpop.permute.xlu0 %2742  ;;  %6237 = vmatprep.subr.bf16.mxu0 %v15379_v30  ;;  %v15440_v30 = vld [vmem:[%s20616_s5 + $0x2b0] ss:$8 sps:$4 sm:$0xff]   ;;  %v15445_v0 = vld [vmem:[%s20616_s5 + $0x2c4] ss:$8 sps:$4 sm:$0xff]  }
 0x383   : > { %2745 = vst.msk [vmem:[#allocation4 + $0x18] sm:$0x1] %vm17171_vm4, %v2743_v32  ;;  %v15448_v32 = vld [vmem:[%s20616_s5 + $0x2d4] ss:$8 sps:$4 sm:$0xff]  }
 0x385   : > { %6238 = vmatpush1.bf16.msra.mxu0 %v15377_v31  ;;  %v2809_v37 = vpop.permute.xlu1 %2808  ;;  %v15443_v31 = vld [vmem:[%s20616_s5 + $0x2c0] ss:$8 sps:$4 sm:$0xff]  }
 0x386   : > { %2811 = vst.msk [vmem:[#allocation4 + $0x1b] sm:$0x1] %vm17171_vm4, %v2809_v37  ;;  %v2787_v39 = vpop.permute.xlu0 %2786  ;;  %6239 = vmatprep.subr.bf16.mxu0 %v15382_v35  ;;  %v15446_v35 = vld [vmem:[%s20616_s5 + $0x2d0] ss:$8 sps:$4 sm:$0xff]   ;;  %v15451_v37 = vld [vmem:[%s20616_s5 + $0x2e4] ss:$8 sps:$4 sm:$0xff]  }
 0x387   : > { %2789 = vst.msk [vmem:[#allocation4 + $0x1a] sm:$0x1] %vm17171_vm4, %v2787_v39  ;;  %v15454_v39 = vld [vmem:[%s20616_s5 + $0x2f4] ss:$8 sps:$4 sm:$0xff]  }
 0x389   : > { %6240 = vmatpush1.bf16.msra.mxu0 %v15380_v38  ;;  %v2853_v41 = vpop.permute.xlu1 %2852  ;;  %v15449_v38 = vld [vmem:[%s20616_s5 + $0x2e0] ss:$8 sps:$4 sm:$0xff]  }
 0x38a   : > { %2855 = vst.msk [vmem:[#allocation4 + $0x1d] sm:$0x1] %vm17171_vm4, %v2853_v41  ;;  %v2831_v42 = vpop.permute.xlu0 %2830  ;;  %6241 = vmatprep.subr.bf16.mxu0 %v15385_v40  ;;  %v17453_v40 = vsub.s32 4, %v16988_v43  ;;  %v17456_v41 = vsub.s32 7, %v16988_v43 }
 0x38b   : > { %2833 = vst.msk [vmem:[#allocation4 + $0x1c] sm:$0x1] %vm17171_vm4, %v2831_v42 }
 0x38c   : > { %v2927_v42 = vrot.slane %v17206_v6, %v17453_v40 }
 0x38d   : > { %6242 = vmatpush1.bf16.msra.mxu0 %v15383_v63  ;;  %v2897_v45 = vpop.permute.xlu1 %2896  ;;  %v15452_v63 = vld [vmem:[%s20616_s5 + $0x2f0] ss:$8 sps:$4 sm:$0xff]  }
 0x38e   : > { %2899 = vst.msk [vmem:[#allocation4 + $0x1f] sm:$0x1] %vm17171_vm4, %v2897_v45  ;;  %v2875_v17 = vpop.permute.xlu0 %2874  ;;  %6243 = vmatprep.subr.bf16.mxu0 %v15388_v44  ;;  %v15457_v44 = vld [vmem:[%s20616_s5 + $0x304] ss:$8 sps:$4 sm:$0xff]   ;;  %v2939_v45 = vrot.slane %v17206_v6, %v17456_v41 }
 0x38f   : > { %2877 = vst.msk [vmem:[#allocation4 + $0x1e] sm:$0x1] %vm17171_vm4, %v2875_v17  ;;  %v3072_v17 = vpack.c.bf16 %v2927_v42, %v2927_v42  ;;  %v15521_v42 = vld [vmem:[%s20616_s5 + $0x460] ss:$8 sps:$4 sm:$0xff]  }
 0x391   : > { %6244 = vmatpush1.bf16.msra.mxu0 %v15386_v47  ;;  %v15455_v47 = vld [vmem:[%s20616_s5 + $0x300] ss:$8 sps:$4 sm:$0xff]  }
 0x392   : > { %6245 = vmatprep.subr.bf16.mxu0 %v15391_v33  ;;  %v15460_v33 = vld [vmem:[%s20616_s5 + $0x314] ss:$8 sps:$4 sm:$0xff]  }
 0x395   : > { %6246 = vmatpush1.bf16.msra.mxu0 %v15389_v36  ;;  %v3075_v36 = vpack.c.bf16 %v2939_v45, %v2939_v45  ;;  %v15524_v45 = vld [vmem:[%s20616_s5 + $0x470] ss:$8 sps:$4 sm:$0xff]  }
 0x396   : > { %6247 = vmatprep.subr.bf16.mxu0 %v15394_v16  ;;  %v15458_v16 = vld [vmem:[%s20616_s5 + $0x310] ss:$8 sps:$4 sm:$0xff]  }
 0x399   : > { %6248 = vmatpush1.bf16.msra.mxu0 %v15392_v21  ;;  %v15463_v21 = vld [vmem:[%s20616_s5 + $0x324] ss:$8 sps:$4 sm:$0xff]  }
 0x39a   : > { %6249 = vmatprep.subr.bf16.mxu0 %v15397_v48  ;;  %v15461_v48 = vld [vmem:[%s20616_s5 + $0x320] ss:$8 sps:$4 sm:$0xff]  }
 0x39d   : > { %6250 = vmatpush1.bf16.msra.mxu0 %v15395_v52  ;;  %v15466_v52 = vld [vmem:[%s20616_s5 + $0x334] ss:$8 sps:$4 sm:$0xff]  }
 0x39e   : > { %6251 = vmatprep.subr.bf16.mxu0 %v15400_v53  ;;  %v15464_v53 = vld [vmem:[%s20616_s5 + $0x330] ss:$8 sps:$4 sm:$0xff]  }
 0x3a1   : > { %6252 = vmatpush1.bf16.msra.mxu0 %v15398_v54  ;;  %v15469_v54 = vld [vmem:[%s20616_s5 + $0x344] ss:$8 sps:$4 sm:$0xff]  }
 0x3a2   : > { %6253 = vmatprep.subr.bf16.mxu0 %v15403_v56  ;;  %v15467_v56 = vld [vmem:[%s20616_s5 + $0x340] ss:$8 sps:$4 sm:$0xff]  }
 0x3a5   : > { %6254 = vmatpush1.bf16.msra.mxu0 %v15401_v58  ;;  %v15472_v58 = vld [vmem:[%s20616_s5 + $0x354] ss:$8 sps:$4 sm:$0xff]  }
 0x3a6   : > { %6255 = vmatprep.subr.bf16.mxu0 %v15406_v50  ;;  %v15470_v50 = vld [vmem:[%s20616_s5 + $0x350] ss:$8 sps:$4 sm:$0xff]  }
 0x3a9   : > { %6256 = vmatpush1.bf16.msra.mxu0 %v15404_v8  ;;  %v15475_v8 = vld [vmem:[%s20616_s5 + $0x364] ss:$8 sps:$4 sm:$0xff]  }
 0x3aa   : > { %6266 = vmatprep.subr.bf16.mxu0 %v15409_v11  ;;  %v15478_v11 = vld [vmem:[%s20616_s5 + $0x374] ss:$8 sps:$4 sm:$0xff]  }
 0x3ac   : > { %6258 = vmatmul.mubr.bf16.vlgmr.msra.gmra.mrb[24].mxu0 %v3070_v18  ;;  %v15479_v18 = vld [vmem:[%s20616_s5 + $0x380] ss:$8 sps:$4 sm:$0xff]  }
 0x3ad   : > { %6267 = vmatpush1.bf16.msra.mxu0 %v15407_v14  ;;  %6298 = vmatprep.mubr.bf16.mxu0 %v3073_v23  ;;  %v15481_v14 = vld [vmem:[%s20616_s5 + $0x384] ss:$8 sps:$4 sm:$0xff]   ;;  %v15482_v23 = vld [vmem:[%s20616_s5 + $0x390] ss:$8 sps:$4 sm:$0xff]  }
 0x3ae   : > { %6268 = vmatprep.subr.bf16.mxu0 %v15412_v22  ;;  %v15484_v22 = vld [vmem:[%s20616_s5 + $0x394] ss:$8 sps:$4 sm:$0xff]  }
 0x3b1   : > { %6269 = vmatpush1.bf16.msra.mxu0 %v15410_v24  ;;  %v15487_v24 = vld [vmem:[%s20616_s5 + $0x3a4] ss:$8 sps:$4 sm:$0xff]  }
 0x3b2   : > { %6270 = vmatprep.subr.bf16.mxu0 %v15415_v25  ;;  %v15485_v25 = vld [vmem:[%s20616_s5 + $0x3a0] ss:$8 sps:$4 sm:$0xff]  }
 0x3b5   : > { %6271 = vmatpush1.bf16.msra.mxu0 %v15413_v26  ;;  %v15490_v26 = vld [vmem:[%s20616_s5 + $0x3b4] ss:$8 sps:$4 sm:$0xff]  }
 0x3b6   : > { %6272 = vmatprep.subr.bf16.mxu0 %v15418_v46  ;;  %v15488_v46 = vld [vmem:[%s20616_s5 + $0x3b0] ss:$8 sps:$4 sm:$0xff]  }
 0x3b9   : > { %6273 = vmatpush1.bf16.msra.mxu0 %v15416_v49  ;;  %v15493_v49 = vld [vmem:[%s20616_s5 + $0x3c4] ss:$8 sps:$4 sm:$0xff]  }
 0x3ba   : > { %6274 = vmatprep.subr.bf16.mxu0 %v15421_v51  ;;  %v15491_v51 = vld [vmem:[%s20616_s5 + $0x3c0] ss:$8 sps:$4 sm:$0xff]  }
 0x3bd   : > { %6275 = vmatpush1.bf16.msra.mxu0 %v15419_v27  ;;  %v15496_v27 = vld [vmem:[%s20616_s5 + $0x3d4] ss:$8 sps:$4 sm:$0xff]  }
 0x3be   : > { %6276 = vmatprep.subr.bf16.mxu0 %v15424_v29  ;;  %v15494_v29 = vld [vmem:[%s20616_s5 + $0x3d0] ss:$8 sps:$4 sm:$0xff]  }
 0x3c1   : > { %6277 = vmatpush1.bf16.msra.mxu0 %v15422_v57  ;;  %v15499_v57 = vld [vmem:[%s20616_s5 + $0x3e4] ss:$8 sps:$4 sm:$0xff]  }
 0x3c2   : > { %6278 = vmatprep.subr.bf16.mxu0 %v15427_v61  ;;  %v15497_v61 = vld [vmem:[%s20616_s5 + $0x3e0] ss:$8 sps:$4 sm:$0xff]  }
 0x3c5   : > { %6279 = vmatpush1.bf16.msra.mxu0 %v15425_v3  ;;  %v15502_v3 = vld [vmem:[%s20616_s5 + $0x3f4] ss:$8 sps:$4 sm:$0xff]  }
 0x3c6   : > { %6280 = vmatprep.subr.bf16.mxu0 %v15430_v60  ;;  %v17559_v60 = vsub.s32 6, %v16988_v43  ;;  %v15503_v43 = vld [vmem:[%s20616_s5 + $0x400] ss:$8 sps:$4 sm:$0xff]  }
 0x3c9   : > { %6281 = vmatpush1.bf16.msra.mxu0 %v15428_v2  ;;  %v17561_v2 = vld [vmem:[#allocation4 + $0x8] sm:$0xff] }
 0x3ca   : > { %6282 = vmatprep.subr.bf16.mxu0 %v15433_v4  ;;  %v15500_v4 = vld [vmem:[%s20616_s5 + $0x3f0] ss:$8 sps:$4 sm:$0xff]  }
 0x3cd   : > { %6283 = vmatpush1.bf16.msra.mxu0 %v15431_v10  ;;  %v2935_v10 = vrot.slane %v17206_v6, %v17559_v60  ;;  %v15506_v6 = vld [vmem:[%s20616_s5 + $0x410] ss:$8 sps:$4 sm:$0xff]  }
 0x3ce   : > { %6284 = vmatprep.subr.bf16.mxu0 %v15436_v15  ;;  %v15505_v15 = vld [vmem:[%s20616_s5 + $0x404] ss:$8 sps:$4 sm:$0xff]  }
 0x3d1   : > { %6285 = vmatpush1.bf16.msra.mxu0 %v15434_v20  ;;  %v2947_v20 = vrot.slane %v17561_v2, %v17196_v59 }
 0x3d2   : > { %6286 = vmatprep.subr.bf16.mxu0 %v15439_v13  ;;  %v3074_v13 = vpack.c.bf16 %v2935_v10, %v2935_v10  ;;  %v15569_v10 = vld [vmem:[%s20616_s5 + $0x560] ss:$8 sps:$4 sm:$0xff]  }
 0x3d5   : > { %6287 = vmatpush1.bf16.msra.mxu0 %v15437_v19  ;;  %v15508_v19 = vld [vmem:[%s20616_s5 + $0x414] ss:$8 sps:$4 sm:$0xff]  }
 0x3d6   : > { %6288 = vmatprep.subr.bf16.mxu0 %v15442_v28  ;;  %v3077_v28 = vpack.c.bf16 %v2947_v20, %v2947_v20  ;;  %v15572_v20 = vld [vmem:[%s20616_s5 + $0x570] ss:$8 sps:$4 sm:$0xff]  }
 0x3d9   : > { %6289 = vmatpush1.bf16.msra.mxu0 %v15440_v30  ;;  %v15511_v30 = vld [vmem:[%s20616_s5 + $0x424] ss:$8 sps:$4 sm:$0xff]  }
 0x3da   : > { %6290 = vmatprep.subr.bf16.mxu0 %v15445_v0  ;;  %v15509_v0 = vld [vmem:[%s20616_s5 + $0x420] ss:$8 sps:$4 sm:$0xff]  }
 0x3dd   : > { %6291 = vmatpush1.bf16.msra.mxu0 %v15443_v31  ;;  %v15514_v31 = vld [vmem:[%s20616_s5 + $0x434] ss:$8 sps:$4 sm:$0xff]  }
 0x3de   : > { %6292 = vmatprep.subr.bf16.mxu0 %v15448_v32  ;;  %v15512_v32 = vld [vmem:[%s20616_s5 + $0x430] ss:$8 sps:$4 sm:$0xff]  }
 0x3e1   : > { %6293 = vmatpush1.bf16.msra.mxu0 %v15446_v35  ;;  %v15517_v35 = vld [vmem:[%s20616_s5 + $0x444] ss:$8 sps:$4 sm:$0xff]  }
 0x3e2   : > { %6294 = vmatprep.subr.bf16.mxu0 %v15451_v37  ;;  %v15515_v37 = vld [vmem:[%s20616_s5 + $0x440] ss:$8 sps:$4 sm:$0xff]  }
 0x3e5   : > { %6295 = vmatpush1.bf16.msra.mxu0 %v15449_v38  ;;  %v15520_v38 = vld [vmem:[%s20616_s5 + $0x454] ss:$8 sps:$4 sm:$0xff]  }
 0x3e6   : > { %6296 = vmatprep.subr.bf16.mxu0 %v15454_v39  ;;  %v15518_v39 = vld [vmem:[%s20616_s5 + $0x450] ss:$8 sps:$4 sm:$0xff]  }
 0x3e9   : > { %6297 = vmatpush1.bf16.msra.mxu0 %v15452_v63  ;;  %v15523_v63 = vld [vmem:[%s20616_s5 + $0x464] ss:$8 sps:$4 sm:$0xff]  }
 0x3ea   : > { %6307 = vmatprep.subr.bf16.mxu0 %v15457_v44  ;;  %v15526_v44 = vld [vmem:[%s20616_s5 + $0x474] ss:$8 sps:$4 sm:$0xff]  }
 0x3ec   : > { %6299 = vmatmul.mubr.bf16.vlgmr.msra.gmra.mrb[24].mxu0 %v3072_v17  ;;  %v15527_v17 = vld [vmem:[%s20616_s5 + $0x480] ss:$8 sps:$4 sm:$0xff]  }
 0x3ed   : > { %6308 = vmatpush1.bf16.msra.mxu0 %v15455_v47  ;;  %6339 = vmatprep.mubr.bf16.mxu0 %v3075_v36  ;;  %v15529_v47 = vld [vmem:[%s20616_s5 + $0x484] ss:$8 sps:$4 sm:$0xff]   ;;  %v15530_v36 = vld [vmem:[%s20616_s5 + $0x490] ss:$8 sps:$4 sm:$0xff]  }
 0x3ee   : > { %6309 = vmatprep.subr.bf16.mxu0 %v15460_v33  ;;  %v15532_v33 = vld [vmem:[%s20616_s5 + $0x494] ss:$8 sps:$4 sm:$0xff]  }
 0x3f1   : > { %6310 = vmatpush1.bf16.msra.mxu0 %v15458_v16  ;;  %v15535_v16 = vld [vmem:[%s20616_s5 + $0x4a4] ss:$8 sps:$4 sm:$0xff]  }
 0x3f2   : > { %6311 = vmatprep.subr.bf16.mxu0 %v15463_v21  ;;  %v15533_v21 = vld [vmem:[%s20616_s5 + $0x4a0] ss:$8 sps:$4 sm:$0xff]  }
 0x3f5   : > { %6312 = vmatpush1.bf16.msra.mxu0 %v15461_v48  ;;  %v15538_v48 = vld [vmem:[%s20616_s5 + $0x4b4] ss:$8 sps:$4 sm:$0xff]  }
 0x3f6   : > { %6313 = vmatprep.subr.bf16.mxu0 %v15466_v52  ;;  %v15536_v52 = vld [vmem:[%s20616_s5 + $0x4b0] ss:$8 sps:$4 sm:$0xff]  }
 0x3f9   : > { %6314 = vmatpush1.bf16.msra.mxu0 %v15464_v53  ;;  %v15541_v53 = vld [vmem:[%s20616_s5 + $0x4c4] ss:$8 sps:$4 sm:$0xff]  }
 0x3fa   : > { %6315 = vmatprep.subr.bf16.mxu0 %v15469_v54  ;;  %v15539_v54 = vld [vmem:[%s20616_s5 + $0x4c0] ss:$8 sps:$4 sm:$0xff]  }
 0x3fd   : > { %6316 = vmatpush1.bf16.msra.mxu0 %v15467_v56  ;;  %v15544_v56 = vld [vmem:[%s20616_s5 + $0x4d4] ss:$8 sps:$4 sm:$0xff]  }
 0x3fe   : > { %6317 = vmatprep.subr.bf16.mxu0 %v15472_v58  ;;  %v15542_v58 = vld [vmem:[%s20616_s5 + $0x4d0] ss:$8 sps:$4 sm:$0xff]  }
 0x401   : > { %6318 = vmatpush1.bf16.msra.mxu0 %v15470_v50  ;;  %v15547_v50 = vld [vmem:[%s20616_s5 + $0x4e4] ss:$8 sps:$4 sm:$0xff]  }
 0x402   : > { %6319 = vmatprep.subr.bf16.mxu0 %v15475_v8  ;;  %v15545_v8 = vld [vmem:[%s20616_s5 + $0x4e0] ss:$8 sps:$4 sm:$0xff]  }
 0x405   : > { %6320 = vmatpush1.bf16.msra.mxu0 %v15473_v9  ;;  %v15550_v9 = vld [vmem:[%s20616_s5 + $0x4f4] ss:$8 sps:$4 sm:$0xff]  }
 0x406   : > { %6321 = vmatprep.subr.bf16.mxu0 %v15478_v11  ;;  %v15548_v11 = vld [vmem:[%s20616_s5 + $0x4f0] ss:$8 sps:$4 sm:$0xff]  }
 0x409   : > { %6322 = vmatpush1.bf16.msra.mxu0 %v15476_v12  ;;  %v2943_v12 = vrot.slane %v17561_v2, %v17199_v62 }
 0x40a   : > { %6323 = vmatprep.subr.bf16.mxu0 %v15481_v14  ;;  %v15553_v14 = vld [vmem:[%s20616_s5 + $0x504] ss:$8 sps:$4 sm:$0xff]  }
 0x40d   : > { %6324 = vmatpush1.bf16.msra.mxu0 %v15479_v18  ;;  %v2955_v18 = vrot.slane %v17561_v2, %v17202_v34 }
 0x40e   : > { %6325 = vmatprep.subr.bf16.mxu0 %v15484_v22  ;;  %v15551_v22 = vld [vmem:[%s20616_s5 + $0x500] ss:$8 sps:$4 sm:$0xff]  }
 0x411   : > { %6326 = vmatpush1.bf16.msra.mxu0 %v15482_v23  ;;  %v3076_v23 = vpack.c.bf16 %v2943_v12, %v2943_v12  ;;  %v15617_v12 = vld [vmem:[%s20616_s5 + $0x660] ss:$8 sps:$4 sm:$0xff]  }
 0x412   : > { %6327 = vmatprep.subr.bf16.mxu0 %v15487_v24  ;;  %v15556_v24 = vld [vmem:[%s20616_s5 + $0x514] ss:$8 sps:$4 sm:$0xff]  }
 0x415   : > { %6328 = vmatpush1.bf16.msra.mxu0 %v15485_v25  ;;  %v3079_v25 = vpack.c.bf16 %v2955_v18, %v2955_v18  ;;  %v15620_v18 = vld [vmem:[%s20616_s5 + $0x670] ss:$8 sps:$4 sm:$0xff]  }
 0x416   : > { %6329 = vmatprep.subr.bf16.mxu0 %v15490_v26  ;;  %v15554_v26 = vld [vmem:[%s20616_s5 + $0x510] ss:$8 sps:$4 sm:$0xff]  }
 0x419   : > { %6330 = vmatpush1.bf16.msra.mxu0 %v15488_v46  ;;  %v15559_v46 = vld [vmem:[%s20616_s5 + $0x524] ss:$8 sps:$4 sm:$0xff]  }
 0x41a   : > { %6331 = vmatprep.subr.bf16.mxu0 %v15493_v49  ;;  %v15557_v49 = vld [vmem:[%s20616_s5 + $0x520] ss:$8 sps:$4 sm:$0xff]  }
 0x41d   : > { %6332 = vmatpush1.bf16.msra.mxu0 %v15491_v51  ;;  %v15562_v51 = vld [vmem:[%s20616_s5 + $0x534] ss:$8 sps:$4 sm:$0xff]  }
 0x41e   : > { %6333 = vmatprep.subr.bf16.mxu0 %v15496_v27  ;;  %v15560_v27 = vld [vmem:[%s20616_s5 + $0x530] ss:$8 sps:$4 sm:$0xff]  }
 0x421   : > { %6334 = vmatpush1.bf16.msra.mxu0 %v15494_v29  ;;  %v15565_v29 = vld [vmem:[%s20616_s5 + $0x544] ss:$8 sps:$4 sm:$0xff]  }
 0x422   : > { %6335 = vmatprep.subr.bf16.mxu0 %v15499_v57  ;;  %v15563_v57 = vld [vmem:[%s20616_s5 + $0x540] ss:$8 sps:$4 sm:$0xff]  }
 0x425   : > { %6336 = vmatpush1.bf16.msra.mxu0 %v15497_v61  ;;  %v15568_v61 = vld [vmem:[%s20616_s5 + $0x554] ss:$8 sps:$4 sm:$0xff]  }
 0x426   : > { %6337 = vmatprep.subr.bf16.mxu0 %v15502_v3  ;;  %v15566_v3 = vld [vmem:[%s20616_s5 + $0x550] ss:$8 sps:$4 sm:$0xff]  }
 0x429   : > { %6338 = vmatpush1.bf16.msra.mxu0 %v15500_v4  ;;  %v15571_v4 = vld [vmem:[%s20616_s5 + $0x564] ss:$8 sps:$4 sm:$0xff]  }
 0x42a   : > { %6348 = vmatprep.subr.bf16.mxu0 %v15505_v15  ;;  %v15574_v15 = vld [vmem:[%s20616_s5 + $0x574] ss:$8 sps:$4 sm:$0xff]  }
 0x42c   : > { %6340 = vmatmul.mubr.bf16.vlgmr.msra.gmra.mrb[24].mxu0 %v3074_v13  ;;  %v15575_v13 = vld [vmem:[%s20616_s5 + $0x580] ss:$8 sps:$4 sm:$0xff]  }
 0x42d   : > { %6349 = vmatpush1.bf16.msra.mxu0 %v15503_v43  ;;  %6380 = vmatprep.mubr.bf16.mxu0 %v3077_v28  ;;  %v15577_v43 = vld [vmem:[%s20616_s5 + $0x584] ss:$8 sps:$4 sm:$0xff]   ;;  %v15578_v28 = vld [vmem:[%s20616_s5 + $0x590] ss:$8 sps:$4 sm:$0xff]  }
 0x42e   : > { %6350 = vmatprep.subr.bf16.mxu0 %v15508_v19  ;;  %v15580_v19 = vld [vmem:[%s20616_s5 + $0x594] ss:$8 sps:$4 sm:$0xff]  }
 0x431   : > { %6351 = vmatpush1.bf16.msra.mxu0 %v15506_v6  ;;  %v15583_v6 = vld [vmem:[%s20616_s5 + $0x5a4] ss:$8 sps:$4 sm:$0xff]  }
 0x432   : > { %6352 = vmatprep.subr.bf16.mxu0 %v15511_v30  ;;  %v15581_v30 = vld [vmem:[%s20616_s5 + $0x5a0] ss:$8 sps:$4 sm:$0xff]  }
 0x435   : > { %6353 = vmatpush1.bf16.msra.mxu0 %v15509_v0  ;;  %v15586_v0 = vld [vmem:[%s20616_s5 + $0x5b4] ss:$8 sps:$4 sm:$0xff]  }
 0x436   : > { %6354 = vmatprep.subr.bf16.mxu0 %v15514_v31  ;;  %v15584_v31 = vld [vmem:[%s20616_s5 + $0x5b0] ss:$8 sps:$4 sm:$0xff]  }
 0x439   : > { %6355 = vmatpush1.bf16.msra.mxu0 %v15512_v32  ;;  %v15589_v32 = vld [vmem:[%s20616_s5 + $0x5c4] ss:$8 sps:$4 sm:$0xff]  }
 0x43a   : > { %6356 = vmatprep.subr.bf16.mxu0 %v15517_v35  ;;  %v15587_v35 = vld [vmem:[%s20616_s5 + $0x5c0] ss:$8 sps:$4 sm:$0xff]  }
 0x43d   : > { %6357 = vmatpush1.bf16.msra.mxu0 %v15515_v37  ;;  %v15592_v37 = vld [vmem:[%s20616_s5 + $0x5d4] ss:$8 sps:$4 sm:$0xff]  }
 0x43e   : > { %6358 = vmatprep.subr.bf16.mxu0 %v15520_v38  ;;  %v15590_v38 = vld [vmem:[%s20616_s5 + $0x5d0] ss:$8 sps:$4 sm:$0xff]  }
 0x441   : > { %6359 = vmatpush1.bf16.msra.mxu0 %v15518_v39  ;;  %v15595_v39 = vld [vmem:[%s20616_s5 + $0x5e4] ss:$8 sps:$4 sm:$0xff]  }
 0x442   : > { %6360 = vmatprep.subr.bf16.mxu0 %v15523_v63  ;;  %v15593_v63 = vld [vmem:[%s20616_s5 + $0x5e0] ss:$8 sps:$4 sm:$0xff]  }
 0x445   : > { %6361 = vmatpush1.bf16.msra.mxu0 %v15521_v42  ;;  %v15598_v42 = vld [vmem:[%s20616_s5 + $0x5f4] ss:$8 sps:$4 sm:$0xff]  }
 0x446   : > { %6362 = vmatprep.subr.bf16.mxu0 %v15526_v44  ;;  %v15596_v44 = vld [vmem:[%s20616_s5 + $0x5f0] ss:$8 sps:$4 sm:$0xff]  }
 0x449   : > { %6363 = vmatpush1.bf16.msra.mxu0 %v15524_v45  ;;  %v2951_v45 = vrot.slane %v17561_v2, %v17347_v5 }
 0x44a   : > { %6364 = vmatprep.subr.bf16.mxu0 %v15529_v47  ;;  %v15601_v47 = vld [vmem:[%s20616_s5 + $0x604] ss:$8 sps:$4 sm:$0xff]  }
 0x44d   : > { %6365 = vmatpush1.bf16.msra.mxu0 %v15527_v17  ;;  %v2963_v17 = vrot.slane %v17561_v2, %v17350_v7 }
 0x44e   : > { %6366 = vmatprep.subr.bf16.mxu0 %v15532_v33  ;;  %v15599_v33 = vld [vmem:[%s20616_s5 + $0x600] ss:$8 sps:$4 sm:$0xff]  }
 0x451   : > { %6367 = vmatpush1.bf16.msra.mxu0 %v15530_v36  ;;  %v3078_v36 = vpack.c.bf16 %v2951_v45, %v2951_v45  ;;  %v15665_v45 = vld [vmem:[%s20616_s5 + $0x760] ss:$8 sps:$4 sm:$0xff]  }
 0x452   : > { %6368 = vmatprep.subr.bf16.mxu0 %v15535_v16  ;;  %v15604_v16 = vld [vmem:[%s20616_s5 + $0x614] ss:$8 sps:$4 sm:$0xff]  }
 0x455   : > { %6369 = vmatpush1.bf16.msra.mxu0 %v15533_v21  ;;  %v3081_v21 = vpack.c.bf16 %v2963_v17, %v2963_v17  ;;  %v15668_v17 = vld [vmem:[%s20616_s5 + $0x770] ss:$8 sps:$4 sm:$0xff]  }
 0x456   : > { %6370 = vmatprep.subr.bf16.mxu0 %v15538_v48  ;;  %v15602_v48 = vld [vmem:[%s20616_s5 + $0x610] ss:$8 sps:$4 sm:$0xff]  }
 0x459   : > { %6371 = vmatpush1.bf16.msra.mxu0 %v15536_v52  ;;  %v15607_v52 = vld [vmem:[%s20616_s5 + $0x624] ss:$8 sps:$4 sm:$0xff]  }
 0x45a   : > { %6372 = vmatprep.subr.bf16.mxu0 %v15541_v53  ;;  %v15605_v53 = vld [vmem:[%s20616_s5 + $0x620] ss:$8 sps:$4 sm:$0xff]  }
 0x45d   : > { %6373 = vmatpush1.bf16.msra.mxu0 %v15539_v54  ;;  %v15610_v54 = vld [vmem:[%s20616_s5 + $0x634] ss:$8 sps:$4 sm:$0xff]  }
 0x45e   : > { %6374 = vmatprep.subr.bf16.mxu0 %v15544_v56  ;;  %v15608_v56 = vld [vmem:[%s20616_s5 + $0x630] ss:$8 sps:$4 sm:$0xff]  }
 0x461   : > { %6375 = vmatpush1.bf16.msra.mxu0 %v15542_v58  ;;  %v15613_v58 = vld [vmem:[%s20616_s5 + $0x644] ss:$8 sps:$4 sm:$0xff]  }
 0x462   : > { %6376 = vmatprep.subr.bf16.mxu0 %v15547_v50  ;;  %v15611_v50 = vld [vmem:[%s20616_s5 + $0x640] ss:$8 sps:$4 sm:$0xff]  }
 0x465   : > { %6377 = vmatpush1.bf16.msra.mxu0 %v15545_v8  ;;  %v15616_v8 = vld [vmem:[%s20616_s5 + $0x654] ss:$8 sps:$4 sm:$0xff]  }
 0x466   : > { %6378 = vmatprep.subr.bf16.mxu0 %v15550_v9  ;;  %v15614_v9 = vld [vmem:[%s20616_s5 + $0x650] ss:$8 sps:$4 sm:$0xff]  }
 0x469   : > { %6379 = vmatpush1.bf16.msra.mxu0 %v15548_v11  ;;  %v15619_v11 = vld [vmem:[%s20616_s5 + $0x664] ss:$8 sps:$4 sm:$0xff]  }
 0x46a   : > { %6389 = vmatprep.subr.bf16.mxu0 %v15553_v14  ;;  %v15622_v14 = vld [vmem:[%s20616_s5 + $0x674] ss:$8 sps:$4 sm:$0xff]  }
 0x46c   : > { %6381 = vmatmul.mubr.bf16.vlgmr.msra.gmra.mrb[24].mxu0 %v3076_v23  ;;  %v15623_v23 = vld [vmem:[%s20616_s5 + $0x680] ss:$8 sps:$4 sm:$0xff]  }
 0x46d   : > { %6390 = vmatpush1.bf16.msra.mxu0 %v15551_v22  ;;  %6421 = vmatprep.mubr.bf16.mxu0 %v3079_v25  ;;  %v15625_v22 = vld [vmem:[%s20616_s5 + $0x684] ss:$8 sps:$4 sm:$0xff]   ;;  %v15626_v25 = vld [vmem:[%s20616_s5 + $0x690] ss:$8 sps:$4 sm:$0xff]  }
 0x46e   : > { %6391 = vmatprep.subr.bf16.mxu0 %v15556_v24  ;;  %v15628_v24 = vld [vmem:[%s20616_s5 + $0x694] ss:$8 sps:$4 sm:$0xff]  }
 0x471   : > { %6392 = vmatpush1.bf16.msra.mxu0 %v15554_v26  ;;  %v15631_v26 = vld [vmem:[%s20616_s5 + $0x6a4] ss:$8 sps:$4 sm:$0xff]  }
 0x472   : > { %6393 = vmatprep.subr.bf16.mxu0 %v15559_v46  ;;  %v15629_v46 = vld [vmem:[%s20616_s5 + $0x6a0] ss:$8 sps:$4 sm:$0xff]  }
 0x475   : > { %6394 = vmatpush1.bf16.msra.mxu0 %v15557_v49  ;;  %v15634_v49 = vld [vmem:[%s20616_s5 + $0x6b4] ss:$8 sps:$4 sm:$0xff]  }
 0x476   : > { %6395 = vmatprep.subr.bf16.mxu0 %v15562_v51  ;;  %v15632_v51 = vld [vmem:[%s20616_s5 + $0x6b0] ss:$8 sps:$4 sm:$0xff]  }
 0x479   : > { %6396 = vmatpush1.bf16.msra.mxu0 %v15560_v27  ;;  %v15637_v27 = vld [vmem:[%s20616_s5 + $0x6c4] ss:$8 sps:$4 sm:$0xff]  }
 0x47a   : > { %6397 = vmatprep.subr.bf16.mxu0 %v15565_v29  ;;  %v15635_v29 = vld [vmem:[%s20616_s5 + $0x6c0] ss:$8 sps:$4 sm:$0xff]  }
 0x47d   : > { %6398 = vmatpush1.bf16.msra.mxu0 %v15563_v57  ;;  %v15640_v57 = vld [vmem:[%s20616_s5 + $0x6d4] ss:$8 sps:$4 sm:$0xff]  }
 0x47e   : > { %6399 = vmatprep.subr.bf16.mxu0 %v15568_v61  ;;  %v15638_v61 = vld [vmem:[%s20616_s5 + $0x6d0] ss:$8 sps:$4 sm:$0xff]  }
 0x481   : > { %6400 = vmatpush1.bf16.msra.mxu0 %v15566_v3  ;;  %v15643_v3 = vld [vmem:[%s20616_s5 + $0x6e4] ss:$8 sps:$4 sm:$0xff]  }
 0x482   : > { %6401 = vmatprep.subr.bf16.mxu0 %v15571_v4  ;;  %v15641_v4 = vld [vmem:[%s20616_s5 + $0x6e0] ss:$8 sps:$4 sm:$0xff]  }
 0x485   : > { %6402 = vmatpush1.bf16.msra.mxu0 %v15569_v10  ;;  %v15646_v10 = vld [vmem:[%s20616_s5 + $0x6f4] ss:$8 sps:$4 sm:$0xff]  }
 0x486   : > { %6403 = vmatprep.subr.bf16.mxu0 %v15574_v15  ;;  %v15644_v15 = vld [vmem:[%s20616_s5 + $0x6f0] ss:$8 sps:$4 sm:$0xff]  }
 0x489   : > { %6404 = vmatpush1.bf16.msra.mxu0 %v15572_v20  ;;  %v2959_v20 = vrot.slane %v17561_v2, %v17453_v40 }
 0x48a   : > { %6405 = vmatprep.subr.bf16.mxu0 %v15577_v43  ;;  %v15649_v43 = vld [vmem:[%s20616_s5 + $0x704] ss:$8 sps:$4 sm:$0xff]  }
 0x48d   : > { %6406 = vmatpush1.bf16.msra.mxu0 %v15575_v13  ;;  %v2971_v13 = vrot.slane %v17561_v2, %v17456_v41 }
 0x48e   : > { %6407 = vmatprep.subr.bf16.mxu0 %v15580_v19  ;;  %v15647_v19 = vld [vmem:[%s20616_s5 + $0x700] ss:$8 sps:$4 sm:$0xff]  }
 0x491   : > { %6408 = vmatpush1.bf16.msra.mxu0 %v15578_v28  ;;  %v3080_v28 = vpack.c.bf16 %v2959_v20, %v2959_v20  ;;  %v15713_v20 = vld [vmem:[%s20616_s5 + $0x860] ss:$8 sps:$4 sm:$0xff]  }
 0x492   : > { %6409 = vmatprep.subr.bf16.mxu0 %v15583_v6  ;;  %v15652_v6 = vld [vmem:[%s20616_s5 + $0x714] ss:$8 sps:$4 sm:$0xff]  }
 0x495   : > { %6410 = vmatpush1.bf16.msra.mxu0 %v15581_v30  ;;  %v3083_v30 = vpack.c.bf16 %v2971_v13, %v2971_v13  ;;  %v15716_v13 = vld [vmem:[%s20616_s5 + $0x870] ss:$8 sps:$4 sm:$0xff]  }
 0x496   : > { %6411 = vmatprep.subr.bf16.mxu0 %v15586_v0  ;;  %v15650_v0 = vld [vmem:[%s20616_s5 + $0x710] ss:$8 sps:$4 sm:$0xff]  }
 0x499   : > { %6412 = vmatpush1.bf16.msra.mxu0 %v15584_v31  ;;  %v15655_v31 = vld [vmem:[%s20616_s5 + $0x724] ss:$8 sps:$4 sm:$0xff]  }
 0x49a   : > { %6413 = vmatprep.subr.bf16.mxu0 %v15589_v32  ;;  %v15653_v32 = vld [vmem:[%s20616_s5 + $0x720] ss:$8 sps:$4 sm:$0xff]  }
 0x49d   : > { %6414 = vmatpush1.bf16.msra.mxu0 %v15587_v35  ;;  %v15658_v35 = vld [vmem:[%s20616_s5 + $0x734] ss:$8 sps:$4 sm:$0xff]  }
 0x49e   : > { %6415 = vmatprep.subr.bf16.mxu0 %v15592_v37  ;;  %v15656_v37 = vld [vmem:[%s20616_s5 + $0x730] ss:$8 sps:$4 sm:$0xff]  }
 0x4a1   : > { %6416 = vmatpush1.bf16.msra.mxu0 %v15590_v38  ;;  %v15661_v38 = vld [vmem:[%s20616_s5 + $0x744] ss:$8 sps:$4 sm:$0xff]  }
 0x4a2   : > { %6417 = vmatprep.subr.bf16.mxu0 %v15595_v39  ;;  %v15659_v39 = vld [vmem:[%s20616_s5 + $0x740] ss:$8 sps:$4 sm:$0xff]  }
 0x4a5   : > { %6418 = vmatpush1.bf16.msra.mxu0 %v15593_v63  ;;  %v15664_v63 = vld [vmem:[%s20616_s5 + $0x754] ss:$8 sps:$4 sm:$0xff]  }
 0x4a6   : > { %6419 = vmatprep.subr.bf16.mxu0 %v15598_v42  ;;  %v15662_v42 = vld [vmem:[%s20616_s5 + $0x750] ss:$8 sps:$4 sm:$0xff]  }
 0x4a9   : > { %6420 = vmatpush1.bf16.msra.mxu0 %v15596_v44  ;;  %v15667_v44 = vld [vmem:[%s20616_s5 + $0x764] ss:$8 sps:$4 sm:$0xff]  }
 0x4aa   : > { %6430 = vmatprep.subr.bf16.mxu0 %v15601_v47  ;;  %v15670_v47 = vld [vmem:[%s20616_s5 + $0x774] ss:$8 sps:$4 sm:$0xff]  }
 0x4ac   : > { %6422 = vmatmul.mubr.bf16.vlgmr.msra.gmra.mrb[24].mxu0 %v3078_v36  ;;  %v15671_v36 = vld [vmem:[%s20616_s5 + $0x780] ss:$8 sps:$4 sm:$0xff]  }
 0x4ad   : > { %6431 = vmatpush1.bf16.msra.mxu0 %v15599_v33  ;;  %6462 = vmatprep.mubr.bf16.mxu0 %v3081_v21  ;;  %v15673_v33 = vld [vmem:[%s20616_s5 + $0x784] ss:$8 sps:$4 sm:$0xff]   ;;  %v15674_v21 = vld [vmem:[%s20616_s5 + $0x790] ss:$8 sps:$4 sm:$0xff]  }
 0x4ae   : > { %6432 = vmatprep.subr.bf16.mxu0 %v15604_v16  ;;  %v15676_v16 = vld [vmem:[%s20616_s5 + $0x794] ss:$8 sps:$4 sm:$0xff]  }
 0x4b1   : > { %6433 = vmatpush1.bf16.msra.mxu0 %v15602_v48  ;;  %v15679_v48 = vld [vmem:[%s20616_s5 + $0x7a4] ss:$8 sps:$4 sm:$0xff]  }
 0x4b2   : > { %6434 = vmatprep.subr.bf16.mxu0 %v15607_v52  ;;  %v15677_v52 = vld [vmem:[%s20616_s5 + $0x7a0] ss:$8 sps:$4 sm:$0xff]  }
 0x4b5   : > { %6435 = vmatpush1.bf16.msra.mxu0 %v15605_v53  ;;  %v15682_v53 = vld [vmem:[%s20616_s5 + $0x7b4] ss:$8 sps:$4 sm:$0xff]  }
 0x4b6   : > { %6436 = vmatprep.subr.bf16.mxu0 %v15610_v54  ;;  %v15680_v54 = vld [vmem:[%s20616_s5 + $0x7b0] ss:$8 sps:$4 sm:$0xff]  }
 0x4b9   : > { %6437 = vmatpush1.bf16.msra.mxu0 %v15608_v56  ;;  %v15685_v56 = vld [vmem:[%s20616_s5 + $0x7c4] ss:$8 sps:$4 sm:$0xff]  }
 0x4ba   : > { %6438 = vmatprep.subr.bf16.mxu0 %v15613_v58  ;;  %v15683_v58 = vld [vmem:[%s20616_s5 + $0x7c0] ss:$8 sps:$4 sm:$0xff]  }
 0x4bd   : > { %6439 = vmatpush1.bf16.msra.mxu0 %v15611_v50  ;;  %v15688_v50 = vld [vmem:[%s20616_s5 + $0x7d4] ss:$8 sps:$4 sm:$0xff]  }
 0x4be   : > { %6440 = vmatprep.subr.bf16.mxu0 %v15616_v8  ;;  %v15686_v8 = vld [vmem:[%s20616_s5 + $0x7d0] ss:$8 sps:$4 sm:$0xff]  }
 0x4c1   : > { %6441 = vmatpush1.bf16.msra.mxu0 %v15614_v9  ;;  %v15691_v9 = vld [vmem:[%s20616_s5 + $0x7e4] ss:$8 sps:$4 sm:$0xff]  }
 0x4c2   : > { %6442 = vmatprep.subr.bf16.mxu0 %v15619_v11  ;;  %v15689_v11 = vld [vmem:[%s20616_s5 + $0x7e0] ss:$8 sps:$4 sm:$0xff]  }
 0x4c5   : > { %6443 = vmatpush1.bf16.msra.mxu0 %v15617_v12  ;;  %v15694_v12 = vld [vmem:[%s20616_s5 + $0x7f4] ss:$8 sps:$4 sm:$0xff]  }
 0x4c6   : > { %6444 = vmatprep.subr.bf16.mxu0 %v15622_v14  ;;  %v17963_v14 = vld [vmem:[#allocation4 + $0x10] sm:$0xff] }
 0x4c9   : > { %6445 = vmatpush1.bf16.msra.mxu0 %v15620_v18  ;;  %v15692_v18 = vld [vmem:[%s20616_s5 + $0x7f0] ss:$8 sps:$4 sm:$0xff]  }
 0x4ca   : > { %6446 = vmatprep.subr.bf16.mxu0 %v15625_v22  ;;  %v2967_v22 = vrot.slane %v17561_v2, %v17559_v60  ;;  %v15698_v2 = vld [vmem:[%s20616_s5 + $0x810] ss:$8 sps:$4 sm:$0xff]  }
 0x4cd   : > { %6447 = vmatpush1.bf16.msra.mxu0 %v15623_v23  ;;  %v15697_v23 = vld [vmem:[%s20616_s5 + $0x804] ss:$8 sps:$4 sm:$0xff]  }
 0x4ce   : > { %6448 = vmatprep.subr.bf16.mxu0 %v15628_v24  ;;  %v2979_v24 = vrot.slane %v17963_v14, %v17196_v59 }
 0x4d1   : > { %6449 = vmatpush1.bf16.msra.mxu0 %v15626_v25  ;;  %v15695_v25 = vld [vmem:[%s20616_s5 + $0x800] ss:$8 sps:$4 sm:$0xff]  }
 0x4d2   : > { %6450 = vmatprep.subr.bf16.mxu0 %v15631_v26  ;;  %v3082_v26 = vpack.c.bf16 %v2967_v22, %v2967_v22  ;;  %v15761_v22 = vld [vmem:[%s20616_s5 + $0x960] ss:$8 sps:$4 sm:$0xff]  }
 0x4d5   : > { %6451 = vmatpush1.bf16.msra.mxu0 %v15629_v46  ;;  %v15700_v46 = vld [vmem:[%s20616_s5 + $0x814] ss:$8 sps:$4 sm:$0xff]  }
 0x4d6   : > { %6452 = vmatprep.subr.bf16.mxu0 %v15634_v49  ;;  %v3085_v49 = vpack.c.bf16 %v2979_v24, %v2979_v24  ;;  %v15764_v24 = vld [vmem:[%s20616_s5 + $0x970] ss:$8 sps:$4 sm:$0xff]  }
 0x4d9   : > { %6453 = vmatpush1.bf16.msra.mxu0 %v15632_v51  ;;  %v15703_v51 = vld [vmem:[%s20616_s5 + $0x824] ss:$8 sps:$4 sm:$0xff]  }
 0x4da   : > { %6454 = vmatprep.subr.bf16.mxu0 %v15637_v27  ;;  %v15701_v27 = vld [vmem:[%s20616_s5 + $0x820] ss:$8 sps:$4 sm:$0xff]  }
 0x4dd   : > { %6455 = vmatpush1.bf16.msra.mxu0 %v15635_v29  ;;  %v15706_v29 = vld [vmem:[%s20616_s5 + $0x834] ss:$8 sps:$4 sm:$0xff]  }
 0x4de   : > { %6456 = vmatprep.subr.bf16.mxu0 %v15640_v57  ;;  %v15704_v57 = vld [vmem:[%s20616_s5 + $0x830] ss:$8 sps:$4 sm:$0xff]  }
 0x4e1   : > { %6457 = vmatpush1.bf16.msra.mxu0 %v15638_v61  ;;  %v15709_v61 = vld [vmem:[%s20616_s5 + $0x844] ss:$8 sps:$4 sm:$0xff]  }
 0x4e2   : > { %6458 = vmatprep.subr.bf16.mxu0 %v15643_v3  ;;  %v15707_v3 = vld [vmem:[%s20616_s5 + $0x840] ss:$8 sps:$4 sm:$0xff]  }
 0x4e5   : > { %6459 = vmatpush1.bf16.msra.mxu0 %v15641_v4  ;;  %v15712_v4 = vld [vmem:[%s20616_s5 + $0x854] ss:$8 sps:$4 sm:$0xff]  }
 0x4e6   : > { %6460 = vmatprep.subr.bf16.mxu0 %v15646_v10  ;;  %v15710_v10 = vld [vmem:[%s20616_s5 + $0x850] ss:$8 sps:$4 sm:$0xff]  }
 0x4e9   : > { %6461 = vmatpush1.bf16.msra.mxu0 %v15644_v15  ;;  %v15715_v15 = vld [vmem:[%s20616_s5 + $0x864] ss:$8 sps:$4 sm:$0xff]  }
 0x4ea   : > { %6471 = vmatprep.subr.bf16.mxu0 %v15649_v43  ;;  %v15718_v43 = vld [vmem:[%s20616_s5 + $0x874] ss:$8 sps:$4 sm:$0xff]  }
 0x4ec   : > { %6463 = vmatmul.mubr.bf16.vlgmr.msra.gmra.mrb[24].mxu0 %v3080_v28  ;;  %v15719_v28 = vld [vmem:[%s20616_s5 + $0x880] ss:$8 sps:$4 sm:$0xff]  }
 0x4ed   : > { %6472 = vmatpush1.bf16.msra.mxu0 %v15647_v19  ;;  %6503 = vmatprep.mubr.bf16.mxu0 %v3083_v30  ;;  %v15721_v19 = vld [vmem:[%s20616_s5 + $0x884] ss:$8 sps:$4 sm:$0xff]   ;;  %v15722_v30 = vld [vmem:[%s20616_s5 + $0x890] ss:$8 sps:$4 sm:$0xff]  }
 0x4ee   : > { %6473 = vmatprep.subr.bf16.mxu0 %v15652_v6  ;;  %v15724_v6 = vld [vmem:[%s20616_s5 + $0x894] ss:$8 sps:$4 sm:$0xff]  }
 0x4f1   : > { %6474 = vmatpush1.bf16.msra.mxu0 %v15650_v0  ;;  %v15727_v0 = vld [vmem:[%s20616_s5 + $0x8a4] ss:$8 sps:$4 sm:$0xff]  }
 0x4f2   : > { %6475 = vmatprep.subr.bf16.mxu0 %v15655_v31  ;;  %v15725_v31 = vld [vmem:[%s20616_s5 + $0x8a0] ss:$8 sps:$4 sm:$0xff]  }
 0x4f5   : > { %6476 = vmatpush1.bf16.msra.mxu0 %v15653_v32  ;;  %v15730_v32 = vld [vmem:[%s20616_s5 + $0x8b4] ss:$8 sps:$4 sm:$0xff]  }
 0x4f6   : > { %6477 = vmatprep.subr.bf16.mxu0 %v15658_v35  ;;  %v15728_v35 = vld [vmem:[%s20616_s5 + $0x8b0] ss:$8 sps:$4 sm:$0xff]  }
 0x4f9   : > { %6478 = vmatpush1.bf16.msra.mxu0 %v15656_v37  ;;  %v15733_v37 = vld [vmem:[%s20616_s5 + $0x8c4] ss:$8 sps:$4 sm:$0xff]  }
 0x4fa   : > { %6479 = vmatprep.subr.bf16.mxu0 %v15661_v38  ;;  %v15731_v38 = vld [vmem:[%s20616_s5 + $0x8c0] ss:$8 sps:$4 sm:$0xff]  }
 0x4fd   : > { %6480 = vmatpush1.bf16.msra.mxu0 %v15659_v39  ;;  %v15736_v39 = vld [vmem:[%s20616_s5 + $0x8d4] ss:$8 sps:$4 sm:$0xff]  }
 0x4fe   : > { %6481 = vmatprep.subr.bf16.mxu0 %v15664_v63  ;;  %v15734_v63 = vld [vmem:[%s20616_s5 + $0x8d0] ss:$8 sps:$4 sm:$0xff]  }
 0x501   : > { %6482 = vmatpush1.bf16.msra.mxu0 %v15662_v42  ;;  %v15739_v42 = vld [vmem:[%s20616_s5 + $0x8e4] ss:$8 sps:$4 sm:$0xff]  }
 0x502   : > { %6483 = vmatprep.subr.bf16.mxu0 %v15667_v44  ;;  %v15737_v44 = vld [vmem:[%s20616_s5 + $0x8e0] ss:$8 sps:$4 sm:$0xff]  }
 0x505   : > { %6484 = vmatpush1.bf16.msra.mxu0 %v15665_v45  ;;  %v15742_v45 = vld [vmem:[%s20616_s5 + $0x8f4] ss:$8 sps:$4 sm:$0xff]  }
 0x506   : > { %6485 = vmatprep.subr.bf16.mxu0 %v15670_v47  ;;  %v15740_v47 = vld [vmem:[%s20616_s5 + $0x8f0] ss:$8 sps:$4 sm:$0xff]  }
 0x509   : > { %6486 = vmatpush1.bf16.msra.mxu0 %v15668_v17  ;;  %v2975_v17 = vrot.slane %v17963_v14, %v17199_v62 }
 0x50a   : > { %6487 = vmatprep.subr.bf16.mxu0 %v15673_v33  ;;  %v15745_v33 = vld [vmem:[%s20616_s5 + $0x904] ss:$8 sps:$4 sm:$0xff]  }
 0x50d   : > { %6488 = vmatpush1.bf16.msra.mxu0 %v15671_v36  ;;  %v2987_v36 = vrot.slane %v17963_v14, %v17202_v34 }
 0x50e   : > { %6489 = vmatprep.subr.bf16.mxu0 %v15676_v16  ;;  %v15743_v16 = vld [vmem:[%s20616_s5 + $0x900] ss:$8 sps:$4 sm:$0xff]  }
 0x511   : > { %6490 = vmatpush1.bf16.msra.mxu0 %v15674_v21  ;;  %v3084_v21 = vpack.c.bf16 %v2975_v17, %v2975_v17  ;;  %v15809_v17 = vld [vmem:[%s20616_s5 + $0xa60] ss:$8 sps:$4 sm:$0xff]  }
 0x512   : > { %6491 = vmatprep.subr.bf16.mxu0 %v15679_v48  ;;  %v15748_v48 = vld [vmem:[%s20616_s5 + $0x914] ss:$8 sps:$4 sm:$0xff]  }
 0x515   : > { %6492 = vmatpush1.bf16.msra.mxu0 %v15677_v52  ;;  %v3087_v52 = vpack.c.bf16 %v2987_v36, %v2987_v36  ;;  %v15812_v36 = vld [vmem:[%s20616_s5 + $0xa70] ss:$8 sps:$4 sm:$0xff]  }
 0x516   : > { %6493 = vmatprep.subr.bf16.mxu0 %v15682_v53  ;;  %v15746_v53 = vld [vmem:[%s20616_s5 + $0x910] ss:$8 sps:$4 sm:$0xff]  }
 0x519   : > { %6494 = vmatpush1.bf16.msra.mxu0 %v15680_v54  ;;  %v15751_v54 = vld [vmem:[%s20616_s5 + $0x924] ss:$8 sps:$4 sm:$0xff]  }
 0x51a   : > { %6495 = vmatprep.subr.bf16.mxu0 %v15685_v56  ;;  %v15749_v56 = vld [vmem:[%s20616_s5 + $0x920] ss:$8 sps:$4 sm:$0xff]  }
 0x51d   : > { %6496 = vmatpush1.bf16.msra.mxu0 %v15683_v58  ;;  %v15754_v58 = vld [vmem:[%s20616_s5 + $0x934] ss:$8 sps:$4 sm:$0xff]  }
 0x51e   : > { %6497 = vmatprep.subr.bf16.mxu0 %v15688_v50  ;;  %v15752_v50 = vld [vmem:[%s20616_s5 + $0x930] ss:$8 sps:$4 sm:$0xff]  }
 0x521   : > { %6498 = vmatpush1.bf16.msra.mxu0 %v15686_v8  ;;  %v15757_v8 = vld [vmem:[%s20616_s5 + $0x944] ss:$8 sps:$4 sm:$0xff]  }
 0x522   : > { %6499 = vmatprep.subr.bf16.mxu0 %v15691_v9  ;;  %v15755_v9 = vld [vmem:[%s20616_s5 + $0x940] ss:$8 sps:$4 sm:$0xff]  }
 0x525   : > { %6500 = vmatpush1.bf16.msra.mxu0 %v15689_v11  ;;  %v15760_v11 = vld [vmem:[%s20616_s5 + $0x954] ss:$8 sps:$4 sm:$0xff]  }
 0x526   : > { %6501 = vmatprep.subr.bf16.mxu0 %v15694_v12  ;;  %v15758_v12 = vld [vmem:[%s20616_s5 + $0x950] ss:$8 sps:$4 sm:$0xff]  }
 0x529   : > { %6502 = vmatpush1.bf16.msra.mxu0 %v15692_v18  ;;  %v15763_v18 = vld [vmem:[%s20616_s5 + $0x964] ss:$8 sps:$4 sm:$0xff]  }
 0x52a   : > { %6512 = vmatprep.subr.bf16.mxu0 %v15697_v23  ;;  %v15766_v23 = vld [vmem:[%s20616_s5 + $0x974] ss:$8 sps:$4 sm:$0xff]  }
 0x52c   : > { %6504 = vmatmul.mubr.bf16.vlgmr.msra.gmra.mrb[24].mxu0 %v3082_v26  ;;  %v15767_v26 = vld [vmem:[%s20616_s5 + $0x980] ss:$8 sps:$4 sm:$0xff]  }
 0x52d   : > { %6513 = vmatpush1.bf16.msra.mxu0 %v15695_v25  ;;  %6544 = vmatprep.mubr.bf16.mxu0 %v3085_v49  ;;  %v15769_v25 = vld [vmem:[%s20616_s5 + $0x984] ss:$8 sps:$4 sm:$0xff]   ;;  %v15770_v49 = vld [vmem:[%s20616_s5 + $0x990] ss:$8 sps:$4 sm:$0xff]  }
 0x52e   : > { %6514 = vmatprep.subr.bf16.mxu0 %v15700_v46  ;;  %v15772_v46 = vld [vmem:[%s20616_s5 + $0x994] ss:$8 sps:$4 sm:$0xff]  }
 0x531   : > { %6515 = vmatpush1.bf16.msra.mxu0 %v15698_v2  ;;  %v15775_v2 = vld [vmem:[%s20616_s5 + $0x9a4] ss:$8 sps:$4 sm:$0xff]  }
 0x532   : > { %6516 = vmatprep.subr.bf16.mxu0 %v15703_v51  ;;  %v15773_v51 = vld [vmem:[%s20616_s5 + $0x9a0] ss:$8 sps:$4 sm:$0xff]  }
 0x535   : > { %6517 = vmatpush1.bf16.msra.mxu0 %v15701_v27  ;;  %v15778_v27 = vld [vmem:[%s20616_s5 + $0x9b4] ss:$8 sps:$4 sm:$0xff]  }
 0x536   : > { %6518 = vmatprep.subr.bf16.mxu0 %v15706_v29  ;;  %v15776_v29 = vld [vmem:[%s20616_s5 + $0x9b0] ss:$8 sps:$4 sm:$0xff]  }
 0x539   : > { %6519 = vmatpush1.bf16.msra.mxu0 %v15704_v57  ;;  %v15781_v57 = vld [vmem:[%s20616_s5 + $0x9c4] ss:$8 sps:$4 sm:$0xff]  }
 0x53a   : > { %6520 = vmatprep.subr.bf16.mxu0 %v15709_v61  ;;  %v15779_v61 = vld [vmem:[%s20616_s5 + $0x9c0] ss:$8 sps:$4 sm:$0xff]  }
 0x53d   : > { %6521 = vmatpush1.bf16.msra.mxu0 %v15707_v3  ;;  %v15784_v3 = vld [vmem:[%s20616_s5 + $0x9d4] ss:$8 sps:$4 sm:$0xff]  }
 0x53e   : > { %6522 = vmatprep.subr.bf16.mxu0 %v15712_v4  ;;  %v15782_v4 = vld [vmem:[%s20616_s5 + $0x9d0] ss:$8 sps:$4 sm:$0xff]  }
 0x541   : > { %6523 = vmatpush1.bf16.msra.mxu0 %v15710_v10  ;;  %v15787_v10 = vld [vmem:[%s20616_s5 + $0x9e4] ss:$8 sps:$4 sm:$0xff]  }
 0x542   : > { %6524 = vmatprep.subr.bf16.mxu0 %v15715_v15  ;;  %v15785_v15 = vld [vmem:[%s20616_s5 + $0x9e0] ss:$8 sps:$4 sm:$0xff]  }
 0x545   : > { %6525 = vmatpush1.bf16.msra.mxu0 %v15713_v20  ;;  %v15790_v20 = vld [vmem:[%s20616_s5 + $0x9f4] ss:$8 sps:$4 sm:$0xff]  }
 0x546   : > { %6526 = vmatprep.subr.bf16.mxu0 %v15718_v43  ;;  %v15788_v43 = vld [vmem:[%s20616_s5 + $0x9f0] ss:$8 sps:$4 sm:$0xff]  }
 0x549   : > { %6527 = vmatpush1.bf16.msra.mxu0 %v15716_v13  ;;  %v2983_v13 = vrot.slane %v17963_v14, %v17347_v5 }
 0x54a   : > { %6528 = vmatprep.subr.bf16.mxu0 %v15721_v19  ;;  %v15793_v19 = vld [vmem:[%s20616_s5 + $0xa04] ss:$8 sps:$4 sm:$0xff]  }
 0x54d   : > { %6529 = vmatpush1.bf16.msra.mxu0 %v15719_v28  ;;  %v2995_v28 = vrot.slane %v17963_v14, %v17350_v7 }
 0x54e   : > { %6530 = vmatprep.subr.bf16.mxu0 %v15724_v6  ;;  %v15791_v6 = vld [vmem:[%s20616_s5 + $0xa00] ss:$8 sps:$4 sm:$0xff]  }
 0x551   : > { %6531 = vmatpush1.bf16.msra.mxu0 %v15722_v30  ;;  %v3086_v30 = vpack.c.bf16 %v2983_v13, %v2983_v13  ;;  %v15857_v13 = vld [vmem:[%s20616_s5 + $0xb60] ss:$8 sps:$4 sm:$0xff]  }
 0x552   : > { %6532 = vmatprep.subr.bf16.mxu0 %v15727_v0  ;;  %v15796_v0 = vld [vmem:[%s20616_s5 + $0xa14] ss:$8 sps:$4 sm:$0xff]  }
 0x555   : > { %6533 = vmatpush1.bf16.msra.mxu0 %v15725_v31  ;;  %v3089_v31 = vpack.c.bf16 %v2995_v28, %v2995_v28  ;;  %v15860_v28 = vld [vmem:[%s20616_s5 + $0xb70] ss:$8 sps:$4 sm:$0xff]  }
 0x556   : > { %6534 = vmatprep.subr.bf16.mxu0 %v15730_v32  ;;  %v15794_v32 = vld [vmem:[%s20616_s5 + $0xa10] ss:$8 sps:$4 sm:$0xff]  }
 0x559   : > { %6535 = vmatpush1.bf16.msra.mxu0 %v15728_v35  ;;  %v15799_v35 = vld [vmem:[%s20616_s5 + $0xa24] ss:$8 sps:$4 sm:$0xff]  }
 0x55a   : > { %6536 = vmatprep.subr.bf16.mxu0 %v15733_v37  ;;  %v15797_v37 = vld [vmem:[%s20616_s5 + $0xa20] ss:$8 sps:$4 sm:$0xff]  }
 0x55d   : > { %6537 = vmatpush1.bf16.msra.mxu0 %v15731_v38  ;;  %v15802_v38 = vld [vmem:[%s20616_s5 + $0xa34] ss:$8 sps:$4 sm:$0xff]  }
 0x55e   : > { %6538 = vmatprep.subr.bf16.mxu0 %v15736_v39  ;;  %v15800_v39 = vld [vmem:[%s20616_s5 + $0xa30] ss:$8 sps:$4 sm:$0xff]  }
 0x561   : > { %6539 = vmatpush1.bf16.msra.mxu0 %v15734_v63  ;;  %v15805_v63 = vld [vmem:[%s20616_s5 + $0xa44] ss:$8 sps:$4 sm:$0xff]  }
 0x562   : > { %6540 = vmatprep.subr.bf16.mxu0 %v15739_v42  ;;  %v15803_v42 = vld [vmem:[%s20616_s5 + $0xa40] ss:$8 sps:$4 sm:$0xff]  }
 0x565   : > { %6541 = vmatpush1.bf16.msra.mxu0 %v15737_v44  ;;  %v15808_v44 = vld [vmem:[%s20616_s5 + $0xa54] ss:$8 sps:$4 sm:$0xff]  }
 0x566   : > { %6542 = vmatprep.subr.bf16.mxu0 %v15742_v45  ;;  %v15806_v45 = vld [vmem:[%s20616_s5 + $0xa50] ss:$8 sps:$4 sm:$0xff]  }
 0x569   : > { %6543 = vmatpush1.bf16.msra.mxu0 %v15740_v47  ;;  %v15811_v47 = vld [vmem:[%s20616_s5 + $0xa64] ss:$8 sps:$4 sm:$0xff]  }
 0x56a   : > { %6553 = vmatprep.subr.bf16.mxu0 %v15745_v33  ;;  %v15814_v33 = vld [vmem:[%s20616_s5 + $0xa74] ss:$8 sps:$4 sm:$0xff]  }
 0x56c   : > { %6545 = vmatmul.mubr.bf16.vlgmr.msra.gmra.mrb[24].mxu0 %v3084_v21  ;;  %v15815_v21 = vld [vmem:[%s20616_s5 + $0xa80] ss:$8 sps:$4 sm:$0xff]  }
 0x56d   : > { %6554 = vmatpush1.bf16.msra.mxu0 %v15743_v16  ;;  %6585 = vmatprep.mubr.bf16.mxu0 %v3087_v52  ;;  %v15817_v16 = vld [vmem:[%s20616_s5 + $0xa84] ss:$8 sps:$4 sm:$0xff]   ;;  %v15818_v52 = vld [vmem:[%s20616_s5 + $0xa90] ss:$8 sps:$4 sm:$0xff]  }
 0x56e   : > { %6555 = vmatprep.subr.bf16.mxu0 %v15748_v48  ;;  %v15820_v48 = vld [vmem:[%s20616_s5 + $0xa94] ss:$8 sps:$4 sm:$0xff]  }
 0x571   : > { %6556 = vmatpush1.bf16.msra.mxu0 %v15746_v53  ;;  %v15823_v53 = vld [vmem:[%s20616_s5 + $0xaa4] ss:$8 sps:$4 sm:$0xff]  }
 0x572   : > { %6557 = vmatprep.subr.bf16.mxu0 %v15751_v54  ;;  %v15821_v54 = vld [vmem:[%s20616_s5 + $0xaa0] ss:$8 sps:$4 sm:$0xff]  }
 0x575   : > { %6558 = vmatpush1.bf16.msra.mxu0 %v15749_v56  ;;  %v15826_v56 = vld [vmem:[%s20616_s5 + $0xab4] ss:$8 sps:$4 sm:$0xff]  }
 0x576   : > { %6559 = vmatprep.subr.bf16.mxu0 %v15754_v58  ;;  %v15824_v58 = vld [vmem:[%s20616_s5 + $0xab0] ss:$8 sps:$4 sm:$0xff]  }
 0x579   : > { %6560 = vmatpush1.bf16.msra.mxu0 %v15752_v50  ;;  %v15829_v50 = vld [vmem:[%s20616_s5 + $0xac4] ss:$8 sps:$4 sm:$0xff]  }
 0x57a   : > { %6561 = vmatprep.subr.bf16.mxu0 %v15757_v8  ;;  %v15827_v8 = vld [vmem:[%s20616_s5 + $0xac0] ss:$8 sps:$4 sm:$0xff]  }
 0x57d   : > { %6562 = vmatpush1.bf16.msra.mxu0 %v15755_v9  ;;  %v15832_v9 = vld [vmem:[%s20616_s5 + $0xad4] ss:$8 sps:$4 sm:$0xff]  }
 0x57e   : > { %6563 = vmatprep.subr.bf16.mxu0 %v15760_v11  ;;  %v15830_v11 = vld [vmem:[%s20616_s5 + $0xad0] ss:$8 sps:$4 sm:$0xff]  }
 0x581   : > { %6564 = vmatpush1.bf16.msra.mxu0 %v15758_v12  ;;  %v15835_v12 = vld [vmem:[%s20616_s5 + $0xae4] ss:$8 sps:$4 sm:$0xff]  }
 0x582   : > { %6565 = vmatprep.subr.bf16.mxu0 %v15763_v18  ;;  %v15833_v18 = vld [vmem:[%s20616_s5 + $0xae0] ss:$8 sps:$4 sm:$0xff]  }
 0x585   : > { %6566 = vmatpush1.bf16.msra.mxu0 %v15761_v22  ;;  %v15838_v22 = vld [vmem:[%s20616_s5 + $0xaf4] ss:$8 sps:$4 sm:$0xff]  }
 0x586   : > { %6567 = vmatprep.subr.bf16.mxu0 %v15766_v23  ;;  %v15836_v23 = vld [vmem:[%s20616_s5 + $0xaf0] ss:$8 sps:$4 sm:$0xff]  }
 0x589   : > { %6568 = vmatpush1.bf16.msra.mxu0 %v15764_v24  ;;  %v2991_v24 = vrot.slane %v17963_v14, %v17453_v40 }
 0x58a   : > { %6569 = vmatprep.subr.bf16.mxu0 %v15769_v25  ;;  %v15841_v25 = vld [vmem:[%s20616_s5 + $0xb04] ss:$8 sps:$4 sm:$0xff]  }
 0x58d   : > { %6570 = vmatpush1.bf16.msra.mxu0 %v15767_v26  ;;  %v3003_v26 = vrot.slane %v17963_v14, %v17456_v41 }
 0x58e   : > { %6571 = vmatprep.subr.bf16.mxu0 %v15772_v46  ;;  %v15839_v46 = vld [vmem:[%s20616_s5 + $0xb00] ss:$8 sps:$4 sm:$0xff]  }
 0x591   : > { %6572 = vmatpush1.bf16.msra.mxu0 %v15770_v49  ;;  %v3088_v49 = vpack.c.bf16 %v2991_v24, %v2991_v24  ;;  %v15905_v24 = vld [vmem:[%s20616_s5 + $0xc60] ss:$8 sps:$4 sm:$0xff]  }
 0x592   : > { %6573 = vmatprep.subr.bf16.mxu0 %v15775_v2  ;;  %v15844_v2 = vld [vmem:[%s20616_s5 + $0xb14] ss:$8 sps:$4 sm:$0xff]  }
 0x595   : > { %6574 = vmatpush1.bf16.msra.mxu0 %v15773_v51  ;;  %v3091_v51 = vpack.c.bf16 %v3003_v26, %v3003_v26  ;;  %v15908_v26 = vld [vmem:[%s20616_s5 + $0xc70] ss:$8 sps:$4 sm:$0xff]  }
 0x596   : > { %6575 = vmatprep.subr.bf16.mxu0 %v15778_v27  ;;  %v15842_v27 = vld [vmem:[%s20616_s5 + $0xb10] ss:$8 sps:$4 sm:$0xff]  }
 0x599   : > { %6576 = vmatpush1.bf16.msra.mxu0 %v15776_v29  ;;  %v15847_v29 = vld [vmem:[%s20616_s5 + $0xb24] ss:$8 sps:$4 sm:$0xff]  }
 0x59a   : > { %6577 = vmatprep.subr.bf16.mxu0 %v15781_v57  ;;  %v15845_v57 = vld [vmem:[%s20616_s5 + $0xb20] ss:$8 sps:$4 sm:$0xff]  }
 0x59d   : > { %6578 = vmatpush1.bf16.msra.mxu0 %v15779_v61  ;;  %v15850_v61 = vld [vmem:[%s20616_s5 + $0xb34] ss:$8 sps:$4 sm:$0xff]  }
 0x59e   : > { %6579 = vmatprep.subr.bf16.mxu0 %v15784_v3  ;;  %v15848_v3 = vld [vmem:[%s20616_s5 + $0xb30] ss:$8 sps:$4 sm:$0xff]  }
 0x5a1   : > { %6580 = vmatpush1.bf16.msra.mxu0 %v15782_v4  ;;  %v15853_v4 = vld [vmem:[%s20616_s5 + $0xb44] ss:$8 sps:$4 sm:$0xff]  }
 0x5a2   : > { %6581 = vmatprep.subr.bf16.mxu0 %v15787_v10  ;;  %v15851_v10 = vld [vmem:[%s20616_s5 + $0xb40] ss:$8 sps:$4 sm:$0xff]  }
 0x5a5   : > { %6582 = vmatpush1.bf16.msra.mxu0 %v15785_v15  ;;  %v15856_v15 = vld [vmem:[%s20616_s5 + $0xb54] ss:$8 sps:$4 sm:$0xff]  }
 0x5a6   : > { %6583 = vmatprep.subr.bf16.mxu0 %v15790_v20  ;;  %v15854_v20 = vld [vmem:[%s20616_s5 + $0xb50] ss:$8 sps:$4 sm:$0xff]  }
 0x5a9   : > { %6584 = vmatpush1.bf16.msra.mxu0 %v15788_v43  ;;  %v15859_v43 = vld [vmem:[%s20616_s5 + $0xb64] ss:$8 sps:$4 sm:$0xff]  }
 0x5aa   : > { %6594 = vmatprep.subr.bf16.mxu0 %v15793_v19  ;;  %v15862_v19 = vld [vmem:[%s20616_s5 + $0xb74] ss:$8 sps:$4 sm:$0xff]  }
 0x5ac   : > { %6586 = vmatmul.mubr.bf16.vlgmr.msra.gmra.mrb[24].mxu0 %v3086_v30  ;;  %v15863_v30 = vld [vmem:[%s20616_s5 + $0xb80] ss:$8 sps:$4 sm:$0xff]  }
 0x5ad   : > { %6595 = vmatpush1.bf16.msra.mxu0 %v15791_v6  ;;  %6626 = vmatprep.mubr.bf16.mxu0 %v3089_v31  ;;  %v15865_v6 = vld [vmem:[%s20616_s5 + $0xb84] ss:$8 sps:$4 sm:$0xff]   ;;  %v15866_v31 = vld [vmem:[%s20616_s5 + $0xb90] ss:$8 sps:$4 sm:$0xff]  }
 0x5ae   : > { %6596 = vmatprep.subr.bf16.mxu0 %v15796_v0  ;;  %v15868_v0 = vld [vmem:[%s20616_s5 + $0xb94] ss:$8 sps:$4 sm:$0xff]  }
 0x5b1   : > { %6597 = vmatpush1.bf16.msra.mxu0 %v15794_v32  ;;  %v15871_v32 = vld [vmem:[%s20616_s5 + $0xba4] ss:$8 sps:$4 sm:$0xff]  }
 0x5b2   : > { %6598 = vmatprep.subr.bf16.mxu0 %v15799_v35  ;;  %v15869_v35 = vld [vmem:[%s20616_s5 + $0xba0] ss:$8 sps:$4 sm:$0xff]  }
 0x5b5   : > { %6599 = vmatpush1.bf16.msra.mxu0 %v15797_v37  ;;  %v15874_v37 = vld [vmem:[%s20616_s5 + $0xbb4] ss:$8 sps:$4 sm:$0xff]  }
 0x5b6   : > { %6600 = vmatprep.subr.bf16.mxu0 %v15802_v38  ;;  %v15872_v38 = vld [vmem:[%s20616_s5 + $0xbb0] ss:$8 sps:$4 sm:$0xff]  }
 0x5b9   : > { %6601 = vmatpush1.bf16.msra.mxu0 %v15800_v39  ;;  %v15877_v39 = vld [vmem:[%s20616_s5 + $0xbc4] ss:$8 sps:$4 sm:$0xff]  }
 0x5ba   : > { %6602 = vmatprep.subr.bf16.mxu0 %v15805_v63  ;;  %v15875_v63 = vld [vmem:[%s20616_s5 + $0xbc0] ss:$8 sps:$4 sm:$0xff]  }
 0x5bd   : > { %6603 = vmatpush1.bf16.msra.mxu0 %v15803_v42  ;;  %v15880_v42 = vld [vmem:[%s20616_s5 + $0xbd4] ss:$8 sps:$4 sm:$0xff]  }
 0x5be   : > { %6604 = vmatprep.subr.bf16.mxu0 %v15808_v44  ;;  %v15878_v44 = vld [vmem:[%s20616_s5 + $0xbd0] ss:$8 sps:$4 sm:$0xff]  }
 0x5c1   : > { %6605 = vmatpush1.bf16.msra.mxu0 %v15806_v45  ;;  %v15883_v45 = vld [vmem:[%s20616_s5 + $0xbe4] ss:$8 sps:$4 sm:$0xff]  }
 0x5c2   : > { %6606 = vmatprep.subr.bf16.mxu0 %v15811_v47  ;;  %v15881_v47 = vld [vmem:[%s20616_s5 + $0xbe0] ss:$8 sps:$4 sm:$0xff]  }
 0x5c5   : > { %6607 = vmatpush1.bf16.msra.mxu0 %v15809_v17  ;;  %v15886_v17 = vld [vmem:[%s20616_s5 + $0xbf4] ss:$8 sps:$4 sm:$0xff]  }
 0x5c6   : > { %6608 = vmatprep.subr.bf16.mxu0 %v15814_v33  ;;  %v18365_v33 = vld [vmem:[#allocation4 + $0x18] sm:$0xff] }
 0x5c9   : > { %6609 = vmatpush1.bf16.msra.mxu0 %v15812_v36  ;;  %v15884_v36 = vld [vmem:[%s20616_s5 + $0xbf0] ss:$8 sps:$4 sm:$0xff]  }
 0x5ca   : > { %6610 = vmatprep.subr.bf16.mxu0 %v15817_v16  ;;  %v2999_v16 = vrot.slane %v17963_v14, %v17559_v60  ;;  %v15890_v14 = vld [vmem:[%s20616_s5 + $0xc10] ss:$8 sps:$4 sm:$0xff]  }
 0x5cd   : > { %6611 = vmatpush1.bf16.msra.mxu0 %v15815_v21  ;;  %v15889_v21 = vld [vmem:[%s20616_s5 + $0xc04] ss:$8 sps:$4 sm:$0xff]  }
 0x5ce   : > { %6612 = vmatprep.subr.bf16.mxu0 %v15820_v48  ;;  %v3011_v48 = vrot.slane %v18365_v33, %v17196_v59 }
 0x5d1   : > { %6613 = vmatpush1.bf16.msra.mxu0 %v15818_v52  ;;  %v15887_v52 = vld [vmem:[%s20616_s5 + $0xc00] ss:$8 sps:$4 sm:$0xff]  }
 0x5d2   : > { %6614 = vmatprep.subr.bf16.mxu0 %v15823_v53  ;;  %v3090_v53 = vpack.c.bf16 %v2999_v16, %v2999_v16  ;;  %v15953_v16 = vld [vmem:[%s20616_s5 + $0xd60] ss:$8 sps:$4 sm:$0xff]  }
 0x5d5   : > { %6615 = vmatpush1.bf16.msra.mxu0 %v15821_v54  ;;  %v15892_v54 = vld [vmem:[%s20616_s5 + $0xc14] ss:$8 sps:$4 sm:$0xff]  }
 0x5d6   : > { %6616 = vmatprep.subr.bf16.mxu0 %v15826_v56  ;;  %v3093_v56 = vpack.c.bf16 %v3011_v48, %v3011_v48  ;;  %v15956_v48 = vld [vmem:[%s20616_s5 + $0xd70] ss:$8 sps:$4 sm:$0xff]  }
 0x5d9   : > { %6617 = vmatpush1.bf16.msra.mxu0 %v15824_v58  ;;  %v15895_v58 = vld [vmem:[%s20616_s5 + $0xc24] ss:$8 sps:$4 sm:$0xff]  }
 0x5da   : > { %6618 = vmatprep.subr.bf16.mxu0 %v15829_v50  ;;  %v15893_v50 = vld [vmem:[%s20616_s5 + $0xc20] ss:$8 sps:$4 sm:$0xff]  }
 0x5dd   : > { %6619 = vmatpush1.bf16.msra.mxu0 %v15827_v8  ;;  %v15898_v8 = vld [vmem:[%s20616_s5 + $0xc34] ss:$8 sps:$4 sm:$0xff]  }
 0x5de   : > { %6620 = vmatprep.subr.bf16.mxu0 %v15832_v9  ;;  %v15896_v9 = vld [vmem:[%s20616_s5 + $0xc30] ss:$8 sps:$4 sm:$0xff]  }
 0x5e1   : > { %6621 = vmatpush1.bf16.msra.mxu0 %v15830_v11  ;;  %v15901_v11 = vld [vmem:[%s20616_s5 + $0xc44] ss:$8 sps:$4 sm:$0xff]  }
 0x5e2   : > { %6622 = vmatprep.subr.bf16.mxu0 %v15835_v12  ;;  %v15899_v12 = vld [vmem:[%s20616_s5 + $0xc40] ss:$8 sps:$4 sm:$0xff]  }
 0x5e5   : > { %6623 = vmatpush1.bf16.msra.mxu0 %v15833_v18  ;;  %v15904_v18 = vld [vmem:[%s20616_s5 + $0xc54] ss:$8 sps:$4 sm:$0xff]  }
 0x5e6   : > { %6624 = vmatprep.subr.bf16.mxu0 %v15838_v22  ;;  %v15902_v22 = vld [vmem:[%s20616_s5 + $0xc50] ss:$8 sps:$4 sm:$0xff]  }
 0x5e9   : > { %6625 = vmatpush1.bf16.msra.mxu0 %v15836_v23  ;;  %v15907_v23 = vld [vmem:[%s20616_s5 + $0xc64] ss:$8 sps:$4 sm:$0xff]  }
 0x5ea   : > { %6635 = vmatprep.subr.bf16.mxu0 %v15841_v25  ;;  %v15910_v25 = vld [vmem:[%s20616_s5 + $0xc74] ss:$8 sps:$4 sm:$0xff]  }
 0x5ec   : > { %6627 = vmatmul.mubr.bf16.vlgmr.msra.gmra.mrb[24].mxu0 %v3088_v49  ;;  %v15911_v49 = vld [vmem:[%s20616_s5 + $0xc80] ss:$8 sps:$4 sm:$0xff]  }
 0x5ed   : > { %6636 = vmatpush1.bf16.msra.mxu0 %v15839_v46  ;;  %6667 = vmatprep.mubr.bf16.mxu0 %v3091_v51  ;;  %v15913_v46 = vld [vmem:[%s20616_s5 + $0xc84] ss:$8 sps:$4 sm:$0xff]   ;;  %v15914_v51 = vld [vmem:[%s20616_s5 + $0xc90] ss:$8 sps:$4 sm:$0xff]  }
 0x5ee   : > { %6637 = vmatprep.subr.bf16.mxu0 %v15844_v2  ;;  %v15916_v2 = vld [vmem:[%s20616_s5 + $0xc94] ss:$8 sps:$4 sm:$0xff]  }
 0x5f1   : > { %6638 = vmatpush1.bf16.msra.mxu0 %v15842_v27  ;;  %v15919_v27 = vld [vmem:[%s20616_s5 + $0xca4] ss:$8 sps:$4 sm:$0xff]  }
 0x5f2   : > { %6639 = vmatprep.subr.bf16.mxu0 %v15847_v29  ;;  %v15917_v29 = vld [vmem:[%s20616_s5 + $0xca0] ss:$8 sps:$4 sm:$0xff]  }
 0x5f5   : > { %6640 = vmatpush1.bf16.msra.mxu0 %v15845_v57  ;;  %v15922_v57 = vld [vmem:[%s20616_s5 + $0xcb4] ss:$8 sps:$4 sm:$0xff]  }
 0x5f6   : > { %6641 = vmatprep.subr.bf16.mxu0 %v15850_v61  ;;  %v15920_v61 = vld [vmem:[%s20616_s5 + $0xcb0] ss:$8 sps:$4 sm:$0xff]  }
 0x5f9   : > { %6642 = vmatpush1.bf16.msra.mxu0 %v15848_v3  ;;  %v15925_v3 = vld [vmem:[%s20616_s5 + $0xcc4] ss:$8 sps:$4 sm:$0xff]  }
 0x5fa   : > { %6643 = vmatprep.subr.bf16.mxu0 %v15853_v4  ;;  %v15923_v4 = vld [vmem:[%s20616_s5 + $0xcc0] ss:$8 sps:$4 sm:$0xff]  }
 0x5fd   : > { %6644 = vmatpush1.bf16.msra.mxu0 %v15851_v10  ;;  %v15928_v10 = vld [vmem:[%s20616_s5 + $0xcd4] ss:$8 sps:$4 sm:$0xff]  }
 0x5fe   : > { %6645 = vmatprep.subr.bf16.mxu0 %v15856_v15  ;;  %v15926_v15 = vld [vmem:[%s20616_s5 + $0xcd0] ss:$8 sps:$4 sm:$0xff]  }
 0x601   : > { %6646 = vmatpush1.bf16.msra.mxu0 %v15854_v20  ;;  %v15931_v20 = vld [vmem:[%s20616_s5 + $0xce4] ss:$8 sps:$4 sm:$0xff]  }
 0x602   : > { %6647 = vmatprep.subr.bf16.mxu0 %v15859_v43  ;;  %v15929_v43 = vld [vmem:[%s20616_s5 + $0xce0] ss:$8 sps:$4 sm:$0xff]  }
 0x605   : > { %6648 = vmatpush1.bf16.msra.mxu0 %v15857_v13  ;;  %v15934_v13 = vld [vmem:[%s20616_s5 + $0xcf4] ss:$8 sps:$4 sm:$0xff]  }
 0x606   : > { %6649 = vmatprep.subr.bf16.mxu0 %v15862_v19  ;;  %v15932_v19 = vld [vmem:[%s20616_s5 + $0xcf0] ss:$8 sps:$4 sm:$0xff]  }
 0x609   : > { %6650 = vmatpush1.bf16.msra.mxu0 %v15860_v28  ;;  %v3007_v28 = vrot.slane %v18365_v33, %v17199_v62 }
 0x60a   : > { %6651 = vmatprep.subr.bf16.mxu0 %v15865_v6  ;;  %v15937_v6 = vld [vmem:[%s20616_s5 + $0xd04] ss:$8 sps:$4 sm:$0xff]  }
 0x60d   : > { %6652 = vmatpush1.bf16.msra.mxu0 %v15863_v30  ;;  %v3019_v30 = vrot.slane %v18365_v33, %v17202_v34 }
 0x60e   : > { %6653 = vmatprep.subr.bf16.mxu0 %v15868_v0  ;;  %v15935_v0 = vld [vmem:[%s20616_s5 + $0xd00] ss:$8 sps:$4 sm:$0xff]  }
 0x611   : > { %6654 = vmatpush1.bf16.msra.mxu0 %v15866_v31  ;;  %v3092_v31 = vpack.c.bf16 %v3007_v28, %v3007_v28  ;;  %v15989_v28 = vld [vmem:[%s20616_s5 + $0xe20] ss:$8 sps:$4 sm:$0xff]  }
 0x612   : > { %6655 = vmatprep.subr.bf16.mxu0 %v15871_v32  ;;  %v15940_v32 = vld [vmem:[%s20616_s5 + $0xd14] ss:$8 sps:$4 sm:$0xff]  }
 0x615   : > { %6656 = vmatpush1.bf16.msra.mxu0 %v15869_v35  ;;  %v3095_v35 = vpack.c.bf16 %v3019_v30, %v3019_v30  ;;  %v15992_v30 = vld [vmem:[%s20616_s5 + $0xe30] ss:$8 sps:$4 sm:$0xff]  }
 0x616   : > { %6657 = vmatprep.subr.bf16.mxu0 %v15874_v37  ;;  %v15938_v37 = vld [vmem:[%s20616_s5 + $0xd10] ss:$8 sps:$4 sm:$0xff]  }
 0x619   : > { %6658 = vmatpush1.bf16.msra.mxu0 %v15872_v38  ;;  %v15943_v38 = vld [vmem:[%s20616_s5 + $0xd24] ss:$8 sps:$4 sm:$0xff]  }
 0x61a   : > { %6659 = vmatprep.subr.bf16.mxu0 %v15877_v39  ;;  %v15941_v39 = vld [vmem:[%s20616_s5 + $0xd20] ss:$8 sps:$4 sm:$0xff]  }
 0x61d   : > { %6660 = vmatpush1.bf16.msra.mxu0 %v15875_v63  ;;  %v15946_v63 = vld [vmem:[%s20616_s5 + $0xd34] ss:$8 sps:$4 sm:$0xff]  }
 0x61e   : > { %6661 = vmatprep.subr.bf16.mxu0 %v15880_v42  ;;  %v15944_v42 = vld [vmem:[%s20616_s5 + $0xd30] ss:$8 sps:$4 sm:$0xff]  }
 0x621   : > { %6662 = vmatpush1.bf16.msra.mxu0 %v15878_v44  ;;  %v15949_v44 = vld [vmem:[%s20616_s5 + $0xd44] ss:$8 sps:$4 sm:$0xff]  }
 0x622   : > { %6663 = vmatprep.subr.bf16.mxu0 %v15883_v45  ;;  %v15947_v45 = vld [vmem:[%s20616_s5 + $0xd40] ss:$8 sps:$4 sm:$0xff]  }
 0x625   : > { %6664 = vmatpush1.bf16.msra.mxu0 %v15881_v47  ;;  %v15952_v47 = vld [vmem:[%s20616_s5 + $0xd54] ss:$8 sps:$4 sm:$0xff]  }
 0x626   : > { %6665 = vmatprep.subr.bf16.mxu0 %v15886_v17  ;;  %v15950_v17 = vld [vmem:[%s20616_s5 + $0xd50] ss:$8 sps:$4 sm:$0xff]  }
 0x629   : > { %6666 = vmatpush1.bf16.msra.mxu0 %v15884_v36  ;;  %v15955_v36 = vld [vmem:[%s20616_s5 + $0xd64] ss:$8 sps:$4 sm:$0xff]  }
 0x62a   : > { %6676 = vmatprep.subr.bf16.mxu0 %v15889_v21  ;;  %v15958_v21 = vld [vmem:[%s20616_s5 + $0xd74] ss:$8 sps:$4 sm:$0xff]  }
 0x62c   : > { %6668 = vmatmul.mubr.bf16.vlgmr.msra.gmra.mrb[24].mxu0 %v3090_v53  ;;  %v15959_v53 = vld [vmem:[%s20616_s5 + $0xd80] ss:$8 sps:$4 sm:$0xff]  }
 0x62d   : > { %6677 = vmatpush1.bf16.msra.mxu0 %v15887_v52  ;;  %6708 = vmatprep.mubr.bf16.mxu0 %v3093_v56  ;;  %v15961_v52 = vld [vmem:[%s20616_s5 + $0xd84] ss:$8 sps:$4 sm:$0xff]   ;;  %v15962_v56 = vld [vmem:[%s20616_s5 + $0xd90] ss:$8 sps:$4 sm:$0xff]  }
 0x62e   : > { %6678 = vmatprep.subr.bf16.mxu0 %v15892_v54  ;;  %v15964_v54 = vld [vmem:[%s20616_s5 + $0xd94] ss:$8 sps:$4 sm:$0xff]  }
 0x631   : > { %6679 = vmatpush1.bf16.msra.mxu0 %v15890_v14  ;;  %v15967_v14 = vld [vmem:[%s20616_s5 + $0xda4] ss:$8 sps:$4 sm:$0xff]  }
 0x632   : > { %6680 = vmatprep.subr.bf16.mxu0 %v15895_v58  ;;  %v15965_v58 = vld [vmem:[%s20616_s5 + $0xda0] ss:$8 sps:$4 sm:$0xff]  }
 0x635   : > { %6681 = vmatpush1.bf16.msra.mxu0 %v15893_v50  ;;  %v15970_v50 = vld [vmem:[%s20616_s5 + $0xdb4] ss:$8 sps:$4 sm:$0xff]  }
 0x636   : > { %6682 = vmatprep.subr.bf16.mxu0 %v15898_v8  ;;  %v15968_v8 = vld [vmem:[%s20616_s5 + $0xdb0] ss:$8 sps:$4 sm:$0xff]  }
 0x639   : > { %6683 = vmatpush1.bf16.msra.mxu0 %v15896_v9  ;;  %v15973_v9 = vld [vmem:[%s20616_s5 + $0xdc4] ss:$8 sps:$4 sm:$0xff]  }
 0x63a   : > { %6684 = vmatprep.subr.bf16.mxu0 %v15901_v11  ;;  %v15971_v11 = vld [vmem:[%s20616_s5 + $0xdc0] ss:$8 sps:$4 sm:$0xff]  }
 0x63d   : > { %6685 = vmatpush1.bf16.msra.mxu0 %v15899_v12  ;;  %v15976_v12 = vld [vmem:[%s20616_s5 + $0xdd4] ss:$8 sps:$4 sm:$0xff]  }
 0x63e   : > { %6686 = vmatprep.subr.bf16.mxu0 %v15904_v18  ;;  %v15974_v18 = vld [vmem:[%s20616_s5 + $0xdd0] ss:$8 sps:$4 sm:$0xff]  }
 0x641   : > { %6687 = vmatpush1.bf16.msra.mxu0 %v15902_v22  ;;  %v15979_v22 = vld [vmem:[%s20616_s5 + $0xde4] ss:$8 sps:$4 sm:$0xff]  }
 0x642   : > { %6688 = vmatprep.subr.bf16.mxu0 %v15907_v23  ;;  %v15977_v23 = vld [vmem:[%s20616_s5 + $0xde0] ss:$8 sps:$4 sm:$0xff]  }
 0x645   : > { %6689 = vmatpush1.bf16.msra.mxu0 %v15905_v24  ;;  %v15982_v24 = vld [vmem:[%s20616_s5 + $0xdf4] ss:$8 sps:$4 sm:$0xff]  }
 0x646   : > { %6690 = vmatprep.subr.bf16.mxu0 %v15910_v25  ;;  %v15980_v25 = vld [vmem:[%s20616_s5 + $0xdf0] ss:$8 sps:$4 sm:$0xff]  }
 0x649   : > { %6691 = vmatpush1.bf16.msra.mxu0 %v15908_v26  ;;  %v3015_v26 = vrot.slane %v18365_v33, %v17347_v5 }
 0x64a   : > { %6692 = vmatprep.subr.bf16.mxu0 %v15913_v46  ;;  %v15985_v46 = vld [vmem:[%s20616_s5 + $0xe04] ss:$8 sps:$4 sm:$0xff]  }
 0x64d   : > { %6693 = vmatpush1.bf16.msra.mxu0 %v15911_v49  ;;  %v3027_v49 = vrot.slane %v18365_v33, %v17350_v7 }
 0x64e   : > { %6694 = vmatprep.subr.bf16.mxu0 %v15916_v2  ;;  %v15983_v2 = vld [vmem:[%s20616_s5 + $0xe00] ss:$8 sps:$4 sm:$0xff]  }
 0x651   : > { %6695 = vmatpush1.bf16.msra.mxu0 %v15914_v51  ;;  %v3094_v51 = vpack.c.bf16 %v3015_v26, %v3015_v26  ;;  %v16037_v26 = vld [vmem:[%s20616_s5 + $0xf20] ss:$8 sps:$4 sm:$0xff]  }
 0x652   : > { %6696 = vmatprep.subr.bf16.mxu0 %v15919_v27  ;;  %v15988_v27 = vld [vmem:[%s20616_s5 + $0xe14] ss:$8 sps:$4 sm:$0xff]  }
 0x655   : > { %6697 = vmatpush1.bf16.msra.mxu0 %v15917_v29  ;;  %v3097_v29 = vpack.c.bf16 %v3027_v49, %v3027_v49  ;;  %v16040_v49 = vld [vmem:[%s20616_s5 + $0xf30] ss:$8 sps:$4 sm:$0xff]  }
 0x656   : > { %6698 = vmatprep.subr.bf16.mxu0 %v15922_v57  ;;  %v6849_v57 = vld [vmem:[%s20580_s8] sm:$0xff] }
 0x659   : > { %6699 = vmatpush1.bf16.msra.mxu0 %v15920_v61  ;;  %v6865_v61 = vld [vmem:[%s20580_s8 + $0x80] sm:$0xff] }
 0x65a   : > { %6700 = vmatprep.subr.bf16.mxu0 %v15925_v3  ;;  %v6881_v3 = vld [vmem:[%s20580_s8 + $0x100] sm:$0xff] }
 0x65d   : > { %6701 = vmatpush1.bf16.msra.mxu0 %v15923_v4  ;;  %v15986_v4 = vld [vmem:[%s20616_s5 + $0xe10] ss:$8 sps:$4 sm:$0xff]  }
 0x65e   : > { %6702 = vmatprep.subr.bf16.mxu0 %v15928_v10  ;;  %v13409_v10 = vcombine.low %v6849_v57, %v6865_v61 }
 0x661   : > { %6703 = vmatpush1.bf16.msra.mxu0 %v15926_v15  ;;  %v13410_v15 = vcombine.high %v6849_v57, %v6865_v61  ;;  %v16051_v57 = vld [vmem:[%s20616_s5 + $0xf64] ss:$8 sps:$4 sm:$0xff]   ;;  %v16049_v61 = vld [vmem:[%s20616_s5 + $0xf60] ss:$8 sps:$4 sm:$0xff]  }
 0x662   : > { %6704 = vmatprep.subr.bf16.mxu0 %v15931_v20  ;;  %v6897_v20 = vld [vmem:[%s20580_s8 + $0x180] sm:$0xff] }
 0x663   : > { %8553 = vmatprep.subr.bf16.mxu1 %v13410_v15  ;;  %v16055_v15 = vld [vmem:[%s20616_s5 + $0xf80] ss:$8 sps:$4 sm:$0xff]  }
 0x664   : > { %8554 = vmatpush1.bf16.msra.mxu1 %v13409_v10  ;;  %v16057_v10 = vld [vmem:[%s20616_s5 + $0xf84] ss:$8 sps:$4 sm:$0xff]  }
 0x665   : > { %6705 = vmatpush1.bf16.msra.mxu0 %v15929_v43  ;;  %v15991_v43 = vld [vmem:[%s20616_s5 + $0xe24] ss:$8 sps:$4 sm:$0xff]  }
 0x666   : > { %6706 = vmatprep.subr.bf16.mxu0 %v15934_v13  ;;  %v13442_v13 = vcombine.high %v6881_v3, %v6897_v20 }
 0x668   : > { %8555 = vmatprep.subr.bf16.mxu1 %v13442_v13  ;;  %v16063_v13 = vld [vmem:[%s20616_s5 + $0xfa4] ss:$8 sps:$4 sm:$0xff]  }
 0x669   : > { %6707 = vmatpush1.bf16.msra.mxu0 %v15932_v19  ;;  %v13441_v19 = vcombine.low %v6881_v3, %v6897_v20  ;;  %v16054_v3 = vld [vmem:[%s20616_s5 + $0xf74] ss:$8 sps:$4 sm:$0xff]  }
 0x66a   : > { %6717 = vmatprep.subr.bf16.mxu0 %v15937_v6  ;;  %v15994_v6 = vld [vmem:[%s20616_s5 + $0xe34] ss:$8 sps:$4 sm:$0xff]  }
 0x66b   : > { %8556 = vmatpush1.bf16.msra.mxu1 %v13441_v19  ;;  %v16060_v20 = vld [vmem:[%s20616_s5 + $0xf94] ss:$8 sps:$4 sm:$0xff]   ;;  %v16061_v19 = vld [vmem:[%s20616_s5 + $0xfa0] ss:$8 sps:$4 sm:$0xff]  }
 0x66c   : > { %6709 = vmatmul.mubr.bf16.vlgmr.msra.gmra.mrb[24].mxu0 %v3092_v31  ;;  %v15995_v31 = vld [vmem:[%s20616_s5 + $0xe40] ss:$8 sps:$4 sm:$0xff]  }
 0x66d   : > { %6718 = vmatpush1.bf16.msra.mxu0 %v15935_v0  ;;  %6749 = vmatprep.mubr.bf16.mxu0 %v3095_v35  ;;  %v15997_v0 = vld [vmem:[%s20616_s5 + $0xe44] ss:$8 sps:$4 sm:$0xff]   ;;  %v15998_v35 = vld [vmem:[%s20616_s5 + $0xe50] ss:$8 sps:$4 sm:$0xff]  }
 0x66e   : > { %6719 = vmatprep.subr.bf16.mxu0 %v15940_v32  ;;  %v16000_v32 = vld [vmem:[%s20616_s5 + $0xe54] ss:$8 sps:$4 sm:$0xff]  }
 0x671   : > { %6720 = vmatpush1.bf16.msra.mxu0 %v15938_v37  ;;  %v16003_v37 = vld [vmem:[%s20616_s5 + $0xe64] ss:$8 sps:$4 sm:$0xff]  }
 0x672   : > { %6721 = vmatprep.subr.bf16.mxu0 %v15943_v38  ;;  %v16001_v38 = vld [vmem:[%s20616_s5 + $0xe60] ss:$8 sps:$4 sm:$0xff]  }
 0x675   : > { %6722 = vmatpush1.bf16.msra.mxu0 %v15941_v39  ;;  %v16006_v39 = vld [vmem:[%s20616_s5 + $0xe74] ss:$8 sps:$4 sm:$0xff]  }
 0x676   : > { %6723 = vmatprep.subr.bf16.mxu0 %v15946_v63  ;;  %v16004_v63 = vld [vmem:[%s20616_s5 + $0xe70] ss:$8 sps:$4 sm:$0xff]  }
 0x679   : > { %6724 = vmatpush1.bf16.msra.mxu0 %v15944_v42  ;;  %v16009_v42 = vld [vmem:[%s20616_s5 + $0xe84] ss:$8 sps:$4 sm:$0xff]  }
 0x67a   : > { %6725 = vmatprep.subr.bf16.mxu0 %v15949_v44  ;;  %v16007_v44 = vld [vmem:[%s20616_s5 + $0xe80] ss:$8 sps:$4 sm:$0xff]  }
 0x67d   : > { %6726 = vmatpush1.bf16.msra.mxu0 %v15947_v45  ;;  %v16012_v45 = vld [vmem:[%s20616_s5 + $0xe94] ss:$8 sps:$4 sm:$0xff]  }
 0x67e   : > { %6727 = vmatprep.subr.bf16.mxu0 %v15952_v47  ;;  %v16010_v47 = vld [vmem:[%s20616_s5 + $0xe90] ss:$8 sps:$4 sm:$0xff]  }
 0x681   : > { %6728 = vmatpush1.bf16.msra.mxu0 %v15950_v17  ;;  %v16015_v17 = vld [vmem:[%s20616_s5 + $0xea4] ss:$8 sps:$4 sm:$0xff]  }
 0x682   : > { %6729 = vmatprep.subr.bf16.mxu0 %v15955_v36  ;;  %v16013_v36 = vld [vmem:[%s20616_s5 + $0xea0] ss:$8 sps:$4 sm:$0xff]  }
 0x685   : > { %6730 = vmatpush1.bf16.msra.mxu0 %v15953_v16  ;;  %v16018_v16 = vld [vmem:[%s20616_s5 + $0xeb4] ss:$8 sps:$4 sm:$0xff]  }
 0x686   : > { %6731 = vmatprep.subr.bf16.mxu0 %v15958_v21  ;;  %v16016_v21 = vld [vmem:[%s20616_s5 + $0xeb0] ss:$8 sps:$4 sm:$0xff]  }
 0x689   : > { %6732 = vmatpush1.bf16.msra.mxu0 %v15956_v48  ;;  %v16021_v48 = vld [vmem:[%s20616_s5 + $0xec4] ss:$8 sps:$4 sm:$0xff]  }
 0x68a   : > { %6733 = vmatprep.subr.bf16.mxu0 %v15961_v52  ;;  %v16019_v52 = vld [vmem:[%s20616_s5 + $0xec0] ss:$8 sps:$4 sm:$0xff]  }
 0x68d   : > { %6734 = vmatpush1.bf16.msra.mxu0 %v15959_v53  ;;  %v16024_v53 = vld [vmem:[%s20616_s5 + $0xed4] ss:$8 sps:$4 sm:$0xff]  }
 0x68e   : > { %6735 = vmatprep.subr.bf16.mxu0 %v15964_v54  ;;  %v16022_v54 = vld [vmem:[%s20616_s5 + $0xed0] ss:$8 sps:$4 sm:$0xff]  }
 0x691   : > { %6736 = vmatpush1.bf16.msra.mxu0 %v15962_v56  ;;  %v16027_v56 = vld [vmem:[%s20616_s5 + $0xee4] ss:$8 sps:$4 sm:$0xff]  }
 0x692   : > { %6737 = vmatprep.subr.bf16.mxu0 %v15967_v14  ;;  %v16025_v14 = vld [vmem:[%s20616_s5 + $0xee0] ss:$8 sps:$4 sm:$0xff]  }
 0x695   : > { %6738 = vmatpush1.bf16.msra.mxu0 %v15965_v58  ;;  %v16030_v58 = vld [vmem:[%s20616_s5 + $0xef4] ss:$8 sps:$4 sm:$0xff]  }
 0x696   : > { %6739 = vmatprep.subr.bf16.mxu0 %v15970_v50  ;;  %v16028_v50 = vld [vmem:[%s20616_s5 + $0xef0] ss:$8 sps:$4 sm:$0xff]  }
 0x699   : > { %6740 = vmatpush1.bf16.msra.mxu0 %v15968_v8  ;;  %v3023_v8 = vrot.slane %v18365_v33, %v17453_v40 }
 0x69a   : > { %6741 = vmatprep.subr.bf16.mxu0 %v15973_v9  ;;  %v16033_v9 = vld [vmem:[%s20616_s5 + $0xf04] ss:$8 sps:$4 sm:$0xff]  }
 0x69d   : > { %6742 = vmatpush1.bf16.msra.mxu0 %v15971_v11  ;;  %v3035_v11 = vrot.slane %v18365_v33, %v17456_v41 }
 0x69e   : > { %6743 = vmatprep.subr.bf16.mxu0 %v15976_v12  ;;  %v16031_v12 = vld [vmem:[%s20616_s5 + $0xf00] ss:$8 sps:$4 sm:$0xff]  }
 0x6a1   : > { %6744 = vmatpush1.bf16.msra.mxu0 %v15974_v18  ;;  %v3096_v18 = vpack.c.bf16 %v3023_v8, %v3023_v8 }
 0x6a2   : > { %6745 = vmatprep.subr.bf16.mxu0 %v15979_v22  ;;  %v16036_v22 = vld [vmem:[%s20616_s5 + $0xf14] ss:$8 sps:$4 sm:$0xff]  }
 0x6a5   : > { %6746 = vmatpush1.bf16.msra.mxu0 %v15977_v23  ;;  %v3099_v23 = vpack.c.bf16 %v3035_v11, %v3035_v11  ;;  %v7041_v11 = vld [vmem:[%s20580_s8 + $0x600] sm:$0xff] }
 0x6a6   : > { %6747 = vmatprep.subr.bf16.mxu0 %v15982_v24  ;;  %v16034_v24 = vld [vmem:[%s20616_s5 + $0xf10] ss:$8 sps:$4 sm:$0xff]  }
 0x6a9   : > { %6748 = vmatpush1.bf16.msra.mxu0 %v15980_v25  ;;  %v16039_v25 = vld [vmem:[%s20616_s5 + $0xf24] ss:$8 sps:$4 sm:$0xff]  }
 0x6aa   : > { %6758 = vmatprep.subr.bf16.mxu0 %v15985_v46  ;;  %v16042_v46 = vld [vmem:[%s20616_s5 + $0xf34] ss:$8 sps:$4 sm:$0xff]  }
 0x6ac   : > { %6750 = vmatmul.mubr.bf16.vlgmr.msra.gmra.mrb[24].mxu0 %v3094_v51  ;;  %v16043_v51 = vld [vmem:[%s20616_s5 + $0xf40] ss:$8 sps:$4 sm:$0xff]  }
 0x6ad   : > { %6759 = vmatpush1.bf16.msra.mxu0 %v15983_v2  ;;  %6790 = vmatprep.mubr.bf16.mxu0 %v3097_v29  ;;  %v16045_v2 = vld [vmem:[%s20616_s5 + $0xf44] ss:$8 sps:$4 sm:$0xff]   ;;  %v16046_v29 = vld [vmem:[%s20616_s5 + $0xf50] ss:$8 sps:$4 sm:$0xff]  }
 0x6ae   : > { %6760 = vmatprep.subr.bf16.mxu0 %v15988_v27  ;;  %v16048_v27 = vld [vmem:[%s20616_s5 + $0xf54] ss:$8 sps:$4 sm:$0xff]  }
 0x6b1   : > { %6761 = vmatpush1.bf16.msra.mxu0 %v15986_v4  ;;  %v16052_v4 = vld [vmem:[%s20616_s5 + $0xf70] ss:$8 sps:$4 sm:$0xff]  }
 0x6b2   : > { %6762 = vmatprep.subr.bf16.mxu0 %v15991_v43  ;;  %v16058_v43 = vld [vmem:[%s20616_s5 + $0xf90] ss:$8 sps:$4 sm:$0xff]  }
 0x6b5   : > { %6763 = vmatpush1.bf16.msra.mxu0 %v15989_v28  ;;  %v16066_v28 = vld [vmem:[%s20616_s5 + $0xfb4] ss:$8 sps:$4 sm:$0xff]  }
 0x6b6   : > { %6764 = vmatprep.subr.bf16.mxu0 %v15994_v6  ;;  %v16064_v6 = vld [vmem:[%s20616_s5 + $0xfb0] ss:$8 sps:$4 sm:$0xff]  }
 0x6b9   : > { %6765 = vmatpush1.bf16.msra.mxu0 %v15992_v30  ;;  %v16069_v30 = vld [vmem:[%s20616_s5 + $0xfc4] ss:$8 sps:$4 sm:$0xff]  }
 0x6ba   : > { %6766 = vmatprep.subr.bf16.mxu0 %v15997_v0  ;;  %v16067_v0 = vld [vmem:[%s20616_s5 + $0xfc0] ss:$8 sps:$4 sm:$0xff]  }
 0x6bd   : > { %6767 = vmatpush1.bf16.msra.mxu0 %v15995_v31  ;;  %v16072_v31 = vld [vmem:[%s20616_s5 + $0xfd4] ss:$8 sps:$4 sm:$0xff]  }
 0x6be   : > { %6768 = vmatprep.subr.bf16.mxu0 %v16000_v32  ;;  %v16070_v32 = vld [vmem:[%s20616_s5 + $0xfd0] ss:$8 sps:$4 sm:$0xff]  }
 0x6c1   : > { %6769 = vmatpush1.bf16.msra.mxu0 %v15998_v35  ;;  %v16075_v35 = vld [vmem:[%s20616_s5 + $0xfe4] ss:$8 sps:$4 sm:$0xff]  }
 0x6c2   : > { %6770 = vmatprep.subr.bf16.mxu0 %v16003_v37  ;;  %v16073_v37 = vld [vmem:[%s20616_s5 + $0xfe0] ss:$8 sps:$4 sm:$0xff]  }
 0x6c5   : > { %6771 = vmatpush1.bf16.msra.mxu0 %v16001_v38  ;;  %v16078_v38 = vld [vmem:[%s20616_s5 + $0xff4] ss:$8 sps:$4 sm:$0xff]  }
 0x6c6   : > { %6772 = vmatprep.subr.bf16.mxu0 %v16006_v39  ;;  %v16076_v39 = vld [vmem:[%s20616_s5 + $0xff0] ss:$8 sps:$4 sm:$0xff]  }
 0x6c9   : > { %6773 = vmatpush1.bf16.msra.mxu0 %v16004_v63  ;;  %v3031_v63 = vrot.slane %v18365_v33, %v17559_v60  ;;  %v6961_v33 = vld [vmem:[%s20580_s8 + $0x380] sm:$0xff] }
 0x6ca   : > { %6774 = vmatprep.subr.bf16.mxu0 %v16009_v42 }
 0x6cb   : > { %v3098_v42 = vpack.c.bf16 %v3031_v63, %v3031_v63  ;;  %v6962_v63 = vld [vmem:[%s20580_s8 + $0x388] sm:$0xff] }
 0x6cd   : > { %6775 = vmatpush1.bf16.msra.mxu0 %v16007_v44  ;;  %v6913_v44 = vld [vmem:[%s20580_s8 + $0x200] sm:$0xff] }
 0x6ce   : > { %6776 = vmatprep.subr.bf16.mxu0 %v16012_v45  ;;  %v6929_v45 = vld [vmem:[%s20580_s8 + $0x280] sm:$0xff] }
 0x6d1   : > { %6777 = vmatpush1.bf16.msra.mxu0 %v16010_v47  ;;  %v13473_v47 = vcombine.low %v6913_v44, %v6929_v45 }
 0x6d2   : > { %6778 = vmatprep.subr.bf16.mxu0 %v16015_v17  ;;  %v13474_v17 = vcombine.high %v6913_v44, %v6929_v45  ;;  %v6978_v45 = vld [vmem:[%s20580_s8 + $0x408] sm:$0xff] }
 0x6d4   : > { %8557 = vmatprep.subr.bf16.mxu1 %v13474_v17 }
 0x6d5   : > { %6779 = vmatpush1.bf16.msra.mxu0 %v16013_v36  ;;  %8558 = vmatpush1.bf16.msra.mxu1 %v13473_v47  ;;  %v6945_v36 = vld [vmem:[%s20580_s8 + $0x300] sm:$0xff]  ;;  %v6994_v47 = vld [vmem:[%s20580_s8 + $0x488] sm:$0xff] }
 0x6d6   : > { %6780 = vmatprep.subr.bf16.mxu0 %v16018_v16  ;;  %v6977_v16 = vld [vmem:[%s20580_s8 + $0x400] sm:$0xff] }
 0x6d9   : > { %6781 = vmatpush1.bf16.msra.mxu0 %v16016_v21  ;;  %v13505_v21 = vcombine.low %v6945_v36, %v6961_v33 }
 0x6da   : > { %6782 = vmatprep.subr.bf16.mxu0 %v16021_v48  ;;  %v13506_v48 = vcombine.high %v6945_v36, %v6961_v33  ;;  %v13540_v36 = vcombine.high %v6978_v45, %v6994_v47  ;;  %v7010_v33 = vld [vmem:[%s20580_s8 + $0x508] sm:$0xff] }
 0x6dc   : > { %8559 = vmatprep.subr.bf16.mxu1 %v13506_v48 }
 0x6dd   : > { %6783 = vmatpush1.bf16.msra.mxu0 %v16019_v52  ;;  %v6993_v52 = vld [vmem:[%s20580_s8 + $0x480] sm:$0xff]  ;;  %8560 = vmatpush1.bf16.msra.mxu1 %v13505_v21  ;;  %v13539_v21 = vcombine.low %v6978_v45, %v6994_v47  ;;  %v6900_v45 = vld [vmem:[%s20580_s8 + $0x198] sm:$0xff] }
 0x6de   : > { %6784 = vmatprep.subr.bf16.mxu0 %v16024_v53  ;;  %v13538_v53 = vcombine.high %v6977_v16, %v6993_v52 }
 0x6e0   : > { %8561 = vmatprep.subr.bf16.mxu1 %v13538_v53  ;;  %v7058_v53 = vld [vmem:[%s20580_s8 + $0x688] sm:$0xff] }
 0x6e1   : > { %6785 = vmatpush1.bf16.msra.mxu0 %v16022_v54  ;;  %v7009_v54 = vld [vmem:[%s20580_s8 + $0x500] sm:$0xff] }
 0x6e2   : > { %6786 = vmatprep.subr.bf16.mxu0 %v16027_v56  ;;  %v7025_v56 = vld [vmem:[%s20580_s8 + $0x580] sm:$0xff] }
 0x6e5   : > { %6787 = vmatpush1.bf16.msra.mxu0 %v16025_v14  ;;  %v6850_v14 = vld [vmem:[%s20580_s8 + $0x8] sm:$0xff] }
 0x6e6   : > { %6788 = vmatprep.subr.bf16.mxu0 %v16030_v58  ;;  %v6866_v58 = vld [vmem:[%s20580_s8 + $0x88] sm:$0xff] }
 0x6e7   : > { %v13411_v8 = vcombine.low %v6850_v14, %v6866_v58 }
 0x6e9   : > { %6789 = vmatpush1.bf16.msra.mxu0 %v16028_v50  ;;  %v13537_v50 = vcombine.low %v6977_v16, %v6993_v52  ;;  %v7026_v16 = vld [vmem:[%s20580_s8 + $0x588] sm:$0xff] }
 0x6ea   : > { %6799 = vmatprep.subr.bf16.mxu0 %v16033_v9  ;;  %v13570_v9 = vcombine.high %v7009_v54, %v7025_v56  ;;  %v13572_v48 = vcombine.high %v7010_v33, %v7026_v16  ;;  %v7042_v52 = vld [vmem:[%s20580_s8 + $0x608] sm:$0xff] }
 0x6eb   : > { %8562 = vmatpush1.bf16.msra.mxu1 %v13537_v50  ;;  %v13603_v50 = vcombine.low %v7042_v52, %v7058_v53 }
 0x6ec   : > { %6791 = vmatmul.mubr.bf16.vlgmr.msra.gmra.mrb[24].mxu0 %v3096_v18  ;;  %v13569_v18 = vcombine.low %v7009_v54, %v7025_v56  ;;  %8563 = vmatprep.subr.bf16.mxu1 %v13570_v9  ;;  %v13571_v54 = vcombine.low %v7010_v33, %v7026_v16  ;;  %v13604_v56 = vcombine.high %v7042_v52, %v7058_v53  ;;  %v6851_v9 = vld [vmem:[%s20580_s8 + $0x10] sm:$0xff]  ;;  %v6932_v33 = vld [vmem:[%s20580_s8 + $0x298] sm:$0xff] }
 0x6ed   : > { %6800 = vmatpush1.bf16.msra.mxu0 %v16031_v12  ;;  %6831 = vmatprep.mubr.bf16.mxu0 %v3099_v23  ;;  %v7057_v12 = vld [vmem:[%s20580_s8 + $0x680] sm:$0xff]  ;;  %v6964_v52 = vld [vmem:[%s20580_s8 + $0x398] sm:$0xff] }
 0x6ee   : > { %6801 = vmatprep.subr.bf16.mxu0 %v16036_v22  ;;  %v13602_v22 = vcombine.high %v7041_v11, %v7057_v12  ;;  %v7073_v23 = vld [vmem:[%s20580_s8 + $0x700] sm:$0xff] }
 0x6ef   : > { %8564 = vmatpush1.bf16.msra.mxu1 %v13569_v18 }
 0x6f0   : > { %8565 = vmatprep.subr.bf16.mxu1 %v13602_v22  ;;  %v6883_v22 = vld [vmem:[%s20580_s8 + $0x110] sm:$0xff] }
 0x6f1   : > { %6802 = vmatpush1.bf16.msra.mxu0 %v16034_v24  ;;  %v7089_v24 = vld [vmem:[%s20580_s8 + $0x780] sm:$0xff] }
 0x6f2   : > { %6803 = vmatprep.subr.bf16.mxu0 %v16039_v25  ;;  %v13601_v25 = vcombine.low %v7041_v11, %v7057_v12  ;;  %v6867_v11 = vld [vmem:[%s20580_s8 + $0x90] sm:$0xff] }
 0x6f3   : > { %v13414_v18 = vcombine.high %v6851_v9, %v6867_v11 }
 0x6f4   : > { %8566 = vmatpush1.bf16.msra.mxu1 %v13601_v25 }
 0x6f5   : > { %6804 = vmatpush1.bf16.msra.mxu0 %v16037_v26  ;;  %v13634_v26 = vcombine.high %v7073_v23, %v7089_v24 }
 0x6f6   : > { %6805 = vmatprep.subr.bf16.mxu0 %v16042_v46  ;;  %v13633_v46 = vcombine.low %v7073_v23, %v7089_v24  ;;  %v6899_v23 = vld [vmem:[%s20580_s8 + $0x190] sm:$0xff]  ;;  %v13413_v24 = vcombine.low %v6851_v9, %v6867_v11  ;;  %v7028_v9 = vld [vmem:[%s20580_s8 + $0x598] sm:$0xff] }
 0x6f7   : > { %8567 = vmatprep.subr.bf16.mxu1 %v13634_v26  ;;  %v13446_v25 = vcombine.high %v6883_v22, %v6899_v23  ;;  %v6915_v26 = vld [vmem:[%s20580_s8 + $0x210] sm:$0xff] }
 0x6f8   : > { %8568 = vmatpush1.bf16.msra.mxu1 %v13633_v46  ;;  %v6931_v46 = vld [vmem:[%s20580_s8 + $0x290] sm:$0xff] }
 0x6f9   : > { %6806 = vmatpush1.bf16.msra.mxu0 %v16040_v49  ;;  %v13412_v49 = vcombine.high %v6850_v14, %v6866_v58  ;;  %v7074_v14 = vld [vmem:[%s20580_s8 + $0x708] sm:$0xff] }
 0x6fa   : > { %6807 = vmatprep.subr.bf16.mxu0 %v16045_v2  ;;  %v3612_v2 = vld [vmem:[%s20622_s6] sm:$0x3]  ;;  %v7090_v58 = vld [vmem:[%s20580_s8 + $0x788] sm:$0xff] }
 0x6fb   : > { %8594 = vmatprep.subr.bf16.mxu1 %v13412_v49  ;;  %v13635_v12 = vcombine.low %v7074_v14, %v7090_v58  ;;  %v13445_v49 = vcombine.low %v6883_v22, %v6899_v23  ;;  %v7060_v22 = vld [vmem:[%s20580_s8 + $0x698] sm:$0xff] }
 0x6fd   : > { %6808 = vmatpush1.bf16.msra.mxu0 %v16043_v51  ;;  %v6177_v51 = vrot.slane %v3612_v2, %v17199_v62 }
 0x6fe   : > { %6809 = vmatprep.subr.bf16.mxu0 %v16048_v27  ;;  %v6181_v27 = vrot.slane %v3612_v2, %v17196_v59  ;;  %v13478_v2 = vcombine.high %v6915_v26, %v6931_v46 }
 0x701   : > { %6810 = vmatpush1.bf16.msra.mxu0 %v16046_v29 }
 0x702   : > { %6811 = vmatprep.subr.bf16.mxu0 %v16051_v57 }
 0x705   : > { %6812 = vmatpush1.bf16.msra.mxu0 %v16049_v61 }
 0x706   : > { %6813 = vmatprep.subr.bf16.mxu0 %v16054_v3 }
 0x709   : > { %6814 = vmatpush1.bf16.msra.mxu0 %v16052_v4 }
 0x70a   : > { %6815 = vmatprep.subr.bf16.mxu0 %v16057_v10 }
 0x70d   : > { %6816 = vmatpush1.bf16.msra.mxu0 %v16055_v15 }
 0x70e   : > { %6817 = vmatprep.subr.bf16.mxu0 %v16060_v20 }
 0x711   : > { %6818 = vmatpush1.bf16.msra.mxu0 %v16058_v43  ;;  %v6842_v43 = vld [vmem:[%s549_s29] sm:$0x1]  ;;  %s20624_s29 = scalar_lea.vmem [#allocation8], %s18830_s20 }
 0x712   : > { %6819 = vmatprep.subr.bf16.mxu0 %v16063_v13  ;;  %s12498_s18 = sshll.u32 %s20624_s29, 4  ;;  %s12499_s18 = int_to_ptr.vmem [resolvable:$true] %s12498_s18 }
 0x713   : > { %s16224_s1 = scalar_lea.vmem %s12499_s18, 16  ;;  %p16231_p0 = scmp.lt.s32.totalorder %s12499_s18, %s16229_s2 }
 0x714   : > { %p16225_p11 = scmp.ne.s32.totalorder %s12499_s18, %s16224_s1  ;;  %p16232_p1 = scmp.lt.s32.totalorder %s16230_s3, %s16224_s1 }
 0x715   : > { %6820 = vmatpush1.bf16.msra.mxu0 %v16061_v19 }
 0x716   : > { %6821 = vmatprep.subr.bf16.mxu0 %v16066_v28  ;;  %v6882_v28 = vld [vmem:[%s20580_s8 + $0x108] sm:$0xff]  ;;  %p16226_p12 = pnand %p16225_p11, %p16449_p5  ;;  %p16233_p2 = por %p16232_p1, %p16231_p0 }
 0x718   : > { %p16227_p13 = pneg %p16226_p12 }
 0x719   : > { %6822 = vmatpush1.bf16.msra.mxu0 %v16064_v6  ;;  %v6898_v6 = vld [vmem:[%s20580_s8 + $0x188] sm:$0xff] }
 0x71a   : > { %6823 = vmatprep.subr.bf16.mxu0 %v16069_v30  ;;  %p16234_p3 = pnand %p16233_p2, %p16227_p13 }
 0x71d   : > { %6824 = vmatpush1.bf16.msra.mxu0 %v16067_v0 }
 0x71e   : > { %6825 = vmatprep.subr.bf16.mxu0 %v16072_v31  ;;  %v13444_v31 = vcombine.high %v6882_v28, %v6898_v6 }
 0x721   : > { %6826 = vmatpush1.bf16.msra.mxu0 %v16070_v32  ;;  %v6914_v32 = vld [vmem:[%s20580_s8 + $0x208] sm:$0xff] }
 0x722   : > { %6827 = vmatprep.subr.bf16.mxu0 %v16075_v35  ;;  %v6930_v35 = vld [vmem:[%s20580_s8 + $0x288] sm:$0xff] }
 0x725   : > { %6828 = vmatpush1.bf16.msra.mxu0 %v16073_v37  ;;  %v13443_v37 = vcombine.low %v6882_v28, %v6898_v6  ;;  %v7059_v28 = vld [vmem:[%s20580_s8 + $0x690] sm:$0xff] }
 0x726   : > { %6829 = vmatprep.subr.bf16.mxu0 %v16078_v38  ;;  %v13476_v38 = vcombine.high %v6914_v32, %v6930_v35 }
 0x729   : > { %6830 = vmatpush1.bf16.msra.mxu0 %v16076_v39  ;;  %v6946_v39 = vld [vmem:[%s20580_s8 + $0x308] sm:$0xff] }
 0x72a   : > { %v13508_v44 = vcombine.high %v6946_v39, %v6962_v63  ;;  %v13507_v17 = vcombine.low %v6946_v39, %v6962_v63  ;;  %v6868_v39 = vld [vmem:[%s20580_s8 + $0x98] sm:$0xff] }
 0x72c   : > { %6832 = vmatmul.mubr.bf16.vlgmr.msra.gmra.mrb[24].mxu0 %v3098_v42  ;;  %v13475_v42 = vcombine.low %v6914_v32, %v6930_v35  ;;  %v7091_v32 = vld [vmem:[%s20580_s8 + $0x790] sm:$0xff] }
 0x7ff   : > { %v6833_v29 = vpop.f32.mrb[24].mxu0 }
 0x800   : > { %v14921_v57 = vadd.f32 %v6833_v29, %v6177_v51  ;;  %v6835_v61 = vpop.f32.mrb[25].mxu0  ;;  %v6947_v51 = vld [vmem:[%s20580_s8 + $0x310] sm:$0xff]  ;;  %v13477_v29 = vcombine.low %v6915_v26, %v6931_v46  ;;  %v7092_v26 = vld [vmem:[%s20580_s8 + $0x798] sm:$0xff] }
 0x801   : > { %v14922_v3 = vadd.f32 %v6835_v61, %v6181_v27  ;;  %v6837_v4 = vpop.f32.mrb[26].mxu0  ;;  %v6963_v27 = vld [vmem:[%s20580_s8 + $0x390] sm:$0xff] }
 0x802   : > { %6840 = vst [vmem:[%s20597_s19] sm:$0x1] %v14921_v57  ;;  %v6838_v10 = vpop.f32.mrb[27].mxu0  ;;  %v6979_v61 = vld [vmem:[%s20580_s8 + $0x410] sm:$0xff]  ;;  %v13509_v4 = vcombine.low %v6947_v51, %v6963_v27  ;;  %s20598_s19 = sshll.u32 %s16432_s25, 4 }
 0x803   : > { %6841 = vst [vmem:[%s20596_s30] sm:$0x1] %v14922_v3  ;;  %v6843_v15 = vmul.f32 0.5, %v14922_v3  ;;  %v6995_v3 = vld [vmem:[%s20580_s8 + $0x490] sm:$0xff]  ;;  %s20490_s17 = scalar_lea.hbm %s20586_s14, %s20598_s19 }
 0x804   : > { %v13542_v10 = vcombine.high %v6979_v61, %v6995_v3 }
 0x805   : > { %v6844_v20 = vmul.f32 1.442695, %v6843_v15  ;;  %v7011_v15 = vld [vmem:[%s20580_s8 + $0x510] sm:$0xff] }
 0x807   : > { %16187 = vpow2.f32 %v6844_v20  ;;  %v7027_v20 = vld [vmem:[%s20580_s8 + $0x590] sm:$0xff] }
 0x808   : > { %v13573_v6 = vcombine.low %v7011_v15, %v7027_v20 }
 0x811   : > { %v16188_v13 = vpop.eup %16187 }
 0x812   : > { %v6846_v19 = vmul.f32 %v16188_v13, %v6842_v43  ;;  %v13541_v43 = vcombine.low %v6979_v61, %v6995_v3  ;;  %v13574_v13 = vcombine.high %v7011_v15, %v7027_v20  ;;  %v6901_v61 = vld [vmem:[%s20580_s8 + $0x1a0] sm:$0xff] }
 0x813   : > { %v6933_v15 = vld [vmem:[%s20580_s8 + $0x2a0] sm:$0xff] }
 0x814   : > { %v6847_v30 = vadd.f32 %v14921_v57, %v6846_v19  ;;  %v13510_v57 = vcombine.high %v6947_v51, %v6963_v27  ;;  %v7043_v19 = vld [vmem:[%s20580_s8 + $0x610] sm:$0xff]  ;;  %v6869_v51 = vld [vmem:[%s20580_s8 + $0xa0] sm:$0xff] }
 0x815   : > { %v13605_v35 = vcombine.low %v7043_v19, %v7059_v28 }
 0x816   : > { %v18850_v0 = vpack.c.bf16 %v6847_v30, %v6847_v30  ;;  %v13606_v30 = vcombine.high %v7043_v19, %v7059_v28  ;;  %v6965_v19 = vld [vmem:[%s20580_s8 + $0x3a0] sm:$0xff] }
 0x818   : > { %8586 = vmatmul.mubr.bf16.vlgmr.msra.gmra.mrb[8].mxu1 %v18850_v0 }
 0x819   : > { %8595 = vmatpush1.bf16.msra.mxu1 %v13411_v8  ;;  %8626 = vmatprep.mubr.bf16.mxu1 %v16320_v1  ;;  %v13636_v8 = vcombine.high %v7074_v14, %v7090_v58  ;;  %v6996_v14 = vld [vmem:[%s20580_s8 + $0x498] sm:$0xff] }
 0x81a   : > { %8596 = vmatprep.subr.bf16.mxu1 %v13444_v31  ;;  %v7075_v31 = vld [vmem:[%s20580_s8 + $0x710] sm:$0xff] }
 0x81b   : > { %v13637_v63 = vcombine.low %v7075_v31, %v7091_v32 }
 0x81d   : > { %8597 = vmatpush1.bf16.msra.mxu1 %v13443_v37  ;;  %v13638_v37 = vcombine.high %v7075_v31, %v7091_v32  ;;  %v6997_v31 = vld [vmem:[%s20580_s8 + $0x4a0] sm:$0xff] }
 0x81e   : > { %8598 = vmatprep.subr.bf16.mxu1 %v13476_v38  ;;  %v6852_v38 = vld [vmem:[%s20580_s8 + $0x18] sm:$0xff] }
 0x81f   : > { %v13415_v47 = vcombine.low %v6852_v38, %v6868_v39 }
 0x821   : > { %8599 = vmatpush1.bf16.msra.mxu1 %v13475_v42  ;;  %v13416_v42 = vcombine.high %v6852_v38, %v6868_v39  ;;  %v7029_v38 = vld [vmem:[%s20580_s8 + $0x5a0] sm:$0xff] }
 0x822   : > { %8600 = vmatprep.subr.bf16.mxu1 %v13508_v44  ;;  %v6884_v44 = vld [vmem:[%s20580_s8 + $0x118] sm:$0xff] }
 0x823   : > { %v13447_v16 = vcombine.low %v6884_v44, %v6900_v45 }
 0x825   : > { %8601 = vmatpush1.bf16.msra.mxu1 %v13507_v17  ;;  %v13448_v17 = vcombine.high %v6884_v44, %v6900_v45  ;;  %v7061_v44 = vld [vmem:[%s20580_s8 + $0x6a0] sm:$0xff] }
 0x826   : > { %8602 = vmatprep.subr.bf16.mxu1 %v13540_v36  ;;  %v6916_v36 = vld [vmem:[%s20580_s8 + $0x218] sm:$0xff] }
 0x827   : > { %v13479_v53 = vcombine.low %v6916_v36, %v6932_v33 }
 0x829   : > { %8603 = vmatpush1.bf16.msra.mxu1 %v13539_v21  ;;  %v13480_v21 = vcombine.high %v6916_v36, %v6932_v33  ;;  %v7093_v36 = vld [vmem:[%s20580_s8 + $0x7a0] sm:$0xff] }
 0x82a   : > { %8604 = vmatprep.subr.bf16.mxu1 %v13572_v48  ;;  %v6948_v48 = vld [vmem:[%s20580_s8 + $0x318] sm:$0xff] }
 0x82b   : > { %v13511_v58 = vcombine.low %v6948_v48, %v6964_v52 }
 0x82d   : > { %8605 = vmatpush1.bf16.msra.mxu1 %v13571_v54  ;;  %v13512_v54 = vcombine.high %v6948_v48, %v6964_v52  ;;  %v6870_v48 = vld [vmem:[%s20580_s8 + $0xa8] sm:$0xff] }
 0x82e   : > { %8606 = vmatprep.subr.bf16.mxu1 %v13604_v56  ;;  %v6980_v56 = vld [vmem:[%s20580_s8 + $0x418] sm:$0xff] }
 0x82f   : > { %v13543_v11 = vcombine.low %v6980_v56, %v6996_v14 }
 0x831   : > { %8607 = vmatpush1.bf16.msra.mxu1 %v13603_v50  ;;  %v13544_v50 = vcombine.high %v6980_v56, %v6996_v14  ;;  %v6902_v56 = vld [vmem:[%s20580_s8 + $0x1a8] sm:$0xff] }
 0x832   : > { %8608 = vmatprep.subr.bf16.mxu1 %v13636_v8  ;;  %v7012_v8 = vld [vmem:[%s20580_s8 + $0x518] sm:$0xff] }
 0x833   : > { %v13575_v23 = vcombine.low %v7012_v8, %v7028_v9 }
 0x835   : > { %8609 = vmatpush1.bf16.msra.mxu1 %v13635_v12  ;;  %v13576_v12 = vcombine.high %v7012_v8, %v7028_v9  ;;  %v6934_v8 = vld [vmem:[%s20580_s8 + $0x2a8] sm:$0xff] }
 0x836   : > { %8635 = vmatprep.subr.bf16.mxu1 %v13414_v18  ;;  %v7044_v18 = vld [vmem:[%s20580_s8 + $0x618] sm:$0xff] }
 0x837   : > { %v13607_v46 = vcombine.low %v7044_v18, %v7060_v22 }
 0x838   : > { %8627 = vmatmul.mubr.bf16.vlgmr.msra.gmra.mrb[12].mxu1 %v18850_v0 }
 0x839   : > { %8636 = vmatpush1.bf16.msra.mxu1 %v13413_v24  ;;  %8667 = vmatprep.mubr.bf16.mxu1 %v16320_v1  ;;  %v13608_v24 = vcombine.high %v7044_v18, %v7060_v22  ;;  %v6966_v18 = vld [vmem:[%s20580_s8 + $0x3a8] sm:$0xff] }
 0x83a   : > { %8637 = vmatprep.subr.bf16.mxu1 %v13446_v25  ;;  %v7076_v25 = vld [vmem:[%s20580_s8 + $0x718] sm:$0xff] }
 0x83b   : > { %v13639_v27 = vcombine.low %v7076_v25, %v7092_v26 }
 0x83d   : > { %8638 = vmatpush1.bf16.msra.mxu1 %v13445_v49  ;;  %v13640_v49 = vcombine.high %v7076_v25, %v7092_v26  ;;  %v6998_v25 = vld [vmem:[%s20580_s8 + $0x4a8] sm:$0xff] }
 0x83e   : > { %8639 = vmatprep.subr.bf16.mxu1 %v13478_v2  ;;  %v6853_v2 = vld [vmem:[%s20580_s8 + $0x20] sm:$0xff] }
 0x83f   : > { %v13417_v3 = vcombine.low %v6853_v2, %v6869_v51 }
 0x841   : > { %8640 = vmatpush1.bf16.msra.mxu1 %v13477_v29  ;;  %v13418_v29 = vcombine.high %v6853_v2, %v6869_v51  ;;  %v7030_v2 = vld [vmem:[%s20580_s8 + $0x5a8] sm:$0xff] }
 0x842   : > { %8641 = vmatprep.subr.bf16.mxu1 %v13510_v57  ;;  %v6885_v57 = vld [vmem:[%s20580_s8 + $0x120] sm:$0xff] }
 0x843   : > { %v13449_v20 = vcombine.low %v6885_v57, %v6901_v61 }
 0x845   : > { %8642 = vmatpush1.bf16.msra.mxu1 %v13509_v4  ;;  %v13450_v4 = vcombine.high %v6885_v57, %v6901_v61  ;;  %v7062_v57 = vld [vmem:[%s20580_s8 + $0x6a8] sm:$0xff] }
 0x846   : > { %8643 = vmatprep.subr.bf16.mxu1 %v13542_v10  ;;  %v6917_v10 = vld [vmem:[%s20580_s8 + $0x220] sm:$0xff] }
 0x847   : > { %v13481_v28 = vcombine.low %v6917_v10, %v6933_v15 }
 0x849   : > { %8644 = vmatpush1.bf16.msra.mxu1 %v13541_v43  ;;  %v13482_v43 = vcombine.high %v6917_v10, %v6933_v15  ;;  %v7094_v10 = vld [vmem:[%s20580_s8 + $0x7a8] sm:$0xff] }
 0x84a   : > { %8645 = vmatprep.subr.bf16.mxu1 %v13574_v13  ;;  %v6949_v13 = vld [vmem:[%s20580_s8 + $0x320] sm:$0xff] }
 0x84b   : > { %v13513_v32 = vcombine.low %v6949_v13, %v6965_v19 }
 0x84d   : > { %8646 = vmatpush1.bf16.msra.mxu1 %v13573_v6  ;;  %v13514_v6 = vcombine.high %v6949_v13, %v6965_v19  ;;  %v6871_v13 = vld [vmem:[%s20580_s8 + $0xb0] sm:$0xff] }
 0x84e   : > { %8647 = vmatprep.subr.bf16.mxu1 %v13606_v30  ;;  %v6981_v30 = vld [vmem:[%s20580_s8 + $0x420] sm:$0xff] }
 0x84f   : > { %v13545_v39 = vcombine.low %v6981_v30, %v6997_v31 }
 0x851   : > { %8648 = vmatpush1.bf16.msra.mxu1 %v13605_v35  ;;  %v13546_v35 = vcombine.high %v6981_v30, %v6997_v31  ;;  %v6903_v30 = vld [vmem:[%s20580_s8 + $0x1b0] sm:$0xff] }
 0x852   : > { %8649 = vmatprep.subr.bf16.mxu1 %v13638_v37  ;;  %v7013_v37 = vld [vmem:[%s20580_s8 + $0x520] sm:$0xff] }
 0x853   : > { %v13577_v45 = vcombine.low %v7013_v37, %v7029_v38 }
 0x855   : > { %8650 = vmatpush1.bf16.msra.mxu1 %v13637_v63  ;;  %v13578_v63 = vcombine.high %v7013_v37, %v7029_v38  ;;  %v6935_v37 = vld [vmem:[%s20580_s8 + $0x2b0] sm:$0xff] }
 0x856   : > { %8676 = vmatprep.subr.bf16.mxu1 %v13416_v42  ;;  %v7045_v42 = vld [vmem:[%s20580_s8 + $0x620] sm:$0xff] }
 0x857   : > { %v13609_v33 = vcombine.low %v7045_v42, %v7061_v44 }
 0x858   : > { %8668 = vmatmul.mubr.bf16.vlgmr.msra.gmra.mrb[16].mxu1 %v18850_v0 }
 0x859   : > { %8677 = vmatpush1.bf16.msra.mxu1 %v13415_v47  ;;  %8708 = vmatprep.mubr.bf16.mxu1 %v16320_v1  ;;  %v13610_v47 = vcombine.high %v7045_v42, %v7061_v44  ;;  %v6967_v42 = vld [vmem:[%s20580_s8 + $0x3b0] sm:$0xff] }
 0x85a   : > { %8678 = vmatprep.subr.bf16.mxu1 %v13448_v17  ;;  %v7077_v17 = vld [vmem:[%s20580_s8 + $0x720] sm:$0xff] }
 0x85b   : > { %v13641_v52 = vcombine.low %v7077_v17, %v7093_v36 }
 0x85d   : > { %8679 = vmatpush1.bf16.msra.mxu1 %v13447_v16  ;;  %v13642_v16 = vcombine.high %v7077_v17, %v7093_v36  ;;  %v6999_v17 = vld [vmem:[%s20580_s8 + $0x4b0] sm:$0xff] }
 0x85e   : > { %8680 = vmatprep.subr.bf16.mxu1 %v13480_v21  ;;  %v6854_v21 = vld [vmem:[%s20580_s8 + $0x28] sm:$0xff] }
 0x85f   : > { %v13419_v14 = vcombine.low %v6854_v21, %v6870_v48 }
 0x861   : > { %8681 = vmatpush1.bf16.msra.mxu1 %v13479_v53  ;;  %v13420_v53 = vcombine.high %v6854_v21, %v6870_v48  ;;  %v7031_v21 = vld [vmem:[%s20580_s8 + $0x5b0] sm:$0xff] }
 0x862   : > { %8682 = vmatprep.subr.bf16.mxu1 %v13512_v54  ;;  %v6886_v54 = vld [vmem:[%s20580_s8 + $0x128] sm:$0xff] }
 0x863   : > { %v13451_v9 = vcombine.low %v6886_v54, %v6902_v56 }
 0x865   : > { %8683 = vmatpush1.bf16.msra.mxu1 %v13511_v58  ;;  %v13452_v58 = vcombine.high %v6886_v54, %v6902_v56  ;;  %v7063_v54 = vld [vmem:[%s20580_s8 + $0x6b0] sm:$0xff] }
 0x866   : > { %8684 = vmatprep.subr.bf16.mxu1 %v13544_v50  ;;  %v6918_v50 = vld [vmem:[%s20580_s8 + $0x228] sm:$0xff] }
 0x867   : > { %v13483_v22 = vcombine.low %v6918_v50, %v6934_v8 }
 0x869   : > { %8685 = vmatpush1.bf16.msra.mxu1 %v13543_v11  ;;  %v13484_v11 = vcombine.high %v6918_v50, %v6934_v8  ;;  %v7095_v50 = vld [vmem:[%s20580_s8 + $0x7b0] sm:$0xff] }
 0x86a   : > { %8686 = vmatprep.subr.bf16.mxu1 %v13576_v12  ;;  %v6950_v12 = vld [vmem:[%s20580_s8 + $0x328] sm:$0xff] }
 0x86b   : > { %v13515_v26 = vcombine.low %v6950_v12, %v6966_v18 }
 0x86d   : > { %8687 = vmatpush1.bf16.msra.mxu1 %v13575_v23  ;;  %v13516_v23 = vcombine.high %v6950_v12, %v6966_v18  ;;  %v6872_v12 = vld [vmem:[%s20580_s8 + $0xb8] sm:$0xff] }
 0x86e   : > { %8688 = vmatprep.subr.bf16.mxu1 %v13608_v24  ;;  %v6982_v24 = vld [vmem:[%s20580_s8 + $0x428] sm:$0xff] }
 0x86f   : > { %v13547_v51 = vcombine.low %v6982_v24, %v6998_v25 }
 0x871   : > { %8689 = vmatpush1.bf16.msra.mxu1 %v13607_v46  ;;  %v13548_v46 = vcombine.high %v6982_v24, %v6998_v25  ;;  %v6904_v24 = vld [vmem:[%s20580_s8 + $0x1b8] sm:$0xff] }
 0x872   : > { %8690 = vmatprep.subr.bf16.mxu1 %v13640_v49  ;;  %v7014_v49 = vld [vmem:[%s20580_s8 + $0x528] sm:$0xff] }
 0x873   : > { %v13579_v61 = vcombine.low %v7014_v49, %v7030_v2 }
 0x875   : > { %8691 = vmatpush1.bf16.msra.mxu1 %v13639_v27  ;;  %v13580_v27 = vcombine.high %v7014_v49, %v7030_v2  ;;  %v6936_v49 = vld [vmem:[%s20580_s8 + $0x2b8] sm:$0xff] }
 0x876   : > { %8717 = vmatprep.subr.bf16.mxu1 %v13418_v29  ;;  %v7046_v29 = vld [vmem:[%s20580_s8 + $0x628] sm:$0xff] }
 0x877   : > { %v13611_v15 = vcombine.low %v7046_v29, %v7062_v57 }
 0x878   : > { %8709 = vmatmul.mubr.bf16.vlgmr.msra.gmra.mrb[20].mxu1 %v18850_v0 }
 0x879   : > { %8718 = vmatpush1.bf16.msra.mxu1 %v13417_v3  ;;  %8749 = vmatprep.mubr.bf16.mxu1 %v16320_v1  ;;  %v13612_v3 = vcombine.high %v7046_v29, %v7062_v57  ;;  %v6968_v29 = vld [vmem:[%s20580_s8 + $0x3b8] sm:$0xff] }
 0x87a   : > { %8719 = vmatprep.subr.bf16.mxu1 %v13450_v4  ;;  %v7078_v4 = vld [vmem:[%s20580_s8 + $0x728] sm:$0xff] }
 0x87b   : > { %v13643_v19 = vcombine.low %v7078_v4, %v7094_v10 }
 0x87d   : > { %8720 = vmatpush1.bf16.msra.mxu1 %v13449_v20  ;;  %v13644_v20 = vcombine.high %v7078_v4, %v7094_v10  ;;  %v7000_v4 = vld [vmem:[%s20580_s8 + $0x4b8] sm:$0xff] }
 0x87e   : > { %8721 = vmatprep.subr.bf16.mxu1 %v13482_v43  ;;  %v6855_v43 = vld [vmem:[%s20580_s8 + $0x30] sm:$0xff] }
 0x87f   : > { %v13421_v31 = vcombine.low %v6855_v43, %v6871_v13 }
 0x881   : > { %8722 = vmatpush1.bf16.msra.mxu1 %v13481_v28  ;;  %v13422_v28 = vcombine.high %v6855_v43, %v6871_v13  ;;  %v7032_v43 = vld [vmem:[%s20580_s8 + $0x5b8] sm:$0xff] }
 0x882   : > { %8723 = vmatprep.subr.bf16.mxu1 %v13514_v6  ;;  %v6887_v6 = vld [vmem:[%s20580_s8 + $0x130] sm:$0xff] }
 0x883   : > { %v13453_v38 = vcombine.low %v6887_v6, %v6903_v30 }
 0x885   : > { %8724 = vmatpush1.bf16.msra.mxu1 %v13513_v32  ;;  %v13454_v32 = vcombine.high %v6887_v6, %v6903_v30  ;;  %v7048_v6 = vld [vmem:[%s20580_s8 + $0x638] sm:$0xff] }
 0x886   : > { %8725 = vmatprep.subr.bf16.mxu1 %v13546_v35  ;;  %v6919_v35 = vld [vmem:[%s20580_s8 + $0x230] sm:$0xff]  ;;  %v7064_v30 = vld [vmem:[%s20580_s8 + $0x6b8] sm:$0xff] }
 0x887   : > { %v13485_v44 = vcombine.low %v6919_v35, %v6935_v37 }
 0x889   : > { %8726 = vmatpush1.bf16.msra.mxu1 %v13545_v39  ;;  %v13486_v39 = vcombine.high %v6919_v35, %v6935_v37  ;;  %v13616_v37 = vcombine.high %v7048_v6, %v7064_v30 }
 0x88a   : > { %8727 = vmatprep.subr.bf16.mxu1 %v13578_v63  ;;  %v6951_v63 = vld [vmem:[%s20580_s8 + $0x330] sm:$0xff] }
 0x88b   : > { %v13517_v36 = vcombine.low %v6951_v63, %v6967_v42 }
 0x88d   : > { %8728 = vmatpush1.bf16.msra.mxu1 %v13577_v45  ;;  %v13518_v45 = vcombine.high %v6951_v63, %v6967_v42  ;;  %v7096_v63 = vld [vmem:[%s20580_s8 + $0x7b8] sm:$0xff] }
 0x88e   : > { %8729 = vmatprep.subr.bf16.mxu1 %v13610_v47  ;;  %v6983_v47 = vld [vmem:[%s20580_s8 + $0x430] sm:$0xff] }
 0x88f   : > { %v13549_v48 = vcombine.low %v6983_v47, %v6999_v17 }
 0x891   : > { %8730 = vmatpush1.bf16.msra.mxu1 %v13609_v33  ;;  %v13550_v33 = vcombine.high %v6983_v47, %v6999_v17  ;;  %v13615_v17 = vcombine.low %v7048_v6, %v7064_v30 }
 0x892   : > { %8731 = vmatprep.subr.bf16.mxu1 %v13642_v16  ;;  %v7015_v16 = vld [vmem:[%s20580_s8 + $0x530] sm:$0xff] }
 0x893   : > { %v13581_v56 = vcombine.low %v7015_v16, %v7031_v21 }
 0x895   : > { %8732 = vmatpush1.bf16.msra.mxu1 %v13641_v52  ;;  %v13582_v52 = vcombine.high %v7015_v16, %v7031_v21  ;;  %v6857_v21 = vld [vmem:[%s20580_s8 + $0x40] sm:$0xff] }
 0x896   : > { %8758 = vmatprep.subr.bf16.mxu1 %v13420_v53  ;;  %v7047_v53 = vld [vmem:[%s20580_s8 + $0x630] sm:$0xff] }
 0x897   : > { %v13613_v8 = vcombine.low %v7047_v53, %v7063_v54 }
 0x898   : > { %8750 = vmatmul.mubr.bf16.vlgmr.msra.gmra.mrb[24].mxu1 %v18850_v0 }
 0x899   : > { %8759 = vmatpush1.bf16.msra.mxu1 %v13419_v14  ;;  %8790 = vmatprep.mubr.bf16.mxu1 %v16320_v1  ;;  %v13614_v14 = vcombine.high %v7047_v53, %v7063_v54  ;;  %v6889_v54 = vld [vmem:[%s20580_s8 + $0x140] sm:$0xff] }
 0x89a   : > { %8760 = vmatprep.subr.bf16.mxu1 %v13452_v58  ;;  %v7079_v58 = vld [vmem:[%s20580_s8 + $0x730] sm:$0xff] }
 0x89b   : > { %v13645_v18 = vcombine.low %v7079_v58, %v7095_v50 }
 0x89d   : > { %8761 = vmatpush1.bf16.msra.mxu1 %v13451_v9  ;;  %v13646_v9 = vcombine.high %v7079_v58, %v7095_v50  ;;  %v6921_v50 = vld [vmem:[%s20580_s8 + $0x240] sm:$0xff] }
 0x89e   : > { %8762 = vmatprep.subr.bf16.mxu1 %v13484_v11  ;;  %v6856_v11 = vld [vmem:[%s20580_s8 + $0x38] sm:$0xff] }
 0x89f   : > { %v13423_v25 = vcombine.low %v6856_v11, %v6872_v12 }
 0x8a1   : > { %8763 = vmatpush1.bf16.msra.mxu1 %v13483_v22  ;;  %v13424_v22 = vcombine.high %v6856_v11, %v6872_v12  ;;  %v6953_v12 = vld [vmem:[%s20580_s8 + $0x340] sm:$0xff] }
 0x8a2   : > { %8764 = vmatprep.subr.bf16.mxu1 %v13516_v23  ;;  %v6888_v23 = vld [vmem:[%s20580_s8 + $0x138] sm:$0xff] }
 0x8a3   : > { %v13455_v2 = vcombine.low %v6888_v23, %v6904_v24 }
 0x8a5   : > { %8765 = vmatpush1.bf16.msra.mxu1 %v13515_v26  ;;  %v13456_v26 = vcombine.high %v6888_v23, %v6904_v24  ;;  %v6985_v24 = vld [vmem:[%s20580_s8 + $0x440] sm:$0xff] }
 0x8a6   : > { %8766 = vmatprep.subr.bf16.mxu1 %v13548_v46  ;;  %v6920_v46 = vld [vmem:[%s20580_s8 + $0x238] sm:$0xff] }
 0x8a7   : > { %v13487_v57 = vcombine.low %v6920_v46, %v6936_v49 }
 0x8a9   : > { %8767 = vmatpush1.bf16.msra.mxu1 %v13547_v51  ;;  %v13488_v51 = vcombine.high %v6920_v46, %v6936_v49  ;;  %v7017_v49 = vld [vmem:[%s20580_s8 + $0x540] sm:$0xff] }
 0x8aa   : > { %8768 = vmatprep.subr.bf16.mxu1 %v13580_v27  ;;  %v6952_v27 = vld [vmem:[%s20580_s8 + $0x338] sm:$0xff] }
 0x8ab   : > { %v13519_v10 = vcombine.low %v6952_v27, %v6968_v29 }
 0x8ad   : > { %8769 = vmatpush1.bf16.msra.mxu1 %v13579_v61  ;;  %v13520_v61 = vcombine.high %v6952_v27, %v6968_v29  ;;  %v7049_v29 = vld [vmem:[%s20580_s8 + $0x640] sm:$0xff] }
 0x8ae   : > { %8770 = vmatprep.subr.bf16.mxu1 %v13612_v3  ;;  %v6984_v3 = vld [vmem:[%s20580_s8 + $0x438] sm:$0xff] }
 0x8af   : > { %v13551_v13 = vcombine.low %v6984_v3, %v7000_v4 }
 0x8b1   : > { %8771 = vmatpush1.bf16.msra.mxu1 %v13611_v15  ;;  %v13552_v15 = vcombine.high %v6984_v3, %v7000_v4 }
 0x8b2   : > { %8772 = vmatprep.subr.bf16.mxu1 %v13644_v20  ;;  %v7016_v20 = vld [vmem:[%s20580_s8 + $0x538] sm:$0xff] }
 0x8b5   : > { %8773 = vmatpush1.bf16.msra.mxu1 %v13643_v19  ;;  %v19181_v19 = vld [vmem:[%s20581_s9] sm:$0xff] }
 0x8b6   : > { %8799 = vmatprep.subr.bf16.mxu1 %v13422_v28  ;;  %v13584_v28 = vcombine.high %v7016_v20, %v7032_v43  ;;  %v8400_v35 = vrot.slane %v19181_v19, %v17196_v59  ;;  %v8408_v3 = vrot.slane %v19181_v19, %v17202_v34 }
 0x8b8   : > { %8791 = vmatmul.mubr.bf16.vlgmr.msra.gmra.mrb[28].mxu1 %v18850_v0 }
 0x8b9   : > { %8800 = vmatpush1.bf16.msra.mxu1 %v13421_v31  ;;  %8831 = vmatprep.mubr.bf16.mxu1 %v16320_v1  ;;  %v8396_v31 = vrot.slane %v19181_v19, %v17199_v62 }
 0x8ba   : > { %8801 = vmatprep.subr.bf16.mxu1 %v13454_v32  ;;  %v13583_v32 = vcombine.low %v7016_v20, %v7032_v43  ;;  %v7081_v20 = vld [vmem:[%s20580_s8 + $0x740] sm:$0xff] }
 0x8bb   : > { %v7097_v43 = vld [vmem:[%s20580_s8 + $0x7c0] sm:$0xff] }
 0x8bd   : > { %8802 = vmatpush1.bf16.msra.mxu1 %v13453_v38 }
 0x8be   : > { %8803 = vmatprep.subr.bf16.mxu1 %v13486_v39  ;;  %v7080_v39 = vld [vmem:[%s20580_s8 + $0x738] sm:$0xff] }
 0x8c1   : > { %8804 = vmatpush1.bf16.msra.mxu1 %v13485_v44 }
 0x8c2   : > { %8805 = vmatprep.subr.bf16.mxu1 %v13518_v45 }
 0x8c5   : > { %8806 = vmatpush1.bf16.msra.mxu1 %v13517_v36 }
 0x8c6   : > { %8807 = vmatprep.subr.bf16.mxu1 %v13550_v33  ;;  %v13648_v33 = vcombine.high %v7080_v39, %v7096_v63 }
 0x8c9   : > { %8808 = vmatpush1.bf16.msra.mxu1 %v13549_v48  ;;  %v6873_v48 = vld [vmem:[%s20580_s8 + $0xc0] sm:$0xff] }
 0x8ca   : > { %8809 = vmatprep.subr.bf16.mxu1 %v13582_v52  ;;  %v13647_v52 = vcombine.low %v7080_v39, %v7096_v63  ;;  %v13426_v53 = vcombine.high %v6857_v21, %v6873_v48  ;;  %v6874_v39 = vld [vmem:[%s20580_s8 + $0xc8] sm:$0xff] }
 0x8cd   : > { %8810 = vmatpush1.bf16.msra.mxu1 %v13581_v56  ;;  %v6905_v56 = vld [vmem:[%s20580_s8 + $0x1c0] sm:$0xff] }
 0x8ce   : > { %8811 = vmatprep.subr.bf16.mxu1 %v13614_v14  ;;  %v13425_v14 = vcombine.low %v6857_v21, %v6873_v48  ;;  %v13458_v58 = vcombine.high %v6889_v54, %v6905_v56  ;;  %v6922_v21 = vld [vmem:[%s20580_s8 + $0x248] sm:$0xff] }
 0x8cf   : > { %v6938_v48 = vld [vmem:[%s20580_s8 + $0x2c8] sm:$0xff] }
 0x8d1   : > { %8812 = vmatpush1.bf16.msra.mxu1 %v13613_v8  ;;  %v6937_v8 = vld [vmem:[%s20580_s8 + $0x2c0] sm:$0xff] }
 0x8d2   : > { %8813 = vmatprep.subr.bf16.mxu1 %v13646_v9  ;;  %v13457_v9 = vcombine.low %v6889_v54, %v6905_v56  ;;  %v13490_v11 = vcombine.high %v6921_v50, %v6937_v8  ;;  %v6954_v54 = vld [vmem:[%s20580_s8 + $0x348] sm:$0xff] }
 0x8d3   : > { %v6970_v56 = vld [vmem:[%s20580_s8 + $0x3c8] sm:$0xff] }
 0x8d5   : > { %8814 = vmatpush1.bf16.msra.mxu1 %v13645_v18  ;;  %v6969_v18 = vld [vmem:[%s20580_s8 + $0x3c0] sm:$0xff] }
 0x8d6   : > { %8840 = vmatprep.subr.bf16.mxu1 %v13424_v22  ;;  %v13489_v22 = vcombine.low %v6921_v50, %v6937_v8  ;;  %v13522_v23 = vcombine.high %v6953_v12, %v6969_v18  ;;  %v6986_v50 = vld [vmem:[%s20580_s8 + $0x448] sm:$0xff] }
 0x8d7   : > { %v7002_v8 = vld [vmem:[%s20580_s8 + $0x4c8] sm:$0xff] }
 0x8d8   : > { %8832 = vmatmul.mubr.bf16.vlgmr.msra.gmra.mrb[32].mxu1 %v18850_v0 }
 0x8d9   : > { %8841 = vmatpush1.bf16.msra.mxu1 %v13423_v25  ;;  %8872 = vmatprep.mubr.bf16.mxu1 %v16320_v1  ;;  %v7001_v25 = vld [vmem:[%s20580_s8 + $0x4c0] sm:$0xff] }
 0x8da   : > { %8842 = vmatprep.subr.bf16.mxu1 %v13456_v26  ;;  %v13521_v26 = vcombine.low %v6953_v12, %v6969_v18  ;;  %v13554_v46 = vcombine.high %v6985_v24, %v7001_v25  ;;  %v7018_v12 = vld [vmem:[%s20580_s8 + $0x548] sm:$0xff] }
 0x8db   : > { %v7034_v18 = vld [vmem:[%s20580_s8 + $0x5c8] sm:$0xff] }
 0x8dd   : > { %8843 = vmatpush1.bf16.msra.mxu1 %v13455_v2  ;;  %v7033_v2 = vld [vmem:[%s20580_s8 + $0x5c0] sm:$0xff] }
 0x8de   : > { %8844 = vmatprep.subr.bf16.mxu1 %v13488_v51  ;;  %v13553_v51 = vcombine.low %v6985_v24, %v7001_v25  ;;  %v13586_v27 = vcombine.high %v7017_v49, %v7033_v2  ;;  %v13585_v4 = vcombine.low %v7017_v49, %v7033_v2  ;;  %v7050_v24 = vld [vmem:[%s20580_s8 + $0x648] sm:$0xff]  ;;  %v13587_v49 = vcombine.low %v7018_v12, %v7034_v18 }
 0x8df   : > { %v7066_v25 = vld [vmem:[%s20580_s8 + $0x6c8] sm:$0xff] }
 0x8e0   : > { %v13620_v2 = vcombine.high %v7050_v24, %v7066_v25 }
 0x8e1   : > { %8845 = vmatpush1.bf16.msra.mxu1 %v13487_v57  ;;  %v7065_v57 = vld [vmem:[%s20580_s8 + $0x6c0] sm:$0xff] }
 0x8e2   : > { %8846 = vmatprep.subr.bf16.mxu1 %v13520_v61  ;;  %v8404_v61 = vrot.slane %v19181_v19, %v17347_v5 }
 0x8e5   : > { %8847 = vmatpush1.bf16.msra.mxu1 %v13519_v10  ;;  %v13618_v10 = vcombine.high %v7049_v29, %v7065_v57 }
 0x8e6   : > { %8848 = vmatprep.subr.bf16.mxu1 %v13552_v15 }
 0x8e9   : > { %8849 = vmatpush1.bf16.msra.mxu1 %v13551_v13 }
 0x8ea   : > { %8850 = vmatprep.subr.bf16.mxu1 %v13584_v28 }
 0x8eb   : > { %v8587_v38 = vpop.f32.mrb[8].mxu1 }
 0x8ec   : > { %v19199_v42 = vadd.f32 %v8587_v38, %v8396_v31  ;;  %v8589_v44 = vpop.f32.mrb[9].mxu1  ;;  %v13617_v31 = vcombine.low %v7049_v29, %v7065_v57  ;;  %v6858_v38 = vld [vmem:[%s20580_s8 + $0x48] sm:$0xff] }
 0x8ed   : > { %v19201_v45 = vadd.f32 %v8589_v44, %v8400_v35  ;;  %8851 = vmatpush1.bf16.msra.mxu1 %v13583_v32  ;;  %v8591_v47 = vpop.f32.mrb[10].mxu1  ;;  %v13650_v35 = vcombine.high %v7081_v20, %v7097_v43  ;;  %v13649_v44 = vcombine.low %v7081_v20, %v7097_v43  ;;  %v7098_v29 = vld [vmem:[%s20580_s8 + $0x7c8] sm:$0xff] }
 0x8ee   : > { %v8592_v36 = vpop.f32.mrb[11].mxu1  ;;  %8852 = vmatprep.subr.bf16.mxu1 %v13616_v37 }
 0x8ef   : > { %v9241_v16 = vcombine.low %v19199_v42, %v19201_v45  ;;  %v13428_v45 = vcombine.high %v6858_v38, %v6874_v39  ;;  %v6906_v36 = vld [vmem:[%s20580_s8 + $0x1c8] sm:$0xff] }
 0x8f1   : > { %8853 = vmatpush1.bf16.msra.mxu1 %v13615_v17  ;;  %v19266_v63 = vrot.slane %v9241_v16, %v17003_v55  ;;  %v6890_v17 = vld [vmem:[%s20580_s8 + $0x148] sm:$0xff] }
 0x8f2   : > { %8854 = vmatprep.subr.bf16.mxu1 %v13648_v33  ;;  %v13427_v33 = vcombine.low %v6858_v38, %v6874_v39  ;;  %v13460_v16 = vcombine.high %v6890_v17, %v6906_v36  ;;  %v6923_v38 = vld [vmem:[%s20580_s8 + $0x250] sm:$0xff] }
 0x8f3   : > { %v6939_v39 = vld [vmem:[%s20580_s8 + $0x2d0] sm:$0xff] }
 0x8f5   : > { %8855 = vmatpush1.bf16.msra.mxu1 %v13647_v52  ;;  %v13459_v52 = vcombine.low %v6890_v17, %v6906_v36  ;;  %v6955_v17 = vld [vmem:[%s20580_s8 + $0x350] sm:$0xff] }
 0x8f6   : > { %8881 = vmatprep.subr.bf16.mxu1 %v13426_v53  ;;  %v13492_v53 = vcombine.high %v6922_v21, %v6938_v48  ;;  %v6971_v36 = vld [vmem:[%s20580_s8 + $0x3d0] sm:$0xff] }
 0x8f8   : > { %8873 = vmatmul.mubr.bf16.vlgmr.msra.gmra.mrb[36].mxu1 %v18850_v0 }
 0x8f9   : > { %8882 = vmatpush1.bf16.msra.mxu1 %v13425_v14  ;;  %8913 = vmatprep.mubr.bf16.mxu1 %v16320_v1  ;;  %v13491_v14 = vcombine.low %v6922_v21, %v6938_v48  ;;  %v6987_v21 = vld [vmem:[%s20580_s8 + $0x450] sm:$0xff] }
 0x8fa   : > { %8883 = vmatprep.subr.bf16.mxu1 %v13458_v58  ;;  %v13524_v58 = vcombine.high %v6954_v54, %v6970_v56  ;;  %v7003_v48 = vld [vmem:[%s20580_s8 + $0x4d0] sm:$0xff] }
 0x8fd   : > { %8884 = vmatpush1.bf16.msra.mxu1 %v13457_v9  ;;  %v13523_v9 = vcombine.low %v6954_v54, %v6970_v56  ;;  %v7019_v54 = vld [vmem:[%s20580_s8 + $0x550] sm:$0xff] }
 0x8fe   : > { %8885 = vmatprep.subr.bf16.mxu1 %v13490_v11  ;;  %v13556_v11 = vcombine.high %v6986_v50, %v7002_v8  ;;  %v7035_v56 = vld [vmem:[%s20580_s8 + $0x5d0] sm:$0xff] }
 0x901   : > { %8886 = vmatpush1.bf16.msra.mxu1 %v13489_v22  ;;  %v13555_v22 = vcombine.low %v6986_v50, %v7002_v8  ;;  %v7051_v50 = vld [vmem:[%s20580_s8 + $0x650] sm:$0xff] }
 0x902   : > { %8887 = vmatprep.subr.bf16.mxu1 %v13522_v23  ;;  %v13588_v23 = vcombine.high %v7018_v12, %v7034_v18  ;;  %v7067_v8 = vld [vmem:[%s20580_s8 + $0x6d0] sm:$0xff]  ;;  %v13589_v12 = vcombine.low %v7019_v54, %v7035_v56 }
 0x903   : > { %v13622_v18 = vcombine.high %v7051_v50, %v7067_v8 }
 0x905   : > { %8888 = vmatpush1.bf16.msra.mxu1 %v13521_v26  ;;  %v8412_v26 = vrot.slane %v19181_v19, %v17453_v40 }
 0x906   : > { %8889 = vmatprep.subr.bf16.mxu1 %v13554_v46  ;;  %v8416_v46 = vrot.slane %v19181_v19, %v17350_v7 }
 0x909   : > { %8890 = vmatpush1.bf16.msra.mxu1 %v13553_v51 }
 0x90a   : > { %8891 = vmatprep.subr.bf16.mxu1 %v13586_v27  ;;  %v7082_v27 = vld [vmem:[%s20580_s8 + $0x748] sm:$0xff] }
 0x90b   : > { %v8628_v15 = vpop.f32.mrb[12].mxu1  ;;  %v13652_v20 = vcombine.high %v7082_v27, %v7098_v29 }
 0x90c   : > { %v8629_v13 = vadd.f32 %v8628_v15, %v8404_v61  ;;  %v8630_v28 = vpop.f32.mrb[13].mxu1 }
 0x90d   : > { %v8631_v6 = vadd.f32 %v8630_v28, %v8408_v3  ;;  %v8632_v30 = vpop.f32.mrb[14].mxu1  ;;  %8892 = vmatpush1.bf16.msra.mxu1 %v13585_v4  ;;  %v6875_v28 = vld [vmem:[%s20580_s8 + $0xd0] sm:$0xff] }
 0x90e   : > { %v8633_v32 = vpop.f32.mrb[15].mxu1  ;;  %8893 = vmatprep.subr.bf16.mxu1 %v13618_v10  ;;  %v13619_v10 = vcombine.low %v7050_v24, %v7066_v25  ;;  %v7099_v24 = vld [vmem:[%s20580_s8 + $0x7d0] sm:$0xff] }
 0x90f   : > { %v9242_v37 = vcombine.low %v8629_v13, %v8631_v6  ;;  %v6859_v13 = vld [vmem:[%s20580_s8 + $0x50] sm:$0xff]  ;;  %v13651_v6 = vcombine.low %v7082_v27, %v7098_v29  ;;  %v6860_v29 = vld [vmem:[%s20580_s8 + $0x58] sm:$0xff] }
 0x910   : > { %v13430_v30 = vcombine.high %v6859_v13, %v6875_v28  ;;  %v6907_v32 = vld [vmem:[%s20580_s8 + $0x1d0] sm:$0xff] }
 0x911   : > { %v19269_v42 = vrot.slane %v9242_v37, %v17003_v55  ;;  %8894 = vmatpush1.bf16.msra.mxu1 %v13617_v31  ;;  %v6891_v31 = vld [vmem:[%s20580_s8 + $0x150] sm:$0xff] }
 0x912   : > { %8895 = vmatprep.subr.bf16.mxu1 %v13650_v35  ;;  %v13429_v35 = vcombine.low %v6859_v13, %v6875_v28  ;;  %v13462_v37 = vcombine.high %v6891_v31, %v6907_v32  ;;  %v6908_v13 = vld [vmem:[%s20580_s8 + $0x1d8] sm:$0xff] }
 0x913   : > { %v9273_v47 = vcombine.low %v19266_v63, %v19269_v42 }
 0x915   : > { %8896 = vmatpush1.bf16.msra.mxu1 %v13649_v44  ;;  %v13461_v44 = vcombine.low %v6891_v31, %v6907_v32  ;;  %v6924_v32 = vld [vmem:[%s20580_s8 + $0x258] sm:$0xff] }
 0x916   : > { %8922 = vmatprep.subr.bf16.mxu1 %v13428_v45  ;;  %v13494_v45 = vcombine.high %v6923_v38, %v6939_v39 }
 0x918   : > { %8914 = vmatmul.mubr.bf16.vlgmr.msra.gmra.mrb[40].mxu1 %v18850_v0 }
 0x919   : > { %8923 = vmatpush1.bf16.msra.mxu1 %v13427_v33  ;;  %8954 = vmatprep.mubr.bf16.mxu1 %v16320_v1  ;;  %v13493_v33 = vcombine.low %v6923_v38, %v6939_v39 }
 0x91a   : > { %8924 = vmatprep.subr.bf16.mxu1 %v13460_v16  ;;  %v13526_v16 = vcombine.high %v6955_v17, %v6971_v36 }
 0x91d   : > { %8925 = vmatpush1.bf16.msra.mxu1 %v13459_v52  ;;  %v13525_v52 = vcombine.low %v6955_v17, %v6971_v36 }
 0x91e   : > { %8926 = vmatprep.subr.bf16.mxu1 %v13492_v53  ;;  %v13558_v53 = vcombine.high %v6987_v21, %v7003_v48 }
 0x921   : > { %8927 = vmatpush1.bf16.msra.mxu1 %v13491_v14  ;;  %v13557_v14 = vcombine.low %v6987_v21, %v7003_v48 }
 0x922   : > { %8928 = vmatprep.subr.bf16.mxu1 %v13524_v58  ;;  %v13590_v58 = vcombine.high %v7019_v54, %v7035_v56  ;;  %v7020_v54 = vld [vmem:[%s20580_s8 + $0x558] sm:$0xff] }
 0x923   : > { %v7036_v56 = vld [vmem:[%s20580_s8 + $0x5d8] sm:$0xff] }
 0x925   : > { %8929 = vmatpush1.bf16.msra.mxu1 %v13523_v9  ;;  %v8420_v9 = vrot.slane %v19181_v19, %v17559_v60 }
 0x926   : > { %8930 = vmatprep.subr.bf16.mxu1 %v13556_v11  ;;  %v8424_v11 = vrot.slane %v19181_v19, %v17456_v41 }
 0x929   : > { %8931 = vmatpush1.bf16.msra.mxu1 %v13555_v22 }
 0x92a   : > { %8932 = vmatprep.subr.bf16.mxu1 %v13588_v23  ;;  %v7083_v23 = vld [vmem:[%s20580_s8 + $0x750] sm:$0xff] }
 0x92b   : > { %v8669_v51 = vpop.f32.mrb[16].mxu1  ;;  %v13654_v19 = vcombine.high %v7083_v23, %v7099_v24 }
 0x92c   : > { %v19321_v57 = vadd.f32 %v8669_v51, %v8412_v26  ;;  %v8671_v61 = vpop.f32.mrb[17].mxu1 }
 0x92d   : > { %v19323_v3 = vadd.f32 %v8671_v61, %v8416_v46  ;;  %v8673_v4 = vpop.f32.mrb[18].mxu1  ;;  %8933 = vmatpush1.bf16.msra.mxu1 %v13587_v49 }
 0x92e   : > { %v8674_v15 = vpop.f32.mrb[19].mxu1  ;;  %8934 = vmatprep.subr.bf16.mxu1 %v13620_v2  ;;  %v13621_v2 = vcombine.low %v7051_v50, %v7067_v8  ;;  %v13653_v4 = vcombine.low %v7083_v23, %v7099_v24  ;;  %v19435_v8 = vld [vmem:[%s20581_s9 + $0x8] sm:$0xff] }
 0x92f   : > { %v9243_v43 = vcombine.low %v19321_v57, %v19323_v3  ;;  %v6876_v57 = vld [vmem:[%s20580_s8 + $0xd8] sm:$0xff]  ;;  %v8428_v24 = vrot.slane %v19435_v8, %v17199_v62 }
 0x931   : > { %8935 = vmatpush1.bf16.msra.mxu1 %v13619_v10  ;;  %v9265_v61 = vrot.slane %v9243_v43, %v17003_v55  ;;  %v13432_v10 = vcombine.high %v6860_v29, %v6876_v57  ;;  %v9281_v43 = vrot.slane %v9273_v47, %v17003_v55  ;;  %v6956_v47 = vld [vmem:[%s20580_s8 + $0x358] sm:$0xff] }
 0x932   : > { %8936 = vmatprep.subr.bf16.mxu1 %v13652_v20  ;;  %v6892_v20 = vld [vmem:[%s20580_s8 + $0x158] sm:$0xff] }
 0x933   : > { %v13463_v63 = vcombine.low %v6892_v20, %v6908_v13 }
 0x935   : > { %8937 = vmatpush1.bf16.msra.mxu1 %v13651_v6  ;;  %v13431_v6 = vcombine.low %v6860_v29, %v6876_v57  ;;  %v7100_v29 = vld [vmem:[%s20580_s8 + $0x7d8] sm:$0xff] }
 0x936   : > { %8963 = vmatprep.subr.bf16.mxu1 %v13430_v30  ;;  %v13464_v30 = vcombine.high %v6892_v20, %v6908_v13 }
 0x938   : > { %8955 = vmatmul.mubr.bf16.vlgmr.msra.gmra.mrb[44].mxu1 %v18850_v0 }
 0x939   : > { %8964 = vmatpush1.bf16.msra.mxu1 %v13429_v35  ;;  %8995 = vmatprep.mubr.bf16.mxu1 %v16320_v1  ;;  %v6940_v35 = vld [vmem:[%s20580_s8 + $0x2d8] sm:$0xff] }
 0x93a   : > { %8965 = vmatprep.subr.bf16.mxu1 %v13462_v37  ;;  %v13496_v42 = vcombine.high %v6924_v32, %v6940_v35  ;;  %v6972_v37 = vld [vmem:[%s20580_s8 + $0x3d8] sm:$0xff]  ;;  %v13495_v38 = vcombine.low %v6924_v32, %v6940_v35  ;;  %v6909_v32 = vld [vmem:[%s20580_s8 + $0x1e0] sm:$0xff] }
 0x93b   : > { %v13528_v39 = vcombine.high %v6956_v47, %v6972_v37 }
 0x93d   : > { %8966 = vmatpush1.bf16.msra.mxu1 %v13461_v44  ;;  %v6988_v44 = vld [vmem:[%s20580_s8 + $0x458] sm:$0xff] }
 0x93e   : > { %8967 = vmatprep.subr.bf16.mxu1 %v13494_v45  ;;  %v7004_v45 = vld [vmem:[%s20580_s8 + $0x4d8] sm:$0xff] }
 0x93f   : > { %v13559_v50 = vcombine.low %v6988_v44, %v7004_v45 }
 0x941   : > { %8968 = vmatpush1.bf16.msra.mxu1 %v13493_v33 }
 0x942   : > { %8969 = vmatprep.subr.bf16.mxu1 %v13526_v16 }
 0x945   : > { %8970 = vmatpush1.bf16.msra.mxu1 %v13525_v52  ;;  %v13527_v52 = vcombine.low %v6956_v47, %v6972_v37  ;;  %v6941_v47 = vld [vmem:[%s20580_s8 + $0x2e0] sm:$0xff] }
 0x946   : > { %8971 = vmatprep.subr.bf16.mxu1 %v13558_v53  ;;  %v13560_v53 = vcombine.high %v6988_v44, %v7004_v45  ;;  %v6973_v44 = vld [vmem:[%s20580_s8 + $0x3e0] sm:$0xff] }
 0x949   : > { %8972 = vmatpush1.bf16.msra.mxu1 %v13557_v14 }
 0x94a   : > { %8973 = vmatprep.subr.bf16.mxu1 %v13590_v58 }
 0x94b   : > { %v8710_v22 = vpop.f32.mrb[20].mxu1 }
 0x94c   : > { %v8711_v25 = vadd.f32 %v8710_v22, %v8420_v9  ;;  %v8712_v26 = vpop.f32.mrb[21].mxu1 }
 0x94d   : > { %v8713_v46 = vadd.f32 %v8712_v26, %v8424_v11  ;;  %v8714_v49 = vpop.f32.mrb[22].mxu1  ;;  %8974 = vmatpush1.bf16.msra.mxu1 %v13589_v12  ;;  %v13592_v11 = vcombine.high %v7020_v54, %v7036_v56  ;;  %v7052_v12 = vld [vmem:[%s20580_s8 + $0x658] sm:$0xff]  ;;  %v13591_v26 = vcombine.low %v7020_v54, %v7036_v56  ;;  %v7053_v56 = vld [vmem:[%s20580_s8 + $0x660] sm:$0xff] }
 0x94e   : > { %v8715_v51 = vpop.f32.mrb[23].mxu1  ;;  %8975 = vmatprep.subr.bf16.mxu1 %v13622_v18  ;;  %v7068_v18 = vld [vmem:[%s20580_s8 + $0x6d8] sm:$0xff] }
 0x94f   : > { %v9244_v27 = vcombine.low %v8711_v25, %v8713_v46  ;;  %v8432_v25 = vrot.slane %v19435_v8, %v17196_v59  ;;  %v13624_v51 = vcombine.high %v7052_v12, %v7068_v18 }
 0x951   : > { %v9272_v3 = vrot.slane %v9244_v27, %v17003_v55  ;;  %8976 = vmatpush1.bf16.msra.mxu1 %v13621_v2  ;;  %v7084_v27 = vld [vmem:[%s20580_s8 + $0x758] sm:$0xff] }
 0x952   : > { %8977 = vmatprep.subr.bf16.mxu1 %v13654_v19  ;;  %v13656_v20 = vcombine.high %v7084_v27, %v7100_v29 }
 0x953   : > { %v9274_v15 = vcombine.low %v9265_v61, %v9272_v3 }
 0x955   : > { %v9288_v28 = vrot.slane %v9274_v15, %v17003_v55  ;;  %8978 = vmatpush1.bf16.msra.mxu1 %v13653_v4 }
 0x956   : > { %9004 = vmatprep.subr.bf16.mxu1 %v13432_v10  ;;  %v13623_v10 = vcombine.low %v7052_v12, %v7068_v18  ;;  %v7085_v18 = vld [vmem:[%s20580_s8 + $0x760] sm:$0xff] }
 0x957   : > { %v9289_v31 = vcombine.low %v9281_v43, %v9288_v28  ;;  %v6861_v43 = vld [vmem:[%s20580_s8 + $0x60] sm:$0xff] }
 0x958   : > { %8996 = vmatmul.mubr.bf16.vlgmr.msra.gmra.mrb[48].mxu1 %v18850_v0  ;;  %v6877_v28 = vld [vmem:[%s20580_s8 + $0xe0] sm:$0xff] }
 0x959   : > { %9441 = vst [vmem:[#allocation5] sm:$0xff] %v9289_v31  ;;  %9005 = vmatpush1.bf16.msra.mxu1 %v13431_v6  ;;  %9036 = vmatprep.mubr.bf16.mxu1 %v16320_v1  ;;  %v13655_v6 = vcombine.low %v7084_v27, %v7100_v29  ;;  %v6893_v31 = vld [vmem:[%s20580_s8 + $0x160] sm:$0xff]  ;;  %v13433_v35 = vcombine.low %v6861_v43, %v6877_v28  ;;  %v6878_v27 = vld [vmem:[%s20580_s8 + $0xe8] sm:$0xff] }
 0x95a   : > { %9006 = vmatprep.subr.bf16.mxu1 %v13464_v30  ;;  %v13434_v30 = vcombine.high %v6861_v43, %v6877_v28  ;;  %v13465_v37 = vcombine.low %v6893_v31, %v6909_v32  ;;  %v6926_v43 = vld [vmem:[%s20580_s8 + $0x268] sm:$0xff] }
 0x95b   : > { %v6942_v28 = vld [vmem:[%s20580_s8 + $0x2e8] sm:$0xff] }
 0x95d   : > { %9007 = vmatpush1.bf16.msra.mxu1 %v13463_v63  ;;  %v13466_v63 = vcombine.high %v6893_v31, %v6909_v32  ;;  %v6958_v31 = vld [vmem:[%s20580_s8 + $0x368] sm:$0xff] }
 0x95e   : > { %9008 = vmatprep.subr.bf16.mxu1 %v13496_v42  ;;  %v6925_v42 = vld [vmem:[%s20580_s8 + $0x260] sm:$0xff]  ;;  %v6974_v32 = vld [vmem:[%s20580_s8 + $0x3e8] sm:$0xff] }
 0x95f   : > { %v13497_v45 = vcombine.low %v6925_v42, %v6941_v47 }
 0x960   : > { %v9516_v17 = vld [vmem:[#allocation5 + $0x4] sm:$0x1]  ;;  %v9529_v36 = vld [vmem:[#allocation5 + $0x5] sm:$0x1]  ;;  %v9541_v33 = vld [vmem:[#allocation5 + $0x6] sm:$0x1] }
 0x961   : > { %v9553_v16 = vld [vmem:[#allocation5 + $0x7] sm:$0x1]  ;;  %9009 = vmatpush1.bf16.msra.mxu1 %v13495_v38  ;;  %v13666_v21 = vld [vmem:[#allocation5 + $0x1] ss:$0 sm:$0xff]  ;;  %v13665_v48 = vld [vmem:[#allocation5] ss:$0 sm:$0xff]  ;;  %v13498_v38 = vcombine.high %v6925_v42, %v6941_v47 }
 0x962   : > { %9518 = vst.msk [vmem:[#allocation6 + $0x21] sm:$0x1] %vm9468_vm5, %v9516_v17  ;;  %9530 = vst.msk [vmem:[#allocation6 + $0x23] sm:$0x1] %vm9468_vm5, %v9529_v36  ;;  %9488 = vrot.lane.b32.xlu1 %v13666_v21, %s20623_s27  ;;  %9476 = vrot.lane.b32.xlu0 %v13665_v48, %s20623_s27  ;;  %v13669_v14 = vld [vmem:[#allocation5 + $0x4] ss:$0 sm:$0xff] }
 0x963   : > { %9542 = vst.msk [vmem:[#allocation6 + $0x25] sm:$0x1] %vm9468_vm5, %v9541_v33  ;;  %9554 = vst.msk [vmem:[#allocation6 + $0x27] sm:$0x1] %vm9468_vm5, %v9553_v16  ;;  %9010 = vmatprep.subr.bf16.mxu1 %v13528_v39  ;;  %v13667_v58 = vld [vmem:[#allocation5 + $0x2] ss:$0 sm:$0xff] }
 0x964   : > { %v9466_v9 = vld [vmem:[#allocation5] sm:$0x1]  ;;  %v13671_v22 = vld [vmem:[#allocation5 + $0x6] ss:$0 sm:$0xff]  ;;  %v13670_v23 = vld [vmem:[#allocation5 + $0x5] ss:$0 sm:$0xff] }
 0x965   : > { %9011 = vmatpush1.bf16.msra.mxu1 %v13527_v52  ;;  %9469 = vst.msk [vmem:[#allocation6 + $0x11] sm:$0x1] %vm9468_vm5, %v9466_v9  ;;  %v9480_v46 = vld [vmem:[#allocation5 + $0x1] sm:$0x1]  ;;  %v9492_v49 = vld [vmem:[#allocation5 + $0x2] sm:$0x1] }
 0x966   : > { %9525 = vrot.lane.b32.xlu1 %v13669_v14, %s20623_s27  ;;  %9500 = vrot.lane.b32.xlu0 %v13667_v58, %s20623_s27  ;;  %v9504_v2 = vld [vmem:[#allocation5 + $0x3] sm:$0x1]  ;;  %9481 = vst.msk [vmem:[#allocation6 + $0x13] sm:$0x1] %vm9468_vm5, %v9480_v46  ;;  %9493 = vst.msk [vmem:[#allocation6 + $0x15] sm:$0x1] %vm9468_vm5, %v9492_v49  ;;  %v8436_v58 = vrot.slane %v19435_v8, %v17347_v5 }
 0x967   : > { %9012 = vmatprep.subr.bf16.mxu1 %v13560_v53  ;;  %9505 = vst.msk [vmem:[#allocation6 + $0x17] sm:$0x1] %vm9468_vm5, %v9504_v2  ;;  %v6957_v39 = vld [vmem:[%s20580_s8 + $0x360] sm:$0xff]  ;;  %v6990_v42 = vld [vmem:[%s20580_s8 + $0x468] sm:$0xff] }
 0x968   : > { %v13530_v17 = vcombine.high %v6957_v39, %v6973_v44  ;;  %v6989_v36 = vld [vmem:[%s20580_s8 + $0x460] sm:$0xff]  ;;  %v13529_v16 = vcombine.low %v6957_v39, %v6973_v44  ;;  %v7006_v47 = vld [vmem:[%s20580_s8 + $0x4e8] sm:$0xff] }
 0x969   : > { %9013 = vmatpush1.bf16.msra.mxu1 %v13559_v50  ;;  %v7005_v33 = vld [vmem:[%s20580_s8 + $0x4e0] sm:$0xff]  ;;  %v8440_v50 = vrot.slane %v19435_v8, %v17202_v34  ;;  %v7022_v39 = vld [vmem:[%s20580_s8 + $0x568] sm:$0xff] }
 0x96a   : > { %9549 = vrot.lane.b32.xlu1 %v13671_v22, %s20623_s27  ;;  %9537 = vrot.lane.b32.xlu0 %v13670_v23, %s20623_s27  ;;  %v13562_v21 = vcombine.high %v6989_v36, %v7005_v33  ;;  %v7021_v48 = vld [vmem:[%s20580_s8 + $0x560] sm:$0xff]  ;;  %v13561_v53 = vcombine.low %v6989_v36, %v7005_v33  ;;  %v7038_v44 = vld [vmem:[%s20580_s8 + $0x5e8] sm:$0xff] }
 0x96b   : > { %v8751_v19 = vpop.f32.mrb[24].mxu1  ;;  %9014 = vmatprep.subr.bf16.mxu1 %v13592_v11  ;;  %v7037_v52 = vld [vmem:[%s20580_s8 + $0x5e0] sm:$0xff]  ;;  %v7054_v36 = vld [vmem:[%s20580_s8 + $0x668] sm:$0xff] }
 0x96c   : > { %v19461_v57 = vadd.f32 %v8751_v19, %v8428_v24  ;;  %v8753_v61 = vpop.f32.mrb[25].mxu1  ;;  %v13594_v54 = vcombine.high %v7021_v48, %v7037_v52  ;;  %v7069_v14 = vld [vmem:[%s20580_s8 + $0x6e0] sm:$0xff]  ;;  %v13593_v9 = vcombine.low %v7021_v48, %v7037_v52  ;;  %v6862_v19 = vld [vmem:[%s20580_s8 + $0x68] sm:$0xff]  ;;  %v13595_v48 = vcombine.low %v7022_v39, %v7038_v44 }
 0x96d   : > { %v19463_v3 = vadd.f32 %v8753_v61, %v8432_v25  ;;  %v8755_v4 = vpop.f32.mrb[26].mxu1  ;;  %9015 = vmatpush1.bf16.msra.mxu1 %v13591_v26  ;;  %v13626_v11 = vcombine.high %v7053_v56, %v7069_v14  ;;  %v7101_v22 = vld [vmem:[%s20580_s8 + $0x7e0] sm:$0xff]  ;;  %v13625_v46 = vcombine.low %v7053_v56, %v7069_v14  ;;  %v7070_v33 = vld [vmem:[%s20580_s8 + $0x6e8] sm:$0xff] }
 0x96e   : > { %v8756_v15 = vpop.f32.mrb[27].mxu1  ;;  %9016 = vmatprep.subr.bf16.mxu1 %v13624_v51  ;;  %v13658_v2 = vcombine.high %v7085_v18, %v7101_v22  ;;  %v13657_v61 = vcombine.low %v7085_v18, %v7101_v22  ;;  %v13628_v52 = vcombine.high %v7054_v36, %v7070_v33  ;;  %v7102_v56 = vld [vmem:[%s20580_s8 + $0x7e8] sm:$0xff] }
 0x96f   : > { %v9290_v13 = vcombine.low %v19461_v57, %v19463_v3  ;;  %v13436_v3 = vcombine.high %v6862_v19, %v6878_v27  ;;  %v6910_v15 = vld [vmem:[%s20580_s8 + $0x1e8] sm:$0xff] }
 0x971   : > { %9017 = vmatpush1.bf16.msra.mxu1 %v13623_v10  ;;  %v19528_v29 = vrot.slane %v9290_v13, %v17003_v55  ;;  %v6894_v10 = vld [vmem:[%s20580_s8 + $0x168] sm:$0xff] }
 0x972   : > { %9018 = vmatprep.subr.bf16.mxu1 %v13656_v20  ;;  %v13435_v20 = vcombine.low %v6862_v19, %v6878_v27  ;;  %v13468_v13 = vcombine.high %v6894_v10, %v6910_v15  ;;  %v6927_v19 = vld [vmem:[%s20580_s8 + $0x270] sm:$0xff] }
 0x973   : > { %v6943_v27 = vld [vmem:[%s20580_s8 + $0x2f0] sm:$0xff] }
 0x975   : > { %9019 = vmatpush1.bf16.msra.mxu1 %v13655_v6  ;;  %v13467_v6 = vcombine.low %v6894_v10, %v6910_v15  ;;  %v6959_v10 = vld [vmem:[%s20580_s8 + $0x370] sm:$0xff] }
 0x976   : > { %9045 = vmatprep.subr.bf16.mxu1 %v13434_v30  ;;  %v13500_v30 = vcombine.high %v6926_v43, %v6942_v28  ;;  %v6975_v15 = vld [vmem:[%s20580_s8 + $0x3f0] sm:$0xff] }
 0x978   : > { %9037 = vmatmul.mubr.bf16.vlgmr.msra.gmra.mrb[52].mxu1 %v18850_v0 }
 0x979   : > { %9046 = vmatpush1.bf16.msra.mxu1 %v13433_v35  ;;  %9077 = vmatprep.mubr.bf16.mxu1 %v16320_v1  ;;  %v13499_v35 = vcombine.low %v6926_v43, %v6942_v28  ;;  %v6991_v43 = vld [vmem:[%s20580_s8 + $0x470] sm:$0xff] }
 0x97a   : > { %9047 = vmatprep.subr.bf16.mxu1 %v13466_v63  ;;  %v13532_v63 = vcombine.high %v6958_v31, %v6974_v32  ;;  %v7007_v28 = vld [vmem:[%s20580_s8 + $0x4f0] sm:$0xff] }
 0x97d   : > { %9048 = vmatpush1.bf16.msra.mxu1 %v13465_v37  ;;  %v13531_v37 = vcombine.low %v6958_v31, %v6974_v32  ;;  %v7023_v31 = vld [vmem:[%s20580_s8 + $0x570] sm:$0xff] }
 0x97e   : > { %9049 = vmatprep.subr.bf16.mxu1 %v13498_v38  ;;  %v13564_v38 = vcombine.high %v6990_v42, %v7006_v47  ;;  %v7039_v32 = vld [vmem:[%s20580_s8 + $0x5f0] sm:$0xff] }
 0x981   : > { %9050 = vmatpush1.bf16.msra.mxu1 %v13497_v45  ;;  %v13563_v45 = vcombine.low %v6990_v42, %v7006_v47  ;;  %v7055_v42 = vld [vmem:[%s20580_s8 + $0x670] sm:$0xff] }
 0x982   : > { %9051 = vmatprep.subr.bf16.mxu1 %v13530_v17  ;;  %v13596_v17 = vcombine.high %v7022_v39, %v7038_v44  ;;  %v7071_v47 = vld [vmem:[%s20580_s8 + $0x6f0] sm:$0xff]  ;;  %v13597_v39 = vcombine.low %v7023_v31, %v7039_v32 }
 0x983   : > { %v13630_v44 = vcombine.high %v7055_v42, %v7071_v47 }
 0x985   : > { %9052 = vmatpush1.bf16.msra.mxu1 %v13529_v16  ;;  %v8444_v16 = vrot.slane %v19435_v8, %v17453_v40 }
 0x986   : > { %9053 = vmatprep.subr.bf16.mxu1 %v13562_v21  ;;  %v8448_v21 = vrot.slane %v19435_v8, %v17350_v7 }
 0x989   : > { %9054 = vmatpush1.bf16.msra.mxu1 %v13561_v53 }
 0x98a   : > { %9055 = vmatprep.subr.bf16.mxu1 %v13594_v54  ;;  %v7086_v54 = vld [vmem:[%s20580_s8 + $0x768] sm:$0xff] }
 0x98b   : > { %v8792_v12 = vpop.f32.mrb[28].mxu1  ;;  %v13660_v18 = vcombine.high %v7086_v54, %v7102_v56 }
 0x98c   : > { %v8793_v23 = vadd.f32 %v8792_v12, %v8436_v58  ;;  %v8794_v24 = vpop.f32.mrb[29].mxu1 }
 0x98d   : > { %v8795_v25 = vadd.f32 %v8794_v24, %v8440_v50  ;;  %v8796_v26 = vpop.f32.mrb[30].mxu1  ;;  %9056 = vmatpush1.bf16.msra.mxu1 %v13593_v9  ;;  %v6879_v24 = vld [vmem:[%s20580_s8 + $0xf0] sm:$0xff] }
 0x98e   : > { %v8797_v49 = vpop.f32.mrb[31].mxu1  ;;  %9057 = vmatprep.subr.bf16.mxu1 %v13626_v11  ;;  %v13627_v11 = vcombine.low %v7054_v36, %v7070_v33  ;;  %v7103_v36 = vld [vmem:[%s20580_s8 + $0x7f0] sm:$0xff] }
 0x98f   : > { %v9291_v51 = vcombine.low %v8793_v23, %v8795_v25  ;;  %v6863_v23 = vld [vmem:[%s20580_s8 + $0x70] sm:$0xff]  ;;  %v13659_v25 = vcombine.low %v7086_v54, %v7102_v56  ;;  %v6864_v56 = vld [vmem:[%s20580_s8 + $0x78] sm:$0xff] }
 0x990   : > { %v13438_v26 = vcombine.high %v6863_v23, %v6879_v24  ;;  %v6911_v49 = vld [vmem:[%s20580_s8 + $0x1f0] sm:$0xff] }
 0x991   : > { %v19531_v57 = vrot.slane %v9291_v51, %v17003_v55  ;;  %9058 = vmatpush1.bf16.msra.mxu1 %v13625_v46  ;;  %v6895_v46 = vld [vmem:[%s20580_s8 + $0x170] sm:$0xff] }
 0x992   : > { %9059 = vmatprep.subr.bf16.mxu1 %v13658_v2  ;;  %v13437_v2 = vcombine.low %v6863_v23, %v6879_v24  ;;  %v13470_v51 = vcombine.high %v6895_v46, %v6911_v49  ;;  %v6912_v23 = vld [vmem:[%s20580_s8 + $0x1f8] sm:$0xff] }
 0x993   : > { %v9322_v4 = vcombine.low %v19528_v29, %v19531_v57  ;;  %v6944_v29 = vld [vmem:[%s20580_s8 + $0x2f8] sm:$0xff] }
 0x995   : > { %9060 = vmatpush1.bf16.msra.mxu1 %v13657_v61  ;;  %v13469_v61 = vcombine.low %v6895_v46, %v6911_v49 }
 0x996   : > { %9086 = vmatprep.subr.bf16.mxu1 %v13436_v3  ;;  %v13502_v3 = vcombine.high %v6927_v19, %v6943_v27 }
 0x998   : > { %9078 = vmatmul.mubr.bf16.vlgmr.msra.gmra.mrb[56].mxu1 %v18850_v0 }
 0x999   : > { %9087 = vmatpush1.bf16.msra.mxu1 %v13435_v20  ;;  %9118 = vmatprep.mubr.bf16.mxu1 %v16320_v1  ;;  %v13501_v20 = vcombine.low %v6927_v19, %v6943_v27 }
 0x99a   : > { %9088 = vmatprep.subr.bf16.mxu1 %v13468_v13  ;;  %v13534_v13 = vcombine.high %v6959_v10, %v6975_v15 }
 0x99d   : > { %9089 = vmatpush1.bf16.msra.mxu1 %v13467_v6  ;;  %v13533_v6 = vcombine.low %v6959_v10, %v6975_v15  ;;  %v6960_v10 = vld [vmem:[%s20580_s8 + $0x378] sm:$0xff] }
 0x99e   : > { %9090 = vmatprep.subr.bf16.mxu1 %v13500_v30  ;;  %v13566_v30 = vcombine.high %v6991_v43, %v7007_v28  ;;  %v6976_v15 = vld [vmem:[%s20580_s8 + $0x3f8] sm:$0xff] }
 0x9a1   : > { %9091 = vmatpush1.bf16.msra.mxu1 %v13499_v35  ;;  %v13565_v35 = vcombine.low %v6991_v43, %v7007_v28  ;;  %v7008_v43 = vld [vmem:[%s20580_s8 + $0x4f8] sm:$0xff] }
 0x9a2   : > { %9092 = vmatprep.subr.bf16.mxu1 %v13532_v63  ;;  %v13598_v63 = vcombine.high %v7023_v31, %v7039_v32 }
 0x9a5   : > { %9093 = vmatpush1.bf16.msra.mxu1 %v13531_v37  ;;  %v8452_v37 = vrot.slane %v19435_v8, %v17559_v60 }
 0x9a6   : > { %9094 = vmatprep.subr.bf16.mxu1 %v13564_v38  ;;  %v8456_v38 = vrot.slane %v19435_v8, %v17456_v41 }
 0x9a9   : > { %9095 = vmatpush1.bf16.msra.mxu1 %v13563_v45 }
 0x9aa   : > { %9096 = vmatprep.subr.bf16.mxu1 %v13596_v17  ;;  %v7087_v17 = vld [vmem:[%s20580_s8 + $0x770] sm:$0xff] }
 0x9ab   : > { %v8833_v53 = vpop.f32.mrb[32].mxu1  ;;  %v13662_v8 = vcombine.high %v7087_v17, %v7103_v36 }
 0x9ac   : > { %v19583_v14 = vadd.f32 %v8833_v53, %v8444_v16  ;;  %v8835_v58 = vpop.f32.mrb[33].mxu1 }
 0x9ad   : > { %v19585_v50 = vadd.f32 %v8835_v58, %v8448_v21  ;;  %v8837_v9 = vpop.f32.mrb[34].mxu1  ;;  %9097 = vmatpush1.bf16.msra.mxu1 %v13595_v48 }
 0x9ae   : > { %v8838_v12 = vpop.f32.mrb[35].mxu1  ;;  %9098 = vmatprep.subr.bf16.mxu1 %v13628_v52  ;;  %v13629_v52 = vcombine.low %v7055_v42, %v7071_v47  ;;  %v13661_v9 = vcombine.low %v7087_v17, %v7103_v36  ;;  %v19697_v47 = vld [vmem:[%s20581_s9 + $0x10] sm:$0xff] }
 0x9af   : > { %v9292_v22 = vcombine.low %v19583_v14, %v19585_v50  ;;  %v6880_v14 = vld [vmem:[%s20580_s8 + $0xf8] sm:$0xff] }
 0x9b0   : > { %v13439_v46 = vcombine.low %v6864_v56, %v6880_v14 }
 0x9b1   : > { %9099 = vmatpush1.bf16.msra.mxu1 %v13627_v11  ;;  %v9314_v58 = vrot.slane %v9292_v22, %v17003_v55  ;;  %v13440_v11 = vcombine.high %v6864_v56, %v6880_v14  ;;  %v9330_v22 = vrot.slane %v9322_v4, %v17003_v55  ;;  %v8464_v56 = vrot.slane %v19697_v47, %v17196_v59 }
 0x9b2   : > { %9100 = vmatprep.subr.bf16.mxu1 %v13660_v18  ;;  %v6896_v18 = vld [vmem:[%s20580_s8 + $0x178] sm:$0xff] }
 0x9b3   : > { %v13472_v49 = vcombine.high %v6896_v18, %v6912_v23  ;;  %v13471_v19 = vcombine.low %v6896_v18, %v6912_v23 }
 0x9b5   : > { %9101 = vmatpush1.bf16.msra.mxu1 %v13659_v25 }
 0x9b6   : > { %9127 = vmatprep.subr.bf16.mxu1 %v13438_v26 }
 0x9b8   : > { %9119 = vmatmul.mubr.bf16.vlgmr.msra.gmra.mrb[60].mxu1 %v18850_v0 }
 0x9b9   : > { %9128 = vmatpush1.bf16.msra.mxu1 %v13437_v2  ;;  %9159 = vmatprep.mubr.bf16.mxu1 %v16320_v1 }
 0x9ba   : > { %9129 = vmatprep.subr.bf16.mxu1 %v13470_v51  ;;  %v6928_v51 = vld [vmem:[%s20580_s8 + $0x278] sm:$0xff] }
 0x9bb   : > { %v13504_v27 = vcombine.high %v6928_v51, %v6944_v29 }
 0x9bd   : > { %9130 = vmatpush1.bf16.msra.mxu1 %v13469_v61 }
 0x9be   : > { %9131 = vmatprep.subr.bf16.mxu1 %v13502_v3 }
 0x9c1   : > { %9132 = vmatpush1.bf16.msra.mxu1 %v13501_v20  ;;  %v13503_v20 = vcombine.low %v6928_v51, %v6944_v29  ;;  %v9859_v51 = vld [vmem:[#allocation6] sm:$0xff] }
 0x9c2   : > { %9133 = vmatprep.subr.bf16.mxu1 %v13534_v13  ;;  %v6992_v13 = vld [vmem:[%s20580_s8 + $0x478] sm:$0xff] }
 0x9c3   : > { %v13568_v42 = vcombine.high %v6992_v13, %v7008_v43 }
 0x9c5   : > { %9134 = vmatpush1.bf16.msra.mxu1 %v13533_v6 }
 0x9c6   : > { %9135 = vmatprep.subr.bf16.mxu1 %v13566_v30 }
 0x9c9   : > { %9136 = vmatpush1.bf16.msra.mxu1 %v13565_v35 }
 0x9ca   : > { %9137 = vmatprep.subr.bf16.mxu1 %v13598_v63  ;;  %v13535_v63 = vcombine.low %v6960_v10, %v6976_v15 }
 0x9cb   : > { %v8874_v45 = vpop.f32.mrb[36].mxu1 }
 0x9cc   : > { %v8875_v33 = vadd.f32 %v8874_v45, %v8452_v37  ;;  %v8876_v16 = vpop.f32.mrb[37].mxu1  ;;  %v7024_v37 = vld [vmem:[%s20580_s8 + $0x578] sm:$0xff] }
 0x9cd   : > { %v8877_v21 = vadd.f32 %v8876_v16, %v8456_v38  ;;  %v8878_v48 = vpop.f32.mrb[38].mxu1  ;;  %9138 = vmatpush1.bf16.msra.mxu1 %v13597_v39  ;;  %v7040_v39 = vld [vmem:[%s20580_s8 + $0x5f8] sm:$0xff] }
 0x9ce   : > { %v8879_v53 = vpop.f32.mrb[39].mxu1  ;;  %9139 = vmatprep.subr.bf16.mxu1 %v13630_v44  ;;  %v7056_v48 = vld [vmem:[%s20580_s8 + $0x678] sm:$0xff]  ;;  %v13599_v14 = vcombine.low %v7024_v37, %v7040_v39 }
 0x9cf   : > { %v9293_v54 = vcombine.low %v8875_v33, %v8877_v21  ;;  %v13567_v33 = vcombine.low %v6992_v13, %v7008_v43  ;;  %v13600_v21 = vcombine.high %v7024_v37, %v7040_v39  ;;  %v8460_v53 = vrot.slane %v19697_v47, %v17199_v62 }
 0x9d1   : > { %v9321_v50 = vrot.slane %v9293_v54, %v17003_v55  ;;  %9140 = vmatpush1.bf16.msra.mxu1 %v13629_v52  ;;  %v7072_v52 = vld [vmem:[%s20580_s8 + $0x6f8] sm:$0xff] }
 0x9d2   : > { %9141 = vmatprep.subr.bf16.mxu1 %v13662_v8 }
 0x9d3   : > { %v9323_v12 = vcombine.low %v9314_v58, %v9321_v50  ;;  %v13632_v58 = vcombine.high %v7056_v48, %v7072_v52 }
 0x9d4   : > { %v9489_v24 = vpop.permute.xlu1 %9488  ;;  %v9477_v25 = vpop.permute.xlu0 %9476 }
 0x9d5   : > { %v9337_v26 = vrot.slane %v9323_v12, %v17003_v55  ;;  %9491 = vst.msk [vmem:[#allocation6 + $0x14] sm:$0x1] %vm9468_vm5, %v9489_v24  ;;  %9479 = vst.msk [vmem:[#allocation6 + $0x12] sm:$0x1] %vm9468_vm5, %v9477_v25  ;;  %9142 = vmatpush1.bf16.msra.mxu1 %v13661_v9  ;;  %v7088_v9 = vld [vmem:[%s20580_s8 + $0x778] sm:$0xff]  ;;  %v13631_v25 = vcombine.low %v7056_v48, %v7072_v52 }
 0x9d6   : > { %9168 = vmatprep.subr.bf16.mxu1 %v13440_v11  ;;  %v7104_v11 = vld [vmem:[%s20580_s8 + $0x7f8] sm:$0xff] }
 0x9d7   : > { %v9338_v2 = vcombine.low %v9330_v22, %v9337_v26  ;;  %v13664_v26 = vcombine.high %v7088_v9, %v7104_v11 }
 0x9d8   : > { %v9526_v57 = vpop.permute.xlu1 %9525  ;;  %v9501_v4 = vpop.permute.xlu0 %9500  ;;  %9160 = vmatmul.mubr.bf16.vlgmr.msra.gmra.mrb[64].mxu1 %v18850_v0 }
 0x9d9   : > { %9442 = vst [vmem:[#allocation5 + $0x8] sm:$0xff] %v9338_v2  ;;  %9528 = vst.msk [vmem:[#allocation6 + $0x22] sm:$0x1] %vm9468_vm5, %v9526_v57  ;;  %9169 = vmatpush1.bf16.msra.mxu1 %v13439_v46  ;;  %9200 = vmatprep.mubr.bf16.mxu1 %v16320_v1  ;;  %v13536_v1 = vcombine.high %v6960_v10, %v6976_v15  ;;  %v16079_v2 = vld [vmem:[%s20582_s10] sm:$0xff]   ;;  %v16080_v57 = vld [vmem:[%s20582_s10 + $0x8] sm:$0xff]  }
 0x9da   : > { %9503 = vst.msk [vmem:[#allocation6 + $0x16] sm:$0x1] %vm9468_vm5, %v9501_v4  ;;  %9170 = vmatprep.subr.bf16.mxu1 %v13472_v49  ;;  %v13663_v49 = vcombine.low %v7088_v9, %v7104_v11 }
 0x9dc   : > { %v9550_v61 = vpop.permute.xlu1 %9549  ;;  %v9538_v3 = vpop.permute.xlu0 %9537 }
 0x9dd   : > { %9552 = vst.msk [vmem:[#allocation6 + $0x26] sm:$0x1] %vm9468_vm5, %v9550_v61  ;;  %9540 = vst.msk [vmem:[#allocation6 + $0x24] sm:$0x1] %vm9468_vm5, %v9538_v3  ;;  %9171 = vmatpush1.bf16.msra.mxu1 %v13471_v19  ;;  %v16081_v19 = vld [vmem:[%s20582_s10 + $0x10] sm:$0xff]   ;;  %v8472_v61 = vrot.slane %v19697_v47, %v17202_v34 }
 0x9de   : > { %9172 = vmatprep.subr.bf16.mxu1 %v13504_v27  ;;  %v16082_v27 = vld [vmem:[%s20582_s10 + $0x18] sm:$0xff]  }
 0x9e0   : > { %v9565_v28 = vld [vmem:[#allocation5 + $0x8] sm:$0x1]  ;;  %v9578_v6 = vld [vmem:[#allocation5 + $0x9] sm:$0x1]  ;;  %v9590_v30 = vld [vmem:[#allocation5 + $0xa] sm:$0x1] }
 0x9e1   : > { %v9602_v31 = vld [vmem:[#allocation5 + $0xb] sm:$0x1]  ;;  %9567 = vst.msk [vmem:[#allocation6 + $0x31] sm:$0x1] %vm9468_vm5, %v9565_v28  ;;  %9579 = vst.msk [vmem:[#allocation6 + $0x33] sm:$0x1] %vm9468_vm5, %v9578_v6  ;;  %9173 = vmatpush1.bf16.msra.mxu1 %v13503_v20 }
 0x9e2   : > { %9591 = vst.msk [vmem:[#allocation6 + $0x35] sm:$0x1] %vm9468_vm5, %v9590_v30  ;;  %v13674_v32 = vld [vmem:[#allocation5 + $0x9] ss:$0 sm:$0xff]  ;;  %v13673_v35 = vld [vmem:[#allocation5 + $0x8] ss:$0 sm:$0xff]  ;;  %9174 = vmatprep.subr.bf16.mxu1 %v13536_v1 }
 0x9e3   : > { %9603 = vst.msk [vmem:[#allocation6 + $0x37] sm:$0x1] %vm9468_vm5, %v9602_v31  ;;  %9586 = vrot.lane.b32.xlu1 %v13674_v32, %s20623_s27  ;;  %9574 = vrot.lane.b32.xlu0 %v13673_v35, %s20623_s27  ;;  %v9614_v38 = vld [vmem:[#allocation5 + $0xc] sm:$0x1]  ;;  %v9627_v44 = vld [vmem:[#allocation5 + $0xd] sm:$0x1]  ;;  %v8476_v31 = vrot.slane %v19697_v47, %v17453_v40  ;;  %v8480_v32 = vrot.slane %v19697_v47, %v17350_v7 }
 0x9e4   : > { %9616 = vst.msk [vmem:[#allocation6 + $0x41] sm:$0x1] %vm9468_vm5, %v9614_v38  ;;  %v9639_v45 = vld [vmem:[#allocation5 + $0xe] sm:$0x1]  ;;  %v13677_v17 = vld [vmem:[#allocation5 + $0xc] ss:$0 sm:$0xff] }
 0x9e5   : > { %9175 = vmatpush1.bf16.msra.mxu1 %v13535_v63  ;;  %v13675_v36 = vld [vmem:[#allocation5 + $0xa] ss:$0 sm:$0xff]  ;;  %9628 = vst.msk [vmem:[#allocation6 + $0x43] sm:$0x1] %vm9468_vm5, %v9627_v44  ;;  %9640 = vst.msk [vmem:[#allocation6 + $0x45] sm:$0x1] %vm9468_vm5, %v9639_v45  ;;  %v8484_v45 = vrot.slane %v19697_v47, %v17559_v60 }
 0x9e6   : > { %v9651_v16 = vld [vmem:[#allocation5 + $0xf] sm:$0x1]  ;;  %9176 = vmatprep.subr.bf16.mxu1 %v13568_v42  ;;  %v13679_v8 = vld [vmem:[#allocation5 + $0xe] ss:$0 sm:$0xff]  ;;  %v13678_v54 = vld [vmem:[#allocation5 + $0xd] ss:$0 sm:$0xff] }
 0x9e7   : > { %9623 = vrot.lane.b32.xlu1 %v13677_v17, %s20623_s27  ;;  %9598 = vrot.lane.b32.xlu0 %v13675_v36, %s20623_s27  ;;  %9652 = vst.msk [vmem:[#allocation6 + $0x47] sm:$0x1] %vm9468_vm5, %v9651_v16  ;;  %v19732_v29 = vld [vmem:[#allocation6 + $0x10] sm:$0xff]  ;;  %v8488_v17 = vrot.slane %v19697_v47, %v17456_v41 }
 0x9e8   : > { %v9867_v4 = vpack.c.bf16 %v19732_v29, %v9859_v51  ;;  %v7108_v51 = vld [vmem:[%s20581_s9 + $0x18] sm:$0xff] }
 0x9e9   : > { %9177 = vmatpush1.bf16.msra.mxu1 %v13567_v33 }
 0x9ea   : > { %9178 = vmatprep.subr.bf16.mxu1 %v13600_v21 }
 0x9eb   : > { %9647 = vrot.lane.b32.xlu1 %v13679_v8, %s20623_s27  ;;  %9635 = vrot.lane.b32.xlu0 %v13678_v54, %s20623_s27  ;;  %v8915_v50 = vpop.f32.mrb[40].mxu1 }
 0x9ec   : > { %v8916_v12 = vadd.f32 %v8915_v50, %v8460_v53  ;;  %v8917_v18 = vpop.f32.mrb[41].mxu1 }
 0x9ed   : > { %v8918_v23 = vadd.f32 %v8917_v18, %v8464_v56  ;;  %v8919_v24 = vpop.f32.mrb[42].mxu1  ;;  %9179 = vmatpush1.bf16.msra.mxu1 %v13599_v14 }
 0x9ee   : > { %v8920_v22 = vpop.f32.mrb[43].mxu1  ;;  %9180 = vmatprep.subr.bf16.mxu1 %v13632_v58  ;;  %v19770_v24 = vld [vmem:[#allocation6 + $0x20] sm:$0xff] }
 0x9ef   : > { %v9339_v46 = vcombine.low %v8916_v12, %v8918_v23 }
 0x9f1   : > { %9181 = vmatpush1.bf16.msra.mxu1 %v13631_v25  ;;  %v9349_v28 = vrot.slane %v9339_v46, %v17003_v55 }
 0x9f2   : > { %9182 = vmatprep.subr.bf16.mxu1 %v13664_v26 }
 0x9f5   : > { %9183 = vmatpush1.bf16.msra.mxu1 %v13663_v49 }
 0x9f6   : > { %14569 = vmatprep.subr.bf16.mxu1 %v16079_v2 }
 0x9f8   : > { %9201 = vmatmul.mubr.bf16.vlgmr.msra.gmra.mrb[68].mxu1 %v18850_v0  ;;  %v8468_v0 = vrot.slane %v19697_v47, %v17347_v5 }
 0x9f9   : > { %14577 = vmatprep.mubr.msk.bf16.mxu1 %vm703_vm0, %v9867_v4  ;;  %14570 = vmatpush3.bf16.msra.mxu1 %v16079_v2 }
 0x9fa   : > { %14571 = vmatprep.subr.bf16.mxu1 %v16080_v57 }
 0x9fd   : > { %14572 = vmatpush3.bf16.msra.mxu1 %v16080_v57 }
 0x9fe   : > { %14573 = vmatprep.subr.bf16.mxu1 %v16081_v19 }
 0xa01   : > { %14574 = vmatpush3.bf16.msra.mxu1 %v16081_v19 }
 0xa02   : > { %14575 = vmatprep.subr.bf16.mxu1 %v16082_v27 }
 0xa05   : > { %14576 = vmatpush3.bf16.msra.mxu1 %v16082_v27 }
 0xa0b   : > { %v8956_v3 = vpop.f32.mrb[44].mxu1 }
 0xa0c   : > { %v8957_v10 = vadd.f32 %v8956_v3, %v8468_v0  ;;  %v8958_v15 = vpop.f32.mrb[45].mxu1 }
 0xa0d   : > { %v8959_v20 = vadd.f32 %v8958_v15, %v8472_v61  ;;  %v8960_v1 = vpop.f32.mrb[46].mxu1 }
 0xa0e   : > { %v8961_v13 = vpop.f32.mrb[47].mxu1  ;;  %v8492_v1 = vrot.slane %v7108_v51, %v17199_v62 }
 0xa0f   : > { %v9340_v43 = vcombine.low %v8957_v10, %v8959_v20  ;;  %v8496_v13 = vrot.slane %v7108_v51, %v17196_v59 }
 0xa11   : > { %v9356_v6 = vrot.slane %v9340_v43, %v17003_v55 }
 0xa13   : > { %v9371_v30 = vcombine.low %v9349_v28, %v9356_v6 }
 0xa15   : > { %v9379_v50 = vrot.slane %v9371_v30, %v17003_v55 }
 0xa2b   : > { %v8997_v35 = vpop.f32.mrb[48].mxu1 }
 0xa2c   : > { %v8998_v63 = vadd.f32 %v8997_v35, %v8476_v31  ;;  %v8999_v42 = vpop.f32.mrb[49].mxu1 }
 0xa2d   : > { %v9000_v37 = vadd.f32 %v8999_v42, %v8480_v32  ;;  %v9001_v38 = vpop.f32.mrb[50].mxu1  ;;  %v8504_v42 = vrot.slane %v7108_v51, %v17202_v34 }
 0xa2e   : > { %v9002_v39 = vpop.f32.mrb[51].mxu1 }
 0xa2f   : > { %v9341_v44 = vcombine.low %v8998_v63, %v9000_v37  ;;  %v8500_v63 = vrot.slane %v7108_v51, %v17347_v5 }
 0xa31   : > { %v9363_v8 = vrot.slane %v9341_v44, %v17003_v55 }
 0xa4b   : > { %v9038_v36 = vpop.f32.mrb[52].mxu1 }
 0xa4c   : > { %v9039_v33 = vadd.f32 %v9038_v36, %v8484_v45  ;;  %v9040_v16 = vpop.f32.mrb[53].mxu1 }
 0xa4d   : > { %v9041_v21 = vadd.f32 %v9040_v16, %v8488_v17  ;;  %v9042_v48 = vpop.f32.mrb[54].mxu1  ;;  %v8508_v16 = vrot.slane %v7108_v51, %v17453_v40 }
 0xa4e   : > { %v9043_v52 = vpop.f32.mrb[55].mxu1 }
 0xa4f   : > { %v9342_v53 = vcombine.low %v9039_v33, %v9041_v21  ;;  %v8512_v21 = vrot.slane %v7108_v51, %v17350_v7 }
 0xa51   : > { %v9370_v54 = vrot.slane %v9342_v53, %v17003_v55 }
 0xa53   : > { %v9372_v56 = vcombine.low %v9363_v8, %v9370_v54 }
 0xa55   : > { %v9587_v14 = vpop.permute.xlu1 %9586  ;;  %v9575_v58 = vpop.permute.xlu0 %9574  ;;  %v9386_v9 = vrot.slane %v9372_v56, %v17003_v55  ;;  %v8516_v56 = vrot.slane %v7108_v51, %v17559_v60 }
 0xa56   : > { %9589 = vst.msk [vmem:[#allocation6 + $0x34] sm:$0x1] %vm9468_vm5, %v9587_v14  ;;  %9577 = vst.msk [vmem:[#allocation6 + $0x32] sm:$0x1] %vm9468_vm5, %v9575_v58  ;;  %v8520_v14 = vrot.slane %v7108_v51, %v17456_v41  ;;  %v16083_v41 = vld [vmem:[%s20582_s10 + $0x20] sm:$0xff]  }
 0xa57   : > { %v9387_v47 = vcombine.low %v9379_v50, %v9386_v9  ;;  %14553 = vmatprep.subr.bf16.mxu0 %v16083_v41 }
 0xa58   : > { %14554 = vmatpush3.bf16.msra.mxu0 %v16083_v41 }
 0xa59   : > { %v9624_v11 = vpop.permute.xlu1 %9623  ;;  %v9599_v12 = vpop.permute.xlu0 %9598  ;;  %9443 = vst [vmem:[#allocation5 + $0x10] sm:$0xff] %v9387_v47 }
 0xa5a   : > { %9626 = vst.msk [vmem:[#allocation6 + $0x42] sm:$0x1] %vm9468_vm5, %v9624_v11  ;;  %9601 = vst.msk [vmem:[#allocation6 + $0x36] sm:$0x1] %vm9468_vm5, %v9599_v12 }
 0xa5d   : > { %v9648_v18 = vpop.permute.xlu1 %9647  ;;  %v9636_v23 = vpop.permute.xlu0 %9635 }
 0xa5e   : > { %9650 = vst.msk [vmem:[#allocation6 + $0x46] sm:$0x1] %vm9468_vm5, %v9648_v18  ;;  %9638 = vst.msk [vmem:[#allocation6 + $0x44] sm:$0x1] %vm9468_vm5, %v9636_v23 }
 0xa60   : > { %v13682_v25 = vld [vmem:[#allocation5 + $0x11] ss:$0 sm:$0xff]  ;;  %v13681_v22 = vld [vmem:[#allocation5 + $0x10] ss:$0 sm:$0xff]  ;;  %v9688_v57 = vld [vmem:[#allocation5 + $0x12] sm:$0x1] }
 0xa61   : > { %v19772_v26 = vld [vmem:[#allocation6 + $0x30] sm:$0xff]  ;;  %9684 = vrot.lane.b32.xlu1 %v13682_v25, %s20623_s27  ;;  %9672 = vrot.lane.b32.xlu0 %v13681_v22, %s20623_s27  ;;  %9689 = vst.msk [vmem:[#allocation6 + $0x55] sm:$0x1] %vm9468_vm5, %v9688_v57 }
 0xa62   : > { %v19778_v46 = vpack.c.bf16 %v19772_v26, %v19770_v24  ;;  %v9663_v49 = vld [vmem:[#allocation5 + $0x10] sm:$0x1]  ;;  %v9676_v2 = vld [vmem:[#allocation5 + $0x11] sm:$0x1]  ;;  %v9700_v4 = vld [vmem:[#allocation5 + $0x13] sm:$0x1] }
 0xa63   : > { %9665 = vst.msk [vmem:[#allocation6 + $0x51] sm:$0x1] %vm9468_vm5, %v9663_v49  ;;  %9677 = vst.msk [vmem:[#allocation6 + $0x53] sm:$0x1] %vm9468_vm5, %v9676_v2  ;;  %v13685_v19 = vld [vmem:[#allocation5 + $0x14] ss:$0 sm:$0xff] }
 0xa64   : > { %14578 = vmatmul.mubr.msk.bf16.vlgmr.msra.gmra.mrb[72].mxu1 %vm703_vm0, %v19778_v46  ;;  %v13683_v27 = vld [vmem:[#allocation5 + $0x12] ss:$0 sm:$0xff]  ;;  %9701 = vst.msk [vmem:[#allocation6 + $0x57] sm:$0x1] %vm9468_vm5, %v9700_v4  ;;  %v9712_v0 = vld [vmem:[#allocation5 + $0x14] sm:$0x1] }
 0xa65   : > { %9721 = vrot.lane.b32.xlu1 %v13685_v19, %s20623_s27  ;;  %9696 = vrot.lane.b32.xlu0 %v13683_v27, %s20623_s27  ;;  %9714 = vst.msk [vmem:[#allocation6 + $0x61] sm:$0x1] %vm9468_vm5, %v9712_v0  ;;  %v9725_v61 = vld [vmem:[#allocation5 + $0x15] sm:$0x1]  ;;  %v9737_v3 = vld [vmem:[#allocation5 + $0x16] sm:$0x1] }
 0xa66   : > { %v9749_v10 = vld [vmem:[#allocation5 + $0x17] sm:$0x1]  ;;  %9726 = vst.msk [vmem:[#allocation6 + $0x63] sm:$0x1] %vm9468_vm5, %v9725_v61  ;;  %9738 = vst.msk [vmem:[#allocation6 + $0x65] sm:$0x1] %vm9468_vm5, %v9737_v3 }
 0xa67   : > { %9750 = vst.msk [vmem:[#allocation6 + $0x67] sm:$0x1] %vm9468_vm5, %v9749_v10  ;;  %v13687_v15 = vld [vmem:[#allocation5 + $0x16] ss:$0 sm:$0xff]  ;;  %v13686_v20 = vld [vmem:[#allocation5 + $0x15] ss:$0 sm:$0xff] }
 0xa68   : > { %v19816_v2 = vld [vmem:[#allocation2] sm:$0xff]  ;;  %v16085_v19 = vld [vmem:[%s20582_s10 + $0x28] sm:$0xff]   ;;  %v16087_v3 = vld [vmem:[%s20582_s10 + $0x30] sm:$0xff]  }
 0xa69   : > { %9745 = vrot.lane.b32.xlu1 %v13687_v15, %s20623_s27  ;;  %9733 = vrot.lane.b32.xlu0 %v13686_v20, %s20623_s27  ;;  %9449 = vst.msk [vmem:[#allocation6 + $0x18] sm:$0x3] %vm9446_vm6, %v19816_v2  ;;  %9447 = vst.msk [vmem:[#allocation6 + $0x8] sm:$0x3] %vm9446_vm6, %v19816_v2  ;;  %v16084_v4 = vld [vmem:[%s20582_s10 + $0x40] sm:$0xff]   ;;  %v16086_v61 = vld [vmem:[%s20582_s10 + $0x48] sm:$0xff]  }
 0xa6a   : > { %9451 = vst.msk [vmem:[#allocation6 + $0x28] sm:$0x3] %vm9446_vm6, %v19816_v2  ;;  %9453 = vst.msk [vmem:[#allocation6 + $0x38] sm:$0x3] %vm9446_vm6, %v19816_v2  ;;  %14585 = vmatprep.subr.bf16.mxu1 %v16084_v4  ;;  %14555 = vmatprep.subr.bf16.mxu0 %v16085_v19  ;;  %v19844_v10 = vld [vmem:[#allocation6 + $0x40] sm:$0xff] }
 0xa6b   : > { %v9079_v43 = vpop.f32.mrb[56].mxu1  ;;  %9455 = vst.msk [vmem:[#allocation6 + $0x48] sm:$0x3] %vm9446_vm6, %v19816_v2  ;;  %9457 = vst.msk [vmem:[#allocation6 + $0x58] sm:$0x3] %vm9446_vm6, %v19816_v2  ;;  %14586 = vmatpush3.bf16.msra.mxu1 %v16084_v4  ;;  %14556 = vmatpush3.bf16.msra.mxu0 %v16085_v19 }
 0xa6c   : > { %v9080_v28 = vadd.f32 %v9079_v43, %v8492_v1  ;;  %v9081_v6 = vpop.f32.mrb[57].mxu1  ;;  %9459 = vst.msk [vmem:[#allocation6 + $0x68] sm:$0x3] %vm9446_vm6, %v19816_v2  ;;  %9461 = vst.msk [vmem:[#allocation6 + $0x78] sm:$0x3] %vm9446_vm6, %v19816_v2  ;;  %14587 = vmatprep.subr.bf16.mxu1 %v16086_v61  ;;  %14557 = vmatprep.subr.bf16.mxu0 %v16087_v3 }
 0xa6d   : > { %v9082_v30 = vadd.f32 %v9081_v6, %v8496_v13  ;;  %v9083_v31 = vpop.f32.mrb[58].mxu1  ;;  %9463 = vst.msk [vmem:[#allocation6 + $0x88] sm:$0x3] %vm9446_vm6, %v19816_v2  ;;  %9465 = vst.msk [vmem:[#allocation6 + $0x98] sm:$0x3] %vm9446_vm6, %v19816_v2 }
 0xa6e   : > { %v9084_v32 = vpop.f32.mrb[59].mxu1  ;;  %v13668_v43 = vld [vmem:[#allocation5 + $0x3] ss:$0 sm:$0xff] }
 0xa6f   : > { %v9388_v35 = vcombine.low %v9080_v28, %v9082_v30  ;;  %14588 = vmatpush3.bf16.msra.mxu1 %v16086_v61  ;;  %14558 = vmatpush3.bf16.msra.mxu0 %v16087_v3  ;;  %v16088_v28 = vld [vmem:[%s20582_s10 + $0x50] sm:$0xff]   ;;  %v16089_v30 = vld [vmem:[%s20582_s10 + $0x38] sm:$0xff]  }
 0xa70   : > { %14589 = vmatprep.subr.bf16.mxu1 %v16088_v28  ;;  %14559 = vmatprep.subr.bf16.mxu0 %v16089_v30 }
 0xa71   : > { %v9398_v59 = vrot.slane %v9388_v35, %v17003_v55 }
 0xa73   : > { %14590 = vmatpush3.bf16.msra.mxu1 %v16088_v28  ;;  %14560 = vmatpush3.bf16.msra.mxu0 %v16089_v30 }
 0xa8b   : > { %v9120_v37 = vpop.f32.mrb[60].mxu1 }
 0xa8c   : > { %v9121_v38 = vadd.f32 %v9120_v37, %v8500_v63  ;;  %v9122_v62 = vpop.f32.mrb[61].mxu1 }
 0xa8d   : > { %v9123_v39 = vadd.f32 %v9122_v62, %v8504_v42  ;;  %v9124_v44 = vpop.f32.mrb[62].mxu1  ;;  %v16090_v42 = vld [vmem:[%s20582_s10 + $0x58] sm:$0xff]  }
 0xa8e   : > { %v9125_v45 = vpop.f32.mrb[63].mxu1  ;;  %14591 = vmatprep.subr.bf16.mxu1 %v16090_v42  ;;  %v13676_v44 = vld [vmem:[#allocation5 + $0xb] ss:$0 sm:$0xff] }
 0xa8f   : > { %v9389_v17 = vcombine.low %v9121_v38, %v9123_v39  ;;  %v13672_v45 = vld [vmem:[#allocation5 + $0x7] ss:$0 sm:$0xff]  ;;  %14592 = vmatpush3.bf16.msra.mxu1 %v16090_v42 }
 0xa91   : > { %v9405_v36 = vrot.slane %v9389_v17, %v17003_v55  ;;  %v19877_v17 = vld [vmem:[%s20582_s10 + $0x60] sm:$0xff]  }
 0xa92   : > { %14601 = vmatprep.subr.bf16.mxu1 %v19877_v17 }
 0xa93   : > { %v9420_v33 = vcombine.low %v9398_v59, %v9405_v36  ;;  %v13684_v59 = vld [vmem:[#allocation5 + $0x13] ss:$0 sm:$0xff]  ;;  %v13680_v36 = vld [vmem:[#allocation5 + $0xf] ss:$0 sm:$0xff] }
 0xa95   : > { %v9428_v60 = vrot.slane %v9420_v33, %v17003_v55 }
 0xaab   : > { %v9161_v48 = vpop.f32.mrb[64].mxu1 }
 0xaac   : > { %v9162_v5 = vadd.f32 %v9161_v48, %v8508_v16  ;;  %v9163_v52 = vpop.f32.mrb[65].mxu1  ;;  %v13688_v16 = vld [vmem:[#allocation5 + $0x17] ss:$0 sm:$0xff] }
 0xaad   : > { %v9164_v34 = vadd.f32 %v9163_v52, %v8512_v21  ;;  %v9165_v53 = vpop.f32.mrb[66].mxu1 }
 0xaae   : > { %v9166_v8 = vpop.f32.mrb[67].mxu1 }
 0xaaf   : > { %v9390_v54 = vcombine.low %v9162_v5, %v9164_v34 }
 0xab1   : > { %v9412_v7 = vrot.slane %v9390_v54, %v17003_v55 }
 0xacb   : > { %v9202_v58 = vpop.f32.mrb[68].mxu1 }
 0xacc   : > { %v9203_v50 = vadd.f32 %v9202_v58, %v8516_v56  ;;  %v9204_v9 = vpop.f32.mrb[69].mxu1  ;;  %v9879_v58 = vld [vmem:[#allocation6 + $0x1] sm:$0xff] }
 0xacd   : > { %v9205_v47 = vadd.f32 %v9204_v9, %v8520_v14  ;;  %v9206_v11 = vpop.f32.mrb[70].mxu1 }
 0xace   : > { %v9207_v12 = vpop.f32.mrb[71].mxu1 }
 0xacf   : > { %v9391_v40 = vcombine.low %v9203_v50, %v9205_v47  ;;  %v10102_v50 = vld [vmem:[#allocation6 + $0x2] sm:$0xff] }
 0xad1   : > { %v9419_v18 = vrot.slane %v9391_v40, %v17003_v55 }
 0xad3   : > { %v9421_v23 = vcombine.low %v9412_v7, %v9419_v18  ;;  %v9685_v25 = vpop.permute.xlu1 %9684  ;;  %v9673_v22 = vpop.permute.xlu0 %9672 }
 0xad4   : > { %9687 = vst.msk [vmem:[#allocation6 + $0x54] sm:$0x1] %vm9468_vm5, %v9685_v25  ;;  %9675 = vst.msk [vmem:[#allocation6 + $0x52] sm:$0x1] %vm9468_vm5, %v9673_v22 }
 0xad5   : > { %v9435_v49 = vrot.slane %v9421_v23, %v17003_v55 }
 0xad7   : > { %v9436_v55 = vcombine.low %v9428_v60, %v9435_v49  ;;  %v9722_v51 = vpop.permute.xlu1 %9721  ;;  %v9697_v57 = vpop.permute.xlu0 %9696 }
 0xad8   : > { %9724 = vst.msk [vmem:[#allocation6 + $0x62] sm:$0x1] %vm9468_vm5, %v9722_v51  ;;  %9699 = vst.msk [vmem:[#allocation6 + $0x56] sm:$0x1] %vm9468_vm5, %v9697_v57 }
 0xad9   : > { %9444 = vst [vmem:[#allocation5 + $0x18] sm:$0xff] %v9436_v55 }
 0xadb   : > { %v9746_v27 = vpop.permute.xlu1 %9745  ;;  %v9734_v0 = vpop.permute.xlu0 %9733 }
 0xadc   : > { %9748 = vst.msk [vmem:[#allocation6 + $0x66] sm:$0x1] %vm9468_vm5, %v9746_v27  ;;  %9736 = vst.msk [vmem:[#allocation6 + $0x64] sm:$0x1] %vm9468_vm5, %v9734_v0 }
 0xadf   : > { %v19846_v15 = vld [vmem:[#allocation6 + $0x50] sm:$0xff] }
 0xae0   : > { %v13690_v20 = vld [vmem:[#allocation5 + $0x19] ss:$0 sm:$0xff]  ;;  %v13689_v1 = vld [vmem:[#allocation5 + $0x18] ss:$0 sm:$0xff]  ;;  %v19850_v13 = vpack.c.bf16 %v19846_v15, %v19844_v10  ;;  %v13691_v6 = vld [vmem:[#allocation5 + $0x1a] ss:$0 sm:$0xff] }
 0xae1   : > { %9782 = vrot.lane.b32.xlu1 %v13690_v20, %s20623_s27  ;;  %9770 = vrot.lane.b32.xlu0 %v13689_v1, %s20623_s27  ;;  %v9761_v31 = vld [vmem:[#allocation5 + $0x18] sm:$0x1]  ;;  %v9774_v32 = vld [vmem:[#allocation5 + $0x19] sm:$0x1]  ;;  %v9786_v35 = vld [vmem:[#allocation5 + $0x1a] sm:$0x1] }
 0xae2   : > { %14581 = vmatprep.mubr.msk.bf16.mxu1 %vm703_vm0, %v19850_v13  ;;  %9763 = vst.msk [vmem:[#allocation6 + $0x71] sm:$0x1] %vm9468_vm5, %v9761_v31  ;;  %v9798_v63 = vld [vmem:[#allocation5 + $0x1b] sm:$0x1]  ;;  %9775 = vst.msk [vmem:[#allocation6 + $0x73] sm:$0x1] %vm9468_vm5, %v9774_v32 }
 0xae3   : > { %9787 = vst.msk [vmem:[#allocation6 + $0x75] sm:$0x1] %vm9468_vm5, %v9786_v35  ;;  %9799 = vst.msk [vmem:[#allocation6 + $0x77] sm:$0x1] %vm9468_vm5, %v9798_v63  ;;  %v9810_v37 = vld [vmem:[#allocation5 + $0x1c] sm:$0x1] }
 0xae4   : > { %v9823_v38 = vld [vmem:[#allocation5 + $0x1d] sm:$0x1]  ;;  %v9835_v62 = vld [vmem:[#allocation5 + $0x1e] sm:$0x1]  ;;  %9812 = vst.msk [vmem:[#allocation6 + $0x81] sm:$0x1] %vm9468_vm5, %v9810_v37 }
 0xae5   : > { %9512 = vrot.lane.b32.xlu1 %v13668_v43, %s20623_s27  ;;  %9794 = vrot.lane.b32.xlu0 %v13691_v6, %s20623_s27  ;;  %9824 = vst.msk [vmem:[#allocation6 + $0x83] sm:$0x1] %vm9468_vm5, %v9823_v38  ;;  %9836 = vst.msk [vmem:[#allocation6 + $0x85] sm:$0x1] %vm9468_vm5, %v9835_v62  ;;  %v9847_v39 = vld [vmem:[#allocation5 + $0x1f] sm:$0x1] }
 0xae6   : > { %9848 = vst.msk [vmem:[#allocation6 + $0x87] sm:$0x1] %vm9468_vm5, %v9847_v39  ;;  %v13692_v33 = vld [vmem:[#allocation5 + $0x1b] ss:$0 sm:$0xff]  ;;  %v13694_v21 = vld [vmem:[#allocation5 + $0x1d] ss:$0 sm:$0xff]  ;;  %v10240_v39 = vpack.c.bf16 %v19770_v24, %v19732_v29 }
 0xae7   : > { %v13693_v48 = vld [vmem:[#allocation5 + $0x1c] ss:$0 sm:$0xff]  ;;  %v13696_v5 = vld [vmem:[#allocation5 + $0x1f] ss:$0 sm:$0xff]  ;;  %v13695_v52 = vld [vmem:[#allocation5 + $0x1e] ss:$0 sm:$0xff] }
 0xae8   : > { %v19897_v9 = vld [vmem:[#allocation6 + $0x60] sm:$0xff]  ;;  %v16092_v43 = vld [vmem:[%s20582_s10 + $0x68] sm:$0xff]   ;;  %v16093_v63 = vld [vmem:[%s20582_s10 + $0x70] sm:$0xff]  }
 0xae9   : > { %9610 = vrot.lane.b32.xlu1 %v13676_v44, %s20623_s27  ;;  %9561 = vrot.lane.b32.xlu0 %v13672_v45, %s20623_s27  ;;  %v16094_v62 = vld [vmem:[%s20582_s10 + $0x78] sm:$0xff]   ;;  %v16095_v44 = vld [vmem:[%s20582_s10 + $0x80] sm:$0xff]   ;;  %v10241_v45 = vpack.c.bf16 %v19844_v10, %v19772_v26  ;;  %v10242_v24 = vpack.c.bf16 %v19897_v9, %v19846_v15 }
 0xaea   : > { %v16096_v29 = vld [vmem:[%s20582_s10 + $0x88] sm:$0xff]   ;;  %v16098_v10 = vld [vmem:[%s20582_s10 + $0x98] sm:$0xff]  }
 0xaed   : > { %9708 = vrot.lane.b32.xlu1 %v13684_v59, %s20623_s27  ;;  %9659 = vrot.lane.b32.xlu0 %v13680_v36, %s20623_s27  ;;  %v16099_v36 = vld [vmem:[%s20582_s10 + $0xa0] sm:$0xff]  }
 0xaf1   : > { %9806 = vrot.lane.b32.xlu1 %v13692_v33, %s20623_s27  ;;  %9757 = vrot.lane.b32.xlu0 %v13688_v16, %s20623_s27  ;;  %v16100_v16 = vld [vmem:[%s20582_s10 + $0xa8] sm:$0xff]  }
 0xaf5   : > { %9831 = vrot.lane.b32.xlu1 %v13694_v21, %s20623_s27  ;;  %9819 = vrot.lane.b32.xlu0 %v13693_v48, %s20623_s27  ;;  %v16101_v48 = vld [vmem:[%s20582_s10 + $0xb0] sm:$0xff]  }
 0xaf9   : > { %9855 = vrot.lane.b32.xlu1 %v13696_v5, %s20623_s27  ;;  %9843 = vrot.lane.b32.xlu0 %v13695_v52, %s20623_s27  ;;  %s12477_s27 = scalar_lea.sflag [#allocation9], %s18830_s20 }
 0xb53   : > { %v9783_v34 = vpop.permute.xlu1 %9782  ;;  %v9771_v53 = vpop.permute.xlu0 %9770 }
 0xb54   : > { %9785 = vst.msk [vmem:[#allocation6 + $0x74] sm:$0x1] %vm9468_vm5, %v9783_v34  ;;  %9773 = vst.msk [vmem:[#allocation6 + $0x72] sm:$0x1] %vm9468_vm5, %v9771_v53  ;;  %v16102_v34 = vld [vmem:[%s20582_s10 + $0xb8] sm:$0xff]  }
 0xb57   : > { %v9513_v8 = vpop.permute.xlu1 %9512  ;;  %v9795_v54 = vpop.permute.xlu0 %9794 }
 0xb58   : > { %9515 = vst.msk [vmem:[#allocation6 + $0x18] sm:$0x1] %vm9468_vm5, %v9513_v8  ;;  %9797 = vst.msk [vmem:[#allocation6 + $0x76] sm:$0x1] %vm9468_vm5, %v9795_v54  ;;  %v16103_v8 = vld [vmem:[%s20582_s10 + $0xc0] sm:$0xff]  }
 0xb5b   : > { %v9611_v56 = vpop.permute.xlu1 %9610  ;;  %v9562_v14 = vpop.permute.xlu0 %9561 }
 0xb5c   : > { %9613 = vst.msk [vmem:[#allocation6 + $0x38] sm:$0x1] %vm9468_vm5, %v9611_v56  ;;  %9564 = vst.msk [vmem:[#allocation6 + $0x28] sm:$0x1] %vm9468_vm5, %v9562_v14  ;;  %v16104_v56 = vld [vmem:[%s20582_s10 + $0xc8] sm:$0xff]  }
 0xb5f   : > { %v9709_v47 = vpop.permute.xlu1 %9708  ;;  %v9660_v11 = vpop.permute.xlu0 %9659  ;;  %v19899_v12 = vld [vmem:[#allocation6 + $0x11] sm:$0xff] }
 0xb60   : > { %v19901_v40 = vld [vmem:[#allocation6 + $0x70] sm:$0xff]  ;;  %9711 = vst.msk [vmem:[#allocation6 + $0x58] sm:$0x1] %vm9468_vm5, %v9709_v47  ;;  %9662 = vst.msk [vmem:[#allocation6 + $0x48] sm:$0x1] %vm9468_vm5, %v9660_v11  ;;  %v9887_v18 = vpack.c.bf16 %v19899_v12, %v9879_v58  ;;  %v16106_v47 = vld [vmem:[%s20582_s10 + $0xd8] sm:$0xff]  }
 0xb61   : > { %v19903_v7 = vld [vmem:[#allocation6 + $0x12] sm:$0xff]  ;;  %v19910_v23 = vpack.c.bf16 %v19901_v40, %v19897_v9  ;;  %v16107_v11 = vld [vmem:[%s20582_s10 + $0xe0] sm:$0xff]  }
 0xb62   : > { %v10110_v25 = vpack.c.bf16 %v19903_v7, %v10102_v50  ;;  %14561 = vmatprep.mubr.msk.bf16.mxu0 %vm703_vm0, %v9887_v18  ;;  %v16105_v58 = vld [vmem:[%s20582_s10 + $0xd0] sm:$0xff]   ;;  %v16110_v18 = vld [vmem:[%s20582_s10 + $0xf8] sm:$0xff]  }
 0xb63   : > { %14582 = vmatmul.mubr.msk.bf16.gmra.mrb[76].mxu1 %vm703_vm0, %v19910_v23  ;;  %v9807_v22 = vpop.permute.xlu1 %9806  ;;  %v9758_v41 = vpop.permute.xlu0 %9757  ;;  %v19917_v60 = vld [vmem:[#allocation6 + $0x21] sm:$0xff]  ;;  %v19919_v49 = vld [vmem:[#allocation6 + $0x31] sm:$0xff] }
 0xb64   : > { %14593 = vmatprep.mubr.msk.bf16.mxu1 %vm703_vm0, %v10110_v25  ;;  %9809 = vst.msk [vmem:[#allocation6 + $0x78] sm:$0x1] %vm9468_vm5, %v9807_v22  ;;  %9760 = vst.msk [vmem:[#allocation6 + $0x68] sm:$0x1] %vm9468_vm5, %v9758_v41  ;;  %v19925_v55 = vpack.c.bf16 %v19919_v49, %v19917_v60  ;;  %v19927_v51 = vld [vmem:[#allocation6 + $0x22] sm:$0xff]  ;;  %v19929_v57 = vld [vmem:[#allocation6 + $0x32] sm:$0xff]  ;;  %v10370_v15 = vpack.c.bf16 %v19917_v60, %v19899_v12 }
 0xb65   : > { %v19947_v20 = vpack.c.bf16 %v19929_v57, %v19927_v51  ;;  %v10500_v53 = vpack.c.bf16 %v19927_v51, %v19903_v7  ;;  %v16108_v12 = vld [vmem:[%s20582_s10 + $0xe8] sm:$0xff]   ;;  %v16113_v25 = vld [vmem:[%s20582_s10 + $0x110] sm:$0xff]   ;;  %v16114_v60 = vld [vmem:[%s20582_s10 + $0x118] sm:$0xff]  }
 0xb66   : > { %14562 = vmatmul.mubr.msk.bf16.vlgmr.msra.gmra.mrb[28].mxu0 %vm703_vm0, %v19925_v55  ;;  %v10759_v22 = vld [vmem:[#allocation6 + $0x91] sm:$0xff] }
 0xb67   : > { %v9832_v4 = vpop.permute.xlu1 %9831  ;;  %v9820_v19 = vpop.permute.xlu0 %9819  ;;  %v19933_v27 = vld [vmem:[#allocation6 + $0x41] sm:$0xff]  ;;  %v19935_v0 = vld [vmem:[#allocation6 + $0x51] sm:$0xff] }
 0xb68   : > { %v19937_v61 = vld [vmem:[#allocation6 + $0x42] sm:$0xff]  ;;  %9834 = vst.msk [vmem:[#allocation6 + $0x84] sm:$0x1] %vm9468_vm5, %v9832_v4  ;;  %9822 = vst.msk [vmem:[#allocation6 + $0x82] sm:$0x1] %vm9468_vm5, %v9820_v19  ;;  %v19943_v3 = vpack.c.bf16 %v19935_v0, %v19933_v27  ;;  %v19949_v1 = vld [vmem:[#allocation6 + $0x52] sm:$0xff]  ;;  %v10371_v33 = vpack.c.bf16 %v19933_v27, %v19919_v49 }
 0xb69   : > { %v19956_v28 = vpack.c.bf16 %v19949_v1, %v19937_v61  ;;  %v10501_v54 = vpack.c.bf16 %v19937_v61, %v19929_v57  ;;  %v16115_v49 = vld [vmem:[%s20584_s12 + $0x40] sm:$0xff]   ;;  %v16117_v51 = vld [vmem:[%s20584_s12 + $0x50] sm:$0xff]   ;;  %v16118_v19 = vld [vmem:[%s20584_s12 + $0x58] sm:$0xff]  }
 0xb6a   : > { %14565 = vmatprep.mubr.msk.bf16.mxu0 %vm703_vm0, %v19943_v3  ;;  %v10889_v57 = vld [vmem:[#allocation6 + $0x92] sm:$0xff]  ;;  %v16119_v27 = vld [vmem:[%s20584_s12 + $0x60] sm:$0xff]  }
 0xb6b   : > { %14594 = vmatmul.mubr.msk.bf16.vlgmr.msra.gmra.mrb[72].mxu1 %vm703_vm0, %v19947_v20  ;;  %v9856_v6 = vpop.permute.xlu1 %9855  ;;  %v9844_v30 = vpop.permute.xlu0 %9843  ;;  %v9885_v31 = vld [vmem:[#allocation6 + $0x61] sm:$0xff]  ;;  %v9886_v32 = vld [vmem:[#allocation6 + $0x71] sm:$0xff] }
 0xb6c   : > { %14602 = vmatpush3.bf16.msra.mxu1 %v19877_v17  ;;  %14597 = vmatprep.mubr.msk.bf16.mxu1 %vm703_vm0, %v19956_v28  ;;  %9858 = vst.msk [vmem:[#allocation6 + $0x88] sm:$0x1] %vm9468_vm5, %v9856_v6  ;;  %9846 = vst.msk [vmem:[#allocation6 + $0x86] sm:$0x1] %vm9468_vm5, %v9844_v30  ;;  %v19967_v35 = vpack.c.bf16 %v9886_v32, %v9885_v31  ;;  %v19972_v42 = vld [vmem:[#allocation6 + $0x62] sm:$0xff]  ;;  %v19974_v37 = vld [vmem:[#allocation6 + $0x72] sm:$0xff]  ;;  %v10372_v21 = vpack.c.bf16 %v9885_v31, %v19935_v0 }
 0xb6d   : > { %14603 = vmatprep.subr.bf16.mxu1 %v16092_v43  ;;  %v19980_v38 = vpack.c.bf16 %v19974_v37, %v19972_v42  ;;  %v16097_v17 = vld [vmem:[%s20582_s10 + $0x90] sm:$0xff]   ;;  %v10502_v14 = vpack.c.bf16 %v19972_v42, %v19949_v1  ;;  %v16120_v0 = vld [vmem:[%s20584_s12 + $0x68] sm:$0xff]   ;;  %v13833_v42 = vld [vmem:[%s20583_s11] ss:$0 sm:$0xff] }
 0xb6e   : > { %14566 = vmatmul.mubr.msk.bf16.gmra.mrb[32].mxu0 %vm703_vm0, %v19967_v35  ;;  %v16121_v61 = vld [vmem:[%s20584_s12 + $0x70] sm:$0xff]  }
 0xb70   : > { %14604 = vmatpush3.bf16.msra.mxu1 %v16092_v43 }
 0xb71   : > { %14605 = vmatprep.subr.bf16.mxu1 %v16093_v63 }
 0xb73   : > { %14598 = vmatmul.mubr.msk.bf16.gmra.mrb[76].mxu1 %vm703_vm0, %v19980_v38  ;;  %v20005_v59 = vld [vmem:[#allocation6 + $0x80] sm:$0xff] }
 0xb74   : > { %14606 = vmatpush3.bf16.msra.mxu1 %v16093_v63  ;;  %14609 = vmatprep.mubr.msk.bf16.mxu1 %vm703_vm0, %v10240_v39  ;;  %v10243_v26 = vpack.c.bf16 %v20005_v59, %v19901_v40  ;;  %v20030_v5 = vld [vmem:[#allocation6 + $0x81] sm:$0xff]  ;;  %v10629_v40 = vld [vmem:[#allocation6 + $0x90] sm:$0xff] }
 0xb75   : > { %14607 = vmatprep.subr.bf16.mxu1 %v16094_v62  ;;  %v10373_v52 = vpack.c.bf16 %v20030_v5, %v9886_v32  ;;  %v10499_v50 = vld [vmem:[#allocation6 + $0x82] sm:$0xff]  ;;  %v10633_v7 = vpack.c.bf16 %v10629_v40, %v20005_v59  ;;  %v10763_v41 = vpack.c.bf16 %v10759_v22, %v20030_v5 }
 0xb76   : > { %v10503_v9 = vpack.c.bf16 %v10499_v50, %v19974_v37  ;;  %v10893_v4 = vpack.c.bf16 %v10889_v57, %v10499_v50 }
 0xb78   : > { %14608 = vmatpush3.bf16.msra.mxu1 %v16094_v62 }
 0xb79   : > { %14617 = vmatprep.subr.bf16.mxu1 %v16095_v44 }
 0xb7b   : > { %14610 = vmatmul.mubr.msk.bf16.vlgmr.msra.gmra.mrb[72].mxu1 %vm703_vm0, %v10241_v45 }
 0xb7c   : > { %14618 = vmatpush3.bf16.msra.mxu1 %v16095_v44  ;;  %14613 = vmatprep.mubr.msk.bf16.mxu1 %vm703_vm0, %v10242_v24 }
 0xb7d   : > { %14619 = vmatprep.subr.bf16.mxu1 %v16096_v29 }
 0xb80   : > { %14620 = vmatpush3.bf16.msra.mxu1 %v16096_v29 }
 0xb81   : > { %14621 = vmatprep.subr.bf16.mxu1 %v16097_v17 }
 0xb83   : > { %14614 = vmatmul.mubr.msk.bf16.gmra.mrb[76].mxu1 %vm703_vm0, %v10243_v26 }
 0xb84   : > { %14622 = vmatpush3.bf16.msra.mxu1 %v16097_v17  ;;  %14625 = vmatprep.mubr.msk.bf16.mxu1 %vm703_vm0, %v10370_v15 }
 0xb85   : > { %14623 = vmatprep.subr.bf16.mxu1 %v16098_v10 }
 0xb88   : > { %14624 = vmatpush3.bf16.msra.mxu1 %v16098_v10  ;;  %v11099_v10 = vld [vmem:[#allocation7 + $0x1] sm:$0xff] }
 0xb89   : > { %14633 = vmatprep.subr.bf16.mxu1 %v16099_v36 }
 0xb8b   : > { %14626 = vmatmul.mubr.msk.bf16.vlgmr.msra.gmra.mrb[72].mxu1 %vm703_vm0, %v10371_v33 }
 0xb8c   : > { %14634 = vmatpush3.bf16.msra.mxu1 %v16099_v36  ;;  %14629 = vmatprep.mubr.msk.bf16.mxu1 %vm703_vm0, %v10372_v21 }
 0xb8d   : > { %14635 = vmatprep.subr.bf16.mxu1 %v16100_v16 }
 0xb90   : > { %14636 = vmatpush3.bf16.msra.mxu1 %v16100_v16 }
 0xb91   : > { %14637 = vmatprep.subr.bf16.mxu1 %v16101_v48 }
 0xb93   : > { %14630 = vmatmul.mubr.msk.bf16.gmra.mrb[76].mxu1 %vm703_vm0, %v10373_v52 }
 0xb94   : > { %14638 = vmatpush3.bf16.msra.mxu1 %v16101_v48  ;;  %14641 = vmatprep.mubr.msk.bf16.mxu1 %vm703_vm0, %v10500_v53 }
 0xb95   : > { %14639 = vmatprep.subr.bf16.mxu1 %v16102_v34 }
 0xb98   : > { %14640 = vmatpush3.bf16.msra.mxu1 %v16102_v34 }
 0xb99   : > { %14649 = vmatprep.subr.bf16.mxu1 %v16103_v8 }
 0xb9b   : > { %14642 = vmatmul.mubr.msk.bf16.vlgmr.msra.gmra.mrb[72].mxu1 %vm703_vm0, %v10501_v54 }
 0xb9c   : > { %14650 = vmatpush3.bf16.msra.mxu1 %v16103_v8  ;;  %14645 = vmatprep.mubr.msk.bf16.mxu1 %vm703_vm0, %v10502_v14 }
 0xb9d   : > { %14651 = vmatprep.subr.bf16.mxu1 %v16104_v56 }
 0xba0   : > { %14652 = vmatpush3.bf16.msra.mxu1 %v16104_v56  ;;  %v16124_v56 = vld [vmem:[%s20584_s12 + $0x8] sm:$0xff]  }
 0xba1   : > { %14653 = vmatprep.subr.bf16.mxu1 %v16105_v58 }
 0xba3   : > { %14646 = vmatmul.mubr.msk.bf16.gmra.mrb[76].mxu1 %vm703_vm0, %v10503_v9 }
 0xba4   : > { %14654 = vmatpush3.bf16.msra.mxu1 %v16105_v58  ;;  %14657 = vmatprep.mubr.msk.bf16.mxu1 %vm703_vm0, %v19778_v46  ;;  %v16109_v46 = vld [vmem:[%s20582_s10 + $0xf0] sm:$0xff]  }
 0xba5   : > { %14655 = vmatprep.subr.bf16.mxu1 %v16106_v47 }
 0xba8   : > { %14656 = vmatpush3.bf16.msra.mxu1 %v16106_v47 }
 0xba9   : > { %14665 = vmatprep.subr.bf16.mxu1 %v16107_v11 }
 0xbab   : > { %14658 = vmatmul.mubr.msk.bf16.vlgmr.msra.gmra.mrb[72].mxu1 %vm703_vm0, %v19850_v13  ;;  %v16111_v13 = vld [vmem:[%s20582_s10 + $0x100] sm:$0xff]  }
 0xbac   : > { %14666 = vmatpush3.bf16.msra.mxu1 %v16107_v11  ;;  %14661 = vmatprep.mubr.msk.bf16.mxu1 %vm703_vm0, %v19910_v23  ;;  %v16112_v23 = vld [vmem:[%s20582_s10 + $0x108] sm:$0xff]  }
 0xbad   : > { %14667 = vmatprep.subr.bf16.mxu1 %v16108_v12 }
 0xbb0   : > { %14668 = vmatpush3.bf16.msra.mxu1 %v16108_v12 }
 0xbb1   : > { %14669 = vmatprep.subr.bf16.mxu1 %v16109_v46 }
 0xbb3   : > { %14662 = vmatmul.mubr.msk.bf16.gmra.mrb[76].mxu1 %vm703_vm0, %v10633_v7 }
 0xbb4   : > { %14670 = vmatpush3.bf16.msra.mxu1 %v16109_v46  ;;  %14673 = vmatprep.mubr.msk.bf16.mxu1 %vm703_vm0, %v19925_v55  ;;  %v16116_v55 = vld [vmem:[%s20584_s12 + $0x48] sm:$0xff]  }
 0xbb5   : > { %14671 = vmatprep.subr.bf16.mxu1 %v16110_v18 }
 0xbb8   : > { %14672 = vmatpush3.bf16.msra.mxu1 %v16110_v18  ;;  %v16125_v18 = vld [vmem:[%s20584_s12 + $0x10] sm:$0xff]  }
 0xbb9   : > { %14681 = vmatprep.subr.bf16.mxu1 %v16111_v13 }
 0xbbb   : > { %14674 = vmatmul.mubr.msk.bf16.vlgmr.msra.gmra.mrb[72].mxu1 %vm703_vm0, %v19943_v3  ;;  %v16122_v3 = vld [vmem:[%s20584_s12 + $0x78] sm:$0xff]  }
 0xbbc   : > { %14682 = vmatpush3.bf16.msra.mxu1 %v16111_v13  ;;  %14677 = vmatprep.mubr.msk.bf16.mxu1 %vm703_vm0, %v19967_v35 }
 0xbbd   : > { %14683 = vmatprep.subr.bf16.mxu1 %v16112_v23 }
 0xbc0   : > { %14684 = vmatpush3.bf16.msra.mxu1 %v16112_v23 }
 0xbc1   : > { %14685 = vmatprep.subr.bf16.mxu1 %v16113_v25 }
 0xbc3   : > { %14678 = vmatmul.mubr.msk.bf16.gmra.mrb[76].mxu1 %vm703_vm0, %v10763_v41 }
 0xbc4   : > { %14686 = vmatpush3.bf16.msra.mxu1 %v16113_v25  ;;  %14689 = vmatprep.mubr.msk.bf16.mxu1 %vm703_vm0, %v19947_v20  ;;  %v16123_v20 = vld [vmem:[%s20584_s12] sm:$0xff]  }
 0xbc5   : > { %14687 = vmatprep.subr.bf16.mxu1 %v16114_v60 }
 0xbc8   : > { %14688 = vmatpush3.bf16.msra.mxu1 %v16114_v60 }
 0xbc9   : > { %14697 = vmatprep.subr.bf16.mxu1 %v16115_v49 }
 0xbcb   : > { %14690 = vmatmul.mubr.msk.bf16.vlgmr.msra.gmra.mrb[72].mxu1 %vm703_vm0, %v19956_v28 }
 0xbcc   : > { %14693 = vmatprep.mubr.msk.bf16.mxu1 %vm703_vm0, %v19980_v38  ;;  %14698 = vmatpush3.bf16.msra.mxu1 %v16115_v49 }
 0xbcd   : > { %14699 = vmatprep.subr.bf16.mxu1 %v16116_v55 }
 0xbd0   : > { %14700 = vmatpush3.bf16.msra.mxu1 %v16116_v55 }
 0xbd1   : > { %14701 = vmatprep.subr.bf16.mxu1 %v16117_v51 }
 0xbd3   : > { %14694 = vmatmul.mubr.msk.bf16.gmra.mrb[76].mxu1 %vm703_vm0, %v10893_v4  ;;  %v16126_v4 = vld [vmem:[%s20584_s12 + $0x18] sm:$0xff]  }
 0xbd4   : > { %14702 = vmatpush3.bf16.msra.mxu1 %v16117_v51 }
 0xbd5   : > { %14703 = vmatprep.subr.bf16.mxu1 %v16118_v19 }
 0xbd8   : > { %14704 = vmatpush3.bf16.msra.mxu1 %v16118_v19 }
 0xbd9   : > { %14705 = vmatprep.subr.bf16.mxu1 %v16119_v27 }
 0xbdc   : > { %14706 = vmatpush3.bf16.msra.mxu1 %v16119_v27 }
 0xbdd   : > { %14707 = vmatprep.subr.bf16.mxu1 %v16120_v0 }
 0xbe0   : > { %14708 = vmatpush3.bf16.msra.mxu1 %v16120_v0 }
 0xbe1   : > { %14709 = vmatprep.subr.bf16.mxu1 %v16121_v61 }
 0xbe4   : > { %14710 = vmatpush3.bf16.msra.mxu1 %v16121_v61 }
 0xbe5   : > { %14711 = vmatprep.subr.bf16.mxu1 %v16122_v3 }
 0xbe8   : > { %14712 = vmatpush3.bf16.msra.mxu1 %v16122_v3  ;;  %v16127_v3 = vld [vmem:[%s20584_s12 + $0x20] sm:$0xff]  }
 0xbe9   : > { %14721 = vmatprep.subr.bf16.mxu1 %v16123_v20 }
 0xc39   : > { %v14563_v1 = vpop.f32.mrb[28].mxu0 }
 0xc3a   : > { %v9970_v43 = vpop.f32.mrb[29].mxu0 }
 0xc3b   : > { %v14564_v28 = vpop.f32.mrb[30].mxu0 }
 0xc3c   : > { %v9973_v6 = vpop.f32.mrb[31].mxu0 }
 0xc41   : > { %v14567_v30 = vpop.f32.mrb[32].mxu0 }
 0xc42   : > { %v9986_v31 = vpop.f32.mrb[33].mxu0 }
 0xc43   : > { %v14568_v32 = vpop.f32.mrb[34].mxu0 }
 0xc44   : > { %v9989_v35 = vpop.f32.mrb[35].mxu0 }
 0xc9e   : > { %v14691_v63 = vpop.f32.mrb[72].mxu1 }
 0xc9f   : > { %v14923_v37 = vadd.f32 %v14691_v63, %v14563_v1  ;;  %v10973_v38 = vpop.f32.mrb[73].mxu1 }
 0xca0   : > { %v14924_v62 = vadd.f32 %v10973_v38, %v9970_v43  ;;  %v14692_v39 = vpop.f32.mrb[74].mxu1 }
 0xca1   : > { %v11021_v44 = vadd.f32 %v14923_v37, %v13833_v42  ;;  %v14925_v45 = vadd.f32 %v14692_v39, %v14564_v28  ;;  %v10976_v29 = vpop.f32.mrb[75].mxu1  ;;  %v16129_v28 = vld [vmem:[%s20584_s12 + $0x30] sm:$0xff]   ;;  %v16132_v37 = vld [vmem:[%s20584_s12 + $0x88] sm:$0xff]  }
 0xca2   : > { %v11019_v24 = vadd.f32 %v14924_v62, %v13833_v42  ;;  %v14926_v17 = vadd.f32 %v10976_v29, %v9973_v6  ;;  %v16130_v6 = vld [vmem:[%s20584_s12 + $0x38] sm:$0xff]   ;;  %v16133_v62 = vld [vmem:[%s20584_s12 + $0x90] sm:$0xff]  }
 0xca3   : > { %v20137_v59 = vmax.f32 %v11021_v44, 0.0  ;;  %v11022_v26 = vadd.f32 %v14925_v45, %v13833_v42  ;;  %v11354_v44 = vld [vmem:[#allocation7 + $0x2] sm:$0xff] }
 0xca4   : > { %v20139_v15 = vmax.f32 %v11019_v24, 0.0  ;;  %v11020_v36 = vadd.f32 %v14926_v17, %v13833_v42  ;;  %v16134_v24 = vld [vmem:[%s20584_s12 + $0x98] sm:$0xff]  }
 0xca5   : > { %11060 = vst [vmem:[#allocation7 + $0x31] sm:$0xff] %v20137_v59  ;;  %v20142_v33 = vmax.f32 %v11022_v26, 0.0  ;;  %v16135_v26 = vld [vmem:[%s20584_s12 + $0xa0] sm:$0xff]  }
 0xca6   : > { %11056 = vst [vmem:[#allocation7 + $0x11] sm:$0xff] %v20139_v15  ;;  %v20145_v16 = vmax.f32 %v11020_v36, 0.0  ;;  %v14695_v21 = vpop.f32.mrb[76].mxu1  ;;  %v11107_v48 = vpack.c.bf16 %v20139_v15, %v11099_v10  ;;  %v16136_v10 = vld [vmem:[%s20584_s12 + $0xa8] sm:$0xff]   ;;  %v16137_v36 = vld [vmem:[%s20584_s12 + $0xb0] sm:$0xff]  }
 0xca7   : > { %11062 = vst [vmem:[#allocation7 + $0x41] sm:$0xff] %v20142_v33  ;;  %v14927_v5 = vadd.f32 %v14695_v21, %v14567_v30  ;;  %v10989_v52 = vpop.f32.mrb[77].mxu1  ;;  %v11663_v34 = vpack.c.bf16 %v20142_v33, %v20137_v59  ;;  %v16131_v30 = vld [vmem:[%s20584_s12 + $0x80] sm:$0xff]   ;;  %v16138_v21 = vld [vmem:[%s20584_s12 + $0xb8] sm:$0xff]  }
 0xca8   : > { %11058 = vst [vmem:[#allocation7 + $0x21] sm:$0xff] %v20145_v16  ;;  %v14928_v53 = vadd.f32 %v10989_v52, %v9986_v31  ;;  %v14696_v8 = vpop.f32.mrb[78].mxu1  ;;  %14713 = vmatprep.mubr.bf16.mxu1 %v11107_v48  ;;  %v20154_v54 = vpack.c.bf16 %v20137_v59, %v20145_v16  ;;  %v11662_v14 = vpack.c.bf16 %v20145_v16, %v20139_v15  ;;  %v16139_v48 = vld [vmem:[%s20584_s12 + $0xc0] sm:$0xff]   ;;  %v16140_v52 = vld [vmem:[%s20584_s12 + $0xc8] sm:$0xff]   ;;  %v16154_v15 = vld [vmem:[%s20584_s12 + $0x138] sm:$0xff]  }
 0xca9   : > { %v11025_v58 = vadd.f32 %v14927_v5, %v13833_v42  ;;  %v14929_v50 = vadd.f32 %v14696_v8, %v14568_v32  ;;  %v10992_v9 = vpop.f32.mrb[79].mxu1  ;;  %v16141_v8 = vld [vmem:[%s20584_s12 + $0xd0] sm:$0xff]   ;;  %v16155_v16 = vld [vmem:[%s20584_s12 + $0x140] sm:$0xff]  }
 0xcaa   : > { %v11023_v47 = vadd.f32 %v14928_v53, %v13833_v42  ;;  %v14930_v11 = vadd.f32 %v10992_v9, %v9989_v35  ;;  %14714 = vmatmul.mubr.bf16.vlgmr.msra.gmra.mrb[80].mxu1 %v20154_v54  ;;  %v16159_v59 = vld [vmem:[%s20584_s12 + $0x160] sm:$0xff]  }
 0xcab   : > { %v20162_v12 = vmax.f32 %v11025_v58, 0.0  ;;  %v11026_v46 = vadd.f32 %v14929_v50, %v13833_v42  ;;  %14722 = vmatpush3.bf16.msra.mxu1 %v16123_v20  ;;  %v16142_v50 = vld [vmem:[%s20584_s12 + $0xd8] sm:$0xff]  }
 0xcac   : > { %v20164_v40 = vmax.f32 %v11023_v47, 0.0  ;;  %v11024_v7 = vadd.f32 %v14930_v11, %v13833_v42  ;;  %14723 = vmatprep.subr.bf16.mxu1 %v16124_v56  ;;  %v20181_v41 = vld [vmem:[#allocation7 + $0x32] sm:$0xff]  ;;  %v16143_v47 = vld [vmem:[%s20584_s12 + $0xe0] sm:$0xff]   ;;  %v16144_v11 = vld [vmem:[%s20584_s12 + $0xe8] sm:$0xff]  }
 0xcad   : > { %11068 = vst [vmem:[#allocation7 + $0x71] sm:$0xff] %v20162_v12  ;;  %v20170_v13 = vmax.f32 %v11026_v46, 0.0  ;;  %v20179_v22 = vld [vmem:[#allocation7 + $0x10] sm:$0xff] }
 0xcae   : > { %11064 = vst [vmem:[#allocation7 + $0x51] sm:$0xff] %v20164_v40  ;;  %v20173_v23 = vmax.f32 %v11024_v7, 0.0  ;;  %v20177_v25 = vpack.c.bf16 %v20164_v40, %v20142_v33  ;;  %v20183_v60 = vld [vmem:[#allocation7 + $0x42] sm:$0xff]  ;;  %v20201_v19 = vld [vmem:[#allocation7 + $0x12] sm:$0xff]  ;;  %v11079_v27 = vpack.c.bf16 %v20179_v22, %v19816_v2 }
 0xcaf   : > { %11070 = vst [vmem:[#allocation7 + $0x81] sm:$0xff] %v20170_v13  ;;  %14724 = vmatpush3.bf16.msra.mxu1 %v16124_v56  ;;  %v20186_v49 = vld [vmem:[#allocation7 + $0x22] sm:$0xff]  ;;  %v11665_v55 = vpack.c.bf16 %v20170_v13, %v20162_v12  ;;  %v11813_v51 = vpack.c.bf16 %v20183_v60, %v20181_v41  ;;  %v20233_v35 = vld [vmem:[#allocation7 + $0x30] sm:$0xff]  ;;  %v11362_v17 = vpack.c.bf16 %v20201_v19, %v11354_v44  ;;  %v16146_v7 = vld [vmem:[%s20584_s12 + $0xf8] sm:$0xff]  }
 0xcb0   : > { %11066 = vst [vmem:[#allocation7 + $0x61] sm:$0xff] %v20173_v23  ;;  %14717 = vmatprep.mubr.bf16.mxu1 %v20177_v25  ;;  %14725 = vmatprep.subr.bf16.mxu1 %v16125_v18  ;;  %v20196_v57 = vpack.c.bf16 %v20162_v12, %v20173_v23  ;;  %v11664_v0 = vpack.c.bf16 %v20173_v23, %v20164_v40  ;;  %v16128_v2 = vld [vmem:[%s20584_s12 + $0x28] sm:$0xff]   ;;  %v11073_v31 = vld [vmem:[#allocation7 + $0x20] sm:$0xff]  ;;  %v16145_v46 = vld [vmem:[%s20584_s12 + $0xf0] sm:$0xff]  }
 0xcb1   : > { %v11812_v61 = vpack.c.bf16 %v20186_v49, %v20201_v19  ;;  %v20236_v63 = vpack.c.bf16 %v20233_v35, %v11073_v31  ;;  %v20238_v42 = vld [vmem:[#allocation7 + $0x40] sm:$0xff]  ;;  %v20282_v5 = vpack.c.bf16 %v20181_v41, %v20186_v49  ;;  %v11512_v9 = vpack.c.bf16 %v11073_v31, %v20179_v22  ;;  %v16152_v31 = vld [vmem:[%s20584_s12 + $0x128] sm:$0xff]   ;;  %v16162_v12 = vld [vmem:[%s20584_s12 + $0x178] sm:$0xff]  }
 0xcb2   : > { %14718 = vmatmul.mubr.bf16.gmra.mrb[84].mxu1 %v20196_v57  ;;  %v11513_v22 = vpack.c.bf16 %v20238_v42, %v20233_v35  ;;  %v16157_v35 = vld [vmem:[%s20584_s12 + $0x150] sm:$0xff]   ;;  %v16160_v33 = vld [vmem:[%s20584_s12 + $0x168] sm:$0xff]   ;;  %v16163_v40 = vld [vmem:[%s20584_s12 + $0x180] sm:$0xff]  }
 0xcb3   : > { %14726 = vmatpush3.bf16.msra.mxu1 %v16125_v18  ;;  %14737 = vmatprep.mubr.bf16.mxu1 %v11079_v27  ;;  %v16147_v18 = vld [vmem:[%s20584_s12 + $0x100] sm:$0xff]   ;;  %v16164_v23 = vld [vmem:[%s20584_s12 + $0x188] sm:$0xff]   ;;  %v16165_v49 = vld [vmem:[%s20584_s12 + $0x190] sm:$0xff]  }
 0xcb4   : > { %14727 = vmatprep.subr.bf16.mxu1 %v16126_v4  ;;  %v20254_v45 = vld [vmem:[#allocation7 + $0x70] sm:$0xff]  ;;  %v16166_v41 = vld [vmem:[%s20584_s12 + $0x198] sm:$0xff]  }
 0xcb5   : > { %v20213_v20 = vld [vmem:[#allocation7 + $0x52] sm:$0xff] }
 0xcb6   : > { %v20231_v32 = vld [vmem:[#allocation7 + $0x50] sm:$0xff]  ;;  %v20289_v53 = vpack.c.bf16 %v20213_v20, %v20183_v60  ;;  %v16167_v60 = vld [vmem:[%s20584_s12 + $0x1a0] sm:$0xff]  }
 0xcb7   : > { %14728 = vmatpush3.bf16.msra.mxu1 %v16126_v4  ;;  %v20215_v1 = vld [vmem:[#allocation7 + $0x62] sm:$0xff]  ;;  %v20245_v38 = vpack.c.bf16 %v20231_v32, %v20238_v42  ;;  %v20296_v56 = vld [vmem:[#allocation7 + $0x72] sm:$0xff] }
 0xcb8   : > { %14729 = vmatprep.subr.bf16.mxu1 %v16127_v3  ;;  %v11814_v43 = vpack.c.bf16 %v20215_v1, %v20213_v20  ;;  %v20252_v39 = vld [vmem:[#allocation7 + $0x60] sm:$0xff]  ;;  %v20300_v58 = vpack.c.bf16 %v20296_v56, %v20215_v1  ;;  %v16148_v4 = vld [vmem:[%s20584_s12 + $0x108] sm:$0xff]   ;;  %v16158_v42 = vld [vmem:[%s20584_s12 + $0x158] sm:$0xff]  }
 0xcb9   : > { %v20258_v29 = vpack.c.bf16 %v20254_v45, %v20252_v39  ;;  %v11514_v27 = vpack.c.bf16 %v20252_v39, %v20231_v32  ;;  %v16153_v32 = vld [vmem:[%s20584_s12 + $0x130] sm:$0xff]   ;;  %v16171_v20 = vld [vmem:[%s20584_s12 + $0x1c0] sm:$0xff]   ;;  %v16172_v1 = vld [vmem:[%s20584_s12 + $0x1c8] sm:$0xff]  }
 0xcba   : > { %v16176_v39 = vld [vmem:[%s20584_s12 + $0x1e8] sm:$0xff]   ;;  %v16177_v44 = vld [vmem:[%s20584_s12 + $0x1f0] sm:$0xff]  }
 0xcbb   : > { %14730 = vmatpush3.bf16.msra.mxu1 %v16127_v3  ;;  %v16149_v3 = vld [vmem:[%s20584_s12 + $0x110] sm:$0xff]  }
 0xcbc   : > { %14731 = vmatprep.subr.bf16.mxu1 %v16128_v2 }
 0xcbf   : > { %14732 = vmatpush3.bf16.msra.mxu1 %v16128_v2  ;;  %v20332_v2 = vld [vmem:[#allocation7 + $0x80] sm:$0xff] }
 0xcc0   : > { %14733 = vmatprep.subr.bf16.mxu1 %v16129_v28 }
 0xcc3   : > { %14734 = vmatpush3.bf16.msra.mxu1 %v16129_v28  ;;  %v11515_v28 = vpack.c.bf16 %v20332_v2, %v20254_v45  ;;  %v16179_v45 = vld [vmem:[%s20584_s12 + $0x200] sm:$0xff]  }
 0xcc4   : > { %14735 = vmatprep.subr.bf16.mxu1 %v16130_v6 }
 0xcc7   : > { %14736 = vmatpush3.bf16.msra.mxu1 %v16130_v6  ;;  %v16150_v6 = vld [vmem:[%s20584_s12 + $0x118] sm:$0xff]  }
 0xcc8   : > { %14745 = vmatprep.subr.bf16.mxu1 %v16131_v30 }
 0xcca   : > { %14738 = vmatmul.mubr.bf16.vlgmr.msra.gmra.mrb[80].mxu1 %v20236_v63 }
 0xccb   : > { %14741 = vmatprep.mubr.bf16.mxu1 %v20245_v38  ;;  %14746 = vmatpush3.bf16.msra.mxu1 %v16131_v30  ;;  %v16151_v30 = vld [vmem:[%s20584_s12 + $0x120] sm:$0xff]  }
 0xccc   : > { %14747 = vmatprep.subr.bf16.mxu1 %v16132_v37 }
 0xccf   : > { %14748 = vmatpush3.bf16.msra.mxu1 %v16132_v37 }
 0xcd0   : > { %14749 = vmatprep.subr.bf16.mxu1 %v16133_v62 }
 0xcd2   : > { %14742 = vmatmul.mubr.bf16.gmra.mrb[84].mxu1 %v20258_v29 }
 0xcd3   : > { %14750 = vmatpush3.bf16.msra.mxu1 %v16133_v62  ;;  %14761 = vmatprep.mubr.bf16.mxu1 %v11362_v17  ;;  %v16174_v62 = vld [vmem:[%s20584_s12 + $0x1d8] sm:$0xff]  }
 0xcd4   : > { %14751 = vmatprep.subr.bf16.mxu1 %v16134_v24  ;;  %v12111_v17 = vld [vmem:[#allocation7 + $0x91] sm:$0xff] }
 0xcd7   : > { %14752 = vmatpush3.bf16.msra.mxu1 %v16134_v24  ;;  %v16181_v24 = vld [vmem:[%s20584_s12 + $0x210] sm:$0xff]  }
 0xcd8   : > { %14753 = vmatprep.subr.bf16.mxu1 %v16135_v26 }
 0xcdb   : > { %14754 = vmatpush3.bf16.msra.mxu1 %v16135_v26  ;;  %v12115_v26 = vpack.c.bf16 %v12111_v17, %v20170_v13  ;;  %v16184_v13 = vld [vmem:[%s20584_s12 + $0x228] sm:$0xff]  }
 0xcdc   : > { %14755 = vmatprep.subr.bf16.mxu1 %v16136_v10 }
 0xcdf   : > { %14756 = vmatpush3.bf16.msra.mxu1 %v16136_v10  ;;  %v16182_v10 = vld [vmem:[%s20584_s12 + $0x218] sm:$0xff]  }
 0xce0   : > { %14757 = vmatprep.subr.bf16.mxu1 %v16137_v36 }
 0xce3   : > { %14758 = vmatpush3.bf16.msra.mxu1 %v16137_v36  ;;  %v16186_v36 = vld [vmem:[%s20584_s12 + $0x238] sm:$0xff]  }
 0xce4   : > { %14759 = vmatprep.subr.bf16.mxu1 %v16138_v21 }
 0xce7   : > { %14760 = vmatpush3.bf16.msra.mxu1 %v16138_v21  ;;  %v12261_v21 = vld [vmem:[#allocation7 + $0x92] sm:$0xff] }
 0xce8   : > { %14769 = vmatprep.subr.bf16.mxu1 %v16139_v48 }
 0xcea   : > { %14762 = vmatmul.mubr.bf16.vlgmr.msra.gmra.mrb[80].mxu1 %v20282_v5 }
 0xceb   : > { %14765 = vmatprep.mubr.bf16.mxu1 %v20289_v53  ;;  %14770 = vmatpush3.bf16.msra.mxu1 %v16139_v48 }
 0xcec   : > { %14771 = vmatprep.subr.bf16.mxu1 %v16140_v52 }
 0xcef   : > { %14772 = vmatpush3.bf16.msra.mxu1 %v16140_v52 }
 0xcf0   : > { %14773 = vmatprep.subr.bf16.mxu1 %v16141_v8 }
 0xcf2   : > { %14766 = vmatmul.mubr.bf16.gmra.mrb[84].mxu1 %v20300_v58 }
 0xcf3   : > { %14774 = vmatpush3.bf16.msra.mxu1 %v16141_v8  ;;  %14785 = vmatprep.mubr.bf16.mxu1 %v11512_v9 }
 0xcf4   : > { %14775 = vmatprep.subr.bf16.mxu1 %v16142_v50 }
 0xcf7   : > { %14776 = vmatpush3.bf16.msra.mxu1 %v16142_v50 }
 0xcf8   : > { %14777 = vmatprep.subr.bf16.mxu1 %v16143_v47 }
 0xcfb   : > { %14778 = vmatpush3.bf16.msra.mxu1 %v16143_v47 }
 0xcfc   : > { %14779 = vmatprep.subr.bf16.mxu1 %v16144_v11 }
 0xcff   : > { %14780 = vmatpush3.bf16.msra.mxu1 %v16144_v11 }
 0xd00   : > { %14781 = vmatprep.subr.bf16.mxu1 %v16145_v46 }
 0xd03   : > { %14782 = vmatpush3.bf16.msra.mxu1 %v16145_v46 }
 0xd04   : > { %14783 = vmatprep.subr.bf16.mxu1 %v16146_v7 }
 0xd07   : > { %14784 = vmatpush3.bf16.msra.mxu1 %v16146_v7 }
 0xd08   : > { %14793 = vmatprep.subr.bf16.mxu1 %v16147_v18 }
 0xd0a   : > { %14786 = vmatmul.mubr.bf16.vlgmr.msra.gmra.mrb[80].mxu1 %v11513_v22 }
 0xd0b   : > { %14789 = vmatprep.mubr.bf16.mxu1 %v11514_v27  ;;  %14794 = vmatpush3.bf16.msra.mxu1 %v16147_v18 }
 0xd0c   : > { %14795 = vmatprep.subr.bf16.mxu1 %v16148_v4 }
 0xd0f   : > { %14796 = vmatpush3.bf16.msra.mxu1 %v16148_v4 }
 0xd10   : > { %14797 = vmatprep.subr.bf16.mxu1 %v16149_v3 }
 0xd12   : > { %14790 = vmatmul.mubr.bf16.gmra.mrb[84].mxu1 %v11515_v28 }
 0xd13   : > { %14798 = vmatpush3.bf16.msra.mxu1 %v16149_v3  ;;  %14809 = vmatprep.mubr.bf16.mxu1 %v11662_v14  ;;  %v16156_v14 = vld [vmem:[%s20584_s12 + $0x148] sm:$0xff]  }
 0xd14   : > { %14799 = vmatprep.subr.bf16.mxu1 %v16150_v6 }
 0xd17   : > { %14800 = vmatpush3.bf16.msra.mxu1 %v16150_v6 }
 0xd18   : > { %14801 = vmatprep.subr.bf16.mxu1 %v16151_v30 }
 0xd1b   : > { %14802 = vmatpush3.bf16.msra.mxu1 %v16151_v30 }
 0xd1c   : > { %14803 = vmatprep.subr.bf16.mxu1 %v16152_v31 }
 0xd1f   : > { %14804 = vmatpush3.bf16.msra.mxu1 %v16152_v31 }
 0xd20   : > { %14805 = vmatprep.subr.bf16.mxu1 %v16153_v32 }
 0xd23   : > { %14806 = vmatpush3.bf16.msra.mxu1 %v16153_v32 }
 0xd24   : > { %14807 = vmatprep.subr.bf16.mxu1 %v16154_v15 }
 0xd27   : > { %14808 = vmatpush3.bf16.msra.mxu1 %v16154_v15 }
 0xd28   : > { %14817 = vmatprep.subr.bf16.mxu1 %v16155_v16 }
 0xd2a   : > { %14810 = vmatmul.mubr.bf16.vlgmr.msra.gmra.mrb[80].mxu1 %v11663_v34  ;;  %v16161_v34 = vld [vmem:[%s20584_s12 + $0x170] sm:$0xff]  }
 0xd2b   : > { %14813 = vmatprep.mubr.bf16.mxu1 %v11664_v0  ;;  %14818 = vmatpush3.bf16.msra.mxu1 %v16155_v16  ;;  %v16169_v0 = vld [vmem:[%s20584_s12 + $0x1b0] sm:$0xff]  }
 0xd2c   : > { %14819 = vmatprep.subr.bf16.mxu1 %v16156_v14 }
 0xd2f   : > { %14820 = vmatpush3.bf16.msra.mxu1 %v16156_v14 }
 0xd30   : > { %14821 = vmatprep.subr.bf16.mxu1 %v16157_v35 }
 0xd32   : > { %14814 = vmatmul.mubr.bf16.gmra.mrb[84].mxu1 %v11665_v55  ;;  %v20405_v55 = vld [vmem:[#allocation7 + $0x82] sm:$0xff] }
 0xd33   : > { %14822 = vmatpush3.bf16.msra.mxu1 %v16157_v35  ;;  %14833 = vmatprep.mubr.bf16.mxu1 %v11812_v61  ;;  %v11815_v19 = vpack.c.bf16 %v20405_v55, %v20296_v56  ;;  %v16170_v61 = vld [vmem:[%s20584_s12 + $0x1b8] sm:$0xff]   ;;  %v12265_v48 = vpack.c.bf16 %v12261_v21, %v20405_v55 }
 0xd34   : > { %14823 = vmatprep.subr.bf16.mxu1 %v16158_v42 }
 0xd37   : > { %14824 = vmatpush3.bf16.msra.mxu1 %v16158_v42 }
 0xd38   : > { %14825 = vmatprep.subr.bf16.mxu1 %v16159_v59 }
 0xd3b   : > { %14826 = vmatpush3.bf16.msra.mxu1 %v16159_v59 }
 0xd3c   : > { %14827 = vmatprep.subr.bf16.mxu1 %v16160_v33 }
 0xd3f   : > { %14828 = vmatpush3.bf16.msra.mxu1 %v16160_v33 }
 0xd40   : > { %14829 = vmatprep.subr.bf16.mxu1 %v16161_v34 }
 0xd43   : > { %14830 = vmatpush3.bf16.msra.mxu1 %v16161_v34 }
 0xd44   : > { %14831 = vmatprep.subr.bf16.mxu1 %v16162_v12 }
 0xd47   : > { %14832 = vmatpush3.bf16.msra.mxu1 %v16162_v12 }
 0xd48   : > { %14841 = vmatprep.subr.bf16.mxu1 %v16163_v40 }
 0xd4a   : > { %14834 = vmatmul.mubr.bf16.vlgmr.msra.gmra.mrb[80].mxu1 %v11813_v51  ;;  %v16168_v51 = vld [vmem:[%s20584_s12 + $0x1a8] sm:$0xff]  }
 0xd4b   : > { %14837 = vmatprep.mubr.bf16.mxu1 %v11814_v43  ;;  %14842 = vmatpush3.bf16.msra.mxu1 %v16163_v40  ;;  %v16173_v43 = vld [vmem:[%s20584_s12 + $0x1d0] sm:$0xff]  }
 0xd4c   : > { %14843 = vmatprep.subr.bf16.mxu1 %v16164_v23 }
 0xd4f   : > { %14844 = vmatpush3.bf16.msra.mxu1 %v16164_v23 }
 0xd50   : > { %14845 = vmatprep.subr.bf16.mxu1 %v16165_v49 }
 0xd52   : > { %14838 = vmatmul.mubr.bf16.gmra.mrb[84].mxu1 %v11815_v19 }
 0xd53   : > { %14846 = vmatpush3.bf16.msra.mxu1 %v16165_v49  ;;  %14857 = vmatprep.mubr.bf16.mxu1 %v20236_v63  ;;  %v16223_v63 = vld [vmem:[#allocation2] sm:$0xff] }
 0xd54   : > { %14847 = vmatprep.subr.bf16.mxu1 %v16166_v41  ;;  %v11965_v37 = vpack.c.bf16 %v16223_v63, %v20332_v2 }
 0xd57   : > { %14848 = vmatpush3.bf16.msra.mxu1 %v16166_v41 }
 0xd58   : > { %14849 = vmatprep.subr.bf16.mxu1 %v16167_v60 }
 0xd5b   : > { %14850 = vmatpush3.bf16.msra.mxu1 %v16167_v60 }
 0xd5c   : > { %14851 = vmatprep.subr.bf16.mxu1 %v16168_v51 }
 0xd5f   : > { %14852 = vmatpush3.bf16.msra.mxu1 %v16168_v51 }
 0xd60   : > { %14853 = vmatprep.subr.bf16.mxu1 %v16169_v0 }
 0xd63   : > { %14854 = vmatpush3.bf16.msra.mxu1 %v16169_v0 }
 0xd64   : > { %14855 = vmatprep.subr.bf16.mxu1 %v16170_v61 }
 0xd67   : > { %14856 = vmatpush3.bf16.msra.mxu1 %v16170_v61 }
 0xd68   : > { %14865 = vmatprep.subr.bf16.mxu1 %v16171_v20 }
 0xd6a   : > { %14858 = vmatmul.mubr.bf16.vlgmr.msra.gmra.mrb[80].mxu1 %v20245_v38  ;;  %v16175_v38 = vld [vmem:[%s20584_s12 + $0x1e0] sm:$0xff]  }
 0xd6b   : > { %14861 = vmatprep.mubr.bf16.mxu1 %v20258_v29  ;;  %14866 = vmatpush3.bf16.msra.mxu1 %v16171_v20  ;;  %v16180_v29 = vld [vmem:[%s20584_s12 + $0x208] sm:$0xff]  }
 0xd6c   : > { %14867 = vmatprep.subr.bf16.mxu1 %v16172_v1 }
 0xd6f   : > { %14868 = vmatpush3.bf16.msra.mxu1 %v16172_v1 }
 0xd70   : > { %14869 = vmatprep.subr.bf16.mxu1 %v16173_v43 }
 0xd72   : > { %14862 = vmatmul.mubr.bf16.gmra.mrb[84].mxu1 %v11965_v37 }
 0xd73   : > { %14870 = vmatpush3.bf16.msra.mxu1 %v16173_v43  ;;  %14881 = vmatprep.mubr.bf16.mxu1 %v20154_v54  ;;  %v16178_v54 = vld [vmem:[%s20584_s12 + $0x1f8] sm:$0xff]  }
 0xd74   : > { %14871 = vmatprep.subr.bf16.mxu1 %v16174_v62 }
 0xd77   : > { %14872 = vmatpush3.bf16.msra.mxu1 %v16174_v62 }
 0xd78   : > { %14873 = vmatprep.subr.bf16.mxu1 %v16175_v38 }
 0xd7b   : > { %14874 = vmatpush3.bf16.msra.mxu1 %v16175_v38 }
 0xd7c   : > { %14875 = vmatprep.subr.bf16.mxu1 %v16176_v39 }
 0xd7f   : > { %14876 = vmatpush3.bf16.msra.mxu1 %v16176_v39 }
 0xd80   : > { %14877 = vmatprep.subr.bf16.mxu1 %v16177_v44 }
 0xd83   : > { %14878 = vmatpush3.bf16.msra.mxu1 %v16177_v44 }
 0xd84   : > { %14879 = vmatprep.subr.bf16.mxu1 %v16178_v54 }
 0xd87   : > { %14880 = vmatpush3.bf16.msra.mxu1 %v16178_v54 }
 0xd88   : > { %14889 = vmatprep.subr.bf16.mxu1 %v16179_v45 }
 0xd8a   : > { %14882 = vmatmul.mubr.bf16.vlgmr.msra.gmra.mrb[80].mxu1 %v20177_v25  ;;  %v16183_v25 = vld [vmem:[%s20584_s12 + $0x220] sm:$0xff]  }
 0xd8b   : > { %14885 = vmatprep.mubr.bf16.mxu1 %v20196_v57  ;;  %14890 = vmatpush3.bf16.msra.mxu1 %v16179_v45  ;;  %v16185_v57 = vld [vmem:[%s20584_s12 + $0x230] sm:$0xff]  }
 0xd8c   : > { %14891 = vmatprep.subr.bf16.mxu1 %v16180_v29 }
 0xd8f   : > { %14892 = vmatpush3.bf16.msra.mxu1 %v16180_v29 }
 0xd90   : > { %14893 = vmatprep.subr.bf16.mxu1 %v16181_v24 }
 0xd92   : > { %14886 = vmatmul.mubr.bf16.gmra.mrb[84].mxu1 %v12115_v26 }
 0xd93   : > { %14894 = vmatpush3.bf16.msra.mxu1 %v16181_v24  ;;  %14905 = vmatprep.mubr.bf16.mxu1 %v20282_v5 }
 0xd94   : > { %14895 = vmatprep.subr.bf16.mxu1 %v16182_v10 }
 0xd97   : > { %14896 = vmatpush3.bf16.msra.mxu1 %v16182_v10 }
 0xd98   : > { %14897 = vmatprep.subr.bf16.mxu1 %v16183_v25 }
 0xd9b   : > { %14898 = vmatpush3.bf16.msra.mxu1 %v16183_v25 }
 0xd9c   : > { %14899 = vmatprep.subr.bf16.mxu1 %v16184_v13 }
 0xd9f   : > { %14900 = vmatpush3.bf16.msra.mxu1 %v16184_v13 }
 0xda0   : > { %14901 = vmatprep.subr.bf16.mxu1 %v16185_v57 }
 0xda3   : > { %14902 = vmatpush3.bf16.msra.mxu1 %v16185_v57 }
 0xda4   : > { %14903 = vmatprep.subr.bf16.mxu1 %v16186_v36 }
 0xda7   : > { %14904 = vmatpush3.bf16.msra.mxu1 %v16186_v36 }
 0xdaa   : > { %14906 = vmatmul.mubr.bf16.vlgmr.msra.gmra.mrb[80].mxu1 %v20289_v53 }
 0xdab   : > { %14909 = vmatprep.mubr.bf16.mxu1 %v20300_v58 }
 0xdb2   : > { %14910 = vmatmul.mubr.bf16.gmra.mrb[84].mxu1 %v12265_v48 }
 0xdb3   : > { %16237 = shalt.err (!%p16234_p3)
}
 0xdb4   : > { %s16238_s30 = scalar_lea.hbm %s20490_s17, 16  ;;  %s16242_s23 = scalar_lea.hbm %s20586_s14, 32 }
 0xdb5   : > { %p16239_p4 = scmp.ne.s32.totalorder %s20490_s17, %s16238_s30  ;;  %p16243_p9 = scmp.lt.u32.totalorder %s20490_s17, %s20586_s14 }
 0xdb6   : > { %p16244_p10 = scmp.lt.u32.totalorder %s16242_s23, %s16238_s30  ;;  %p16246_p12 = scmp.lt.u32.totalorder %s16238_s30, %s20490_s17 }
 0xdb7   : > { %p16240_p7 = pnand %p16239_p4, %p16449_p5 }
 0xdb8   : > { %p16245_p11 = por %p16244_p10, %p16243_p9 }
 0xdb9   : > { %p16241_p8 = pneg %p16240_p7 }
 0xdba   : > { %p16247_p13 = por %p16246_p12, %p16245_p11 }
 0xdbc   : > { %p16248_p0 = pnand %p16247_p13, %p16241_p8 }
 0xdbe   : > { %16251 = shalt.err (!%p16248_p0)
}
 0xdbf   : > { %15167 = dma.vmem_to_hbm [thread:$0]  (%p16449_p5), %s12499_s18, 16, %s20490_s17, %s12477_s27  }
 0xdc0   : > { %s20625_s3 = sshll.u32 %s16432_s25, 4  ;;  %s20626_s29 = scalar_lea.vmem [#allocation10], %s18830_s20 }
 0xdc1   : > { %s20517_s19 = scalar_lea.hbm %s20587_s15, %s20625_s3  ;;  %s12511_s23 = sshll.u32 %s20626_s29, 4  ;;  %s12512_s23 = int_to_ptr.vmem [resolvable:$true] %s12511_s23 }
 0xdc2   : > { %s12481_s30 = scalar_lea.sflag [#allocation11], %s18830_s20  ;;  %s16252_s2 = scalar_lea.vmem %s12512_s23, 16 }
 0xdc3   : > { %p16253_p1 = scmp.ne.s32.totalorder %s12512_s23, %s16252_s2  ;;  %s16325_s4 = smov [#allocation10]  }
 0xdc4   : > { %s16256_s5 = sshll.u32 %s16325_s4, 4  ;;  %s16257_s5 = int_to_ptr.vmem [resolvable:$false] %s16256_s5 }
 0xdc5   : > { %p16254_p2 = pnand %p16253_p1, %p16449_p5  ;;  %s16258_s6 = scalar_lea.vmem %s16257_s5, 32 }
 0xdc6   : > { %p16259_p4 = scmp.lt.s32.totalorder %s12512_s23, %s16257_s5  ;;  %p16260_p7 = scmp.lt.s32.totalorder %s16258_s6, %s16252_s2 }
 0xdc7   : > { %p16255_p3 = pneg %p16254_p2 }
 0xdc8   : > { %p16261_p8 = por %p16260_p7, %p16259_p4 }
 0xdca   : > { %p16262_p9 = pnand %p16261_p8, %p16255_p3 }
 0xdcc   : > { %16265 = shalt.err (!%p16262_p9)
}
 0xdcd   : > { %s16266_s25 = scalar_lea.hbm %s20517_s19, 16  ;;  %s16270_s4 = scalar_lea.hbm %s20587_s15, 32 }
 0xdce   : > { %p16267_p10 = scmp.ne.s32.totalorder %s20517_s19, %s16266_s25  ;;  %p16271_p13 = scmp.lt.u32.totalorder %s20517_s19, %s20587_s15 }
 0xdcf   : > { %p16272_p0 = scmp.lt.u32.totalorder %s16270_s4, %s16266_s25  ;;  %p16274_p2 = scmp.lt.u32.totalorder %s16266_s25, %s20517_s19 }
 0xdd0   : > { %p16268_p11 = pnand %p16267_p10, %p16449_p5 }
 0xdd1   : > { %p16273_p1 = por %p16272_p0, %p16271_p13 }
 0xdd2   : > { %p16269_p12 = pneg %p16268_p11 }
 0xdd3   : > { %p16275_p3 = por %p16274_p2, %p16273_p1 }
 0xdd5   : > { %p16276_p4 = pnand %p16275_p3, %p16269_p12 }
 0xdd7   : > { %16279 = shalt.err (!%p16276_p4)
}
 0xdd8   : > { %15168 = dma.vmem_to_hbm [thread:$0]  (%p16449_p5), %s12512_s23, 16, %s20517_s19, %s12481_s30   ;;  %v14034_v5 = vld [vmem:[%s20585_s13] ss:$0 sm:$0xff]  ;;  %vm12467_vm7 = vcmask 392192  }
 0xdd9   : > { %s20627_s0 = sshll.u32 %s16469_s28, 6 }
 0xdda   : > { %s554_s26 = scalar_lea.vmem %s20588_s16, %s20627_s0 }
 0xe7d   : > { %v14907_v52 = vpop.f32.mrb[80].mxu1 }
 0xe7e   : > { %v12413_v53 = vadd.f32 %v14907_v52, %v14034_v5  ;;  %v12365_v8 = vpop.f32.mrb[81].mxu1 }
 0xe7f   : > { %v12411_v56 = vadd.f32 %v14034_v5, %v12365_v8  ;;  %v14908_v58 = vpop.f32.mrb[82].mxu1 }
 0xe80   : > { %v14037_v50 = vmul.f32 -1.442695, %v12413_v53  ;;  %v12414_v9 = vadd.f32 %v14908_v58, %v14034_v5  ;;  %v12368_v47 = vpop.f32.mrb[83].mxu1 }
 0xe81   : > { %v14035_v11 = vmul.f32 -1.442695, %v12411_v56  ;;  %v12412_v46 = vadd.f32 %v14034_v5, %v12368_v47 }
 0xe82   : > { %16189 = vpow2.f32 %v14037_v50  ;;  %v14038_v7 = vmul.f32 -1.442695, %v12414_v9 }
 0xe83   : > { %16191 = vpow2.f32 %v14035_v11  ;;  %v14036_v18 = vmul.f32 -1.442695, %v12412_v46 }
 0xe84   : > { %16193 = vpow2.f32 %v14038_v7 }
 0xe85   : > { %16195 = vpow2.f32 %v14036_v18  ;;  %v14911_v22 = vpop.f32.mrb[84].mxu1 }
 0xe86   : > { %v12417_v4 = vadd.f32 %v14911_v22, %v14034_v5  ;;  %v12381_v27 = vpop.f32.mrb[85].mxu1 }
 0xe87   : > { %v12415_v3 = vadd.f32 %v14034_v5, %v12381_v27  ;;  %v14912_v2 = vpop.f32.mrb[86].mxu1 }
 0xe88   : > { %v14041_v28 = vmul.f32 -1.442695, %v12417_v4  ;;  %v12418_v6 = vadd.f32 %v14912_v2, %v14034_v5  ;;  %v12384_v30 = vpop.f32.mrb[87].mxu1 }
 0xe89   : > { %v14039_v31 = vmul.f32 -1.442695, %v12415_v3  ;;  %v12416_v32 = vadd.f32 %v14034_v5, %v12384_v30 }
 0xe8a   : > { %16197 = vpow2.f32 %v14041_v28  ;;  %v14042_v15 = vmul.f32 -1.442695, %v12418_v6 }
 0xe8b   : > { %16199 = vpow2.f32 %v14039_v31  ;;  %v14040_v16 = vmul.f32 -1.442695, %v12416_v32 }
 0xe8c   : > { %v16190_v14 = vpop.eup %16189  ;;  %16201 = vpow2.f32 %v14042_v15 }
 0xe8d   : > { %v16192_v35 = vpop.eup %16191  ;;  %v12445_v42 = vadd.f32 1.0, %v16190_v14  ;;  %16203 = vpow2.f32 %v14040_v16 }
 0xe8e   : > { %v16194_v59 = vpop.eup %16193  ;;  %v12443_v33 = vadd.f32 1.0, %v16192_v35 }
 0xe8f   : > { %v16196_v34 = vpop.eup %16195  ;;  %16205 = vrcp.f32 %v12445_v42  ;;  %v12446_v12 = vadd.f32 1.0, %v16194_v59 }
 0xe90   : > { %16207 = vrcp.f32 %v12443_v33  ;;  %v12444_v40 = vadd.f32 1.0, %v16196_v34 }
 0xe91   : > { %16209 = vrcp.f32 %v12446_v12 }
 0xe92   : > { %16211 = vrcp.f32 %v12444_v40 }
 0xe94   : > { %v16198_v23 = vpop.eup %16197 }
 0xe95   : > { %v16200_v49 = vpop.eup %16199  ;;  %v12449_v55 = vadd.f32 1.0, %v16198_v23 }
 0xe96   : > { %v16202_v19 = vpop.eup %16201  ;;  %v12447_v41 = vadd.f32 1.0, %v16200_v49 }
 0xe97   : > { %v16204_v60 = vpop.eup %16203  ;;  %16213 = vrcp.f32 %v12449_v55  ;;  %v12450_v51 = vadd.f32 1.0, %v16202_v19 }
 0xe98   : > { %16215 = vrcp.f32 %v12447_v41  ;;  %v12448_v0 = vadd.f32 1.0, %v16204_v60 }
 0xe99   : > { %v16206_v61 = vpop.eup %16205  ;;  %16217 = vrcp.f32 %v12450_v51 }
 0xe9a   : > { %v16208_v20 = vpop.eup %16207  ;;  %12470 = vst.msk [vmem:[%s554_s26 + $0x10] sm:$0xff] %vm12467_vm7, %v16206_v61  ;;  %16219 = vrcp.f32 %v12448_v0 }
 0xe9b   : > { %v16210_v1 = vpop.eup %16209  ;;  %12468 = vst.msk [vmem:[%s554_s26] sm:$0xff] %vm12467_vm7, %v16208_v20 }
 0xe9c   : > { %v16212_v43 = vpop.eup %16211  ;;  %12471 = vst.msk [vmem:[%s554_s26 + $0x18] sm:$0xff] %vm12467_vm7, %v16210_v1 }
 0xe9d   : > { %12469 = vst.msk [vmem:[%s554_s26 + $0x8] sm:$0xff] %vm12467_vm7, %v16212_v43 }
 0xea1   : > { %v16214_v63 = vpop.eup %16213 }
 0xea2   : > { %v16216_v37 = vpop.eup %16215  ;;  %12474 = vst.msk [vmem:[%s554_s26 + $0x30] sm:$0xff] %vm12467_vm7, %v16214_v63 }
 0xea3   : > { %v16218_v62 = vpop.eup %16217  ;;  %12472 = vst.msk [vmem:[%s554_s26 + $0x20] sm:$0xff] %vm12467_vm7, %v16216_v37 }
 0xea4   : > { %v16220_v38 = vpop.eup %16219  ;;  %12475 = vst.msk [vmem:[%s554_s26 + $0x38] sm:$0xff] %vm12467_vm7, %v16218_v62 }
 0xea5   : > { %12473 = vst.msk [vmem:[%s554_s26 + $0x28] sm:$0xff] %vm12467_vm7, %v16220_v38 }
 0xea6 PF: > { %p15178_p5 = scmp.ge.s32.totalorder %s16318_s24, 2  ;;  %s12526_s19 = sand.u32 1, %s16306_s21  }
 0xea7   : > { %s12527_s29 = scalar_lea.sflag [#allocation9], %s12526_s19 }
 0xea8   : > { %p15172_p7 = pnand %p15178_p5, %p16453_p6 }
 0xeaa   : > { %16297 = dma.done.wait (!%p15172_p7), %s12527_s29, 16  }
 0xeab   : > { %16299 = vsyncadd (!%p15172_p7), %s12527_s29, 4294967280  ;;  %s12535_s23 = scalar_lea.sflag [#allocation11], %s12526_s19 }
 0xeac   : > { %16301 = dma.done.wait (!%p15172_p7), %s12535_s23, 16  }
 0xead   : > { %16303 = vsyncadd (!%p15172_p7), %s12535_s23, 4294967280  ;;  %s20629_s24 = sld [smem:[#allocation15_spill]]  ;;  %s20630_s30 = sld [smem:[#allocation14_spill]] }
 0xeae   : > { %s20631_s23 = sld [smem:[#allocation16_spill]]  ;;  %s20632_s21 = smov %s16310_s22 }
 0xeb3   : > { %p30_p8 = scmp.ge.s32.totalorder %s20629_s24, 4   ;;  %s20633_s22 = smov %s20630_s30 }
 0xeb5   :  { %32 = sbr.rel (!%p30_p8) target bundleno = 13 (0xd), region = 191 }
 0xebc   :  { %12547 = vsyncpa [#allocation9], 1 }
 0xebd   :  { %12549 = vsyncpa [#allocation9 + $0x1], 1 }
 0xebe   :  { %12550 = vsyncpa [#allocation11], 1 }
 0xebf   :  { %12552 = vsyncpa [#allocation11 + $0x1], 1 }

</bundles_post_ra>
